<compile_context>
chip_gen: v7x
topology: tpu7x:2x2x1
jax: 0.10.0
libtpu: 0.0.40
codegen_flags: <defaults>
</compile_context>

<pallas_src>
import functools

import jax
import jax.numpy as jnp
from jax.experimental import pallas as pl
from jax.experimental.pallas import tpu as pltpu

D_ENC = 768                     # hidden size of each pretrained encoder (BERT / ViT base)
D_FUSED = 2 * D_ENC             # 1536, as hard-coded in the module
HEAD_DIMS = (3, 6, 7)           # s, e, d head output dims
D_OUT = sum(HEAD_DIMS)          # 16 — combined lane-packed logits
D_HID_FUSED = 3 * D_FUSED       # 4608 — the three 1536-wide hidden layers side by side
N_PAR = 2                       # grid width (even -> one tile per v7x TensorCore)
TILE_N = D_HID_FUSED // N_PAR   # 2304


def _heads_kernel(txt_ref, img_ref, w1t_ref, w1b_ref, b1_ref, w2_ref, b2h_ref, out_ref):
    """One 2304-wide slab of the fused hidden dim -> partial (B, 16) logits (+ b2/2)."""
    # bf16 operands into the MXU, f32 accumulation; bias/ReLU/second layer stay f32.
    h = (jnp.dot(txt_ref[...], w1t_ref[0], preferred_element_type=jnp.float32)
         + jnp.dot(img_ref[...], w1b_ref[0], preferred_element_type=jnp.float32)
         + b1_ref[0])                                  # (B, TILE_N), f32
    h = jnp.maximum(h, 0.0)                            # ReLU
    # Block-diagonal second layer restricted to this slab's rows; half of b2 added per step
    # so the two partials sum to the exact logits.
    out_ref[0] = (jnp.dot(h, w2_ref[0], preferred_element_type=jnp.float32)
                  + b2h_ref[...])                      # (B, D_OUT), f32


@jax.jit
def no_cross_attn_heads(txt_cls, vit_pooler, fused):
    """Fused concat + three (Linear-ReLU-Linear) heads.

    TODO(synk): the remaining structural lever is keeping the ~14 MB fused weights
    VMEM-resident across calls (cross-pallas_call prefetch, P10) instead of re-streaming
    them every invocation — >2x per call, but needs a persistent-buffer protocol around
    this wrapper.
    """
    B = txt_cls.shape[0]
    # Cast once here (not per grid step): halves the tiny activation DMA and keeps VPU casts
    # out of the steady-state loop.
    txt_bf16 = txt_cls.astype(jnp.bfloat16)
    img_bf16 = vit_pooler.astype(jnp.bfloat16)

    flops = 2 * B * D_FUSED * D_HID_FUSED + 2 * B * D_HID_FUSED * D_OUT
    bytes_accessed = ((fused["w1_top"].size + fused["w1_bot"].size) * 2   # bf16 weights
                      + fused["b1"].size * 4 + fused["w2"].size * 4 + fused["b2_half"].size * 4
                      + 2 * B * D_ENC * 2 + N_PAR * B * D_OUT * 4)

    partials = pl.pallas_call(
        _heads_kernel,
        out_shape=jax.ShapeDtypeStruct((N_PAR, B, D_OUT), jnp.float32),
        grid_spec=pltpu.PrefetchScalarGridSpec(
            num_scalar_prefetch=0,
            grid=(N_PAR,),
            in_specs=[
                pl.BlockSpec((B, D_ENC), lambda i: (0, 0)),            # txt CLS (resident, bf16)
                pl.BlockSpec((B, D_ENC), lambda i: (0, 0)),            # vit pooler (resident, bf16)
                pl.BlockSpec((1, D_ENC, TILE_N), lambda i: (i, 0, 0)),  # W1 top rows, pre-tiled slab
                pl.BlockSpec((1, D_ENC, TILE_N), lambda i: (i, 0, 0)),  # W1 bottom rows
                pl.BlockSpec((1, 1, TILE_N), lambda i: (i, 0, 0)),      # b1 slab
                pl.BlockSpec((1, TILE_N, D_OUT), lambda i: (i, 0, 0)),  # block-diag W2 rows
                pl.BlockSpec((1, D_OUT), lambda i: (0, 0)),             # b2/2 (resident)
            ],
            out_specs=pl.BlockSpec((1, B, D_OUT), lambda i: (i, 0, 0)),
        ),
        compiler_params=pltpu.CompilerParams(
            # TODO(synk): verify in a profile that "parallel" actually shards the 2 steps
            # across v7x TensorCores; if not, switch to pltpu.CORE_PARALLEL / core_map there.
            dimension_semantics=("parallel",),
            vmem_limit_bytes=32 << 20,
        ),
        cost_estimate=pl.CostEstimate(
            flops=flops, transcendentals=0, bytes_accessed=int(bytes_accessed)),
    )(txt_bf16, img_bf16,
      fused["w1_top"], fused["w1_bot"], fused["b1"], fused["w2"], fused["b2_half"])

    logits = partials[0] + partials[1]     # (B, 16): tiny; fuses with the slicing under jit
    s = logits[:, :HEAD_DIMS[0]]
    e = logits[:, HEAD_DIMS[0]:HEAD_DIMS[0] + HEAD_DIMS[1]]
    d = logits[:, HEAD_DIMS[0] + HEAD_DIMS[1]:]
    return s, e, d


def fuse_params(params):
    """One-time (offline) fusion of the three heads + bf16 storage + DMA-friendly pre-tiling."""
    w1 = jnp.concatenate([params["w1s"], params["w1e"], params["w1d"]], axis=1)  # (1536, 4608)
    b1 = jnp.concatenate([params["b1s"], params["b1e"], params["b1d"]], axis=1)  # (1, 4608)
    w2 = jnp.zeros((D_HID_FUSED, D_OUT), jnp.float32)                            # block-diagonal
    row, col = 0, 0
    for name, out_dim in zip("sed", HEAD_DIMS):
        w2 = w2.at[row:row + D_FUSED, col:col + out_dim].set(params[f"w2{name}"])
        row += D_FUSED
        col += out_dim
    b2 = jnp.concatenate([params["b2s"], params["b2e"], params["b2d"]], axis=1)  # (1, 16)

    def tile_cols(x, rows):
        # (rows, 4608) -> (N_PAR, rows, TILE_N): slab i holds columns [i*TILE_N:(i+1)*TILE_N],
        # stored contiguously so each per-step weight fetch is one linear DMA.
        return jnp.transpose(x.reshape(rows, N_PAR, TILE_N), (1, 0, 2))

    # TODO(synk): a further ~1.9x on the weight stream is available by storing W1 as int8 with
    # per-column scales on v5e/v6e (fp8 e4m3 on v7x, which has no MXU int path); kept at bf16
    # here pending an accuracy check.
    return {
        "w1_top": tile_cols(w1[:D_ENC], D_ENC).astype(jnp.bfloat16),   # (2, 768, 2304) bf16
        "w1_bot": tile_cols(w1[D_ENC:], D_ENC).astype(jnp.bfloat16),   # (2, 768, 2304) bf16
        "b1": tile_cols(b1, 1),                                        # (2, 1, 2304)  f32
        "w2": w2.reshape(N_PAR, TILE_N, D_OUT),                        # (2, 2304, 16) f32
        "b2_half": 0.5 * b2,                                           # (1, 16); added once per slab
    }


def _linear_init(key, fan_in, fan_out):
    """Deterministic init mimicking torch.nn.Linear's default U(-1/sqrt(fan_in), ...)."""
    kw, kb = jax.random.split(key)
    bound = 1.0 / jnp.sqrt(jnp.float32(fan_in))
    w = jax.random.uniform(kw, (fan_in, fan_out), jnp.float32, -bound, bound)
    b = jax.random.uniform(kb, (1, fan_out), jnp.float32, -bound, bound)
    return w, b


if __name__ == "__main__":
    key = jax.random.PRNGKey(0)
    B, S, N_PATCH = 2, 8, 16  # batch, text seq len, number of image patches
    ks = jax.random.split(key, 8)

    # TODO(synk): ViTModel / BertModel are external pretrained checkpoints, not defined by
    # this module; their outputs are stubbed with deterministic random features of the
    # shapes the forward pass consumes.
    bert_seq_out = jax.random.normal(ks[0], (B, S, D_ENC), jnp.float32)            # bert(**txt)[0]
    vit_seq_out  = jax.random.normal(ks[1], (B, N_PATCH + 1, D_ENC), jnp.float32)  # ViT(img)[0]
    vit_pooler   = jax.random.normal(ks[2], (B, D_ENC), jnp.float32)               # ViT(img)[1]

    # Mirror the forward's (unused) patch slicing and the CLS extraction (pure glue).
    _image_patches = vit_seq_out[:, 1:, :]   # image_output_[0][:, 1:, :] — unused downstream
    txt_cls = bert_seq_out[:, 0, :]          # output[:, 0, :]

    # Deterministic per-head parameters (torch.nn.Linear layout, transposed to x @ W + b).
    params = {}
    for name, out_dim, k in (("s", 3, ks[3]), ("e", 6, ks[4]), ("d", 7, ks[5])):
        k1, k2 = jax.random.split(k)
        w1, b1 = _linear_init(k1, D_FUSED, D_FUSED)
        w2, b2 = _linear_init(k2, D_FUSED, out_dim)
        params[f"w1{name}"], params[f"b1{name}"] = w1, b1
        params[f"w2{name}"], params[f"b2{name}"] = w2, b2

    fused = fuse_params(params)   # done once; a deployment would store weights pre-fused/pre-tiled

    s, e, d = jax.block_until_ready(no_cross_attn_heads(txt_cls, vit_pooler, fused))
    assert s.shape == (B, 3) and e.shape == (B, 6) and d.shape == (B, 7)

    # Pure-JAX reference using the same bf16 weight/activation quantization the kernel uses,
    # with f32 accumulation — verifies the fused split-K + block-diagonal math.
    cls_q = jnp.concatenate([txt_cls, vit_pooler], axis=1).astype(jnp.bfloat16).astype(jnp.float32)
    def ref_head(n):
        w1q = params[f"w1{n}"].astype(jnp.bfloat16).astype(jnp.float32)
        h = jnp.maximum(cls_q @ w1q + params[f"b1{n}"], 0.0)
        return h @ params[f"w2{n}"] + params[f"b2{n}"]
    for got, name in ((s, "s"), (e, "e"), (d, "d")):
        ref = ref_head(name)
        assert jnp.allclose(got, ref, atol=2e-3, rtol=2e-3), (
            name, float(jnp.max(jnp.abs(got - ref))))

    print("KERNEL_OK")
</pallas_src>

<mosaic_0001>
module attributes {stable_mosaic.version = 11 : i64} {
  func.func @_heads_kernel(%arg0: i32, %arg1: memref<2x768xbf16, #tpu.memory_space<vmem>>, %arg2: memref<2x768xbf16, #tpu.memory_space<vmem>>, %arg3: memref<1x768x2304xbf16, #tpu.memory_space<vmem>>, %arg4: memref<1x768x2304xbf16, #tpu.memory_space<vmem>>, %arg5: memref<1x1x2304xf32, #tpu.memory_space<vmem>>, %arg6: memref<1x2304x16xf32, #tpu.memory_space<vmem>>, %arg7: memref<1x16xf32, #tpu.memory_space<vmem>>, %arg8: memref<1x2x16xf32, #tpu.memory_space<vmem>>) attributes {dimension_semantics = [#tpu.dimension_semantics<parallel>], iteration_bounds = array<i64: 2>, scalar_prefetch = 0 : i64, scratch_operands = 0 : i64, tpu.core_type = #tpu.core_type<tc>, window_params = [{pipeline_mode = #tpu.pipeline_mode<synchronous>, transform_indices = @transform_0, window_bounds = array<i64: 2, 768>}, {pipeline_mode = #tpu.pipeline_mode<synchronous>, transform_indices = @transform_1, window_bounds = array<i64: 2, 768>}, {transform_indices = @transform_2, window_bounds = array<i64: 1, 768, 2304>}, {transform_indices = @transform_3, window_bounds = array<i64: 1, 768, 2304>}, {transform_indices = @transform_4, window_bounds = array<i64: 1, 1, 2304>}, {transform_indices = @transform_5, window_bounds = array<i64: 1, 2304, 16>}, {pipeline_mode = #tpu.pipeline_mode<synchronous>, transform_indices = @transform_6, window_bounds = array<i64: 1, 16>}, {transform_indices = @transform_7, window_bounds = array<i64: 1, 2, 16>}]} {
    %c0 = arith.constant 0 : index
    %c0_0 = arith.constant 0 : index
    %0 = vector.load %arg1[%c0, %c0_0] : memref<2x768xbf16, #tpu.memory_space<vmem>>, vector<2x768xbf16>
    %c0_1 = arith.constant 0 : index
    %c0_2 = arith.constant 0 : index
    %c0_3 = arith.constant 0 : index
    %1 = vector.load %arg3[%c0_1, %c0_2, %c0_3] : memref<1x768x2304xbf16, #tpu.memory_space<vmem>>, vector<1x768x2304xbf16>
    %2 = vector.shape_cast %1 : vector<1x768x2304xbf16> to vector<768x2304xbf16>
    %cst = arith.constant dense<0.000000e+00> : vector<2x2304xf32>
    %3 = tpu.matmul %0, %2, %cst {dimension_numbers = #tpu.dot_dimension_numbers<[1], [0], [0], [1], [0, 0, 1, 1], [], []>} : vector<2x768xbf16>, vector<768x2304xbf16>, vector<2x2304xf32> -> vector<2x2304xf32>
    %c0_4 = arith.constant 0 : index
    %c0_5 = arith.constant 0 : index
    %4 = vector.load %arg2[%c0_4, %c0_5] : memref<2x768xbf16, #tpu.memory_space<vmem>>, vector<2x768xbf16>
    %c0_6 = arith.constant 0 : index
    %c0_7 = arith.constant 0 : index
    %c0_8 = arith.constant 0 : index
    %5 = vector.load %arg4[%c0_6, %c0_7, %c0_8] : memref<1x768x2304xbf16, #tpu.memory_space<vmem>>, vector<1x768x2304xbf16>
    %6 = vector.shape_cast %5 : vector<1x768x2304xbf16> to vector<768x2304xbf16>
    %cst_9 = arith.constant dense<0.000000e+00> : vector<2x2304xf32>
    %7 = tpu.matmul %4, %6, %cst_9 {dimension_numbers = #tpu.dot_dimension_numbers<[1], [0], [0], [1], [0, 0, 1, 1], [], []>} : vector<2x768xbf16>, vector<768x2304xbf16>, vector<2x2304xf32> -> vector<2x2304xf32>
    %8 = arith.addf %3, %7 : vector<2x2304xf32>
    %c0_10 = arith.constant 0 : index
    %c0_11 = arith.constant 0 : index
    %c0_12 = arith.constant 0 : index
    %9 = vector.load %arg5[%c0_10, %c0_11, %c0_12] : memref<1x1x2304xf32, #tpu.memory_space<vmem>>, vector<1x1x2304xf32>
    %10 = vector.shape_cast %9 : vector<1x1x2304xf32> to vector<1x2304xf32>
    %11 = vector.broadcast %10 : vector<1x2304xf32> to vector<2x2304xf32>
    %12 = arith.addf %8, %11 : vector<2x2304xf32>
    %cst_13 = arith.constant 0.000000e+00 : f32
    %13 = vector.broadcast %cst_13 : f32 to vector<2x2304xf32>
    %14 = arith.maximumf %12, %13 : vector<2x2304xf32>
    %c0_14 = arith.constant 0 : index
    %c0_15 = arith.constant 0 : index
    %c0_16 = arith.constant 0 : index
    %15 = vector.load %arg6[%c0_14, %c0_15, %c0_16] : memref<1x2304x16xf32, #tpu.memory_space<vmem>>, vector<1x2304x16xf32>
    %16 = vector.shape_cast %15 : vector<1x2304x16xf32> to vector<2304x16xf32>
    %cst_17 = arith.constant dense<0.000000e+00> : vector<2x16xf32>
    %17 = tpu.matmul %14, %16, %cst_17 {dimension_numbers = #tpu.dot_dimension_numbers<[1], [0], [0], [1], [0, 0, 1, 1], [], []>} : vector<2x2304xf32>, vector<2304x16xf32>, vector<2x16xf32> -> vector<2x16xf32>
    %c0_18 = arith.constant 0 : index
    %c0_19 = arith.constant 0 : index
    %18 = vector.load %arg7[%c0_18, %c0_19] : memref<1x16xf32, #tpu.memory_space<vmem>>, vector<1x16xf32>
    %19 = vector.broadcast %18 : vector<1x16xf32> to vector<2x16xf32>
    %20 = arith.addf %17, %19 : vector<2x16xf32>
    %c0_20 = arith.constant 0 : index
    %c0_21 = arith.constant 0 : index
    %c0_22 = arith.constant 0 : index
    %21 = vector.load %arg8[%c0_20, %c0_21, %c0_22] : memref<1x2x16xf32, #tpu.memory_space<vmem>>, vector<1x2x16xf32>
    %22 = vector.shape_cast %21 : vector<1x2x16xf32> to vector<2x16xf32>
    %23 = vector.shape_cast %20 : vector<2x16xf32> to vector<1x2x16xf32>
    tpu.vector_store %arg8[%c0_20, %c0_21, %c0_22], %23 {strides = array<i32>} : memref<1x2x16xf32, #tpu.memory_space<vmem>>, vector<1x2x16xf32>,
    return
  }
  func.func @transform_0(%arg0: i32) -> (i32, i32) {
    %c0_i32 = arith.constant 0 : i32
    %c0_i32_0 = arith.constant 0 : i32
    %c0_i32_1 = arith.constant 0 : i32
    return %c0_i32, %c0_i32_0 : i32, i32
  }
  func.func @transform_1(%arg0: i32) -> (i32, i32) {
    %c0_i32 = arith.constant 0 : i32
    %c0_i32_0 = arith.constant 0 : i32
    %c0_i32_1 = arith.constant 0 : i32
    return %c0_i32, %c0_i32_0 : i32, i32
  }
  func.func @transform_2(%arg0: i32) -> (i32, i32, i32) {
    %c0_i32 = arith.constant 0 : i32
    %c0_i32_0 = arith.constant 0 : i32
    %c0_i32_1 = arith.constant 0 : i32
    return %arg0, %c0_i32, %c0_i32_0 : i32, i32, i32
  }
  func.func @transform_3(%arg0: i32) -> (i32, i32, i32) {
    %c0_i32 = arith.constant 0 : i32
    %c0_i32_0 = arith.constant 0 : i32
    %c0_i32_1 = arith.constant 0 : i32
    return %arg0, %c0_i32, %c0_i32_0 : i32, i32, i32
  }
  func.func @transform_4(%arg0: i32) -> (i32, i32, i32) {
    %c0_i32 = arith.constant 0 : i32
    %c0_i32_0 = arith.constant 0 : i32
    %c0_i32_1 = arith.constant 0 : i32
    return %arg0, %c0_i32, %c0_i32_0 : i32, i32, i32
  }
  func.func @transform_5(%arg0: i32) -> (i32, i32, i32) {
    %c0_i32 = arith.constant 0 : i32
    %c0_i32_0 = arith.constant 0 : i32
    %c0_i32_1 = arith.constant 0 : i32
    return %arg0, %c0_i32, %c0_i32_0 : i32, i32, i32
  }
  func.func @transform_6(%arg0: i32) -> (i32, i32) {
    %c0_i32 = arith.constant 0 : i32
    %c0_i32_0 = arith.constant 0 : i32
    %c0_i32_1 = arith.constant 0 : i32
    return %c0_i32, %c0_i32_0 : i32, i32
  }
  func.func @transform_7(%arg0: i32) -> (i32, i32, i32) {
    %c0_i32 = arith.constant 0 : i32
    %c0_i32_0 = arith.constant 0 : i32
    %c0_i32_1 = arith.constant 0 : i32
    return %arg0, %c0_i32, %c0_i32_0 : i32, i32, i32
  }
}

</mosaic_0001>

<bundles_post_ra>
// kernel: no_cross_attn_heads.1
= control target key start
LH: loop header
LB: loop body
LE: loop exit
PB: predicated region body
PF: predicated region fallthrough
CT: control target
= control target key end

     0   :  { %s22211_s0 = inlined_call_operand.vmem [shape: bf16[2,768], index: 0, kind: input, shape index: {}]   ;;  %s22212_s1 = inlined_call_operand.vmem [shape: bf16[2,768], index: 1, kind: input, shape index: {}]   ;;  %s22213_s2 = inlined_call_operand.hbm [shape: bf16[2,768,2304], index: 2, kind: input, shape index: {}]   ;;  %s22214_s3 = inlined_call_operand.hbm [shape: bf16[2,768,2304], index: 3, kind: input, shape index: {}]   ;;  %s22215_s4 = inlined_call_operand.hbm [shape: f32[2,1,2304], index: 4, kind: input, shape index: {}]   ;;  %s22216_s5 = inlined_call_operand.vmem [shape: f32[2,2304,16], index: 5, kind: input, shape index: {}]   ;;  %s22217_s6 = inlined_call_operand.hbm [shape: f32[1,16], index: 6, kind: input, shape index: {}]   ;;  %s22218_s7 = inlined_call_operand.vmem [shape: f32[2,2,16], index: 7, kind: output, shape index: {}]  }
   0x1   :  { %22227 = sst [smem:[#allocation14_spill]] %s22213_s2 }
   0x2   :  { %22228 = sst [smem:[#allocation15_spill]] %s22214_s3 }
   0x3   :  { %12 = vsyncpa [#allocation3], 0 }
   0x4   :  { %14 = vsyncpa [#allocation3 + $0x1], 0 }
   0x5   :  { %15 = vsyncpa [#allocation5], 0 }
   0x6   :  { %17 = vsyncpa [#allocation5 + $0x1], 0 }
   0x7   :  { %18 = vsyncpa [#allocation8], 0  ;;  %s19508_s24 = smov 0   ;;  %s19510_s25 = smov 0  }
   0x8   :  { %s19512_s26 = smov 0   ;;  %s19514_s27 = smov 0  }
   0x9 LB: > { %22229 = sst [smem:[#allocation12_spill]] %s19455_s26  ;;  %s19529_s28 = sadd.s32 1, %s19459_s27   ;;  %s19459_s27 = sphi %s19514_s27, %s22251_s27   ;;  %s19455_s26 = sphi %s19512_s26, %s22250_s26   ;;  %s19451_s25 = sphi %s19510_s25, %s22249_s25   ;;  %s19447_s24 = sphi %s19508_s24, %s22248_s24  }
   0xa   : > { %s73_s29 = sadd.s32 1, %s19455_s26  ;;  %s70_s30 = ssub.s32 %s19459_s27, %s19529_s28 }
   0xb   : > { %p80_p0 = scmp.ne.s32.totalorder %s19455_s26, %s19451_s25  ;;  %p71_p1 = scmp.eq.s32.totalorder %s70_s30, 0 }
   0xc   : > { %p81_p2 = scmp.eq.s32.totalorder %s19459_s27, 0  ;;  %p16665_p3 = scmp.lt.s32.totalorder %s19459_s27, 2 }
   0xd   : > { %s19539_s8 = scalar_select %p71_p1, %s19455_s26, %s73_s29  }
   0xe   : > { %p82_p4 = por %p81_p2, %p80_p0  ;;  %s19542_s9 = sand.u32 1, %s19455_s26  }
   0xf   : > { %22230 = sst [smem:[#allocation13_spill]] %s19539_s8  ;;  %s16631_s10 = smul.u32 6912, %s19542_s9 }
  0x10   : > { %s16632_s11 = smul.u32 110592, %s19459_s27  ;;  %p19546_p5 = pnand %p16665_p3, %p82_p4 }
  0x11   : > { %s273_s13 = sand.u32 1, %s19459_s27   ;;  %s22232_s3 = sld [smem:[#allocation15_spill]] }
  0x12   : > { %s22231_s12 = scalar_select %p19546_p5, 1, 0 }
  0x13   : > { %s277_s17 = scalar_lea.vmem [#allocation4], %s16631_s10  ;;  %s19562_s19 = scalar_lea.sflag [#allocation5], %s273_s13 }
  0x14   : > { %s284_s18 = sshll.u32 %s277_s17, 4  ;;  %p19568_p7 = pneg %p19546_p5  ;;  %s19560_s18 = int_to_ptr.vmem [resolvable:$true] %s284_s18 }
  0x17   : > { %s19556_s16 = scalar_lea.hbm %s22232_s3, %s16632_s11  ;;  %s19304_s29 = scalar_lea.hbm %s22232_s3, 221184 }
  0x18   : > { %s19299_s20 = scalar_lea.hbm %s19556_s16, 110592  ;;  %p19305_p10 = scmp.lt.u32.totalorder %s19556_s16, %s22232_s3 }
  0x19   : > { %p19300_p6 = scmp.ne.s32.totalorder %s19556_s16, %s19299_s20  ;;  %p19306_p11 = scmp.lt.u32.totalorder %s19304_s29, %s19299_s20 }
  0x1a   : > { %p19308_p13 = scmp.lt.u32.totalorder %s19299_s20, %s19556_s16 }
  0x1b   : > { %p19302_p8 = pnand %p19568_p7, %p19300_p6  ;;  %p19307_p12 = por %p19306_p11, %p19305_p10 }
  0x1d   : > { %p19303_p9 = pneg %p19302_p8  ;;  %p19309_p0 = por %p19308_p13, %p19307_p12 }
  0x1f   : > { %p19310_p1 = pnand %p19309_p0, %p19303_p9 }
  0x21   : > { %19313 = shalt.err (!%p19310_p1)
}
  0x22   : > { %s19314_s13 = scalar_lea.vmem %s19560_s18, 110592  ;;  %s19461_s15 = smov [#allocation4]  }
  0x23   : > { %p19315_p2 = scmp.ne.s32.totalorder %s19560_s18, %s19314_s13  ;;  %s19319_s17 = sshll.u32 %s19461_s15, 4  ;;  %s19320_s17 = int_to_ptr.vmem [resolvable:$false] %s19319_s17 }
  0x24   : > { %s19321_s22 = scalar_lea.vmem %s19320_s17, 221184  ;;  %p19322_p6 = scmp.lt.s32.totalorder %s19560_s18, %s19320_s17 }
  0x25   : > { %p19317_p3 = pnand %p19315_p2, %p19568_p7  ;;  %p19323_p8 = scmp.lt.s32.totalorder %s19321_s22, %s19314_s13 }
  0x27   : > { %p19318_p4 = pneg %p19317_p3  ;;  %p19324_p10 = por %p19323_p8, %p19322_p6 }
  0x29   : > { %p19325_p11 = pnand %p19324_p10, %p19318_p4 }
  0x2b   : > { %19328 = shalt.err (!%p19325_p11)
}
  0x2c   : > { %s22219_s20 = smov 1152   ;;  %s22220_s23 = smov 72  }
  0x2d   : > { %16660 = dma.hbm_to_vmem [thread:$0]  (!%p19546_p5), %s19556_s16, 110592, %s19560_s18, %s19562_s19, %s22219_s20, %s22219_s20, %s22220_s23  }
  0x2e   : > { %s19596_s29 = sadd.s32 4294967295, %s19459_s27   ;;  %p86_p9 = scmp.ne.s32.totalorder %s19451_s25, %s19447_s24 }
  0x2f   : > { %p22221_p12 = scmp.eq.s32.totalorder %s19596_s29, 0  ;;  %p14287_p13 = scmp.ge.s32.totalorder %s19459_s27, 1 }
  0x30   : > { %p222_p0 = scmp.lt.s32.totalorder %s19459_s27, 3  ;;  %s19464_s16 = smov [#allocation7]  }
  0x31   : > { %p19605_p1 = por %p22221_p12, %p86_p9  ;;  %s241_s18 = sshll.u32 %s19464_s16, 4  ;;  %s19613_s18 = int_to_ptr.vmem [resolvable:$true] %s241_s18 }
  0x32   : > { %p19609_p2 = pnand %p14287_p13, %p222_p0  ;;  %s22236_s2 = sld [smem:[#allocation14_spill]] }
  0x33   : > { %s22234_s30 = scalar_select %p19605_p1, 1, 0 }
  0x34   : > { %s22235_s14 = scalar_select %p19609_p2, 1, 0 }
  0x35   : > { %p16650_p3 = pneg %p19609_p2  ;;  %s256_s17 = scalar_lea.vmem [#allocation2], %s16631_s10 }
  0x36   : > { %s263_s22 = sshll.u32 %s256_s17, 4  ;;  %s253_s20 = scalar_lea.sflag [#allocation3], %s19542_s9  ;;  %s19632_s22 = int_to_ptr.vmem [resolvable:$true] %s263_s22 }
  0x37   : > { %p19628_p4 = pnand %p16650_p3, %p22221_p12 }
  0x38   : > { %s19622_s15 = scalar_lea.hbm %s22236_s2, %s16632_s11  ;;  %s19334_s13 = scalar_lea.hbm %s22236_s2, 221184 }
  0x39   : > { %s22237_s16 = scalar_select %p19628_p4, 1, 0 }
  0x3a   : > { %s19329_s23 = scalar_lea.hbm %s19622_s15, 110592  ;;  %p19335_p11 = scmp.lt.u32.totalorder %s19622_s15, %s22236_s2 }
  0x3b   : > { %p19330_p6 = scmp.ne.s32.totalorder %s19622_s15, %s19329_s23  ;;  %p19336_p9 = scmp.lt.u32.totalorder %s19334_s13, %s19329_s23 }
  0x3c   : > { %p19338_p0 = scmp.lt.u32.totalorder %s19329_s23, %s19622_s15 }
  0x3d   : > { %p19332_p8 = pnand %p19330_p6, %p19568_p7  ;;  %p19337_p13 = por %p19336_p9, %p19335_p11 }
  0x3f   : > { %p19333_p10 = pneg %p19332_p8  ;;  %p19339_p3 = por %p19338_p0, %p19337_p13 }
  0x41   : > { %p19340_p12 = pnand %p19339_p3, %p19333_p10 }
  0x43   : > { %19343 = shalt.err (!%p19340_p12)
}
  0x44   : > { %s19344_s17 = scalar_lea.vmem %s19632_s22, 110592  ;;  %s19465_s11 = smov [#allocation2]  }
  0x45   : > { %p19345_p6 = scmp.ne.s32.totalorder %s19632_s22, %s19344_s17  ;;  %s19349_s24 = sshll.u32 %s19465_s11, 4  ;;  %s19350_s24 = int_to_ptr.vmem [resolvable:$false] %s19349_s24 }
  0x46   : > { %s19351_s3 = scalar_lea.vmem %s19350_s24, 221184  ;;  %p19352_p2 = scmp.lt.s32.totalorder %s19632_s22, %s19350_s24 }
  0x47   : > { %p19347_p8 = pnand %p19345_p6, %p19568_p7  ;;  %p19353_p4 = scmp.lt.s32.totalorder %s19351_s3, %s19344_s17 }
  0x49   : > { %p19348_p1 = pneg %p19347_p8  ;;  %p19354_p11 = por %p19353_p4, %p19352_p2 }
  0x4b   : > { %p19355_p9 = pnand %p19354_p11, %p19348_p1 }
  0x4d   : > { %19358 = shalt.err (!%p19355_p9)
}
  0x4e   : > { %s22238_s23 = smov 72   ;;  %s22239_s13 = smov 1152  }
  0x4f   : > { %16657 = dma.hbm_to_vmem [thread:$0]  (!%p19546_p5), %s19622_s15, 110592, %s19632_s22, %s253_s20, %s22239_s13, %s22239_s13, %s22238_s23  }
  0x50   : > { %s16635_s10 = smul.u32 18, %s19542_s9  ;;  %s19359_s17 = scalar_lea.hbm %s22217_s6, 16 }
  0x51   : > { %p19360_p12 = scmp.ne.s32.totalorder %s22217_s6, %s19359_s17  ;;  %p22240_p1 = scmp.ne.s32.totalorder %s22237_s16, 0 }
  0x52   : > { %p19366_p13 = scmp.lt.u32.totalorder %s19359_s17, %s22217_s6 }
  0x53   : > { %p19361_p2 = pneg %p22240_p1 }
  0x55   : > { %p19362_p4 = pnand %p19361_p2, %p19360_p12 }
  0x57   : > { %p19363_p10 = pneg %p19362_p4 }
  0x59   : > { %p19368_p0 = pnand %p19366_p13, %p19363_p10 }
  0x5b   : > { %19371 = shalt.err (!%p19368_p0)
}
  0x5c   : > { %s19372_s2 = scalar_lea.vmem %s19613_s18, 16  ;;  %s19379_s9 = scalar_lea.vmem %s19613_s18, 32 }
  0x5d   : > { %p19373_p3 = scmp.ne.s32.totalorder %s19613_s18, %s19372_s2  ;;  %p19380_p11 = scmp.lt.s32.totalorder %s19613_s18, %s19613_s18 }
  0x5e   : > { %p19381_p9 = scmp.lt.s32.totalorder %s19379_s9, %s19372_s2 }
  0x5f   : > { %p19375_p6 = pnand %p19373_p3, %p19361_p2 }
  0x60   : > { %p19382_p12 = por %p19381_p9, %p19380_p11 }
  0x61   : > { %p19376_p8 = pneg %p19375_p6 }
  0x63   : > { %p19383_p4 = pnand %p19382_p12, %p19376_p8 }
  0x65   : > { %19386 = shalt.err (!%p19383_p4)
}
  0x66   : > { %16653 = dma.hbm_to_vmem [thread:$0]  (!%p22240_p1), %s22217_s6, 16, %s19613_s18, [#allocation8]  }
  0x67   : > { %s16636_s20 = smul.u32 288, %s19459_s27  ;;  %s298_s15 = scalar_lea.vmem [#allocation6], %s16635_s10 }
  0x68   : > { %s306_s22 = sshll.u32 %s298_s15, 4  ;;  %s19392_s3 = scalar_lea.hbm %s22215_s4, 576  ;;  %s307_s22 = int_to_ptr.vmem [resolvable:$true] %s306_s22 }
  0x69   : > { %s304_s11 = scalar_lea.hbm %s22215_s4, %s16636_s20 }
  0x6a   : > { %s19387_s17 = scalar_lea.hbm %s304_s11, 288  ;;  %p19393_p1 = scmp.lt.u32.totalorder %s304_s11, %s22215_s4 }
  0x6b   : > { %p19388_p2 = scmp.ne.s32.totalorder %s304_s11, %s19387_s17  ;;  %p19394_p0 = scmp.lt.u32.totalorder %s19392_s3, %s19387_s17 }
  0x6c   : > { %p19396_p6 = scmp.lt.u32.totalorder %s19387_s17, %s304_s11 }
  0x6d   : > { %p19390_p10 = pnand %p19388_p2, %p19568_p7  ;;  %p19395_p3 = por %p19394_p0, %p19393_p1 }
  0x6f   : > { %p19391_p13 = pneg %p19390_p10  ;;  %p19397_p8 = por %p19396_p6, %p19395_p3 }
  0x71   : > { %p19398_p11 = pnand %p19397_p8, %p19391_p13 }
  0x73   : > { %19401 = shalt.err (!%p19398_p11)
}
  0x74   : > { %s19402_s27 = scalar_lea.vmem %s307_s22, 288  ;;  %s19466_s18 = smov [#allocation6]  }
  0x75   : > { %p19403_p9 = scmp.ne.s32.totalorder %s307_s22, %s19402_s27  ;;  %s19407_s10 = sshll.u32 %s19466_s18, 4  ;;  %s19408_s10 = int_to_ptr.vmem [resolvable:$false] %s19407_s10 }
  0x76   : > { %s19409_s26 = scalar_lea.vmem %s19408_s10, 576  ;;  %p19410_p2 = scmp.lt.s32.totalorder %s307_s22, %s19408_s10 }
  0x77   : > { %p19405_p12 = pnand %p19403_p9, %p19568_p7  ;;  %p19411_p10 = scmp.lt.s32.totalorder %s19409_s26, %s19402_s27 }
  0x79   : > { %p19406_p4 = pneg %p19405_p12  ;;  %p19412_p5 = por %p19411_p10, %p19410_p2 }
  0x7b   : > { %p19413_p0 = pnand %p19412_p5, %p19406_p4 }
  0x7d   : > { %19416 = shalt.err (!%p19413_p0)
}
  0x7e   : > { %p22241_p1 = scmp.ne.s32.totalorder %s22231_s12, 0  ;;  %p22242_p13 = scmp.ne.s32.totalorder %s22235_s14, 0 }
  0x7f   : > { %s325_s21 = sand.u32 (!%p22242_p13), 1, %s19451_s25   ;;  %p22243_p7 = scmp.ne.s32.totalorder (!%p22242_p13), %s22234_s30, 0 }
  0x80   : > { %16663 = dma.hbm_to_vmem [thread:$0]  (!%p22241_p1), %s304_s11, 288, %s307_s22, %s19562_s19  }
  0x81   : > { %323 = sbr.rel (%p22242_p13) target bundleno = 2313 (0x909), region = 48  ;;  %s326_s20 = scalar_lea.sflag (!%p22242_p13), [#allocation3], %s325_s21 }
  0x82   : > { %s16637_s8 = smul.u32 (!%p22242_p13), 6912, %s325_s21 }
  0x84   : > { %s19704_s15 = scalar_lea.vmem (!%p22242_p13), [#allocation2], %s16637_s8 }
  0x88   : > { %19434 = dma.done.wait (%p22243_p7), %s326_s20, 110592  }
  0x89   : > { %19436 = vsyncadd (%p22243_p7), %s326_s20, 4294856704  ;;  %s334_s12 = sand.u32 1, %s19596_s29   ;;  %s19711_s19 = scalar_lea.vmem [#allocation4], %s16637_s8 }
  0x8a   : > { %s335_s23 = scalar_lea.sflag [#allocation5], %s334_s12 }
  0x8b   : > { %19438 = dma.done.wait (%p22243_p7), %s335_s23, 110880  }
  0x8c   : > { %19440 = vsyncadd (%p22243_p7), %s335_s23, 4294856416  ;;  %s16638_s14 = smul.u32 18, %s325_s21  ;;  %p22244_p5 = scmp.eq.s32.totalorder %s19596_s29, 0 }
  0x8e   : > { %s19717_s22 = scalar_lea.vmem [#allocation6], %s16638_s14 }
  0x8f   : > { %19442 = dma.done.wait (%p22244_p5), [#allocation8], 16   ;;  %p22245_p3 = pmov %p22244_p5 }
  0x90   : > { %v16703_v0 = vld [vmem:[%s19711_s19 + $0x4] ss:$72 sps:$4 sm:$0xff]   ;;  %v16707_v2 = vld [vmem:[%s19711_s19] ss:$72 sps:$4 sm:$0xff]   ;;  %v16709_v4 = vld [vmem:[%s19711_s19 + $0x94] ss:$72 sps:$4 sm:$0xff]   ;;  %v2140_v38 = vlaneseq }
  0x91   : > { %19444 = vsyncadd (%p22245_p3), [#allocation8], 4294967280  ;;  %v16705_v1 = vld [vmem:[%s19711_s19 + $0x904] ss:$72 sps:$4 sm:$0xff]   ;;  %6509 = vmatprep.subr.bf16.mxu0 %v16703_v0  ;;  %v16708_v3 = vld [vmem:[%s19711_s19 + $0x900] ss:$72 sps:$4 sm:$0xff]  }
  0x92   : > { %6550 = vmatprep.subr.bf16.mxu1 %v16705_v1  ;;  %6510 = vmatpush1.bf16.msra.mxu0 %v16707_v2  ;;  %v16711_v5 = vld [vmem:[%s19711_s19 + $0x994] ss:$72 sps:$4 sm:$0xff]   ;;  %v16713_v6 = vld [vmem:[%s19711_s19 + $0x90] ss:$72 sps:$4 sm:$0xff]   ;;  %v16715_v8 = vld [vmem:[%s19711_s19 + $0x124] ss:$72 sps:$4 sm:$0xff]  }
  0x93   : > { %6551 = vmatpush1.bf16.msra.mxu1 %v16708_v3  ;;  %6511 = vmatprep.subr.bf16.mxu0 %v16709_v4  ;;  %v16714_v7 = vld [vmem:[%s19711_s19 + $0x990] ss:$72 sps:$4 sm:$0xff]   ;;  %v16717_v9 = vld [vmem:[%s19711_s19 + $0xa24] ss:$72 sps:$4 sm:$0xff]   ;;  %v16719_v10 = vld [vmem:[%s19711_s19 + $0x120] ss:$72 sps:$4 sm:$0xff]  }
  0x94   : > { %6552 = vmatprep.subr.bf16.mxu1 %v16711_v5  ;;  %v16720_v11 = vld [vmem:[%s19711_s19 + $0xa20] ss:$72 sps:$4 sm:$0xff]   ;;  %v16721_v12 = vld [vmem:[%s19711_s19 + $0x1b4] ss:$72 sps:$4 sm:$0xff]   ;;  %v16725_v14 = vld [vmem:[%s19711_s19 + $0x1b0] ss:$72 sps:$4 sm:$0xff]  }
  0x95   : > { %v16723_v13 = vld [vmem:[%s19711_s19 + $0xab4] ss:$72 sps:$4 sm:$0xff]   ;;  %v16726_v15 = vld [vmem:[%s19711_s19 + $0xab0] ss:$72 sps:$4 sm:$0xff]   ;;  %v16727_v16 = vld [vmem:[%s19711_s19 + $0x244] ss:$72 sps:$4 sm:$0xff]  }
  0x96   : > { %6512 = vmatpush1.bf16.msra.mxu0 %v16713_v6  ;;  %v16729_v17 = vld [vmem:[%s19711_s19 + $0xb44] ss:$72 sps:$4 sm:$0xff]   ;;  %v16731_v18 = vld [vmem:[%s19711_s19 + $0x240] ss:$72 sps:$4 sm:$0xff]   ;;  %v16733_v20 = vld [vmem:[%s19711_s19 + $0x2d4] ss:$72 sps:$4 sm:$0xff]  }
  0x97   : > { %6553 = vmatpush1.bf16.msra.mxu1 %v16714_v7  ;;  %6513 = vmatprep.subr.bf16.mxu0 %v16715_v8  ;;  %v16732_v19 = vld [vmem:[%s19711_s19 + $0xb40] ss:$72 sps:$4 sm:$0xff]   ;;  %v16735_v21 = vld [vmem:[%s19711_s19 + $0xbd4] ss:$72 sps:$4 sm:$0xff]   ;;  %v16737_v22 = vld [vmem:[%s19711_s19 + $0x2d0] ss:$72 sps:$4 sm:$0xff]  }
  0x98   : > { %6554 = vmatprep.subr.bf16.mxu1 %v16717_v9  ;;  %v16738_v23 = vld [vmem:[%s19711_s19 + $0xbd0] ss:$72 sps:$4 sm:$0xff]   ;;  %v16739_v24 = vld [vmem:[%s19711_s19 + $0x364] ss:$72 sps:$4 sm:$0xff]   ;;  %v16743_v26 = vld [vmem:[%s19711_s19 + $0x360] ss:$72 sps:$4 sm:$0xff]  }
  0x99   : > { %v16741_v25 = vld [vmem:[%s19711_s19 + $0xc64] ss:$72 sps:$4 sm:$0xff]   ;;  %v16744_v27 = vld [vmem:[%s19711_s19 + $0xc60] ss:$72 sps:$4 sm:$0xff]   ;;  %v16745_v28 = vld [vmem:[%s19711_s19 + $0x3f4] ss:$72 sps:$4 sm:$0xff]  }
  0x9a   : > { %6514 = vmatpush1.bf16.msra.mxu0 %v16719_v10  ;;  %v16747_v29 = vld [vmem:[%s19711_s19 + $0xcf4] ss:$72 sps:$4 sm:$0xff]   ;;  %v16749_v30 = vld [vmem:[%s19711_s19 + $0x3f0] ss:$72 sps:$4 sm:$0xff]   ;;  %v16751_v32 = vld [vmem:[%s19711_s19 + $0x484] ss:$72 sps:$4 sm:$0xff]  }
  0x9b   : > { %6555 = vmatpush1.bf16.msra.mxu1 %v16720_v11  ;;  %6515 = vmatprep.subr.bf16.mxu0 %v16721_v12  ;;  %v16750_v31 = vld [vmem:[%s19711_s19 + $0xcf0] ss:$72 sps:$4 sm:$0xff]   ;;  %v16753_v33 = vld [vmem:[%s19711_s19 + $0xd84] ss:$72 sps:$4 sm:$0xff]   ;;  %v16755_v34 = vld [vmem:[%s19711_s19 + $0x480] ss:$72 sps:$4 sm:$0xff]  }
  0x9c   : > { %6556 = vmatprep.subr.bf16.mxu1 %v16723_v13  ;;  %v16756_v35 = vld [vmem:[%s19711_s19 + $0xd80] ss:$72 sps:$4 sm:$0xff]   ;;  %v19467_v36 = vmov 1966171168   ;;  %v16757_v39 = vld [vmem:[%s19711_s19 + $0x514] ss:$72 sps:$4 sm:$0xff]  }
  0x9d   : > { %v2138_v37 = vunpack.c.l.s4 %v19467_v36  ;;  %v16759_v40 = vld [vmem:[%s19711_s19 + $0xe14] ss:$72 sps:$4 sm:$0xff]   ;;  %v16761_v41 = vld [vmem:[%s19711_s19 + $0x510] ss:$72 sps:$4 sm:$0xff]   ;;  %v19762_v43 = vshrl.u32 %v2140_v38, 7  ;;  %p396_p6 = scmp.lt.s32.totalorder %s19596_s29, 1 }
  0x9e   : > { %6516 = vmatpush1.bf16.msra.mxu0 %v16725_v14  ;;  %v16762_v44 = vld [vmem:[%s19711_s19 + $0xe10] ss:$72 sps:$4 sm:$0xff]   ;;  %v16763_v45 = vld [vmem:[%s19711_s19 + $0x5a4] ss:$72 sps:$4 sm:$0xff]   ;;  %v16767_v47 = vld [vmem:[%s19711_s19 + $0x5a0] ss:$72 sps:$4 sm:$0xff]  }
  0x9f   : > { %6557 = vmatpush1.bf16.msra.mxu1 %v16726_v15  ;;  %6517 = vmatprep.subr.bf16.mxu0 %v16727_v16  ;;  %v2139_v42 = vunpack.c.0.s8 %v2138_v37  ;;  %v16765_v46 = vld [vmem:[%s19711_s19 + $0xea4] ss:$72 sps:$4 sm:$0xff]   ;;  %v16768_v48 = vld [vmem:[%s19711_s19 + $0xea0] ss:$72 sps:$4 sm:$0xff]   ;;  %v16769_v50 = vld [vmem:[%s19711_s19 + $0x634] ss:$72 sps:$4 sm:$0xff]  }
  0xa0   : > { %6558 = vmatprep.subr.bf16.mxu1 %v16729_v17  ;;  %v16771_v51 = vld [vmem:[%s19711_s19 + $0xf34] ss:$72 sps:$4 sm:$0xff]   ;;  %v1270_v52 = vld [vmem:[%s22212_s1] sm:$0x3f]  ;;  %v16773_v53 = vld [vmem:[%s19711_s19 + $0x630] ss:$72 sps:$4 sm:$0xff]  }
  0xa1   : > { %v19770_v49 = vsub.s32 %v2139_v42, %v19762_v43  ;;  %v16774_v55 = vld [vmem:[%s19711_s19 + $0xf30] ss:$72 sps:$4 sm:$0xff]   ;;  %v16775_v56 = vld [vmem:[%s19711_s19 + $0x6c4] ss:$72 sps:$4 sm:$0xff]   ;;  %v16779_v59 = vld [vmem:[%s19711_s19 + $0x6c0] ss:$72 sps:$4 sm:$0xff]   ;;  %v2136_v5 = vcombine.high %v1270_v52, %v1270_v52 }
  0xa2   : > { %6518 = vmatpush1.bf16.msra.mxu0 %v16731_v18  ;;  %v16777_v57 = vld [vmem:[%s19711_s19 + $0xfc4] ss:$72 sps:$4 sm:$0xff]   ;;  %v16780_v61 = vld [vmem:[%s19711_s19 + $0xfc0] ss:$72 sps:$4 sm:$0xff]   ;;  %v16781_v62 = vld [vmem:[%s19711_s19 + $0x754] ss:$72 sps:$4 sm:$0xff]  }
  0xa3   : > { %6559 = vmatpush1.bf16.msra.mxu1 %v16732_v19  ;;  %6519 = vmatprep.subr.bf16.mxu0 %v16733_v20  ;;  %v2143_v54 = vrot.slane %v1270_v52, %v19770_v49  ;;  %v16783_v63 = vld [vmem:[%s19711_s19 + $0x1054] ss:$72 sps:$4 sm:$0xff]   ;;  %v16785_v1 = vld [vmem:[%s19711_s19 + $0x750] ss:$72 sps:$4 sm:$0xff]   ;;  %v16787_v3 = vld [vmem:[%s19711_s19 + $0x7e4] ss:$72 sps:$4 sm:$0xff]   ;;  %v19804_v10 = vrot.slane %v2136_v5, %v19770_v49 }
  0xa4   : > { %6560 = vmatprep.subr.bf16.mxu1 %v16735_v21  ;;  %v16786_v2 = vld [vmem:[%s19711_s19 + $0x1050] ss:$72 sps:$4 sm:$0xff]   ;;  %v16789_v4 = vld [vmem:[%s19711_s19 + $0x10e4] ss:$72 sps:$4 sm:$0xff]   ;;  %v16791_v6 = vld [vmem:[%s19711_s19 + $0x7e0] ss:$72 sps:$4 sm:$0xff]  }
  0xa5   : > { %v2151_v58 = vcombine.high %v2143_v54, %v2143_v54  ;;  %v16792_v7 = vld [vmem:[%s19711_s19 + $0x10e0] ss:$72 sps:$4 sm:$0xff]   ;;  %v16793_v8 = vld [vmem:[%s19711_s19 + $0x874] ss:$72 sps:$4 sm:$0xff]   ;;  %v16797_v11 = vld [vmem:[%s19711_s19 + $0x870] ss:$72 sps:$4 sm:$0xff]   ;;  %v19808_v12 = vrot.slane %v2143_v54, %v19770_v49  ;;  %v2152_v16 = vcombine.high %v19804_v10, %v19804_v10 }
  0xa6   : > { %6520 = vmatpush1.bf16.msra.mxu0 %v16737_v22  ;;  %v16795_v9 = vld [vmem:[%s19711_s19 + $0x1174] ss:$72 sps:$4 sm:$0xff]   ;;  %v16798_v13 = vld [vmem:[%s19711_s19 + $0x1170] ss:$72 sps:$4 sm:$0xff]   ;;  %v16801_v14 = vld [vmem:[%s19711_s19 + $0x1204] ss:$72 sps:$4 sm:$0xff]  }
  0xa7   : > { %6561 = vmatpush1.bf16.msra.mxu1 %v16738_v23  ;;  %6521 = vmatprep.subr.bf16.mxu0 %v16739_v24  ;;  %v19784_v60 = vrot.slane %v2151_v58, %v19770_v49  ;;  %v16804_v15 = vld [vmem:[%s19711_s19 + $0xc] ss:$72 sps:$4 sm:$0xff]   ;;  %v19817_v17 = vcombine.high %v19808_v12, %v19808_v12  ;;  %v16799_v18 = vld [vmem:[%s19711_s19 + $0x1200] ss:$72 sps:$4 sm:$0xff]   ;;  %v16810_v21 = vld [vmem:[%s19711_s19 + $0x9c] ss:$72 sps:$4 sm:$0xff]   ;;  %v19824_v22 = vrot.slane %v2152_v16, %v19770_v49 }
  0xa8   : > { %6562 = vmatprep.subr.bf16.mxu1 %v16741_v25  ;;  %v16802_v19 = vld [vmem:[%s19711_s19 + $0x8] ss:$72 sps:$4 sm:$0xff]   ;;  %v16807_v20 = vld [vmem:[%s19711_s19 + $0x1294] ss:$72 sps:$4 sm:$0xff]   ;;  %v16808_v24 = vld [vmem:[%s19711_s19 + $0x98] ss:$72 sps:$4 sm:$0xff]  }
  0xa9   : > { %v19791_v0 = vcombine.high %v19784_v60, %v19784_v60  ;;  %6541 = vmatprep.mubr.bf16.mxu0 %v19784_v60  ;;  %v16805_v23 = vld [vmem:[%s19711_s19 + $0x1290] ss:$72 sps:$4 sm:$0xff]   ;;  %v16813_v25 = vld [vmem:[%s19711_s19 + $0x1324] ss:$72 sps:$4 sm:$0xff]   ;;  %v16831_v37 = vld [vmem:[%s19711_s19 + $0x14d4] ss:$72 sps:$4 sm:$0xff]  }
  0xaa   : > { %6522 = vmatpush1.bf16.msra.mxu0 %v16743_v26  ;;  %v16816_v26 = vld [vmem:[%s19711_s19 + $0x12c] ss:$72 sps:$4 sm:$0xff]   ;;  %v16826_v36 = vld [vmem:[%s19711_s19 + $0x248] ss:$72 sps:$4 sm:$0xff]   ;;  %v16834_v38 = vld [vmem:[%s19711_s19 + $0x2dc] ss:$72 sps:$4 sm:$0xff]  }
  0xab   : > { %6563 = vmatpush1.bf16.msra.mxu1 %v16744_v27  ;;  %6523 = vmatprep.subr.bf16.mxu0 %v16745_v28  ;;  %v16811_v27 = vld [vmem:[%s19711_s19 + $0x1320] ss:$72 sps:$4 sm:$0xff]   ;;  %v16840_v42 = vld [vmem:[%s19711_s19 + $0x36c] ss:$72 sps:$4 sm:$0xff]   ;;  %s22253_s29 = smov (!%p396_p6, %s19596_s29), 1  ;;  %vm14154_vm0 = vcmask 123904  }
  0xac   : > { %6564 = vmatprep.subr.bf16.mxu1 %v16747_v29  ;;  %6582 = vmatprep.mubr.bf16.mxu1 %v19791_v0  ;;  %v16814_v28 = vld [vmem:[%s19711_s19 + $0x128] ss:$72 sps:$4 sm:$0xff]   ;;  %v16819_v29 = vld [vmem:[%s19711_s19 + $0x13b4] ss:$72 sps:$4 sm:$0xff]   ;;  %v16856_v58 = vld [vmem:[%s19711_s19 + $0x518] ss:$72 sps:$4 sm:$0xff]  }
  0xad   : > { %v16852_v52 = vld [vmem:[%s19711_s19 + $0x48c] ss:$72 sps:$4 sm:$0xff]   ;;  %v16850_v54 = vld [vmem:[%s19711_s19 + $0x488] ss:$72 sps:$4 sm:$0xff]   ;;  %s16639_s16 = smul.u32 2304, %s22253_s29  ;;  %s14296_s9 = sshll.u32 %s22253_s29, 1 }
  0xae   : > { %6524 = vmatpush1.bf16.msra.mxu0 %v16749_v30  ;;  %v16822_v30 = vld [vmem:[%s19711_s19 + $0x1bc] ss:$72 sps:$4 sm:$0xff]   ;;  %v16888_v16 = vld [vmem:[%s19711_s19 + $0x7ec] ss:$72 sps:$4 sm:$0xff]   ;;  %s404_s10 = scalar_lea.vmem %s22218_s7, %s14296_s9 }
  0xaf   : > { %6565 = vmatpush1.bf16.msra.mxu1 %v16750_v31  ;;  %6525 = vmatprep.subr.bf16.mxu0 %v16751_v32  ;;  %v16817_v31 = vld [vmem:[%s19711_s19 + $0x13b0] ss:$72 sps:$4 sm:$0xff]   ;;  %v16873_v5 = vld [vmem:[%s19711_s19 + $0x18c4] ss:$72 sps:$4 sm:$0xff]   ;;  %s21816_s2 = scalar_lea.vmem %s22216_s5, %s16639_s16 }
  0xb0   : > { %6566 = vmatprep.subr.bf16.mxu1 %v16753_v33  ;;  %v16820_v32 = vld [vmem:[%s19711_s19 + $0x1b8] ss:$72 sps:$4 sm:$0xff]   ;;  %v16825_v33 = vld [vmem:[%s19711_s19 + $0x1444] ss:$72 sps:$4 sm:$0xff]  }
  0xb2   : > { %6526 = vmatpush1.bf16.msra.mxu0 %v16755_v34  ;;  %v16828_v34 = vld [vmem:[%s19711_s19 + $0x24c] ss:$72 sps:$4 sm:$0xff]  }
  0xb3   : > { %6567 = vmatpush1.bf16.msra.mxu1 %v16756_v35  ;;  %6527 = vmatprep.subr.bf16.mxu0 %v16757_v39  ;;  %v16823_v35 = vld [vmem:[%s19711_s19 + $0x1440] ss:$72 sps:$4 sm:$0xff]   ;;  %v16829_v39 = vld [vmem:[%s19711_s19 + $0x14d0] ss:$72 sps:$4 sm:$0xff]  }
  0xb4   : > { %6568 = vmatprep.subr.bf16.mxu1 %v16759_v40  ;;  %v16832_v40 = vld [vmem:[%s19711_s19 + $0x2d8] ss:$72 sps:$4 sm:$0xff]  }
  0xb6   : > { %6528 = vmatpush1.bf16.msra.mxu0 %v16761_v41  ;;  %v16837_v41 = vld [vmem:[%s19711_s19 + $0x1564] ss:$72 sps:$4 sm:$0xff]  }
  0xb7   : > { %6569 = vmatpush1.bf16.msra.mxu1 %v16762_v44  ;;  %6529 = vmatprep.subr.bf16.mxu0 %v16763_v45  ;;  %v16835_v44 = vld [vmem:[%s19711_s19 + $0x1560] ss:$72 sps:$4 sm:$0xff]  }
  0xb8   : > { %6570 = vmatprep.subr.bf16.mxu1 %v16765_v46  ;;  %v16838_v45 = vld [vmem:[%s19711_s19 + $0x368] ss:$72 sps:$4 sm:$0xff]   ;;  %v16843_v46 = vld [vmem:[%s19711_s19 + $0x15f4] ss:$72 sps:$4 sm:$0xff]  }
  0xba   : > { %6530 = vmatpush1.bf16.msra.mxu0 %v16767_v47  ;;  %v16846_v47 = vld [vmem:[%s19711_s19 + $0x3fc] ss:$72 sps:$4 sm:$0xff]  }
  0xbb   : > { %6571 = vmatpush1.bf16.msra.mxu1 %v16768_v48  ;;  %6531 = vmatprep.subr.bf16.mxu0 %v16769_v50  ;;  %v16841_v48 = vld [vmem:[%s19711_s19 + $0x15f0] ss:$72 sps:$4 sm:$0xff]  }
  0xbc   : > { %6572 = vmatprep.subr.bf16.mxu1 %v16771_v51  ;;  %v16844_v50 = vld [vmem:[%s19711_s19 + $0x3f8] ss:$72 sps:$4 sm:$0xff]   ;;  %v16849_v51 = vld [vmem:[%s19711_s19 + $0x1684] ss:$72 sps:$4 sm:$0xff]  }
  0xbe   : > { %6532 = vmatpush1.bf16.msra.mxu0 %v16773_v53  ;;  %v16847_v53 = vld [vmem:[%s19711_s19 + $0x1680] ss:$72 sps:$4 sm:$0xff]  }
  0xbf   : > { %6573 = vmatpush1.bf16.msra.mxu1 %v16774_v55  ;;  %6533 = vmatprep.subr.bf16.mxu0 %v16775_v56  ;;  %v16855_v55 = vld [vmem:[%s19711_s19 + $0x1714] ss:$72 sps:$4 sm:$0xff]  }
  0xc0   : > { %6574 = vmatprep.subr.bf16.mxu1 %v16777_v57  ;;  %v16858_v56 = vld [vmem:[%s19711_s19 + $0x51c] ss:$72 sps:$4 sm:$0xff]   ;;  %v16853_v57 = vld [vmem:[%s19711_s19 + $0x1710] ss:$72 sps:$4 sm:$0xff]  }
  0xc2   : > { %6534 = vmatpush1.bf16.msra.mxu0 %v16779_v59  ;;  %v16861_v59 = vld [vmem:[%s19711_s19 + $0x17a4] ss:$72 sps:$4 sm:$0xff]  }
  0xc3   : > { %6575 = vmatpush1.bf16.msra.mxu1 %v16780_v61  ;;  %6535 = vmatprep.subr.bf16.mxu0 %v16781_v62  ;;  %v16864_v61 = vld [vmem:[%s19711_s19 + $0x5ac] ss:$72 sps:$4 sm:$0xff]   ;;  %v16859_v62 = vld [vmem:[%s19711_s19 + $0x17a0] ss:$72 sps:$4 sm:$0xff]  }
  0xc4   : > { %6576 = vmatprep.subr.bf16.mxu1 %v16783_v63  ;;  %v16862_v63 = vld [vmem:[%s19711_s19 + $0x5a8] ss:$72 sps:$4 sm:$0xff]  }
  0xc6   : > { %6536 = vmatpush1.bf16.msra.mxu0 %v16785_v1  ;;  %v16867_v1 = vld [vmem:[%s19711_s19 + $0x1834] ss:$72 sps:$4 sm:$0xff]  }
  0xc7   : > { %6577 = vmatpush1.bf16.msra.mxu1 %v16786_v2  ;;  %6537 = vmatprep.subr.bf16.mxu0 %v16787_v3  ;;  %v16870_v2 = vld [vmem:[%s19711_s19 + $0x63c] ss:$72 sps:$4 sm:$0xff]   ;;  %v16865_v3 = vld [vmem:[%s19711_s19 + $0x1830] ss:$72 sps:$4 sm:$0xff]  }
  0xc8   : > { %6578 = vmatprep.subr.bf16.mxu1 %v16789_v4  ;;  %v16868_v4 = vld [vmem:[%s19711_s19 + $0x638] ss:$72 sps:$4 sm:$0xff]  }
  0xca   : > { %6538 = vmatpush1.bf16.msra.mxu0 %v16791_v6  ;;  %v16876_v6 = vld [vmem:[%s19711_s19 + $0x6cc] ss:$72 sps:$4 sm:$0xff]  }
  0xcb   : > { %6579 = vmatpush1.bf16.msra.mxu1 %v16792_v7  ;;  %6539 = vmatprep.subr.bf16.mxu0 %v16793_v8  ;;  %v16871_v7 = vld [vmem:[%s19711_s19 + $0x18c0] ss:$72 sps:$4 sm:$0xff]  }
  0xcc   : > { %6580 = vmatprep.subr.bf16.mxu1 %v16795_v9  ;;  %v16874_v8 = vld [vmem:[%s19711_s19 + $0x6c8] ss:$72 sps:$4 sm:$0xff]   ;;  %v16879_v9 = vld [vmem:[%s19711_s19 + $0x1954] ss:$72 sps:$4 sm:$0xff]  }
  0xce   : > { %6540 = vmatpush1.bf16.msra.mxu0 %v16797_v11  ;;  %v16882_v11 = vld [vmem:[%s19711_s19 + $0x75c] ss:$72 sps:$4 sm:$0xff]  }
  0xcf   : > { %6581 = vmatpush1.bf16.msra.mxu1 %v16798_v13  ;;  %6591 = vmatprep.subr.bf16.mxu0 %v16801_v14  ;;  %v16877_v13 = vld [vmem:[%s19711_s19 + $0x1950] ss:$72 sps:$4 sm:$0xff]  }
  0xd0   : > { %6632 = vmatprep.subr.bf16.mxu1 %v16804_v15  ;;  %v16880_v14 = vld [vmem:[%s19711_s19 + $0x758] ss:$72 sps:$4 sm:$0xff]   ;;  %v16885_v15 = vld [vmem:[%s19711_s19 + $0x19e4] ss:$72 sps:$4 sm:$0xff]  }
  0xd1   : > { %6542 = vmatmul.mubr.bf16.vlgmr.msra.gmra.mrb[0].mxu0 %v19808_v12 }
  0xd2   : > { %6583 = vmatmul.mubr.bf16.vlgmr.msra.gmra.mrb[0].mxu1 %v19817_v17  ;;  %6592 = vmatpush1.bf16.msra.mxu0 %v16799_v18  ;;  %v16883_v18 = vld [vmem:[%s19711_s19 + $0x19e0] ss:$72 sps:$4 sm:$0xff]  }
  0xd3   : > { %6633 = vmatpush1.bf16.msra.mxu1 %v16802_v19  ;;  %6593 = vmatprep.subr.bf16.mxu0 %v16807_v20  ;;  %v16886_v19 = vld [vmem:[%s19711_s19 + $0x7e8] ss:$72 sps:$4 sm:$0xff]   ;;  %v16891_v20 = vld [vmem:[%s19711_s19 + $0x1a74] ss:$72 sps:$4 sm:$0xff]  }
  0xd4   : > { %6634 = vmatprep.subr.bf16.mxu1 %v16810_v21  ;;  %6623 = vmatprep.mubr.bf16.mxu0 %v19824_v22  ;;  %v16894_v21 = vld [vmem:[%s19711_s19 + $0x87c] ss:$72 sps:$4 sm:$0xff]  }
  0xd5   : > { %6664 = vmatprep.mubr.bf16.mxu1 %v19784_v60 }
  0xd6   : > { %6594 = vmatpush1.bf16.msra.mxu0 %v16805_v23  ;;  %v16889_v23 = vld [vmem:[%s19711_s19 + $0x1a70] ss:$72 sps:$4 sm:$0xff]  }
  0xd7   : > { %6635 = vmatpush1.bf16.msra.mxu1 %v16808_v24  ;;  %6595 = vmatprep.subr.bf16.mxu0 %v16813_v25  ;;  %v16892_v24 = vld [vmem:[%s19711_s19 + $0x878] ss:$72 sps:$4 sm:$0xff]   ;;  %v16898_v25 = vld [vmem:[%s19711_s19 + $0x90c] ss:$72 sps:$4 sm:$0xff]  }
  0xd8   : > { %6636 = vmatprep.subr.bf16.mxu1 %v16816_v26  ;;  %v16901_v26 = vld [vmem:[%s19711_s19 + $0x120c] ss:$72 sps:$4 sm:$0xff]  }
  0xda   : > { %6596 = vmatpush1.bf16.msra.mxu0 %v16811_v27  ;;  %v19892_v27 = vrot.slane %v19804_v10, %v19770_v49  ;;  %v16905_v10 = vld [vmem:[%s19711_s19 + $0x1298] ss:$72 sps:$4 sm:$0xff]  }
  0xdb   : > { %6637 = vmatpush1.bf16.msra.mxu1 %v16814_v28  ;;  %6597 = vmatprep.subr.bf16.mxu0 %v16819_v29  ;;  %v16896_v28 = vld [vmem:[%s19711_s19 + $0x908] ss:$72 sps:$4 sm:$0xff]  }
  0xdc   : > { %6638 = vmatprep.subr.bf16.mxu1 %v16822_v30  ;;  %v16899_v29 = vld [vmem:[%s19711_s19 + $0x1208] ss:$72 sps:$4 sm:$0xff]   ;;  %v16904_v30 = vld [vmem:[%s19711_s19 + $0x99c] ss:$72 sps:$4 sm:$0xff]  }
  0xde   : > { %6598 = vmatpush1.bf16.msra.mxu0 %v16817_v31  ;;  %v16907_v31 = vld [vmem:[%s19711_s19 + $0x129c] ss:$72 sps:$4 sm:$0xff]  }
  0xdf   : > { %6639 = vmatpush1.bf16.msra.mxu1 %v16820_v32  ;;  %6599 = vmatprep.subr.bf16.mxu0 %v16825_v33  ;;  %v16902_v32 = vld [vmem:[%s19711_s19 + $0x998] ss:$72 sps:$4 sm:$0xff]   ;;  %v16910_v33 = vld [vmem:[%s19711_s19 + $0xa2c] ss:$72 sps:$4 sm:$0xff]  }
  0xe0   : > { %6640 = vmatprep.subr.bf16.mxu1 %v16828_v34  ;;  %v16913_v34 = vld [vmem:[%s19711_s19 + $0x132c] ss:$72 sps:$4 sm:$0xff]  }
  0xe2   : > { %6600 = vmatpush1.bf16.msra.mxu0 %v16823_v35  ;;  %v16908_v35 = vld [vmem:[%s19711_s19 + $0xa28] ss:$72 sps:$4 sm:$0xff]  }
  0xe3   : > { %6641 = vmatpush1.bf16.msra.mxu1 %v16826_v36  ;;  %6601 = vmatprep.subr.bf16.mxu0 %v16831_v37  ;;  %v16911_v36 = vld [vmem:[%s19711_s19 + $0x1328] ss:$72 sps:$4 sm:$0xff]   ;;  %v16916_v37 = vld [vmem:[%s19711_s19 + $0xabc] ss:$72 sps:$4 sm:$0xff]  }
  0xe4   : > { %6642 = vmatprep.subr.bf16.mxu1 %v16834_v38  ;;  %v16919_v38 = vld [vmem:[%s19711_s19 + $0x13bc] ss:$72 sps:$4 sm:$0xff]  }
  0xe6   : > { %6602 = vmatpush1.bf16.msra.mxu0 %v16829_v39  ;;  %v16914_v39 = vld [vmem:[%s19711_s19 + $0xab8] ss:$72 sps:$4 sm:$0xff]  }
  0xe7   : > { %6643 = vmatpush1.bf16.msra.mxu1 %v16832_v40  ;;  %6603 = vmatprep.subr.bf16.mxu0 %v16837_v41  ;;  %v16917_v40 = vld [vmem:[%s19711_s19 + $0x13b8] ss:$72 sps:$4 sm:$0xff]   ;;  %v16922_v41 = vld [vmem:[%s19711_s19 + $0xb4c] ss:$72 sps:$4 sm:$0xff]  }
  0xe8   : > { %6644 = vmatprep.subr.bf16.mxu1 %v16840_v42  ;;  %v16925_v42 = vld [vmem:[%s19711_s19 + $0x144c] ss:$72 sps:$4 sm:$0xff]  }
  0xea   : > { %6604 = vmatpush1.bf16.msra.mxu0 %v16835_v44  ;;  %v16920_v44 = vld [vmem:[%s19711_s19 + $0xb48] ss:$72 sps:$4 sm:$0xff]  }
  0xeb   : > { %6645 = vmatpush1.bf16.msra.mxu1 %v16838_v45  ;;  %6605 = vmatprep.subr.bf16.mxu0 %v16843_v46  ;;  %v16923_v45 = vld [vmem:[%s19711_s19 + $0x1448] ss:$72 sps:$4 sm:$0xff]   ;;  %v16928_v46 = vld [vmem:[%s19711_s19 + $0xbdc] ss:$72 sps:$4 sm:$0xff]  }
  0xec   : > { %6646 = vmatprep.subr.bf16.mxu1 %v16846_v47  ;;  %v16931_v47 = vld [vmem:[%s19711_s19 + $0x14dc] ss:$72 sps:$4 sm:$0xff]  }
  0xee   : > { %6606 = vmatpush1.bf16.msra.mxu0 %v16841_v48  ;;  %v16926_v48 = vld [vmem:[%s19711_s19 + $0xbd8] ss:$72 sps:$4 sm:$0xff]  }
  0xef   : > { %6647 = vmatpush1.bf16.msra.mxu1 %v16844_v50  ;;  %6607 = vmatprep.subr.bf16.mxu0 %v16849_v51  ;;  %v16929_v50 = vld [vmem:[%s19711_s19 + $0x14d8] ss:$72 sps:$4 sm:$0xff]   ;;  %v16934_v51 = vld [vmem:[%s19711_s19 + $0xc6c] ss:$72 sps:$4 sm:$0xff]  }
  0xf0   : > { %6648 = vmatprep.subr.bf16.mxu1 %v16852_v52  ;;  %v16937_v52 = vld [vmem:[%s19711_s19 + $0x156c] ss:$72 sps:$4 sm:$0xff]  }
  0xf2   : > { %6608 = vmatpush1.bf16.msra.mxu0 %v16847_v53  ;;  %v16932_v53 = vld [vmem:[%s19711_s19 + $0xc68] ss:$72 sps:$4 sm:$0xff]  }
  0xf3   : > { %6649 = vmatpush1.bf16.msra.mxu1 %v16850_v54  ;;  %6609 = vmatprep.subr.bf16.mxu0 %v16855_v55  ;;  %v16935_v54 = vld [vmem:[%s19711_s19 + $0x1568] ss:$72 sps:$4 sm:$0xff]   ;;  %v16940_v55 = vld [vmem:[%s19711_s19 + $0xcfc] ss:$72 sps:$4 sm:$0xff]  }
  0xf4   : > { %6650 = vmatprep.subr.bf16.mxu1 %v16858_v56  ;;  %v16943_v56 = vld [vmem:[%s19711_s19 + $0x15fc] ss:$72 sps:$4 sm:$0xff]  }
  0xf6   : > { %6610 = vmatpush1.bf16.msra.mxu0 %v16853_v57  ;;  %v16938_v57 = vld [vmem:[%s19711_s19 + $0xcf8] ss:$72 sps:$4 sm:$0xff]  }
  0xf7   : > { %6651 = vmatpush1.bf16.msra.mxu1 %v16856_v58  ;;  %6611 = vmatprep.subr.bf16.mxu0 %v16861_v59  ;;  %v16941_v58 = vld [vmem:[%s19711_s19 + $0x15f8] ss:$72 sps:$4 sm:$0xff]   ;;  %v16946_v59 = vld [vmem:[%s19711_s19 + $0xd8c] ss:$72 sps:$4 sm:$0xff]  }
  0xf8   : > { %6652 = vmatprep.subr.bf16.mxu1 %v16864_v61  ;;  %v16949_v61 = vld [vmem:[%s19711_s19 + $0x168c] ss:$72 sps:$4 sm:$0xff]  }
  0xfa   : > { %6612 = vmatpush1.bf16.msra.mxu0 %v16859_v62  ;;  %v16944_v62 = vld [vmem:[%s19711_s19 + $0xd88] ss:$72 sps:$4 sm:$0xff]  }
  0xfb   : > { %6653 = vmatpush1.bf16.msra.mxu1 %v16862_v63  ;;  %6613 = vmatprep.subr.bf16.mxu0 %v16867_v1  ;;  %v16947_v63 = vld [vmem:[%s19711_s19 + $0x1688] ss:$72 sps:$4 sm:$0xff]   ;;  %v16952_v1 = vld [vmem:[%s19711_s19 + $0xe1c] ss:$72 sps:$4 sm:$0xff]  }
  0xfc   : > { %6654 = vmatprep.subr.bf16.mxu1 %v16870_v2  ;;  %v16955_v2 = vld [vmem:[%s19711_s19 + $0x171c] ss:$72 sps:$4 sm:$0xff]  }
  0xfe   : > { %6614 = vmatpush1.bf16.msra.mxu0 %v16865_v3  ;;  %v16950_v3 = vld [vmem:[%s19711_s19 + $0xe18] ss:$72 sps:$4 sm:$0xff]  }
  0xff   : > { %6655 = vmatpush1.bf16.msra.mxu1 %v16868_v4  ;;  %6615 = vmatprep.subr.bf16.mxu0 %v16873_v5  ;;  %v16953_v4 = vld [vmem:[%s19711_s19 + $0x1718] ss:$72 sps:$4 sm:$0xff]   ;;  %v16958_v5 = vld [vmem:[%s19711_s19 + $0xeac] ss:$72 sps:$4 sm:$0xff]  }
 0x100   : > { %6656 = vmatprep.subr.bf16.mxu1 %v16876_v6  ;;  %v16961_v6 = vld [vmem:[%s19711_s19 + $0x17ac] ss:$72 sps:$4 sm:$0xff]  }
 0x102   : > { %6616 = vmatpush1.bf16.msra.mxu0 %v16871_v7  ;;  %v16956_v7 = vld [vmem:[%s19711_s19 + $0xea8] ss:$72 sps:$4 sm:$0xff]  }
 0x103   : > { %6657 = vmatpush1.bf16.msra.mxu1 %v16874_v8  ;;  %6617 = vmatprep.subr.bf16.mxu0 %v16879_v9  ;;  %v16959_v8 = vld [vmem:[%s19711_s19 + $0x17a8] ss:$72 sps:$4 sm:$0xff]   ;;  %v16964_v9 = vld [vmem:[%s19711_s19 + $0xf3c] ss:$72 sps:$4 sm:$0xff]  }
 0x104   : > { %6658 = vmatprep.subr.bf16.mxu1 %v16882_v11  ;;  %v16967_v11 = vld [vmem:[%s19711_s19 + $0x183c] ss:$72 sps:$4 sm:$0xff]  }
 0x106   : > { %6618 = vmatpush1.bf16.msra.mxu0 %v16877_v13  ;;  %v16962_v13 = vld [vmem:[%s19711_s19 + $0xf38] ss:$72 sps:$4 sm:$0xff]  }
 0x107   : > { %6659 = vmatpush1.bf16.msra.mxu1 %v16880_v14  ;;  %6619 = vmatprep.subr.bf16.mxu0 %v16885_v15  ;;  %v16965_v14 = vld [vmem:[%s19711_s19 + $0x1838] ss:$72 sps:$4 sm:$0xff]   ;;  %v16970_v15 = vld [vmem:[%s19711_s19 + $0xfcc] ss:$72 sps:$4 sm:$0xff]  }
 0x108   : > { %6660 = vmatprep.subr.bf16.mxu1 %v16888_v16  ;;  %v16973_v16 = vld [vmem:[%s19711_s19 + $0x18cc] ss:$72 sps:$4 sm:$0xff]  }
 0x10a   : > { %6620 = vmatpush1.bf16.msra.mxu0 %v16883_v18  ;;  %v16968_v18 = vld [vmem:[%s19711_s19 + $0xfc8] ss:$72 sps:$4 sm:$0xff]  }
 0x10b   : > { %6661 = vmatpush1.bf16.msra.mxu1 %v16886_v19  ;;  %6621 = vmatprep.subr.bf16.mxu0 %v16891_v20  ;;  %v16971_v19 = vld [vmem:[%s19711_s19 + $0x18c8] ss:$72 sps:$4 sm:$0xff]   ;;  %v16976_v20 = vld [vmem:[%s19711_s19 + $0x105c] ss:$72 sps:$4 sm:$0xff]  }
 0x10c   : > { %6662 = vmatprep.subr.bf16.mxu1 %v16894_v21  ;;  %v16979_v21 = vld [vmem:[%s19711_s19 + $0x195c] ss:$72 sps:$4 sm:$0xff]  }
 0x10e   : > { %6622 = vmatpush1.bf16.msra.mxu0 %v16889_v23  ;;  %v16974_v23 = vld [vmem:[%s19711_s19 + $0x1058] ss:$72 sps:$4 sm:$0xff]  }
 0x10f   : > { %6663 = vmatpush1.bf16.msra.mxu1 %v16892_v24  ;;  %6673 = vmatprep.subr.bf16.mxu0 %v16898_v25  ;;  %v16977_v24 = vld [vmem:[%s19711_s19 + $0x1958] ss:$72 sps:$4 sm:$0xff]   ;;  %v16982_v25 = vld [vmem:[%s19711_s19 + $0x10ec] ss:$72 sps:$4 sm:$0xff]  }
 0x110   : > { %6714 = vmatprep.subr.bf16.mxu1 %v16901_v26  ;;  %v16985_v26 = vld [vmem:[%s19711_s19 + $0x19ec] ss:$72 sps:$4 sm:$0xff]  }
 0x111   : > { %6624 = vmatmul.mubr.bf16.vlgmr.msra.gmra.mrb[4].mxu0 %v19892_v27 }
 0x112   : > { %6665 = vmatmul.mubr.bf16.vlgmr.msra.gmra.mrb[4].mxu1 %v19808_v12  ;;  %6674 = vmatpush1.bf16.msra.mxu0 %v16896_v28  ;;  %v16980_v28 = vld [vmem:[%s19711_s19 + $0x10e8] ss:$72 sps:$4 sm:$0xff]  }
 0x113   : > { %6715 = vmatpush1.bf16.msra.mxu1 %v16899_v29  ;;  %6675 = vmatprep.subr.bf16.mxu0 %v16904_v30  ;;  %v16983_v29 = vld [vmem:[%s19711_s19 + $0x19e8] ss:$72 sps:$4 sm:$0xff]   ;;  %v16988_v30 = vld [vmem:[%s19711_s19 + $0x117c] ss:$72 sps:$4 sm:$0xff]  }
 0x114   : > { %6716 = vmatprep.subr.bf16.mxu1 %v16907_v31  ;;  %6705 = vmatprep.mubr.bf16.mxu0 %v19791_v0  ;;  %v16991_v31 = vld [vmem:[%s19711_s19 + $0x1a7c] ss:$72 sps:$4 sm:$0xff]  }
 0x115   : > { %6746 = vmatprep.mubr.bf16.mxu1 %v19824_v22 }
 0x116   : > { %6676 = vmatpush1.bf16.msra.mxu0 %v16902_v32  ;;  %v16986_v32 = vld [vmem:[%s19711_s19 + $0x1178] ss:$72 sps:$4 sm:$0xff]  }
 0x117   : > { %6717 = vmatpush1.bf16.msra.mxu1 %v16905_v10  ;;  %6677 = vmatprep.subr.bf16.mxu0 %v16910_v33  ;;  %v16989_v10 = vld [vmem:[%s19711_s19 + $0x1a78] ss:$72 sps:$4 sm:$0xff]   ;;  %v16994_v33 = vld [vmem:[%s19711_s19 + $0x14] ss:$72 sps:$4 sm:$0xff]  }
 0x118   : > { %6718 = vmatprep.subr.bf16.mxu1 %v16913_v34  ;;  %v16997_v34 = vld [vmem:[%s19711_s19 + $0x914] ss:$72 sps:$4 sm:$0xff]  }
 0x11a   : > { %6678 = vmatpush1.bf16.msra.mxu0 %v16908_v35  ;;  %v16992_v35 = vld [vmem:[%s19711_s19 + $0x10] ss:$72 sps:$4 sm:$0xff]  }
 0x11b   : > { %6719 = vmatpush1.bf16.msra.mxu1 %v16911_v36  ;;  %6679 = vmatprep.subr.bf16.mxu0 %v16916_v37  ;;  %v16995_v36 = vld [vmem:[%s19711_s19 + $0x910] ss:$72 sps:$4 sm:$0xff]   ;;  %v17000_v37 = vld [vmem:[%s19711_s19 + $0xa4] ss:$72 sps:$4 sm:$0xff]  }
 0x11c   : > { %6720 = vmatprep.subr.bf16.mxu1 %v16919_v38  ;;  %v17003_v38 = vld [vmem:[%s19711_s19 + $0x9a4] ss:$72 sps:$4 sm:$0xff]  }
 0x11e   : > { %6680 = vmatpush1.bf16.msra.mxu0 %v16914_v39  ;;  %v16998_v39 = vld [vmem:[%s19711_s19 + $0xa0] ss:$72 sps:$4 sm:$0xff]  }
 0x11f   : > { %6721 = vmatpush1.bf16.msra.mxu1 %v16917_v40  ;;  %6681 = vmatprep.subr.bf16.mxu0 %v16922_v41  ;;  %v17001_v40 = vld [vmem:[%s19711_s19 + $0x9a0] ss:$72 sps:$4 sm:$0xff]   ;;  %v17006_v41 = vld [vmem:[%s19711_s19 + $0x134] ss:$72 sps:$4 sm:$0xff]  }
 0x120   : > { %6722 = vmatprep.subr.bf16.mxu1 %v16925_v42  ;;  %v17009_v42 = vld [vmem:[%s19711_s19 + $0xa34] ss:$72 sps:$4 sm:$0xff]  }
 0x122   : > { %6682 = vmatpush1.bf16.msra.mxu0 %v16920_v44  ;;  %v17004_v44 = vld [vmem:[%s19711_s19 + $0x130] ss:$72 sps:$4 sm:$0xff]  }
 0x123   : > { %6723 = vmatpush1.bf16.msra.mxu1 %v16923_v45  ;;  %6683 = vmatprep.subr.bf16.mxu0 %v16928_v46  ;;  %v17007_v45 = vld [vmem:[%s19711_s19 + $0xa30] ss:$72 sps:$4 sm:$0xff]   ;;  %v17012_v46 = vld [vmem:[%s19711_s19 + $0x1c4] ss:$72 sps:$4 sm:$0xff]  }
 0x124   : > { %6724 = vmatprep.subr.bf16.mxu1 %v16931_v47  ;;  %v17015_v47 = vld [vmem:[%s19711_s19 + $0xac4] ss:$72 sps:$4 sm:$0xff]  }
 0x126   : > { %6684 = vmatpush1.bf16.msra.mxu0 %v16926_v48  ;;  %v17010_v48 = vld [vmem:[%s19711_s19 + $0x1c0] ss:$72 sps:$4 sm:$0xff]  }
 0x127   : > { %6725 = vmatpush1.bf16.msra.mxu1 %v16929_v50  ;;  %6685 = vmatprep.subr.bf16.mxu0 %v16934_v51  ;;  %v17013_v50 = vld [vmem:[%s19711_s19 + $0xac0] ss:$72 sps:$4 sm:$0xff]   ;;  %v17018_v51 = vld [vmem:[%s19711_s19 + $0x254] ss:$72 sps:$4 sm:$0xff]  }
 0x128   : > { %6726 = vmatprep.subr.bf16.mxu1 %v16937_v52  ;;  %v17021_v52 = vld [vmem:[%s19711_s19 + $0xb54] ss:$72 sps:$4 sm:$0xff]  }
 0x12a   : > { %6686 = vmatpush1.bf16.msra.mxu0 %v16932_v53  ;;  %v17016_v53 = vld [vmem:[%s19711_s19 + $0x250] ss:$72 sps:$4 sm:$0xff]  }
 0x12b   : > { %6727 = vmatpush1.bf16.msra.mxu1 %v16935_v54  ;;  %6687 = vmatprep.subr.bf16.mxu0 %v16940_v55  ;;  %v17019_v54 = vld [vmem:[%s19711_s19 + $0xb50] ss:$72 sps:$4 sm:$0xff]   ;;  %v17024_v55 = vld [vmem:[%s19711_s19 + $0x2e4] ss:$72 sps:$4 sm:$0xff]  }
 0x12c   : > { %6728 = vmatprep.subr.bf16.mxu1 %v16943_v56  ;;  %v17027_v56 = vld [vmem:[%s19711_s19 + $0xbe4] ss:$72 sps:$4 sm:$0xff]  }
 0x12e   : > { %6688 = vmatpush1.bf16.msra.mxu0 %v16938_v57  ;;  %v17022_v57 = vld [vmem:[%s19711_s19 + $0x2e0] ss:$72 sps:$4 sm:$0xff]  }
 0x12f   : > { %6729 = vmatpush1.bf16.msra.mxu1 %v16941_v58  ;;  %6689 = vmatprep.subr.bf16.mxu0 %v16946_v59  ;;  %v17025_v58 = vld [vmem:[%s19711_s19 + $0xbe0] ss:$72 sps:$4 sm:$0xff]   ;;  %v17030_v59 = vld [vmem:[%s19711_s19 + $0x374] ss:$72 sps:$4 sm:$0xff]  }
 0x130   : > { %6730 = vmatprep.subr.bf16.mxu1 %v16949_v61  ;;  %v17033_v61 = vld [vmem:[%s19711_s19 + $0xc74] ss:$72 sps:$4 sm:$0xff]  }
 0x132   : > { %6690 = vmatpush1.bf16.msra.mxu0 %v16944_v62  ;;  %v17028_v62 = vld [vmem:[%s19711_s19 + $0x370] ss:$72 sps:$4 sm:$0xff]  }
 0x133   : > { %6731 = vmatpush1.bf16.msra.mxu1 %v16947_v63  ;;  %6691 = vmatprep.subr.bf16.mxu0 %v16952_v1  ;;  %v17031_v63 = vld [vmem:[%s19711_s19 + $0xc70] ss:$72 sps:$4 sm:$0xff]   ;;  %v17036_v1 = vld [vmem:[%s19711_s19 + $0x404] ss:$72 sps:$4 sm:$0xff]  }
 0x134   : > { %6732 = vmatprep.subr.bf16.mxu1 %v16955_v2  ;;  %v17039_v2 = vld [vmem:[%s19711_s19 + $0xd04] ss:$72 sps:$4 sm:$0xff]  }
 0x136   : > { %6692 = vmatpush1.bf16.msra.mxu0 %v16950_v3  ;;  %v17034_v3 = vld [vmem:[%s19711_s19 + $0x400] ss:$72 sps:$4 sm:$0xff]  }
 0x137   : > { %6733 = vmatpush1.bf16.msra.mxu1 %v16953_v4  ;;  %6693 = vmatprep.subr.bf16.mxu0 %v16958_v5  ;;  %v17037_v4 = vld [vmem:[%s19711_s19 + $0xd00] ss:$72 sps:$4 sm:$0xff]   ;;  %v17042_v5 = vld [vmem:[%s19711_s19 + $0x494] ss:$72 sps:$4 sm:$0xff]  }
 0x138   : > { %6734 = vmatprep.subr.bf16.mxu1 %v16961_v6  ;;  %v17045_v6 = vld [vmem:[%s19711_s19 + $0xd94] ss:$72 sps:$4 sm:$0xff]  }
 0x13a   : > { %6694 = vmatpush1.bf16.msra.mxu0 %v16956_v7  ;;  %v17040_v7 = vld [vmem:[%s19711_s19 + $0x490] ss:$72 sps:$4 sm:$0xff]  }
 0x13b   : > { %6735 = vmatpush1.bf16.msra.mxu1 %v16959_v8  ;;  %6695 = vmatprep.subr.bf16.mxu0 %v16964_v9  ;;  %v17043_v8 = vld [vmem:[%s19711_s19 + $0xd90] ss:$72 sps:$4 sm:$0xff]   ;;  %v17048_v9 = vld [vmem:[%s19711_s19 + $0x524] ss:$72 sps:$4 sm:$0xff]  }
 0x13c   : > { %6736 = vmatprep.subr.bf16.mxu1 %v16967_v11  ;;  %v17051_v11 = vld [vmem:[%s19711_s19 + $0xe24] ss:$72 sps:$4 sm:$0xff]  }
 0x13e   : > { %6696 = vmatpush1.bf16.msra.mxu0 %v16962_v13  ;;  %v17046_v13 = vld [vmem:[%s19711_s19 + $0x520] ss:$72 sps:$4 sm:$0xff]  }
 0x13f   : > { %6737 = vmatpush1.bf16.msra.mxu1 %v16965_v14  ;;  %6697 = vmatprep.subr.bf16.mxu0 %v16970_v15  ;;  %v17049_v14 = vld [vmem:[%s19711_s19 + $0xe20] ss:$72 sps:$4 sm:$0xff]   ;;  %v17054_v15 = vld [vmem:[%s19711_s19 + $0x5b4] ss:$72 sps:$4 sm:$0xff]  }
 0x140   : > { %6738 = vmatprep.subr.bf16.mxu1 %v16973_v16  ;;  %v17057_v16 = vld [vmem:[%s19711_s19 + $0xeb4] ss:$72 sps:$4 sm:$0xff]  }
 0x142   : > { %6698 = vmatpush1.bf16.msra.mxu0 %v16968_v18  ;;  %v17052_v18 = vld [vmem:[%s19711_s19 + $0x5b0] ss:$72 sps:$4 sm:$0xff]  }
 0x143   : > { %6739 = vmatpush1.bf16.msra.mxu1 %v16971_v19  ;;  %6699 = vmatprep.subr.bf16.mxu0 %v16976_v20  ;;  %v17055_v19 = vld [vmem:[%s19711_s19 + $0xeb0] ss:$72 sps:$4 sm:$0xff]   ;;  %v17060_v20 = vld [vmem:[%s19711_s19 + $0x644] ss:$72 sps:$4 sm:$0xff]  }
 0x144   : > { %6740 = vmatprep.subr.bf16.mxu1 %v16979_v21  ;;  %v17063_v21 = vld [vmem:[%s19711_s19 + $0xf44] ss:$72 sps:$4 sm:$0xff]  }
 0x146   : > { %6700 = vmatpush1.bf16.msra.mxu0 %v16974_v23  ;;  %v17058_v23 = vld [vmem:[%s19711_s19 + $0x640] ss:$72 sps:$4 sm:$0xff]  }
 0x147   : > { %6741 = vmatpush1.bf16.msra.mxu1 %v16977_v24  ;;  %6701 = vmatprep.subr.bf16.mxu0 %v16982_v25  ;;  %v17061_v24 = vld [vmem:[%s19711_s19 + $0xf40] ss:$72 sps:$4 sm:$0xff]   ;;  %v17066_v25 = vld [vmem:[%s19711_s19 + $0x6d4] ss:$72 sps:$4 sm:$0xff]  }
 0x148   : > { %6742 = vmatprep.subr.bf16.mxu1 %v16985_v26  ;;  %v17069_v26 = vld [vmem:[%s19711_s19 + $0xfd4] ss:$72 sps:$4 sm:$0xff]  }
 0x14a   : > { %6702 = vmatpush1.bf16.msra.mxu0 %v16980_v28  ;;  %v17064_v28 = vld [vmem:[%s19711_s19 + $0x6d0] ss:$72 sps:$4 sm:$0xff]  }
 0x14b   : > { %6743 = vmatpush1.bf16.msra.mxu1 %v16983_v29  ;;  %6703 = vmatprep.subr.bf16.mxu0 %v16988_v30  ;;  %v17067_v29 = vld [vmem:[%s19711_s19 + $0xfd0] ss:$72 sps:$4 sm:$0xff]   ;;  %v17072_v30 = vld [vmem:[%s19711_s19 + $0x764] ss:$72 sps:$4 sm:$0xff]  }
 0x14c   : > { %6744 = vmatprep.subr.bf16.mxu1 %v16991_v31  ;;  %v17075_v31 = vld [vmem:[%s19711_s19 + $0x1064] ss:$72 sps:$4 sm:$0xff]  }
 0x14e   : > { %6704 = vmatpush1.bf16.msra.mxu0 %v16986_v32  ;;  %v17070_v32 = vld [vmem:[%s19711_s19 + $0x760] ss:$72 sps:$4 sm:$0xff]  }
 0x14f   : > { %6745 = vmatpush1.bf16.msra.mxu1 %v16989_v10  ;;  %6755 = vmatprep.subr.bf16.mxu0 %v16994_v33  ;;  %v17073_v10 = vld [vmem:[%s19711_s19 + $0x1060] ss:$72 sps:$4 sm:$0xff]   ;;  %v17078_v33 = vld [vmem:[%s19711_s19 + $0x7f4] ss:$72 sps:$4 sm:$0xff]  }
 0x150   : > { %6796 = vmatprep.subr.bf16.mxu1 %v16997_v34  ;;  %v17081_v34 = vld [vmem:[%s19711_s19 + $0x10f4] ss:$72 sps:$4 sm:$0xff]  }
 0x151   : > { %6706 = vmatmul.mubr.bf16.vlgmr.msra.gmra.mrb[8].mxu0 %v19817_v17 }
 0x152   : > { %6747 = vmatmul.mubr.bf16.vlgmr.msra.gmra.mrb[8].mxu1 %v19892_v27  ;;  %6756 = vmatpush1.bf16.msra.mxu0 %v16992_v35  ;;  %v17076_v35 = vld [vmem:[%s19711_s19 + $0x7f0] ss:$72 sps:$4 sm:$0xff]  }
 0x153   : > { %6797 = vmatpush1.bf16.msra.mxu1 %v16995_v36  ;;  %6757 = vmatprep.subr.bf16.mxu0 %v17000_v37  ;;  %v17079_v36 = vld [vmem:[%s19711_s19 + $0x10f0] ss:$72 sps:$4 sm:$0xff]   ;;  %v17084_v37 = vld [vmem:[%s19711_s19 + $0x884] ss:$72 sps:$4 sm:$0xff]  }
 0x154   : > { %6798 = vmatprep.subr.bf16.mxu1 %v17003_v38  ;;  %6787 = vmatprep.mubr.bf16.mxu0 %v19784_v60  ;;  %v17087_v38 = vld [vmem:[%s19711_s19 + $0x1184] ss:$72 sps:$4 sm:$0xff]  }
 0x155   : > { %6828 = vmatprep.mubr.bf16.mxu1 %v19791_v0 }
 0x156   : > { %6758 = vmatpush1.bf16.msra.mxu0 %v16998_v39  ;;  %v17082_v39 = vld [vmem:[%s19711_s19 + $0x880] ss:$72 sps:$4 sm:$0xff]  }
 0x157   : > { %6799 = vmatpush1.bf16.msra.mxu1 %v17001_v40  ;;  %6759 = vmatprep.subr.bf16.mxu0 %v17006_v41  ;;  %v17085_v40 = vld [vmem:[%s19711_s19 + $0x1180] ss:$72 sps:$4 sm:$0xff]   ;;  %v17090_v41 = vld [vmem:[%s19711_s19 + $0x1214] ss:$72 sps:$4 sm:$0xff]  }
 0x158   : > { %6800 = vmatprep.subr.bf16.mxu1 %v17009_v42  ;;  %v17093_v42 = vld [vmem:[%s19711_s19 + $0x1c] ss:$72 sps:$4 sm:$0xff]  }
 0x15a   : > { %6760 = vmatpush1.bf16.msra.mxu0 %v17004_v44  ;;  %v17088_v44 = vld [vmem:[%s19711_s19 + $0x1210] ss:$72 sps:$4 sm:$0xff]  }
 0x15b   : > { %6801 = vmatpush1.bf16.msra.mxu1 %v17007_v45  ;;  %6761 = vmatprep.subr.bf16.mxu0 %v17012_v46  ;;  %v17091_v45 = vld [vmem:[%s19711_s19 + $0x18] ss:$72 sps:$4 sm:$0xff]   ;;  %v17096_v46 = vld [vmem:[%s19711_s19 + $0x12a4] ss:$72 sps:$4 sm:$0xff]  }
 0x15c   : > { %6802 = vmatprep.subr.bf16.mxu1 %v17015_v47  ;;  %v17099_v47 = vld [vmem:[%s19711_s19 + $0xac] ss:$72 sps:$4 sm:$0xff]  }
 0x15e   : > { %6762 = vmatpush1.bf16.msra.mxu0 %v17010_v48  ;;  %v17094_v48 = vld [vmem:[%s19711_s19 + $0x12a0] ss:$72 sps:$4 sm:$0xff]  }
 0x15f   : > { %6803 = vmatpush1.bf16.msra.mxu1 %v17013_v50  ;;  %6763 = vmatprep.subr.bf16.mxu0 %v17018_v51  ;;  %v17097_v50 = vld [vmem:[%s19711_s19 + $0xa8] ss:$72 sps:$4 sm:$0xff]   ;;  %v17102_v51 = vld [vmem:[%s19711_s19 + $0x1334] ss:$72 sps:$4 sm:$0xff]  }
 0x160   : > { %6804 = vmatprep.subr.bf16.mxu1 %v17021_v52  ;;  %v17105_v52 = vld [vmem:[%s19711_s19 + $0x13c] ss:$72 sps:$4 sm:$0xff]  }
 0x162   : > { %6764 = vmatpush1.bf16.msra.mxu0 %v17016_v53  ;;  %v17100_v53 = vld [vmem:[%s19711_s19 + $0x1330] ss:$72 sps:$4 sm:$0xff]  }
 0x163   : > { %6805 = vmatpush1.bf16.msra.mxu1 %v17019_v54  ;;  %6765 = vmatprep.subr.bf16.mxu0 %v17024_v55  ;;  %v17103_v54 = vld [vmem:[%s19711_s19 + $0x138] ss:$72 sps:$4 sm:$0xff]   ;;  %v17108_v55 = vld [vmem:[%s19711_s19 + $0x13c4] ss:$72 sps:$4 sm:$0xff]  }
 0x164   : > { %6806 = vmatprep.subr.bf16.mxu1 %v17027_v56  ;;  %v17111_v56 = vld [vmem:[%s19711_s19 + $0x1cc] ss:$72 sps:$4 sm:$0xff]  }
 0x166   : > { %6766 = vmatpush1.bf16.msra.mxu0 %v17022_v57  ;;  %v17106_v57 = vld [vmem:[%s19711_s19 + $0x13c0] ss:$72 sps:$4 sm:$0xff]  }
 0x167   : > { %6807 = vmatpush1.bf16.msra.mxu1 %v17025_v58  ;;  %6767 = vmatprep.subr.bf16.mxu0 %v17030_v59  ;;  %v17109_v58 = vld [vmem:[%s19711_s19 + $0x1c8] ss:$72 sps:$4 sm:$0xff]   ;;  %v17114_v59 = vld [vmem:[%s19711_s19 + $0x1454] ss:$72 sps:$4 sm:$0xff]  }
 0x168   : > { %6808 = vmatprep.subr.bf16.mxu1 %v17033_v61  ;;  %v17117_v61 = vld [vmem:[%s19711_s19 + $0x25c] ss:$72 sps:$4 sm:$0xff]  }
 0x16a   : > { %6768 = vmatpush1.bf16.msra.mxu0 %v17028_v62  ;;  %v17112_v62 = vld [vmem:[%s19711_s19 + $0x1450] ss:$72 sps:$4 sm:$0xff]  }
 0x16b   : > { %6809 = vmatpush1.bf16.msra.mxu1 %v17031_v63  ;;  %6769 = vmatprep.subr.bf16.mxu0 %v17036_v1  ;;  %v17115_v63 = vld [vmem:[%s19711_s19 + $0x258] ss:$72 sps:$4 sm:$0xff]   ;;  %v17120_v1 = vld [vmem:[%s19711_s19 + $0x14e4] ss:$72 sps:$4 sm:$0xff]  }
 0x16c   : > { %6810 = vmatprep.subr.bf16.mxu1 %v17039_v2  ;;  %v17123_v2 = vld [vmem:[%s19711_s19 + $0x2ec] ss:$72 sps:$4 sm:$0xff]  }
 0x16e   : > { %6770 = vmatpush1.bf16.msra.mxu0 %v17034_v3  ;;  %v17118_v3 = vld [vmem:[%s19711_s19 + $0x14e0] ss:$72 sps:$4 sm:$0xff]  }
 0x16f   : > { %6811 = vmatpush1.bf16.msra.mxu1 %v17037_v4  ;;  %6771 = vmatprep.subr.bf16.mxu0 %v17042_v5  ;;  %v17121_v4 = vld [vmem:[%s19711_s19 + $0x2e8] ss:$72 sps:$4 sm:$0xff]   ;;  %v17126_v5 = vld [vmem:[%s19711_s19 + $0x1574] ss:$72 sps:$4 sm:$0xff]  }
 0x170   : > { %6812 = vmatprep.subr.bf16.mxu1 %v17045_v6  ;;  %v17129_v6 = vld [vmem:[%s19711_s19 + $0x37c] ss:$72 sps:$4 sm:$0xff]  }
 0x172   : > { %6772 = vmatpush1.bf16.msra.mxu0 %v17040_v7 }
 0x173   : > { %6813 = vmatpush1.bf16.msra.mxu1 %v17043_v8  ;;  %6773 = vmatprep.subr.bf16.mxu0 %v17048_v9  ;;  %v17124_v9 = vld [vmem:[%s19711_s19 + $0x1570] ss:$72 sps:$4 sm:$0xff]  }
 0x174   : > { %6814 = vmatprep.subr.bf16.mxu1 %v17051_v11  ;;  %v17127_v11 = vld [vmem:[%s19711_s19 + $0x378] ss:$72 sps:$4 sm:$0xff]  }
 0x176   : > { %6774 = vmatpush1.bf16.msra.mxu0 %v17046_v13 }
 0x177   : > { %6815 = vmatpush1.bf16.msra.mxu1 %v17049_v14  ;;  %6775 = vmatprep.subr.bf16.mxu0 %v17054_v15 }
 0x178   : > { %6816 = vmatprep.subr.bf16.mxu1 %v17057_v16 }
 0x17a   : > { %6776 = vmatpush1.bf16.msra.mxu0 %v17052_v18 }
 0x17b   : > { %6817 = vmatpush1.bf16.msra.mxu1 %v17055_v19  ;;  %6777 = vmatprep.subr.bf16.mxu0 %v17060_v20 }
 0x17c   : > { %6818 = vmatprep.subr.bf16.mxu1 %v17063_v21 }
 0x17e   : > { %6778 = vmatpush1.bf16.msra.mxu0 %v17058_v23  ;;  %v17132_v23 = vld [vmem:[%s19711_s19 + $0x1604] ss:$72 sps:$4 sm:$0xff]  }
 0x17f   : > { %6819 = vmatpush1.bf16.msra.mxu1 %v17061_v24  ;;  %6779 = vmatprep.subr.bf16.mxu0 %v17066_v25  ;;  %v17135_v24 = vld [vmem:[%s19711_s19 + $0x40c] ss:$72 sps:$4 sm:$0xff]   ;;  %v17130_v25 = vld [vmem:[%s19711_s19 + $0x1600] ss:$72 sps:$4 sm:$0xff]  }
 0x180   : > { %6820 = vmatprep.subr.bf16.mxu1 %v17069_v26  ;;  %v17133_v26 = vld [vmem:[%s19711_s19 + $0x408] ss:$72 sps:$4 sm:$0xff]  }
 0x182   : > { %6780 = vmatpush1.bf16.msra.mxu0 %v17064_v28  ;;  %v17138_v28 = vld [vmem:[%s19711_s19 + $0x1694] ss:$72 sps:$4 sm:$0xff]  }
 0x183   : > { %6821 = vmatpush1.bf16.msra.mxu1 %v17067_v29  ;;  %6781 = vmatprep.subr.bf16.mxu0 %v17072_v30  ;;  %v17141_v29 = vld [vmem:[%s19711_s19 + $0x49c] ss:$72 sps:$4 sm:$0xff]   ;;  %v17136_v30 = vld [vmem:[%s19711_s19 + $0x1690] ss:$72 sps:$4 sm:$0xff]  }
 0x184   : > { %6822 = vmatprep.subr.bf16.mxu1 %v17075_v31  ;;  %v17139_v31 = vld [vmem:[%s19711_s19 + $0x498] ss:$72 sps:$4 sm:$0xff]  }
 0x186   : > { %6782 = vmatpush1.bf16.msra.mxu0 %v17070_v32  ;;  %v17144_v32 = vld [vmem:[%s19711_s19 + $0x1724] ss:$72 sps:$4 sm:$0xff]  }
 0x187   : > { %6823 = vmatpush1.bf16.msra.mxu1 %v17073_v10  ;;  %6783 = vmatprep.subr.bf16.mxu0 %v17078_v33  ;;  %v17147_v10 = vld [vmem:[%s19711_s19 + $0x52c] ss:$72 sps:$4 sm:$0xff]   ;;  %v17142_v33 = vld [vmem:[%s19711_s19 + $0x1720] ss:$72 sps:$4 sm:$0xff]  }
 0x188   : > { %6824 = vmatprep.subr.bf16.mxu1 %v17081_v34  ;;  %v17145_v34 = vld [vmem:[%s19711_s19 + $0x528] ss:$72 sps:$4 sm:$0xff]  }
 0x18a   : > { %6784 = vmatpush1.bf16.msra.mxu0 %v17076_v35  ;;  %v17150_v35 = vld [vmem:[%s19711_s19 + $0x17b4] ss:$72 sps:$4 sm:$0xff]  }
 0x18b   : > { %6825 = vmatpush1.bf16.msra.mxu1 %v17079_v36  ;;  %6785 = vmatprep.subr.bf16.mxu0 %v17084_v37  ;;  %v17153_v36 = vld [vmem:[%s19711_s19 + $0x5bc] ss:$72 sps:$4 sm:$0xff]   ;;  %v17148_v37 = vld [vmem:[%s19711_s19 + $0x17b0] ss:$72 sps:$4 sm:$0xff]  }
 0x18c   : > { %6826 = vmatprep.subr.bf16.mxu1 %v17087_v38  ;;  %v17151_v38 = vld [vmem:[%s19711_s19 + $0x5b8] ss:$72 sps:$4 sm:$0xff]  }
 0x18e   : > { %6786 = vmatpush1.bf16.msra.mxu0 %v17082_v39  ;;  %v17156_v39 = vld [vmem:[%s19711_s19 + $0x1844] ss:$72 sps:$4 sm:$0xff]  }
 0x18f   : > { %6827 = vmatpush1.bf16.msra.mxu1 %v17085_v40  ;;  %6837 = vmatprep.subr.bf16.mxu0 %v17090_v41  ;;  %v17159_v40 = vld [vmem:[%s19711_s19 + $0x64c] ss:$72 sps:$4 sm:$0xff]   ;;  %v17154_v41 = vld [vmem:[%s19711_s19 + $0x1840] ss:$72 sps:$4 sm:$0xff]  }
 0x190   : > { %6878 = vmatprep.subr.bf16.mxu1 %v17093_v42  ;;  %v17157_v42 = vld [vmem:[%s19711_s19 + $0x648] ss:$72 sps:$4 sm:$0xff]  }
 0x191   : > { %6788 = vmatmul.mubr.bf16.vlgmr.msra.gmra.mrb[12].mxu0 %v19808_v12 }
 0x192   : > { %6829 = vmatmul.mubr.bf16.vlgmr.msra.gmra.mrb[12].mxu1 %v19817_v17  ;;  %6838 = vmatpush1.bf16.msra.mxu0 %v17088_v44  ;;  %v17162_v44 = vld [vmem:[%s19711_s19 + $0x18d4] ss:$72 sps:$4 sm:$0xff]  }
 0x193   : > { %6879 = vmatpush1.bf16.msra.mxu1 %v17091_v45  ;;  %6839 = vmatprep.subr.bf16.mxu0 %v17096_v46  ;;  %v17165_v45 = vld [vmem:[%s19711_s19 + $0x6dc] ss:$72 sps:$4 sm:$0xff]   ;;  %v17160_v46 = vld [vmem:[%s19711_s19 + $0x18d0] ss:$72 sps:$4 sm:$0xff]  }
 0x194   : > { %6880 = vmatprep.subr.bf16.mxu1 %v17099_v47  ;;  %6869 = vmatprep.mubr.bf16.mxu0 %v19824_v22  ;;  %v17163_v47 = vld [vmem:[%s19711_s19 + $0x6d8] ss:$72 sps:$4 sm:$0xff]  }
 0x195   : > { %6910 = vmatprep.mubr.bf16.mxu1 %v19784_v60 }
 0x196   : > { %6840 = vmatpush1.bf16.msra.mxu0 %v17094_v48  ;;  %v17168_v48 = vld [vmem:[%s19711_s19 + $0x1964] ss:$72 sps:$4 sm:$0xff]  }
 0x197   : > { %6881 = vmatpush1.bf16.msra.mxu1 %v17097_v50  ;;  %6841 = vmatprep.subr.bf16.mxu0 %v17102_v51  ;;  %v17171_v50 = vld [vmem:[%s19711_s19 + $0x76c] ss:$72 sps:$4 sm:$0xff]   ;;  %v17166_v51 = vld [vmem:[%s19711_s19 + $0x1960] ss:$72 sps:$4 sm:$0xff]  }
 0x198   : > { %6882 = vmatprep.subr.bf16.mxu1 %v17105_v52  ;;  %v17169_v52 = vld [vmem:[%s19711_s19 + $0x768] ss:$72 sps:$4 sm:$0xff]  }
 0x19a   : > { %6842 = vmatpush1.bf16.msra.mxu0 %v17100_v53  ;;  %v17174_v53 = vld [vmem:[%s19711_s19 + $0x19f4] ss:$72 sps:$4 sm:$0xff]  }
 0x19b   : > { %6883 = vmatpush1.bf16.msra.mxu1 %v17103_v54  ;;  %6843 = vmatprep.subr.bf16.mxu0 %v17108_v55  ;;  %v17177_v54 = vld [vmem:[%s19711_s19 + $0x7fc] ss:$72 sps:$4 sm:$0xff]   ;;  %v17172_v55 = vld [vmem:[%s19711_s19 + $0x19f0] ss:$72 sps:$4 sm:$0xff]  }
 0x19c   : > { %6884 = vmatprep.subr.bf16.mxu1 %v17111_v56  ;;  %v17175_v56 = vld [vmem:[%s19711_s19 + $0x7f8] ss:$72 sps:$4 sm:$0xff]  }
 0x19e   : > { %6844 = vmatpush1.bf16.msra.mxu0 %v17106_v57  ;;  %v17180_v57 = vld [vmem:[%s19711_s19 + $0x1a84] ss:$72 sps:$4 sm:$0xff]  }
 0x19f   : > { %6885 = vmatpush1.bf16.msra.mxu1 %v17109_v58  ;;  %6845 = vmatprep.subr.bf16.mxu0 %v17114_v59  ;;  %v17183_v58 = vld [vmem:[%s19711_s19 + $0x88c] ss:$72 sps:$4 sm:$0xff]   ;;  %v17178_v59 = vld [vmem:[%s19711_s19 + $0x1a80] ss:$72 sps:$4 sm:$0xff]  }
 0x1a0   : > { %6886 = vmatprep.subr.bf16.mxu1 %v17117_v61  ;;  %v17181_v61 = vld [vmem:[%s19711_s19 + $0x888] ss:$72 sps:$4 sm:$0xff]  }
 0x1a2   : > { %6846 = vmatpush1.bf16.msra.mxu0 %v17112_v62  ;;  %v17186_v62 = vld [vmem:[%s19711_s19 + $0x91c] ss:$72 sps:$4 sm:$0xff]  }
 0x1a3   : > { %6887 = vmatpush1.bf16.msra.mxu1 %v17115_v63  ;;  %6847 = vmatprep.subr.bf16.mxu0 %v17120_v1  ;;  %v17189_v63 = vld [vmem:[%s19711_s19 + $0x121c] ss:$72 sps:$4 sm:$0xff]   ;;  %v17184_v1 = vld [vmem:[%s19711_s19 + $0x918] ss:$72 sps:$4 sm:$0xff]  }
 0x1a4   : > { %6888 = vmatprep.subr.bf16.mxu1 %v17123_v2  ;;  %v6543_v7 = vpop.f32.mrb[0].mxu0  ;;  %v17187_v2 = vld [vmem:[%s19711_s19 + $0x1218] ss:$72 sps:$4 sm:$0xff]  }
 0x1a5   : > { %v6584_v8 = vpop.f32.mrb[0].mxu1  ;;  %v6545_v14 = vpop.f32.mrb[1].mxu0 }
 0x1a6   : > { %v20060_v13 = vadd.f32 %v6584_v8, %v6543_v7  ;;  %v6586_v15 = vpop.f32.mrb[1].mxu1  ;;  %v6547_v18 = vpop.f32.mrb[2].mxu0  ;;  %6848 = vmatpush1.bf16.msra.mxu0 %v17118_v3  ;;  %v17192_v3 = vld [vmem:[%s19711_s19 + $0x9ac] ss:$72 sps:$4 sm:$0xff]   ;;  %v17198_v7 = vld [vmem:[%s19711_s19 + $0xa3c] ss:$72 sps:$4 sm:$0xff]  }
 0x1a7   : > { %v20062_v16 = vadd.f32 %v6586_v15, %v6545_v14  ;;  %v6588_v19 = vpop.f32.mrb[2].mxu1  ;;  %6889 = vmatpush1.bf16.msra.mxu1 %v17121_v4  ;;  %v6548_v20 = vpop.f32.mrb[3].mxu0  ;;  %6849 = vmatprep.subr.bf16.mxu0 %v17126_v5  ;;  %v17195_v4 = vld [vmem:[%s19711_s19 + $0x12ac] ss:$72 sps:$4 sm:$0xff]   ;;  %v17190_v5 = vld [vmem:[%s19711_s19 + $0x9a8] ss:$72 sps:$4 sm:$0xff]  }
 0x1a8   : > { %v6589_v21 = vpop.f32.mrb[3].mxu1  ;;  %6890 = vmatprep.subr.bf16.mxu1 %v17129_v6  ;;  %v17193_v6 = vld [vmem:[%s19711_s19 + $0x12a8] ss:$72 sps:$4 sm:$0xff]   ;;  %v17201_v8 = vld [vmem:[%s19711_s19 + $0x133c] ss:$72 sps:$4 sm:$0xff]  }
 0x1a9   : > { %v17204_v14 = vld [vmem:[%s19711_s19 + $0xacc] ss:$72 sps:$4 sm:$0xff]   ;;  %v17202_v18 = vld [vmem:[%s19711_s19 + $0xac8] ss:$72 sps:$4 sm:$0xff]   ;;  %v17210_v20 = vld [vmem:[%s19711_s19 + $0xb5c] ss:$72 sps:$4 sm:$0xff]  }
 0x1aa   : > { %6850 = vmatpush1.bf16.msra.mxu0 %v17124_v9  ;;  %v17196_v9 = vld [vmem:[%s19711_s19 + $0xa38] ss:$72 sps:$4 sm:$0xff]   ;;  %v17207_v15 = vld [vmem:[%s19711_s19 + $0x13cc] ss:$72 sps:$4 sm:$0xff]   ;;  %v17205_v19 = vld [vmem:[%s19711_s19 + $0x13c8] ss:$72 sps:$4 sm:$0xff]  }
 0x1ab   : > { %6891 = vmatpush1.bf16.msra.mxu1 %v17127_v11  ;;  %6851 = vmatprep.subr.bf16.mxu0 %v17132_v23  ;;  %v17199_v11 = vld [vmem:[%s19711_s19 + $0x1338] ss:$72 sps:$4 sm:$0xff]   ;;  %v17213_v21 = vld [vmem:[%s19711_s19 + $0x145c] ss:$72 sps:$4 sm:$0xff]  }
 0x1ac   : > { %6892 = vmatprep.subr.bf16.mxu1 %v17135_v24  ;;  %v17208_v23 = vld [vmem:[%s19711_s19 + $0xb58] ss:$72 sps:$4 sm:$0xff]  }
 0x1ad   : > { %v17211_v24 = vld [vmem:[%s19711_s19 + $0x1458] ss:$72 sps:$4 sm:$0xff]  }
 0x1ae   : > { %6852 = vmatpush1.bf16.msra.mxu0 %v17130_v25  ;;  %v17216_v25 = vld [vmem:[%s19711_s19 + $0xbec] ss:$72 sps:$4 sm:$0xff]  }
 0x1af   : > { %6893 = vmatpush1.bf16.msra.mxu1 %v17133_v26  ;;  %6853 = vmatprep.subr.bf16.mxu0 %v17138_v28  ;;  %v17219_v26 = vld [vmem:[%s19711_s19 + $0x14ec] ss:$72 sps:$4 sm:$0xff]   ;;  %v17214_v28 = vld [vmem:[%s19711_s19 + $0xbe8] ss:$72 sps:$4 sm:$0xff]  }
 0x1b0   : > { %6894 = vmatprep.subr.bf16.mxu1 %v17141_v29  ;;  %v17217_v29 = vld [vmem:[%s19711_s19 + $0x14e8] ss:$72 sps:$4 sm:$0xff]  }
 0x1b2   : > { %6854 = vmatpush1.bf16.msra.mxu0 %v17136_v30  ;;  %v17222_v30 = vld [vmem:[%s19711_s19 + $0xc7c] ss:$72 sps:$4 sm:$0xff]  }
 0x1b3   : > { %6895 = vmatpush1.bf16.msra.mxu1 %v17139_v31  ;;  %6855 = vmatprep.subr.bf16.mxu0 %v17144_v32  ;;  %v17225_v31 = vld [vmem:[%s19711_s19 + $0x157c] ss:$72 sps:$4 sm:$0xff]  }
 0x1b4   : > { %6896 = vmatprep.subr.bf16.mxu1 %v17147_v10 }
 0x1b6   : > { %6856 = vmatpush1.bf16.msra.mxu0 %v17142_v33  ;;  %v17220_v33 = vld [vmem:[%s19711_s19 + $0xc78] ss:$72 sps:$4 sm:$0xff]  }
 0x1b7   : > { %6897 = vmatpush1.bf16.msra.mxu1 %v17145_v34  ;;  %6857 = vmatprep.subr.bf16.mxu0 %v17150_v35  ;;  %v17223_v34 = vld [vmem:[%s19711_s19 + $0x1578] ss:$72 sps:$4 sm:$0xff]  }
 0x1b8   : > { %6898 = vmatprep.subr.bf16.mxu1 %v17153_v36 }
 0x1ba   : > { %6858 = vmatpush1.bf16.msra.mxu0 %v17148_v37 }
 0x1bb   : > { %6899 = vmatpush1.bf16.msra.mxu1 %v17151_v38  ;;  %6859 = vmatprep.subr.bf16.mxu0 %v17156_v39 }
 0x1bc   : > { %6900 = vmatprep.subr.bf16.mxu1 %v17159_v40 }
 0x1be   : > { %6860 = vmatpush1.bf16.msra.mxu0 %v17154_v41 }
 0x1bf   : > { %6901 = vmatpush1.bf16.msra.mxu1 %v17157_v42  ;;  %6861 = vmatprep.subr.bf16.mxu0 %v17162_v44  ;;  %v17231_v44 = vld [vmem:[%s19711_s19 + $0x160c] ss:$72 sps:$4 sm:$0xff]  }
 0x1c0   : > { %6902 = vmatprep.subr.bf16.mxu1 %v17165_v45  ;;  %v17229_v45 = vld [vmem:[%s19711_s19 + $0x1608] ss:$72 sps:$4 sm:$0xff]  }
 0x1c2   : > { %6862 = vmatpush1.bf16.msra.mxu0 %v17160_v46  ;;  %v17234_v46 = vld [vmem:[%s19711_s19 + $0xd9c] ss:$72 sps:$4 sm:$0xff]  }
 0x1c3   : > { %6903 = vmatpush1.bf16.msra.mxu1 %v17163_v47  ;;  %6863 = vmatprep.subr.bf16.mxu0 %v17168_v48  ;;  %v17237_v47 = vld [vmem:[%s19711_s19 + $0x169c] ss:$72 sps:$4 sm:$0xff]   ;;  %v17232_v48 = vld [vmem:[%s19711_s19 + $0xd98] ss:$72 sps:$4 sm:$0xff]  }
 0x1c4   : > { %6904 = vmatprep.subr.bf16.mxu1 %v17171_v50  ;;  %v17235_v50 = vld [vmem:[%s19711_s19 + $0x1698] ss:$72 sps:$4 sm:$0xff]  }
 0x1c6   : > { %6864 = vmatpush1.bf16.msra.mxu0 %v17166_v51  ;;  %v17240_v51 = vld [vmem:[%s19711_s19 + $0xe2c] ss:$72 sps:$4 sm:$0xff]  }
 0x1c7   : > { %6905 = vmatpush1.bf16.msra.mxu1 %v17169_v52  ;;  %6865 = vmatprep.subr.bf16.mxu0 %v17174_v53  ;;  %v17243_v52 = vld [vmem:[%s19711_s19 + $0x172c] ss:$72 sps:$4 sm:$0xff]   ;;  %v17238_v53 = vld [vmem:[%s19711_s19 + $0xe28] ss:$72 sps:$4 sm:$0xff]  }
 0x1c8   : > { %6906 = vmatprep.subr.bf16.mxu1 %v17177_v54  ;;  %v17241_v54 = vld [vmem:[%s19711_s19 + $0x1728] ss:$72 sps:$4 sm:$0xff]  }
 0x1ca   : > { %6866 = vmatpush1.bf16.msra.mxu0 %v17172_v55  ;;  %v17246_v55 = vld [vmem:[%s19711_s19 + $0xebc] ss:$72 sps:$4 sm:$0xff]  }
 0x1cb   : > { %6907 = vmatpush1.bf16.msra.mxu1 %v17175_v56  ;;  %6867 = vmatprep.subr.bf16.mxu0 %v17180_v57  ;;  %v17249_v56 = vld [vmem:[%s19711_s19 + $0x17bc] ss:$72 sps:$4 sm:$0xff]   ;;  %v17244_v57 = vld [vmem:[%s19711_s19 + $0xeb8] ss:$72 sps:$4 sm:$0xff]  }
 0x1cc   : > { %6908 = vmatprep.subr.bf16.mxu1 %v17183_v58  ;;  %v17247_v58 = vld [vmem:[%s19711_s19 + $0x17b8] ss:$72 sps:$4 sm:$0xff]  }
 0x1ce   : > { %6868 = vmatpush1.bf16.msra.mxu0 %v17178_v59  ;;  %v17252_v59 = vld [vmem:[%s19711_s19 + $0xf4c] ss:$72 sps:$4 sm:$0xff]  }
 0x1cf   : > { %6909 = vmatpush1.bf16.msra.mxu1 %v17181_v61  ;;  %6919 = vmatprep.subr.bf16.mxu0 %v17186_v62  ;;  %v17255_v61 = vld [vmem:[%s19711_s19 + $0x184c] ss:$72 sps:$4 sm:$0xff]   ;;  %v17250_v62 = vld [vmem:[%s19711_s19 + $0xf48] ss:$72 sps:$4 sm:$0xff]  }
 0x1d0   : > { %6960 = vmatprep.subr.bf16.mxu1 %v17189_v63  ;;  %v17253_v63 = vld [vmem:[%s19711_s19 + $0x1848] ss:$72 sps:$4 sm:$0xff]  }
 0x1d1   : > { %6870 = vmatmul.mubr.bf16.vlgmr.msra.gmra.mrb[16].mxu0 %v19892_v27 }
 0x1d2   : > { %6911 = vmatmul.mubr.bf16.vlgmr.msra.gmra.mrb[16].mxu1 %v19808_v12  ;;  %6920 = vmatpush1.bf16.msra.mxu0 %v17184_v1  ;;  %v17258_v1 = vld [vmem:[%s19711_s19 + $0xfdc] ss:$72 sps:$4 sm:$0xff]  }
 0x1d3   : > { %6961 = vmatpush1.bf16.msra.mxu1 %v17187_v2  ;;  %6921 = vmatprep.subr.bf16.mxu0 %v17192_v3  ;;  %v17261_v2 = vld [vmem:[%s19711_s19 + $0x18dc] ss:$72 sps:$4 sm:$0xff]   ;;  %v17256_v3 = vld [vmem:[%s19711_s19 + $0xfd8] ss:$72 sps:$4 sm:$0xff]  }
 0x1d4   : > { %6962 = vmatprep.subr.bf16.mxu1 %v17195_v4  ;;  %6951 = vmatprep.mubr.bf16.mxu0 %v19791_v0  ;;  %v17259_v4 = vld [vmem:[%s19711_s19 + $0x18d8] ss:$72 sps:$4 sm:$0xff]  }
 0x1d5   : > { %6992 = vmatprep.mubr.bf16.mxu1 %v19824_v22 }
 0x1d6   : > { %6922 = vmatpush1.bf16.msra.mxu0 %v17190_v5  ;;  %v17264_v5 = vld [vmem:[%s19711_s19 + $0x106c] ss:$72 sps:$4 sm:$0xff]  }
 0x1d7   : > { %6963 = vmatpush1.bf16.msra.mxu1 %v17193_v6  ;;  %6923 = vmatprep.subr.bf16.mxu0 %v17198_v7  ;;  %v17267_v6 = vld [vmem:[%s19711_s19 + $0x196c] ss:$72 sps:$4 sm:$0xff]   ;;  %v17262_v7 = vld [vmem:[%s19711_s19 + $0x1068] ss:$72 sps:$4 sm:$0xff]  }
 0x1d8   : > { %6964 = vmatprep.subr.bf16.mxu1 %v17201_v8  ;;  %v17265_v8 = vld [vmem:[%s19711_s19 + $0x1968] ss:$72 sps:$4 sm:$0xff]  }
 0x1da   : > { %6924 = vmatpush1.bf16.msra.mxu0 %v17196_v9  ;;  %v17270_v9 = vld [vmem:[%s19711_s19 + $0x10fc] ss:$72 sps:$4 sm:$0xff]  }
 0x1db   : > { %6965 = vmatpush1.bf16.msra.mxu1 %v17199_v11  ;;  %6925 = vmatprep.subr.bf16.mxu0 %v17204_v14  ;;  %v17273_v11 = vld [vmem:[%s19711_s19 + $0x19fc] ss:$72 sps:$4 sm:$0xff]   ;;  %v17268_v14 = vld [vmem:[%s19711_s19 + $0x10f8] ss:$72 sps:$4 sm:$0xff]  }
 0x1dc   : > { %6966 = vmatprep.subr.bf16.mxu1 %v17207_v15  ;;  %v17271_v15 = vld [vmem:[%s19711_s19 + $0x19f8] ss:$72 sps:$4 sm:$0xff]  }
 0x1de   : > { %6926 = vmatpush1.bf16.msra.mxu0 %v17202_v18  ;;  %v17276_v18 = vld [vmem:[%s19711_s19 + $0x118c] ss:$72 sps:$4 sm:$0xff]  }
 0x1df   : > { %6967 = vmatpush1.bf16.msra.mxu1 %v17205_v19  ;;  %6927 = vmatprep.subr.bf16.mxu0 %v17210_v20  ;;  %v17279_v19 = vld [vmem:[%s19711_s19 + $0x1a8c] ss:$72 sps:$4 sm:$0xff]   ;;  %v17274_v20 = vld [vmem:[%s19711_s19 + $0x1188] ss:$72 sps:$4 sm:$0xff]  }
 0x1e0   : > { %6968 = vmatprep.subr.bf16.mxu1 %v17213_v21  ;;  %v17277_v21 = vld [vmem:[%s19711_s19 + $0x1a88] ss:$72 sps:$4 sm:$0xff]  }
 0x1e2   : > { %6928 = vmatpush1.bf16.msra.mxu0 %v17208_v23  ;;  %v17282_v23 = vld [vmem:[%s19711_s19 + $0x24] ss:$72 sps:$4 sm:$0xff]  }
 0x1e3   : > { %6969 = vmatpush1.bf16.msra.mxu1 %v17211_v24  ;;  %6929 = vmatprep.subr.bf16.mxu0 %v17216_v25  ;;  %v17285_v24 = vld [vmem:[%s19711_s19 + $0x924] ss:$72 sps:$4 sm:$0xff]   ;;  %v17280_v25 = vld [vmem:[%s19711_s19 + $0x20] ss:$72 sps:$4 sm:$0xff]  }
 0x1e4   : > { %6970 = vmatprep.subr.bf16.mxu1 %v17219_v26  ;;  %v6625_v32 = vpop.f32.mrb[4].mxu0  ;;  %v17283_v26 = vld [vmem:[%s19711_s19 + $0x920] ss:$72 sps:$4 sm:$0xff]  }
 0x1e5   : > { %v20130_v10 = vpop.f32.mrb[4].mxu1  ;;  %v20135_v35 = vadd.f32 %v6625_v32, %v20060_v13  ;;  %v6627_v36 = vpop.f32.mrb[5].mxu0  ;;  %v17228_v13 = vld [vmem:[%s19711_s19 + $0xd0c] ss:$72 sps:$4 sm:$0xff]  }
 0x1e6   : > { %v20137_v37 = vpop.f32.mrb[5].mxu1  ;;  %v20140_v38 = vadd.f32 %v6627_v36, %v20062_v16  ;;  %v6629_v39 = vpop.f32.mrb[6].mxu0  ;;  %6930 = vmatpush1.bf16.msra.mxu0 %v17214_v28  ;;  %v17226_v16 = vld [vmem:[%s19711_s19 + $0xd08] ss:$72 sps:$4 sm:$0xff]   ;;  %v17288_v28 = vld [vmem:[%s19711_s19 + $0xb4] ss:$72 sps:$4 sm:$0xff]  }
 0x1e7   : > { %v6670_v40 = vpop.f32.mrb[6].mxu1  ;;  %6971 = vmatpush1.bf16.msra.mxu1 %v17217_v29  ;;  %v6630_v41 = vpop.f32.mrb[7].mxu0  ;;  %6931 = vmatprep.subr.bf16.mxu0 %v17222_v30  ;;  %v17291_v29 = vld [vmem:[%s19711_s19 + $0x9b4] ss:$72 sps:$4 sm:$0xff]   ;;  %v17286_v30 = vld [vmem:[%s19711_s19 + $0xb0] ss:$72 sps:$4 sm:$0xff]  }
 0x1e8   : > { %v6671_v42 = vpop.f32.mrb[7].mxu1  ;;  %6972 = vmatprep.subr.bf16.mxu1 %v17225_v31  ;;  %v17289_v31 = vld [vmem:[%s19711_s19 + $0x9b0] ss:$72 sps:$4 sm:$0xff]   ;;  %v17294_v32 = vld [vmem:[%s19711_s19 + $0x144] ss:$72 sps:$4 sm:$0xff]  }
 0x1e9   : > { %v17295_v36 = vld [vmem:[%s19711_s19 + $0xa40] ss:$72 sps:$4 sm:$0xff]   ;;  %v17300_v39 = vld [vmem:[%s19711_s19 + $0x1d4] ss:$72 sps:$4 sm:$0xff]   ;;  %v17298_v41 = vld [vmem:[%s19711_s19 + $0x1d0] ss:$72 sps:$4 sm:$0xff]  }
 0x1ea   : > { %6932 = vmatpush1.bf16.msra.mxu0 %v17220_v33  ;;  %v17297_v33 = vld [vmem:[%s19711_s19 + $0xa44] ss:$72 sps:$4 sm:$0xff]   ;;  %v17303_v40 = vld [vmem:[%s19711_s19 + $0xad4] ss:$72 sps:$4 sm:$0xff]   ;;  %v17301_v42 = vld [vmem:[%s19711_s19 + $0xad0] ss:$72 sps:$4 sm:$0xff]  }
 0x1eb   : > { %6973 = vmatpush1.bf16.msra.mxu1 %v17223_v34  ;;  %6933 = vmatprep.subr.bf16.mxu0 %v17228_v13  ;;  %v17292_v34 = vld [vmem:[%s19711_s19 + $0x140] ss:$72 sps:$4 sm:$0xff]   ;;  %v17306_v13 = vld [vmem:[%s19711_s19 + $0x264] ss:$72 sps:$4 sm:$0xff]  }
 0x1ec   : > { %6974 = vmatprep.subr.bf16.mxu1 %v17231_v44  ;;  %v17309_v44 = vld [vmem:[%s19711_s19 + $0xb64] ss:$72 sps:$4 sm:$0xff]  }
 0x1ee   : > { %6934 = vmatpush1.bf16.msra.mxu0 %v17226_v16  ;;  %v17304_v16 = vld [vmem:[%s19711_s19 + $0x260] ss:$72 sps:$4 sm:$0xff]  }
 0x1ef   : > { %6975 = vmatpush1.bf16.msra.mxu1 %v17229_v45  ;;  %6935 = vmatprep.subr.bf16.mxu0 %v17234_v46  ;;  %v17307_v45 = vld [vmem:[%s19711_s19 + $0xb60] ss:$72 sps:$4 sm:$0xff]   ;;  %v17312_v46 = vld [vmem:[%s19711_s19 + $0x2f4] ss:$72 sps:$4 sm:$0xff]  }
 0x1f0   : > { %6976 = vmatprep.subr.bf16.mxu1 %v17237_v47  ;;  %v17315_v47 = vld [vmem:[%s19711_s19 + $0xbf4] ss:$72 sps:$4 sm:$0xff]  }
 0x1f2   : > { %6936 = vmatpush1.bf16.msra.mxu0 %v17232_v48  ;;  %v17310_v48 = vld [vmem:[%s19711_s19 + $0x2f0] ss:$72 sps:$4 sm:$0xff]  }
 0x1f3   : > { %6977 = vmatpush1.bf16.msra.mxu1 %v17235_v50  ;;  %6937 = vmatprep.subr.bf16.mxu0 %v17240_v51  ;;  %v17313_v50 = vld [vmem:[%s19711_s19 + $0xbf0] ss:$72 sps:$4 sm:$0xff]   ;;  %v17318_v51 = vld [vmem:[%s19711_s19 + $0x384] ss:$72 sps:$4 sm:$0xff]  }
 0x1f4   : > { %6978 = vmatprep.subr.bf16.mxu1 %v17243_v52  ;;  %v17321_v52 = vld [vmem:[%s19711_s19 + $0xc84] ss:$72 sps:$4 sm:$0xff]  }
 0x1f6   : > { %6938 = vmatpush1.bf16.msra.mxu0 %v17238_v53 }
 0x1f7   : > { %6979 = vmatpush1.bf16.msra.mxu1 %v17241_v54  ;;  %6939 = vmatprep.subr.bf16.mxu0 %v17246_v55  ;;  %v17316_v55 = vld [vmem:[%s19711_s19 + $0x380] ss:$72 sps:$4 sm:$0xff]  }
 0x1f8   : > { %6980 = vmatprep.subr.bf16.mxu1 %v17249_v56  ;;  %v17319_v56 = vld [vmem:[%s19711_s19 + $0xc80] ss:$72 sps:$4 sm:$0xff]  }
 0x1fa   : > { %6940 = vmatpush1.bf16.msra.mxu0 %v17244_v57 }
 0x1fb   : > { %6981 = vmatpush1.bf16.msra.mxu1 %v17247_v58  ;;  %6941 = vmatprep.subr.bf16.mxu0 %v17252_v59 }
 0x1fc   : > { %6982 = vmatprep.subr.bf16.mxu1 %v17255_v61 }
 0x1fe   : > { %6942 = vmatpush1.bf16.msra.mxu0 %v17250_v62 }
 0x1ff   : > { %6983 = vmatpush1.bf16.msra.mxu1 %v17253_v63  ;;  %6943 = vmatprep.subr.bf16.mxu0 %v17258_v1 }
 0x200   : > { %6984 = vmatprep.subr.bf16.mxu1 %v17261_v2 }
 0x202   : > { %6944 = vmatpush1.bf16.msra.mxu0 %v17256_v3 }
 0x203   : > { %6985 = vmatpush1.bf16.msra.mxu1 %v17259_v4  ;;  %6945 = vmatprep.subr.bf16.mxu0 %v17264_v5  ;;  %v17327_v4 = vld [vmem:[%s19711_s19 + $0xd14] ss:$72 sps:$4 sm:$0xff]  }
 0x204   : > { %6986 = vmatprep.subr.bf16.mxu1 %v17267_v6  ;;  %v17325_v6 = vld [vmem:[%s19711_s19 + $0xd10] ss:$72 sps:$4 sm:$0xff]  }
 0x206   : > { %6946 = vmatpush1.bf16.msra.mxu0 %v17262_v7  ;;  %v17330_v7 = vld [vmem:[%s19711_s19 + $0x4a4] ss:$72 sps:$4 sm:$0xff]  }
 0x207   : > { %6987 = vmatpush1.bf16.msra.mxu1 %v17265_v8  ;;  %6947 = vmatprep.subr.bf16.mxu0 %v17270_v9  ;;  %v17333_v8 = vld [vmem:[%s19711_s19 + $0xda4] ss:$72 sps:$4 sm:$0xff]   ;;  %v17328_v9 = vld [vmem:[%s19711_s19 + $0x4a0] ss:$72 sps:$4 sm:$0xff]  }
 0x208   : > { %6988 = vmatprep.subr.bf16.mxu1 %v17273_v11  ;;  %v17331_v11 = vld [vmem:[%s19711_s19 + $0xda0] ss:$72 sps:$4 sm:$0xff]  }
 0x20a   : > { %6948 = vmatpush1.bf16.msra.mxu0 %v17268_v14  ;;  %v17336_v14 = vld [vmem:[%s19711_s19 + $0x534] ss:$72 sps:$4 sm:$0xff]  }
 0x20b   : > { %6989 = vmatpush1.bf16.msra.mxu1 %v17271_v15  ;;  %6949 = vmatprep.subr.bf16.mxu0 %v17276_v18  ;;  %v17339_v15 = vld [vmem:[%s19711_s19 + $0xe34] ss:$72 sps:$4 sm:$0xff]   ;;  %v17334_v18 = vld [vmem:[%s19711_s19 + $0x530] ss:$72 sps:$4 sm:$0xff]  }
 0x20c   : > { %6990 = vmatprep.subr.bf16.mxu1 %v17279_v19  ;;  %v17337_v19 = vld [vmem:[%s19711_s19 + $0xe30] ss:$72 sps:$4 sm:$0xff]  }
 0x20e   : > { %6950 = vmatpush1.bf16.msra.mxu0 %v17274_v20  ;;  %v17342_v20 = vld [vmem:[%s19711_s19 + $0x5c4] ss:$72 sps:$4 sm:$0xff]  }
 0x20f   : > { %6991 = vmatpush1.bf16.msra.mxu1 %v17277_v21  ;;  %7001 = vmatprep.subr.bf16.mxu0 %v17282_v23  ;;  %v17345_v21 = vld [vmem:[%s19711_s19 + $0xec4] ss:$72 sps:$4 sm:$0xff]   ;;  %v17340_v23 = vld [vmem:[%s19711_s19 + $0x5c0] ss:$72 sps:$4 sm:$0xff]  }
 0x210   : > { %7042 = vmatprep.subr.bf16.mxu1 %v17285_v24  ;;  %v17343_v24 = vld [vmem:[%s19711_s19 + $0xec0] ss:$72 sps:$4 sm:$0xff]  }
 0x211   : > { %6952 = vmatmul.mubr.bf16.vlgmr.msra.gmra.mrb[20].mxu0 %v19817_v17 }
 0x212   : > { %6993 = vmatmul.mubr.bf16.vlgmr.msra.gmra.mrb[20].mxu1 %v19892_v27  ;;  %7002 = vmatpush1.bf16.msra.mxu0 %v17280_v25  ;;  %v17348_v25 = vld [vmem:[%s19711_s19 + $0x654] ss:$72 sps:$4 sm:$0xff]  }
 0x213   : > { %7043 = vmatpush1.bf16.msra.mxu1 %v17283_v26  ;;  %7003 = vmatprep.subr.bf16.mxu0 %v17288_v28  ;;  %v17351_v26 = vld [vmem:[%s19711_s19 + $0xf54] ss:$72 sps:$4 sm:$0xff]   ;;  %v17346_v28 = vld [vmem:[%s19711_s19 + $0x650] ss:$72 sps:$4 sm:$0xff]  }
 0x214   : > { %7044 = vmatprep.subr.bf16.mxu1 %v17291_v29  ;;  %7033 = vmatprep.mubr.bf16.mxu0 %v19784_v60  ;;  %v17349_v29 = vld [vmem:[%s19711_s19 + $0xf50] ss:$72 sps:$4 sm:$0xff]  }
 0x215   : > { %7074 = vmatprep.mubr.bf16.mxu1 %v19791_v0 }
 0x216   : > { %7004 = vmatpush1.bf16.msra.mxu0 %v17286_v30  ;;  %v17354_v30 = vld [vmem:[%s19711_s19 + $0x6e4] ss:$72 sps:$4 sm:$0xff]  }
 0x217   : > { %7045 = vmatpush1.bf16.msra.mxu1 %v17289_v31  ;;  %7005 = vmatprep.subr.bf16.mxu0 %v17294_v32  ;;  %v17357_v31 = vld [vmem:[%s19711_s19 + $0xfe4] ss:$72 sps:$4 sm:$0xff]   ;;  %v17352_v32 = vld [vmem:[%s19711_s19 + $0x6e0] ss:$72 sps:$4 sm:$0xff]  }
 0x218   : > { %7046 = vmatprep.subr.bf16.mxu1 %v17297_v33  ;;  %v17355_v33 = vld [vmem:[%s19711_s19 + $0xfe0] ss:$72 sps:$4 sm:$0xff]  }
 0x21a   : > { %7006 = vmatpush1.bf16.msra.mxu0 %v17292_v34  ;;  %v17360_v34 = vld [vmem:[%s19711_s19 + $0x774] ss:$72 sps:$4 sm:$0xff]  }
 0x21b   : > { %7047 = vmatpush1.bf16.msra.mxu1 %v17295_v36  ;;  %7007 = vmatprep.subr.bf16.mxu0 %v17300_v39  ;;  %v17363_v36 = vld [vmem:[%s19711_s19 + $0x1074] ss:$72 sps:$4 sm:$0xff]   ;;  %v17358_v39 = vld [vmem:[%s19711_s19 + $0x770] ss:$72 sps:$4 sm:$0xff]  }
 0x21c   : > { %7048 = vmatprep.subr.bf16.mxu1 %v17303_v40  ;;  %v17361_v40 = vld [vmem:[%s19711_s19 + $0x1070] ss:$72 sps:$4 sm:$0xff]  }
 0x21e   : > { %7008 = vmatpush1.bf16.msra.mxu0 %v17298_v41  ;;  %v17366_v41 = vld [vmem:[%s19711_s19 + $0x804] ss:$72 sps:$4 sm:$0xff]  }
 0x21f   : > { %7049 = vmatpush1.bf16.msra.mxu1 %v17301_v42  ;;  %7009 = vmatprep.subr.bf16.mxu0 %v17306_v13  ;;  %v17369_v42 = vld [vmem:[%s19711_s19 + $0x1104] ss:$72 sps:$4 sm:$0xff]   ;;  %v17364_v13 = vld [vmem:[%s19711_s19 + $0x800] ss:$72 sps:$4 sm:$0xff]  }
 0x220   : > { %7050 = vmatprep.subr.bf16.mxu1 %v17309_v44  ;;  %v17367_v44 = vld [vmem:[%s19711_s19 + $0x1100] ss:$72 sps:$4 sm:$0xff]  }
 0x222   : > { %7010 = vmatpush1.bf16.msra.mxu0 %v17304_v16  ;;  %v17372_v16 = vld [vmem:[%s19711_s19 + $0x894] ss:$72 sps:$4 sm:$0xff]  }
 0x223   : > { %7051 = vmatpush1.bf16.msra.mxu1 %v17307_v45  ;;  %7011 = vmatprep.subr.bf16.mxu0 %v17312_v46  ;;  %v17375_v45 = vld [vmem:[%s19711_s19 + $0x1194] ss:$72 sps:$4 sm:$0xff]   ;;  %v17370_v46 = vld [vmem:[%s19711_s19 + $0x890] ss:$72 sps:$4 sm:$0xff]  }
 0x224   : > { %7052 = vmatprep.subr.bf16.mxu1 %v17315_v47  ;;  %v6707_v53 = vpop.f32.mrb[8].mxu0  ;;  %v17373_v47 = vld [vmem:[%s19711_s19 + $0x1190] ss:$72 sps:$4 sm:$0xff]  }
 0x225   : > { %v6748_v54 = vpop.f32.mrb[8].mxu1  ;;  %v6708_v57 = vadd.f32 %v6707_v53, %v20130_v10  ;;  %v6709_v58 = vpop.f32.mrb[9].mxu0  ;;  %v17324_v10 = vld [vmem:[%s19711_s19 + $0x414] ss:$72 sps:$4 sm:$0xff]  }
 0x226   : > { %v6750_v59 = vpop.f32.mrb[9].mxu1  ;;  %v6710_v61 = vadd.f32 %v6709_v58, %v20137_v37  ;;  %v6711_v62 = vpop.f32.mrb[10].mxu0  ;;  %7012 = vmatpush1.bf16.msra.mxu0 %v17310_v48  ;;  %v17322_v37 = vld [vmem:[%s19711_s19 + $0x410] ss:$72 sps:$4 sm:$0xff]   ;;  %v17378_v48 = vld [vmem:[%s19711_s19 + $0x1224] ss:$72 sps:$4 sm:$0xff]  }
 0x227   : > { %v6752_v63 = vpop.f32.mrb[10].mxu1  ;;  %7053 = vmatpush1.bf16.msra.mxu1 %v17313_v50  ;;  %v20212_v1 = vadd.f32 %v6748_v54, %v6708_v57  ;;  %v6712_v2 = vpop.f32.mrb[11].mxu0  ;;  %7013 = vmatprep.subr.bf16.mxu0 %v17318_v51  ;;  %v17381_v50 = vld [vmem:[%s19711_s19 + $0x2c] ss:$72 sps:$4 sm:$0xff]   ;;  %v17376_v51 = vld [vmem:[%s19711_s19 + $0x1220] ss:$72 sps:$4 sm:$0xff]  }
 0x228   : > { %v6753_v3 = vpop.f32.mrb[11].mxu1  ;;  %7054 = vmatprep.subr.bf16.mxu1 %v17321_v52  ;;  %v20216_v5 = vadd.f32 %v6750_v59, %v6710_v61  ;;  %v17379_v52 = vld [vmem:[%s19711_s19 + $0x28] ss:$72 sps:$4 sm:$0xff]   ;;  %v17384_v53 = vld [vmem:[%s19711_s19 + $0x12b4] ss:$72 sps:$4 sm:$0xff]  }
 0x229   : > { %v17387_v54 = vld [vmem:[%s19711_s19 + $0xbc] ss:$72 sps:$4 sm:$0xff]   ;;  %v17393_v58 = vld [vmem:[%s19711_s19 + $0x14c] ss:$72 sps:$4 sm:$0xff]   ;;  %v17388_v59 = vld [vmem:[%s19711_s19 + $0x1340] ss:$72 sps:$4 sm:$0xff]  }
 0x22a   : > { %7014 = vmatpush1.bf16.msra.mxu0 %v17316_v55  ;;  %v17382_v55 = vld [vmem:[%s19711_s19 + $0x12b0] ss:$72 sps:$4 sm:$0xff]   ;;  %v17390_v57 = vld [vmem:[%s19711_s19 + $0x1344] ss:$72 sps:$4 sm:$0xff]   ;;  %v17396_v62 = vld [vmem:[%s19711_s19 + $0x13d4] ss:$72 sps:$4 sm:$0xff]  }
 0x22b   : > { %7055 = vmatpush1.bf16.msra.mxu1 %v17319_v56  ;;  %7015 = vmatprep.subr.bf16.mxu0 %v17324_v10  ;;  %v17385_v56 = vld [vmem:[%s19711_s19 + $0xb8] ss:$72 sps:$4 sm:$0xff]   ;;  %v17391_v61 = vld [vmem:[%s19711_s19 + $0x148] ss:$72 sps:$4 sm:$0xff]   ;;  %v17399_v63 = vld [vmem:[%s19711_s19 + $0x1dc] ss:$72 sps:$4 sm:$0xff]  }
 0x22c   : > { %7056 = vmatprep.subr.bf16.mxu1 %v17327_v4  ;;  %v17394_v2 = vld [vmem:[%s19711_s19 + $0x13d0] ss:$72 sps:$4 sm:$0xff]   ;;  %v17402_v10 = vld [vmem:[%s19711_s19 + $0x1464] ss:$72 sps:$4 sm:$0xff]  }
 0x22d   : > { %v17397_v3 = vld [vmem:[%s19711_s19 + $0x1d8] ss:$72 sps:$4 sm:$0xff]   ;;  %v17405_v4 = vld [vmem:[%s19711_s19 + $0x26c] ss:$72 sps:$4 sm:$0xff]  }
 0x22e   : > { %7016 = vmatpush1.bf16.msra.mxu0 %v17322_v37  ;;  %v17400_v37 = vld [vmem:[%s19711_s19 + $0x1460] ss:$72 sps:$4 sm:$0xff]  }
 0x22f   : > { %7057 = vmatpush1.bf16.msra.mxu1 %v17325_v6  ;;  %7017 = vmatprep.subr.bf16.mxu0 %v17330_v7  ;;  %v17403_v6 = vld [vmem:[%s19711_s19 + $0x268] ss:$72 sps:$4 sm:$0xff]   ;;  %v17408_v7 = vld [vmem:[%s19711_s19 + $0x14f4] ss:$72 sps:$4 sm:$0xff]  }
 0x230   : > { %7058 = vmatprep.subr.bf16.mxu1 %v17333_v8  ;;  %v17411_v8 = vld [vmem:[%s19711_s19 + $0x2fc] ss:$72 sps:$4 sm:$0xff]  }
 0x232   : > { %7018 = vmatpush1.bf16.msra.mxu0 %v17328_v9  ;;  %v17406_v9 = vld [vmem:[%s19711_s19 + $0x14f0] ss:$72 sps:$4 sm:$0xff]  }
 0x233   : > { %7059 = vmatpush1.bf16.msra.mxu1 %v17331_v11  ;;  %7019 = vmatprep.subr.bf16.mxu0 %v17336_v14  ;;  %v17409_v11 = vld [vmem:[%s19711_s19 + $0x2f8] ss:$72 sps:$4 sm:$0xff]   ;;  %v17414_v14 = vld [vmem:[%s19711_s19 + $0x1584] ss:$72 sps:$4 sm:$0xff]  }
 0x234   : > { %7060 = vmatprep.subr.bf16.mxu1 %v17339_v15  ;;  %v17417_v15 = vld [vmem:[%s19711_s19 + $0x38c] ss:$72 sps:$4 sm:$0xff]  }
 0x236   : > { %7020 = vmatpush1.bf16.msra.mxu0 %v17334_v18 }
 0x237   : > { %7061 = vmatpush1.bf16.msra.mxu1 %v17337_v19  ;;  %7021 = vmatprep.subr.bf16.mxu0 %v17342_v20  ;;  %v17412_v20 = vld [vmem:[%s19711_s19 + $0x1580] ss:$72 sps:$4 sm:$0xff]  }
 0x238   : > { %7062 = vmatprep.subr.bf16.mxu1 %v17345_v21  ;;  %v17415_v21 = vld [vmem:[%s19711_s19 + $0x388] ss:$72 sps:$4 sm:$0xff]  }
 0x23a   : > { %7022 = vmatpush1.bf16.msra.mxu0 %v17340_v23 }
 0x23b   : > { %7063 = vmatpush1.bf16.msra.mxu1 %v17343_v24  ;;  %7023 = vmatprep.subr.bf16.mxu0 %v17348_v25 }
 0x23c   : > { %7064 = vmatprep.subr.bf16.mxu1 %v17351_v26 }
 0x23e   : > { %7024 = vmatpush1.bf16.msra.mxu0 %v17346_v28 }
 0x23f   : > { %7065 = vmatpush1.bf16.msra.mxu1 %v17349_v29  ;;  %7025 = vmatprep.subr.bf16.mxu0 %v17354_v30 }
 0x240   : > { %7066 = vmatprep.subr.bf16.mxu1 %v17357_v31 }
 0x242   : > { %7026 = vmatpush1.bf16.msra.mxu0 %v17352_v32  ;;  %v17420_v32 = vld [vmem:[%s19711_s19 + $0x1614] ss:$72 sps:$4 sm:$0xff]  }
 0x243   : > { %7067 = vmatpush1.bf16.msra.mxu1 %v17355_v33  ;;  %7027 = vmatprep.subr.bf16.mxu0 %v17360_v34  ;;  %v17423_v33 = vld [vmem:[%s19711_s19 + $0x41c] ss:$72 sps:$4 sm:$0xff]   ;;  %v17418_v34 = vld [vmem:[%s19711_s19 + $0x1610] ss:$72 sps:$4 sm:$0xff]  }
 0x244   : > { %7068 = vmatprep.subr.bf16.mxu1 %v17363_v36  ;;  %v17421_v36 = vld [vmem:[%s19711_s19 + $0x418] ss:$72 sps:$4 sm:$0xff]  }
 0x246   : > { %7028 = vmatpush1.bf16.msra.mxu0 %v17358_v39  ;;  %v17426_v39 = vld [vmem:[%s19711_s19 + $0x16a4] ss:$72 sps:$4 sm:$0xff]  }
 0x247   : > { %7069 = vmatpush1.bf16.msra.mxu1 %v17361_v40  ;;  %7029 = vmatprep.subr.bf16.mxu0 %v17366_v41  ;;  %v17429_v40 = vld [vmem:[%s19711_s19 + $0x4ac] ss:$72 sps:$4 sm:$0xff]   ;;  %v17424_v41 = vld [vmem:[%s19711_s19 + $0x16a0] ss:$72 sps:$4 sm:$0xff]  }
 0x248   : > { %7070 = vmatprep.subr.bf16.mxu1 %v17369_v42  ;;  %v17427_v42 = vld [vmem:[%s19711_s19 + $0x4a8] ss:$72 sps:$4 sm:$0xff]  }
 0x24a   : > { %7030 = vmatpush1.bf16.msra.mxu0 %v17364_v13  ;;  %v17432_v13 = vld [vmem:[%s19711_s19 + $0x1734] ss:$72 sps:$4 sm:$0xff]  }
 0x24b   : > { %7071 = vmatpush1.bf16.msra.mxu1 %v17367_v44  ;;  %7031 = vmatprep.subr.bf16.mxu0 %v17372_v16  ;;  %v17435_v44 = vld [vmem:[%s19711_s19 + $0x53c] ss:$72 sps:$4 sm:$0xff]   ;;  %v17430_v16 = vld [vmem:[%s19711_s19 + $0x1730] ss:$72 sps:$4 sm:$0xff]  }
 0x24c   : > { %7072 = vmatprep.subr.bf16.mxu1 %v17375_v45  ;;  %v17433_v45 = vld [vmem:[%s19711_s19 + $0x538] ss:$72 sps:$4 sm:$0xff]  }
 0x24e   : > { %7032 = vmatpush1.bf16.msra.mxu0 %v17370_v46  ;;  %v17438_v46 = vld [vmem:[%s19711_s19 + $0x17c4] ss:$72 sps:$4 sm:$0xff]  }
 0x24f   : > { %7073 = vmatpush1.bf16.msra.mxu1 %v17373_v47  ;;  %7083 = vmatprep.subr.bf16.mxu0 %v17378_v48  ;;  %v17441_v47 = vld [vmem:[%s19711_s19 + $0x5cc] ss:$72 sps:$4 sm:$0xff]   ;;  %v17436_v48 = vld [vmem:[%s19711_s19 + $0x17c0] ss:$72 sps:$4 sm:$0xff]  }
 0x250   : > { %7124 = vmatprep.subr.bf16.mxu1 %v17381_v50  ;;  %v17439_v50 = vld [vmem:[%s19711_s19 + $0x5c8] ss:$72 sps:$4 sm:$0xff]  }
 0x251   : > { %7034 = vmatmul.mubr.bf16.vlgmr.msra.gmra.mrb[24].mxu0 %v19808_v12 }
 0x252   : > { %7075 = vmatmul.mubr.bf16.vlgmr.msra.gmra.mrb[24].mxu1 %v19817_v17  ;;  %7084 = vmatpush1.bf16.msra.mxu0 %v17376_v51  ;;  %v17444_v51 = vld [vmem:[%s19711_s19 + $0x1854] ss:$72 sps:$4 sm:$0xff]  }
 0x253   : > { %7125 = vmatpush1.bf16.msra.mxu1 %v17379_v52  ;;  %7085 = vmatprep.subr.bf16.mxu0 %v17384_v53  ;;  %v17447_v52 = vld [vmem:[%s19711_s19 + $0x65c] ss:$72 sps:$4 sm:$0xff]   ;;  %v17442_v53 = vld [vmem:[%s19711_s19 + $0x1850] ss:$72 sps:$4 sm:$0xff]  }
 0x254   : > { %7126 = vmatprep.subr.bf16.mxu1 %v17387_v54  ;;  %7115 = vmatprep.mubr.bf16.mxu0 %v19824_v22  ;;  %v17445_v54 = vld [vmem:[%s19711_s19 + $0x658] ss:$72 sps:$4 sm:$0xff]  }
 0x255   : > { %7156 = vmatprep.mubr.bf16.mxu1 %v19784_v60 }
 0x256   : > { %7086 = vmatpush1.bf16.msra.mxu0 %v17382_v55  ;;  %v17450_v55 = vld [vmem:[%s19711_s19 + $0x18e4] ss:$72 sps:$4 sm:$0xff]  }
 0x257   : > { %7127 = vmatpush1.bf16.msra.mxu1 %v17385_v56  ;;  %7087 = vmatprep.subr.bf16.mxu0 %v17390_v57  ;;  %v17453_v56 = vld [vmem:[%s19711_s19 + $0x6ec] ss:$72 sps:$4 sm:$0xff]   ;;  %v17448_v57 = vld [vmem:[%s19711_s19 + $0x18e0] ss:$72 sps:$4 sm:$0xff]  }
 0x258   : > { %7128 = vmatprep.subr.bf16.mxu1 %v17393_v58  ;;  %v17451_v58 = vld [vmem:[%s19711_s19 + $0x6e8] ss:$72 sps:$4 sm:$0xff]  }
 0x25a   : > { %7088 = vmatpush1.bf16.msra.mxu0 %v17388_v59  ;;  %v17456_v59 = vld [vmem:[%s19711_s19 + $0x1974] ss:$72 sps:$4 sm:$0xff]  }
 0x25b   : > { %7129 = vmatpush1.bf16.msra.mxu1 %v17391_v61  ;;  %7089 = vmatprep.subr.bf16.mxu0 %v17396_v62  ;;  %v17459_v61 = vld [vmem:[%s19711_s19 + $0x77c] ss:$72 sps:$4 sm:$0xff]   ;;  %v17454_v62 = vld [vmem:[%s19711_s19 + $0x1970] ss:$72 sps:$4 sm:$0xff]  }
 0x25c   : > { %7130 = vmatprep.subr.bf16.mxu1 %v17399_v63  ;;  %v17457_v63 = vld [vmem:[%s19711_s19 + $0x778] ss:$72 sps:$4 sm:$0xff]  }
 0x25e   : > { %7090 = vmatpush1.bf16.msra.mxu0 %v17394_v2  ;;  %v17462_v2 = vld [vmem:[%s19711_s19 + $0x1a04] ss:$72 sps:$4 sm:$0xff]  }
 0x25f   : > { %7131 = vmatpush1.bf16.msra.mxu1 %v17397_v3  ;;  %7091 = vmatprep.subr.bf16.mxu0 %v17402_v10  ;;  %v17465_v3 = vld [vmem:[%s19711_s19 + $0x80c] ss:$72 sps:$4 sm:$0xff]   ;;  %v17460_v10 = vld [vmem:[%s19711_s19 + $0x1a00] ss:$72 sps:$4 sm:$0xff]  }
 0x260   : > { %7132 = vmatprep.subr.bf16.mxu1 %v17405_v4  ;;  %v17463_v4 = vld [vmem:[%s19711_s19 + $0x808] ss:$72 sps:$4 sm:$0xff]  }
 0x262   : > { %7092 = vmatpush1.bf16.msra.mxu0 %v17400_v37  ;;  %v17468_v37 = vld [vmem:[%s19711_s19 + $0x1a94] ss:$72 sps:$4 sm:$0xff]  }
 0x263   : > { %7133 = vmatpush1.bf16.msra.mxu1 %v17403_v6  ;;  %7093 = vmatprep.subr.bf16.mxu0 %v17408_v7  ;;  %v17471_v6 = vld [vmem:[%s19711_s19 + $0x89c] ss:$72 sps:$4 sm:$0xff]   ;;  %v17466_v7 = vld [vmem:[%s19711_s19 + $0x1a90] ss:$72 sps:$4 sm:$0xff]  }
 0x264   : > { %7134 = vmatprep.subr.bf16.mxu1 %v17411_v8  ;;  %v6789_v18 = vpop.f32.mrb[12].mxu0  ;;  %v17469_v8 = vld [vmem:[%s19711_s19 + $0x898] ss:$72 sps:$4 sm:$0xff]  }
 0x265   : > { %v6830_v19 = vpop.f32.mrb[12].mxu1  ;;  %v6791_v24 = vpop.f32.mrb[13].mxu0 }
 0x266   : > { %v20284_v23 = vadd.f32 %v6830_v19, %v6789_v18  ;;  %v6832_v25 = vpop.f32.mrb[13].mxu1  ;;  %v6793_v28 = vpop.f32.mrb[14].mxu0  ;;  %7094 = vmatpush1.bf16.msra.mxu0 %v17406_v9  ;;  %v17474_v9 = vld [vmem:[%s19711_s19 + $0x92c] ss:$72 sps:$4 sm:$0xff]   ;;  %v17480_v18 = vld [vmem:[%s19711_s19 + $0x9bc] ss:$72 sps:$4 sm:$0xff]  }
 0x267   : > { %v20286_v26 = vadd.f32 %v6832_v25, %v6791_v24  ;;  %v6834_v29 = vpop.f32.mrb[14].mxu1  ;;  %7135 = vmatpush1.bf16.msra.mxu1 %v17409_v11  ;;  %v6794_v30 = vpop.f32.mrb[15].mxu0  ;;  %7095 = vmatprep.subr.bf16.mxu0 %v17414_v14  ;;  %v17477_v11 = vld [vmem:[%s19711_s19 + $0x122c] ss:$72 sps:$4 sm:$0xff]   ;;  %v17472_v14 = vld [vmem:[%s19711_s19 + $0x928] ss:$72 sps:$4 sm:$0xff]  }
 0x268   : > { %v6835_v31 = vpop.f32.mrb[15].mxu1  ;;  %7136 = vmatprep.subr.bf16.mxu1 %v17417_v15  ;;  %v17475_v15 = vld [vmem:[%s19711_s19 + $0x1228] ss:$72 sps:$4 sm:$0xff]   ;;  %v17483_v19 = vld [vmem:[%s19711_s19 + $0x12bc] ss:$72 sps:$4 sm:$0xff]  }
 0x269   : > { %v17486_v24 = vld [vmem:[%s19711_s19 + $0xa4c] ss:$72 sps:$4 sm:$0xff]   ;;  %v17484_v28 = vld [vmem:[%s19711_s19 + $0xa48] ss:$72 sps:$4 sm:$0xff]   ;;  %v17492_v30 = vld [vmem:[%s19711_s19 + $0xadc] ss:$72 sps:$4 sm:$0xff]  }
 0x26a   : > { %7096 = vmatpush1.bf16.msra.mxu0 %v17412_v20  ;;  %v17478_v20 = vld [vmem:[%s19711_s19 + $0x9b8] ss:$72 sps:$4 sm:$0xff]   ;;  %v17489_v25 = vld [vmem:[%s19711_s19 + $0x134c] ss:$72 sps:$4 sm:$0xff]   ;;  %v17487_v29 = vld [vmem:[%s19711_s19 + $0x1348] ss:$72 sps:$4 sm:$0xff]  }
 0x26b   : > { %7137 = vmatpush1.bf16.msra.mxu1 %v17415_v21  ;;  %7097 = vmatprep.subr.bf16.mxu0 %v17420_v32  ;;  %v17481_v21 = vld [vmem:[%s19711_s19 + $0x12b8] ss:$72 sps:$4 sm:$0xff]   ;;  %v17495_v31 = vld [vmem:[%s19711_s19 + $0x13dc] ss:$72 sps:$4 sm:$0xff]  }
 0x26c   : > { %7138 = vmatprep.subr.bf16.mxu1 %v17423_v33  ;;  %v17490_v32 = vld [vmem:[%s19711_s19 + $0xad8] ss:$72 sps:$4 sm:$0xff]  }
 0x26d   : > { %v17493_v33 = vld [vmem:[%s19711_s19 + $0x13d8] ss:$72 sps:$4 sm:$0xff]  }
 0x26e   : > { %7098 = vmatpush1.bf16.msra.mxu0 %v17418_v34  ;;  %v17498_v34 = vld [vmem:[%s19711_s19 + $0xb6c] ss:$72 sps:$4 sm:$0xff]  }
 0x26f   : > { %7139 = vmatpush1.bf16.msra.mxu1 %v17421_v36  ;;  %7099 = vmatprep.subr.bf16.mxu0 %v17426_v39  ;;  %v17501_v36 = vld [vmem:[%s19711_s19 + $0x146c] ss:$72 sps:$4 sm:$0xff]   ;;  %v17496_v39 = vld [vmem:[%s19711_s19 + $0xb68] ss:$72 sps:$4 sm:$0xff]  }
 0x270   : > { %7140 = vmatprep.subr.bf16.mxu1 %v17429_v40  ;;  %v17499_v40 = vld [vmem:[%s19711_s19 + $0x1468] ss:$72 sps:$4 sm:$0xff]  }
 0x272   : > { %7100 = vmatpush1.bf16.msra.mxu0 %v17424_v41  ;;  %v17504_v41 = vld [vmem:[%s19711_s19 + $0xbfc] ss:$72 sps:$4 sm:$0xff]  }
 0x273   : > { %7141 = vmatpush1.bf16.msra.mxu1 %v17427_v42  ;;  %7101 = vmatprep.subr.bf16.mxu0 %v17432_v13  ;;  %v17507_v42 = vld [vmem:[%s19711_s19 + $0x14fc] ss:$72 sps:$4 sm:$0xff]   ;;  %v17502_v13 = vld [vmem:[%s19711_s19 + $0xbf8] ss:$72 sps:$4 sm:$0xff]  }
 0x274   : > { %7142 = vmatprep.subr.bf16.mxu1 %v17435_v44  ;;  %v17505_v44 = vld [vmem:[%s19711_s19 + $0x14f8] ss:$72 sps:$4 sm:$0xff]  }
 0x276   : > { %7102 = vmatpush1.bf16.msra.mxu0 %v17430_v16  ;;  %v17510_v16 = vld [vmem:[%s19711_s19 + $0xc8c] ss:$72 sps:$4 sm:$0xff]  }
 0x277   : > { %7143 = vmatpush1.bf16.msra.mxu1 %v17433_v45  ;;  %7103 = vmatprep.subr.bf16.mxu0 %v17438_v46  ;;  %v17513_v45 = vld [vmem:[%s19711_s19 + $0x158c] ss:$72 sps:$4 sm:$0xff]  }
 0x278   : > { %7144 = vmatprep.subr.bf16.mxu1 %v17441_v47 }
 0x27a   : > { %7104 = vmatpush1.bf16.msra.mxu0 %v17436_v48  ;;  %v17508_v48 = vld [vmem:[%s19711_s19 + $0xc88] ss:$72 sps:$4 sm:$0xff]  }
 0x27b   : > { %7145 = vmatpush1.bf16.msra.mxu1 %v17439_v50  ;;  %7105 = vmatprep.subr.bf16.mxu0 %v17444_v51  ;;  %v17511_v50 = vld [vmem:[%s19711_s19 + $0x1588] ss:$72 sps:$4 sm:$0xff]  }
 0x27c   : > { %7146 = vmatprep.subr.bf16.mxu1 %v17447_v52 }
 0x27e   : > { %7106 = vmatpush1.bf16.msra.mxu0 %v17442_v53 }
 0x27f   : > { %7147 = vmatpush1.bf16.msra.mxu1 %v17445_v54  ;;  %7107 = vmatprep.subr.bf16.mxu0 %v17450_v55 }
 0x280   : > { %7148 = vmatprep.subr.bf16.mxu1 %v17453_v56 }
 0x282   : > { %7108 = vmatpush1.bf16.msra.mxu0 %v17448_v57 }
 0x283   : > { %7149 = vmatpush1.bf16.msra.mxu1 %v17451_v58  ;;  %7109 = vmatprep.subr.bf16.mxu0 %v17456_v59  ;;  %v17519_v59 = vld [vmem:[%s19711_s19 + $0x161c] ss:$72 sps:$4 sm:$0xff]  }
 0x284   : > { %7150 = vmatprep.subr.bf16.mxu1 %v17459_v61  ;;  %v17517_v61 = vld [vmem:[%s19711_s19 + $0x1618] ss:$72 sps:$4 sm:$0xff]  }
 0x286   : > { %7110 = vmatpush1.bf16.msra.mxu0 %v17454_v62  ;;  %v17522_v62 = vld [vmem:[%s19711_s19 + $0xdac] ss:$72 sps:$4 sm:$0xff]  }
 0x287   : > { %7151 = vmatpush1.bf16.msra.mxu1 %v17457_v63  ;;  %7111 = vmatprep.subr.bf16.mxu0 %v17462_v2  ;;  %v17525_v63 = vld [vmem:[%s19711_s19 + $0x16ac] ss:$72 sps:$4 sm:$0xff]   ;;  %v17520_v2 = vld [vmem:[%s19711_s19 + $0xda8] ss:$72 sps:$4 sm:$0xff]  }
 0x288   : > { %7152 = vmatprep.subr.bf16.mxu1 %v17465_v3  ;;  %v17523_v3 = vld [vmem:[%s19711_s19 + $0x16a8] ss:$72 sps:$4 sm:$0xff]  }
 0x28a   : > { %7112 = vmatpush1.bf16.msra.mxu0 %v17460_v10  ;;  %v17528_v10 = vld [vmem:[%s19711_s19 + $0xe3c] ss:$72 sps:$4 sm:$0xff]  }
 0x28b   : > { %7153 = vmatpush1.bf16.msra.mxu1 %v17463_v4  ;;  %7113 = vmatprep.subr.bf16.mxu0 %v17468_v37  ;;  %v17531_v4 = vld [vmem:[%s19711_s19 + $0x173c] ss:$72 sps:$4 sm:$0xff]   ;;  %v17526_v37 = vld [vmem:[%s19711_s19 + $0xe38] ss:$72 sps:$4 sm:$0xff]  }
 0x28c   : > { %7154 = vmatprep.subr.bf16.mxu1 %v17471_v6  ;;  %v17529_v6 = vld [vmem:[%s19711_s19 + $0x1738] ss:$72 sps:$4 sm:$0xff]  }
 0x28e   : > { %7114 = vmatpush1.bf16.msra.mxu0 %v17466_v7  ;;  %v17534_v7 = vld [vmem:[%s19711_s19 + $0xecc] ss:$72 sps:$4 sm:$0xff]  }
 0x28f   : > { %7155 = vmatpush1.bf16.msra.mxu1 %v17469_v8  ;;  %7165 = vmatprep.subr.bf16.mxu0 %v17474_v9  ;;  %v17537_v8 = vld [vmem:[%s19711_s19 + $0x17cc] ss:$72 sps:$4 sm:$0xff]   ;;  %v17532_v9 = vld [vmem:[%s19711_s19 + $0xec8] ss:$72 sps:$4 sm:$0xff]  }
 0x290   : > { %7206 = vmatprep.subr.bf16.mxu1 %v17477_v11  ;;  %v17535_v11 = vld [vmem:[%s19711_s19 + $0x17c8] ss:$72 sps:$4 sm:$0xff]  }
 0x291   : > { %7116 = vmatmul.mubr.bf16.vlgmr.msra.gmra.mrb[28].mxu0 %v19892_v27 }
 0x292   : > { %7157 = vmatmul.mubr.bf16.vlgmr.msra.gmra.mrb[28].mxu1 %v19808_v12  ;;  %7166 = vmatpush1.bf16.msra.mxu0 %v17472_v14  ;;  %v17540_v14 = vld [vmem:[%s19711_s19 + $0xf5c] ss:$72 sps:$4 sm:$0xff]  }
 0x293   : > { %7207 = vmatpush1.bf16.msra.mxu1 %v17475_v15  ;;  %7167 = vmatprep.subr.bf16.mxu0 %v17480_v18  ;;  %v17543_v15 = vld [vmem:[%s19711_s19 + $0x185c] ss:$72 sps:$4 sm:$0xff]   ;;  %v17538_v18 = vld [vmem:[%s19711_s19 + $0xf58] ss:$72 sps:$4 sm:$0xff]  }
 0x294   : > { %7208 = vmatprep.subr.bf16.mxu1 %v17483_v19  ;;  %7197 = vmatprep.mubr.bf16.mxu0 %v19791_v0  ;;  %v17541_v19 = vld [vmem:[%s19711_s19 + $0x1858] ss:$72 sps:$4 sm:$0xff]  }
 0x295   : > { %7238 = vmatprep.mubr.bf16.mxu1 %v19824_v22 }
 0x296   : > { %7168 = vmatpush1.bf16.msra.mxu0 %v17478_v20  ;;  %v17546_v20 = vld [vmem:[%s19711_s19 + $0xfec] ss:$72 sps:$4 sm:$0xff]  }
 0x297   : > { %7209 = vmatpush1.bf16.msra.mxu1 %v17481_v21  ;;  %7169 = vmatprep.subr.bf16.mxu0 %v17486_v24  ;;  %v17549_v21 = vld [vmem:[%s19711_s19 + $0x18ec] ss:$72 sps:$4 sm:$0xff]   ;;  %v17544_v24 = vld [vmem:[%s19711_s19 + $0xfe8] ss:$72 sps:$4 sm:$0xff]  }
 0x298   : > { %7210 = vmatprep.subr.bf16.mxu1 %v17489_v25  ;;  %v17547_v25 = vld [vmem:[%s19711_s19 + $0x18e8] ss:$72 sps:$4 sm:$0xff]  }
 0x29a   : > { %7170 = vmatpush1.bf16.msra.mxu0 %v17484_v28  ;;  %v17552_v28 = vld [vmem:[%s19711_s19 + $0x107c] ss:$72 sps:$4 sm:$0xff]  }
 0x29b   : > { %7211 = vmatpush1.bf16.msra.mxu1 %v17487_v29  ;;  %7171 = vmatprep.subr.bf16.mxu0 %v17492_v30  ;;  %v17555_v29 = vld [vmem:[%s19711_s19 + $0x197c] ss:$72 sps:$4 sm:$0xff]   ;;  %v17550_v30 = vld [vmem:[%s19711_s19 + $0x1078] ss:$72 sps:$4 sm:$0xff]  }
 0x29c   : > { %7212 = vmatprep.subr.bf16.mxu1 %v17495_v31  ;;  %v17553_v31 = vld [vmem:[%s19711_s19 + $0x1978] ss:$72 sps:$4 sm:$0xff]  }
 0x29e   : > { %7172 = vmatpush1.bf16.msra.mxu0 %v17490_v32  ;;  %v17558_v32 = vld [vmem:[%s19711_s19 + $0x110c] ss:$72 sps:$4 sm:$0xff]  }
 0x29f   : > { %7213 = vmatpush1.bf16.msra.mxu1 %v17493_v33  ;;  %7173 = vmatprep.subr.bf16.mxu0 %v17498_v34  ;;  %v17561_v33 = vld [vmem:[%s19711_s19 + $0x1a0c] ss:$72 sps:$4 sm:$0xff]   ;;  %v17556_v34 = vld [vmem:[%s19711_s19 + $0x1108] ss:$72 sps:$4 sm:$0xff]  }
 0x2a0   : > { %7214 = vmatprep.subr.bf16.mxu1 %v17501_v36  ;;  %v17559_v36 = vld [vmem:[%s19711_s19 + $0x1a08] ss:$72 sps:$4 sm:$0xff]  }
 0x2a2   : > { %7174 = vmatpush1.bf16.msra.mxu0 %v17496_v39  ;;  %v17564_v39 = vld [vmem:[%s19711_s19 + $0x119c] ss:$72 sps:$4 sm:$0xff]  }
 0x2a3   : > { %7215 = vmatpush1.bf16.msra.mxu1 %v17499_v40  ;;  %7175 = vmatprep.subr.bf16.mxu0 %v17504_v41  ;;  %v17567_v40 = vld [vmem:[%s19711_s19 + $0x1a9c] ss:$72 sps:$4 sm:$0xff]   ;;  %v17562_v41 = vld [vmem:[%s19711_s19 + $0x1198] ss:$72 sps:$4 sm:$0xff]  }
 0x2a4   : > { %7216 = vmatprep.subr.bf16.mxu1 %v17507_v42  ;;  %v6871_v46 = vpop.f32.mrb[16].mxu0  ;;  %v17565_v42 = vld [vmem:[%s19711_s19 + $0x1a98] ss:$72 sps:$4 sm:$0xff]  }
 0x2a5   : > { %v20354_v47 = vpop.f32.mrb[16].mxu1  ;;  %v20359_v51 = vadd.f32 %v6871_v46, %v20284_v23  ;;  %v6873_v52 = vpop.f32.mrb[17].mxu0  ;;  %v17516_v23 = vld [vmem:[%s19711_s19 + $0xd1c] ss:$72 sps:$4 sm:$0xff]  }
 0x2a6   : > { %v20361_v53 = vpop.f32.mrb[17].mxu1  ;;  %v20364_v54 = vadd.f32 %v6873_v52, %v20286_v26  ;;  %v6875_v55 = vpop.f32.mrb[18].mxu0  ;;  %7176 = vmatpush1.bf16.msra.mxu0 %v17502_v13  ;;  %v17514_v26 = vld [vmem:[%s19711_s19 + $0xd18] ss:$72 sps:$4 sm:$0xff]   ;;  %v17570_v13 = vld [vmem:[%s19711_s19 + $0x34] ss:$72 sps:$4 sm:$0xff]  }
 0x2a7   : > { %v6916_v56 = vpop.f32.mrb[18].mxu1  ;;  %7217 = vmatpush1.bf16.msra.mxu1 %v17505_v44  ;;  %v6876_v57 = vpop.f32.mrb[19].mxu0  ;;  %7177 = vmatprep.subr.bf16.mxu0 %v17510_v16  ;;  %v17573_v44 = vld [vmem:[%s19711_s19 + $0x934] ss:$72 sps:$4 sm:$0xff]   ;;  %v17568_v16 = vld [vmem:[%s19711_s19 + $0x30] ss:$72 sps:$4 sm:$0xff]  }
 0x2a8   : > { %v6917_v58 = vpop.f32.mrb[19].mxu1  ;;  %7218 = vmatprep.subr.bf16.mxu1 %v17513_v45  ;;  %v17571_v45 = vld [vmem:[%s19711_s19 + $0x930] ss:$72 sps:$4 sm:$0xff]   ;;  %v17576_v46 = vld [vmem:[%s19711_s19 + $0xc4] ss:$72 sps:$4 sm:$0xff]  }
 0x2a9   : > { %v17577_v52 = vld [vmem:[%s19711_s19 + $0x9c0] ss:$72 sps:$4 sm:$0xff]   ;;  %v17582_v55 = vld [vmem:[%s19711_s19 + $0x154] ss:$72 sps:$4 sm:$0xff]   ;;  %v17580_v57 = vld [vmem:[%s19711_s19 + $0x150] ss:$72 sps:$4 sm:$0xff]  }
 0x2aa   : > { %7178 = vmatpush1.bf16.msra.mxu0 %v17508_v48  ;;  %v17579_v48 = vld [vmem:[%s19711_s19 + $0x9c4] ss:$72 sps:$4 sm:$0xff]   ;;  %v17585_v56 = vld [vmem:[%s19711_s19 + $0xa54] ss:$72 sps:$4 sm:$0xff]   ;;  %v17583_v58 = vld [vmem:[%s19711_s19 + $0xa50] ss:$72 sps:$4 sm:$0xff]  }
 0x2ab   : > { %7219 = vmatpush1.bf16.msra.mxu1 %v17511_v50  ;;  %7179 = vmatprep.subr.bf16.mxu0 %v17516_v23  ;;  %v17574_v50 = vld [vmem:[%s19711_s19 + $0xc0] ss:$72 sps:$4 sm:$0xff]   ;;  %v17588_v23 = vld [vmem:[%s19711_s19 + $0x1e4] ss:$72 sps:$4 sm:$0xff]  }
 0x2ac   : > { %7220 = vmatprep.subr.bf16.mxu1 %v17519_v59  ;;  %v17591_v59 = vld [vmem:[%s19711_s19 + $0xae4] ss:$72 sps:$4 sm:$0xff]  }
 0x2ae   : > { %7180 = vmatpush1.bf16.msra.mxu0 %v17514_v26  ;;  %v17586_v26 = vld [vmem:[%s19711_s19 + $0x1e0] ss:$72 sps:$4 sm:$0xff]  }
 0x2af   : > { %7221 = vmatpush1.bf16.msra.mxu1 %v17517_v61  ;;  %7181 = vmatprep.subr.bf16.mxu0 %v17522_v62  ;;  %v17589_v61 = vld [vmem:[%s19711_s19 + $0xae0] ss:$72 sps:$4 sm:$0xff]   ;;  %v17594_v62 = vld [vmem:[%s19711_s19 + $0x274] ss:$72 sps:$4 sm:$0xff]  }
 0x2b0   : > { %7222 = vmatprep.subr.bf16.mxu1 %v17525_v63  ;;  %v17597_v63 = vld [vmem:[%s19711_s19 + $0xb74] ss:$72 sps:$4 sm:$0xff]  }
 0x2b2   : > { %7182 = vmatpush1.bf16.msra.mxu0 %v17520_v2  ;;  %v17592_v2 = vld [vmem:[%s19711_s19 + $0x270] ss:$72 sps:$4 sm:$0xff]  }
 0x2b3   : > { %7223 = vmatpush1.bf16.msra.mxu1 %v17523_v3  ;;  %7183 = vmatprep.subr.bf16.mxu0 %v17528_v10  ;;  %v17595_v3 = vld [vmem:[%s19711_s19 + $0xb70] ss:$72 sps:$4 sm:$0xff]   ;;  %v17600_v10 = vld [vmem:[%s19711_s19 + $0x304] ss:$72 sps:$4 sm:$0xff]  }
 0x2b4   : > { %7224 = vmatprep.subr.bf16.mxu1 %v17531_v4  ;;  %v17603_v4 = vld [vmem:[%s19711_s19 + $0xc04] ss:$72 sps:$4 sm:$0xff]  }
 0x2b6   : > { %7184 = vmatpush1.bf16.msra.mxu0 %v17526_v37  ;;  %v17598_v37 = vld [vmem:[%s19711_s19 + $0x300] ss:$72 sps:$4 sm:$0xff]  }
 0x2b7   : > { %7225 = vmatpush1.bf16.msra.mxu1 %v17529_v6  ;;  %7185 = vmatprep.subr.bf16.mxu0 %v17534_v7  ;;  %v17601_v6 = vld [vmem:[%s19711_s19 + $0xc00] ss:$72 sps:$4 sm:$0xff]   ;;  %v17606_v7 = vld [vmem:[%s19711_s19 + $0x394] ss:$72 sps:$4 sm:$0xff]  }
 0x2b8   : > { %7226 = vmatprep.subr.bf16.mxu1 %v17537_v8  ;;  %v17609_v8 = vld [vmem:[%s19711_s19 + $0xc94] ss:$72 sps:$4 sm:$0xff]  }
 0x2ba   : > { %7186 = vmatpush1.bf16.msra.mxu0 %v17532_v9 }
 0x2bb   : > { %7227 = vmatpush1.bf16.msra.mxu1 %v17535_v11  ;;  %7187 = vmatprep.subr.bf16.mxu0 %v17540_v14  ;;  %v17604_v14 = vld [vmem:[%s19711_s19 + $0x390] ss:$72 sps:$4 sm:$0xff]  }
 0x2bc   : > { %7228 = vmatprep.subr.bf16.mxu1 %v17543_v15  ;;  %v17607_v15 = vld [vmem:[%s19711_s19 + $0xc90] ss:$72 sps:$4 sm:$0xff]  }
 0x2be   : > { %7188 = vmatpush1.bf16.msra.mxu0 %v17538_v18 }
 0x2bf   : > { %7229 = vmatpush1.bf16.msra.mxu1 %v17541_v19  ;;  %7189 = vmatprep.subr.bf16.mxu0 %v17546_v20 }
 0x2c0   : > { %7230 = vmatprep.subr.bf16.mxu1 %v17549_v21 }
 0x2c2   : > { %7190 = vmatpush1.bf16.msra.mxu0 %v17544_v24 }
 0x2c3   : > { %7231 = vmatpush1.bf16.msra.mxu1 %v17547_v25  ;;  %7191 = vmatprep.subr.bf16.mxu0 %v17552_v28 }
 0x2c4   : > { %7232 = vmatprep.subr.bf16.mxu1 %v17555_v29 }
 0x2c6   : > { %7192 = vmatpush1.bf16.msra.mxu0 %v17550_v30 }
 0x2c7   : > { %7233 = vmatpush1.bf16.msra.mxu1 %v17553_v31  ;;  %7193 = vmatprep.subr.bf16.mxu0 %v17558_v32  ;;  %v17615_v31 = vld [vmem:[%s19711_s19 + $0xd24] ss:$72 sps:$4 sm:$0xff]  }
 0x2c8   : > { %7234 = vmatprep.subr.bf16.mxu1 %v17561_v33  ;;  %v17613_v33 = vld [vmem:[%s19711_s19 + $0xd20] ss:$72 sps:$4 sm:$0xff]  }
 0x2ca   : > { %7194 = vmatpush1.bf16.msra.mxu0 %v17556_v34  ;;  %v17618_v34 = vld [vmem:[%s19711_s19 + $0x4b4] ss:$72 sps:$4 sm:$0xff]  }
 0x2cb   : > { %7235 = vmatpush1.bf16.msra.mxu1 %v17559_v36  ;;  %7195 = vmatprep.subr.bf16.mxu0 %v17564_v39  ;;  %v17621_v36 = vld [vmem:[%s19711_s19 + $0xdb4] ss:$72 sps:$4 sm:$0xff]   ;;  %v17616_v39 = vld [vmem:[%s19711_s19 + $0x4b0] ss:$72 sps:$4 sm:$0xff]  }
 0x2cc   : > { %7236 = vmatprep.subr.bf16.mxu1 %v17567_v40  ;;  %v17619_v40 = vld [vmem:[%s19711_s19 + $0xdb0] ss:$72 sps:$4 sm:$0xff]  }
 0x2ce   : > { %7196 = vmatpush1.bf16.msra.mxu0 %v17562_v41  ;;  %v17624_v41 = vld [vmem:[%s19711_s19 + $0x544] ss:$72 sps:$4 sm:$0xff]  }
 0x2cf   : > { %7237 = vmatpush1.bf16.msra.mxu1 %v17565_v42  ;;  %7247 = vmatprep.subr.bf16.mxu0 %v17570_v13  ;;  %v17627_v42 = vld [vmem:[%s19711_s19 + $0xe44] ss:$72 sps:$4 sm:$0xff]   ;;  %v17622_v13 = vld [vmem:[%s19711_s19 + $0x540] ss:$72 sps:$4 sm:$0xff]  }
 0x2d0   : > { %7288 = vmatprep.subr.bf16.mxu1 %v17573_v44  ;;  %v17625_v44 = vld [vmem:[%s19711_s19 + $0xe40] ss:$72 sps:$4 sm:$0xff]  }
 0x2d1   : > { %7198 = vmatmul.mubr.bf16.vlgmr.msra.gmra.mrb[32].mxu0 %v19817_v17 }
 0x2d2   : > { %7239 = vmatmul.mubr.bf16.vlgmr.msra.gmra.mrb[32].mxu1 %v19892_v27  ;;  %7248 = vmatpush1.bf16.msra.mxu0 %v17568_v16  ;;  %v17630_v16 = vld [vmem:[%s19711_s19 + $0x5d4] ss:$72 sps:$4 sm:$0xff]  }
 0x2d3   : > { %7289 = vmatpush1.bf16.msra.mxu1 %v17571_v45  ;;  %7249 = vmatprep.subr.bf16.mxu0 %v17576_v46  ;;  %v17633_v45 = vld [vmem:[%s19711_s19 + $0xed4] ss:$72 sps:$4 sm:$0xff]   ;;  %v17628_v46 = vld [vmem:[%s19711_s19 + $0x5d0] ss:$72 sps:$4 sm:$0xff]  }
 0x2d4   : > { %7290 = vmatprep.subr.bf16.mxu1 %v17579_v48  ;;  %7279 = vmatprep.mubr.bf16.mxu0 %v19784_v60  ;;  %v17631_v48 = vld [vmem:[%s19711_s19 + $0xed0] ss:$72 sps:$4 sm:$0xff]  }
 0x2d5   : > { %7320 = vmatprep.mubr.bf16.mxu1 %v19791_v0 }
 0x2d6   : > { %7250 = vmatpush1.bf16.msra.mxu0 %v17574_v50  ;;  %v17636_v50 = vld [vmem:[%s19711_s19 + $0x664] ss:$72 sps:$4 sm:$0xff]  }
 0x2d7   : > { %7291 = vmatpush1.bf16.msra.mxu1 %v17577_v52  ;;  %7251 = vmatprep.subr.bf16.mxu0 %v17582_v55  ;;  %v17639_v52 = vld [vmem:[%s19711_s19 + $0xf64] ss:$72 sps:$4 sm:$0xff]   ;;  %v17634_v55 = vld [vmem:[%s19711_s19 + $0x660] ss:$72 sps:$4 sm:$0xff]  }
 0x2d8   : > { %7292 = vmatprep.subr.bf16.mxu1 %v17585_v56  ;;  %v17637_v56 = vld [vmem:[%s19711_s19 + $0xf60] ss:$72 sps:$4 sm:$0xff]  }
 0x2da   : > { %7252 = vmatpush1.bf16.msra.mxu0 %v17580_v57  ;;  %v17642_v57 = vld [vmem:[%s19711_s19 + $0x6f4] ss:$72 sps:$4 sm:$0xff]  }
 0x2db   : > { %7293 = vmatpush1.bf16.msra.mxu1 %v17583_v58  ;;  %7253 = vmatprep.subr.bf16.mxu0 %v17588_v23  ;;  %v17645_v58 = vld [vmem:[%s19711_s19 + $0xff4] ss:$72 sps:$4 sm:$0xff]   ;;  %v17640_v23 = vld [vmem:[%s19711_s19 + $0x6f0] ss:$72 sps:$4 sm:$0xff]  }
 0x2dc   : > { %7294 = vmatprep.subr.bf16.mxu1 %v17591_v59  ;;  %v17643_v59 = vld [vmem:[%s19711_s19 + $0xff0] ss:$72 sps:$4 sm:$0xff]  }
 0x2de   : > { %7254 = vmatpush1.bf16.msra.mxu0 %v17586_v26  ;;  %v17648_v26 = vld [vmem:[%s19711_s19 + $0x784] ss:$72 sps:$4 sm:$0xff]  }
 0x2df   : > { %7295 = vmatpush1.bf16.msra.mxu1 %v17589_v61  ;;  %7255 = vmatprep.subr.bf16.mxu0 %v17594_v62  ;;  %v17651_v61 = vld [vmem:[%s19711_s19 + $0x1084] ss:$72 sps:$4 sm:$0xff]   ;;  %v17646_v62 = vld [vmem:[%s19711_s19 + $0x780] ss:$72 sps:$4 sm:$0xff]  }
 0x2e0   : > { %7296 = vmatprep.subr.bf16.mxu1 %v17597_v63  ;;  %v17649_v63 = vld [vmem:[%s19711_s19 + $0x1080] ss:$72 sps:$4 sm:$0xff]  }
 0x2e2   : > { %7256 = vmatpush1.bf16.msra.mxu0 %v17592_v2  ;;  %v17654_v2 = vld [vmem:[%s19711_s19 + $0x814] ss:$72 sps:$4 sm:$0xff]  }
 0x2e3   : > { %7297 = vmatpush1.bf16.msra.mxu1 %v17595_v3  ;;  %7257 = vmatprep.subr.bf16.mxu0 %v17600_v10  ;;  %v17657_v3 = vld [vmem:[%s19711_s19 + $0x1114] ss:$72 sps:$4 sm:$0xff]   ;;  %v17652_v10 = vld [vmem:[%s19711_s19 + $0x810] ss:$72 sps:$4 sm:$0xff]  }
 0x2e4   : > { %7298 = vmatprep.subr.bf16.mxu1 %v17603_v4  ;;  %v6953_v9 = vpop.f32.mrb[20].mxu0  ;;  %v17655_v4 = vld [vmem:[%s19711_s19 + $0x1110] ss:$72 sps:$4 sm:$0xff]  }
 0x2e5   : > { %v6994_v11 = vpop.f32.mrb[20].mxu1  ;;  %v6954_v18 = vadd.f32 %v6953_v9, %v20354_v47  ;;  %v6955_v19 = vpop.f32.mrb[21].mxu0  ;;  %v17612_v47 = vld [vmem:[%s19711_s19 + $0x424] ss:$72 sps:$4 sm:$0xff]   ;;  %v17666_v9 = vld [vmem:[%s19711_s19 + $0x1234] ss:$72 sps:$4 sm:$0xff]  }
 0x2e6   : > { %v6996_v20 = vpop.f32.mrb[21].mxu1  ;;  %v6956_v21 = vadd.f32 %v6955_v19, %v20361_v53  ;;  %v6957_v24 = vpop.f32.mrb[22].mxu0  ;;  %7258 = vmatpush1.bf16.msra.mxu0 %v17598_v37  ;;  %v17610_v53 = vld [vmem:[%s19711_s19 + $0x420] ss:$72 sps:$4 sm:$0xff]   ;;  %v17660_v37 = vld [vmem:[%s19711_s19 + $0x8a4] ss:$72 sps:$4 sm:$0xff]  }
 0x2e7   : > { %v6998_v25 = vpop.f32.mrb[22].mxu1  ;;  %7299 = vmatpush1.bf16.msra.mxu1 %v17601_v6  ;;  %v20436_v28 = vadd.f32 %v6994_v11, %v6954_v18  ;;  %v6958_v29 = vpop.f32.mrb[23].mxu0  ;;  %7259 = vmatprep.subr.bf16.mxu0 %v17606_v7  ;;  %v17663_v6 = vld [vmem:[%s19711_s19 + $0x11a4] ss:$72 sps:$4 sm:$0xff]   ;;  %v17658_v7 = vld [vmem:[%s19711_s19 + $0x8a0] ss:$72 sps:$4 sm:$0xff]  }
 0x2e8   : > { %v6999_v30 = vpop.f32.mrb[23].mxu1  ;;  %7300 = vmatprep.subr.bf16.mxu1 %v17609_v8  ;;  %v20440_v32 = vadd.f32 %v6996_v20, %v6956_v21  ;;  %v17661_v8 = vld [vmem:[%s19711_s19 + $0x11a0] ss:$72 sps:$4 sm:$0xff]   ;;  %v17669_v11 = vld [vmem:[%s19711_s19 + $0x3c] ss:$72 sps:$4 sm:$0xff]  }
 0x2e9   : > { %v17672_v18 = vld [vmem:[%s19711_s19 + $0x12c4] ss:$72 sps:$4 sm:$0xff]   ;;  %v17670_v20 = vld [vmem:[%s19711_s19 + $0x12c0] ss:$72 sps:$4 sm:$0xff]   ;;  %v17678_v24 = vld [vmem:[%s19711_s19 + $0x1354] ss:$72 sps:$4 sm:$0xff]  }
 0x2ea   : > { %7260 = vmatpush1.bf16.msra.mxu0 %v17604_v14  ;;  %v17664_v14 = vld [vmem:[%s19711_s19 + $0x1230] ss:$72 sps:$4 sm:$0xff]   ;;  %v17675_v19 = vld [vmem:[%s19711_s19 + $0xcc] ss:$72 sps:$4 sm:$0xff]   ;;  %v17681_v25 = vld [vmem:[%s19711_s19 + $0x15c] ss:$72 sps:$4 sm:$0xff]  }
 0x2eb   : > { %7301 = vmatpush1.bf16.msra.mxu1 %v17607_v15  ;;  %7261 = vmatprep.subr.bf16.mxu0 %v17612_v47  ;;  %v17667_v15 = vld [vmem:[%s19711_s19 + $0x38] ss:$72 sps:$4 sm:$0xff]   ;;  %v17673_v21 = vld [vmem:[%s19711_s19 + $0xc8] ss:$72 sps:$4 sm:$0xff]   ;;  %v17684_v47 = vld [vmem:[%s19711_s19 + $0x13e4] ss:$72 sps:$4 sm:$0xff]  }
 0x2ec   : > { %7302 = vmatprep.subr.bf16.mxu1 %v17615_v31  ;;  %v17676_v29 = vld [vmem:[%s19711_s19 + $0x1350] ss:$72 sps:$4 sm:$0xff]   ;;  %v17687_v31 = vld [vmem:[%s19711_s19 + $0x1ec] ss:$72 sps:$4 sm:$0xff]  }
 0x2ed   : > { %v17679_v30 = vld [vmem:[%s19711_s19 + $0x158] ss:$72 sps:$4 sm:$0xff]  }
 0x2ee   : > { %7262 = vmatpush1.bf16.msra.mxu0 %v17610_v53  ;;  %v17682_v53 = vld [vmem:[%s19711_s19 + $0x13e0] ss:$72 sps:$4 sm:$0xff]  }
 0x2ef   : > { %7303 = vmatpush1.bf16.msra.mxu1 %v17613_v33  ;;  %7263 = vmatprep.subr.bf16.mxu0 %v17618_v34  ;;  %v17685_v33 = vld [vmem:[%s19711_s19 + $0x1e8] ss:$72 sps:$4 sm:$0xff]   ;;  %v17690_v34 = vld [vmem:[%s19711_s19 + $0x1474] ss:$72 sps:$4 sm:$0xff]  }
 0x2f0   : > { %7304 = vmatprep.subr.bf16.mxu1 %v17621_v36  ;;  %v17693_v36 = vld [vmem:[%s19711_s19 + $0x27c] ss:$72 sps:$4 sm:$0xff]  }
 0x2f2   : > { %7264 = vmatpush1.bf16.msra.mxu0 %v17616_v39  ;;  %v17688_v39 = vld [vmem:[%s19711_s19 + $0x1470] ss:$72 sps:$4 sm:$0xff]  }
 0x2f3   : > { %7305 = vmatpush1.bf16.msra.mxu1 %v17619_v40  ;;  %7265 = vmatprep.subr.bf16.mxu0 %v17624_v41  ;;  %v17691_v40 = vld [vmem:[%s19711_s19 + $0x278] ss:$72 sps:$4 sm:$0xff]   ;;  %v17696_v41 = vld [vmem:[%s19711_s19 + $0x1504] ss:$72 sps:$4 sm:$0xff]  }
 0x2f4   : > { %7306 = vmatprep.subr.bf16.mxu1 %v17627_v42  ;;  %v17699_v42 = vld [vmem:[%s19711_s19 + $0x30c] ss:$72 sps:$4 sm:$0xff]  }
 0x2f6   : > { %7266 = vmatpush1.bf16.msra.mxu0 %v17622_v13  ;;  %v17694_v13 = vld [vmem:[%s19711_s19 + $0x1500] ss:$72 sps:$4 sm:$0xff]  }
 0x2f7   : > { %7307 = vmatpush1.bf16.msra.mxu1 %v17625_v44  ;;  %7267 = vmatprep.subr.bf16.mxu0 %v17630_v16  ;;  %v17697_v44 = vld [vmem:[%s19711_s19 + $0x308] ss:$72 sps:$4 sm:$0xff]   ;;  %v17702_v16 = vld [vmem:[%s19711_s19 + $0x1594] ss:$72 sps:$4 sm:$0xff]  }
 0x2f8   : > { %7308 = vmatprep.subr.bf16.mxu1 %v17633_v45  ;;  %v17705_v45 = vld [vmem:[%s19711_s19 + $0x39c] ss:$72 sps:$4 sm:$0xff]  }
 0x2fa   : > { %7268 = vmatpush1.bf16.msra.mxu0 %v17628_v46 }
 0x2fb   : > { %7309 = vmatpush1.bf16.msra.mxu1 %v17631_v48  ;;  %7269 = vmatprep.subr.bf16.mxu0 %v17636_v50  ;;  %v17700_v50 = vld [vmem:[%s19711_s19 + $0x1590] ss:$72 sps:$4 sm:$0xff]  }
 0x2fc   : > { %7310 = vmatprep.subr.bf16.mxu1 %v17639_v52  ;;  %v17703_v52 = vld [vmem:[%s19711_s19 + $0x398] ss:$72 sps:$4 sm:$0xff]  }
 0x2fe   : > { %7270 = vmatpush1.bf16.msra.mxu0 %v17634_v55 }
 0x2ff   : > { %7311 = vmatpush1.bf16.msra.mxu1 %v17637_v56  ;;  %7271 = vmatprep.subr.bf16.mxu0 %v17642_v57 }
 0x300   : > { %7312 = vmatprep.subr.bf16.mxu1 %v17645_v58 }
 0x302   : > { %7272 = vmatpush1.bf16.msra.mxu0 %v17640_v23 }
 0x303   : > { %7313 = vmatpush1.bf16.msra.mxu1 %v17643_v59  ;;  %7273 = vmatprep.subr.bf16.mxu0 %v17648_v26 }
 0x304   : > { %7314 = vmatprep.subr.bf16.mxu1 %v17651_v61 }
 0x306   : > { %7274 = vmatpush1.bf16.msra.mxu0 %v17646_v62  ;;  %v17708_v62 = vld [vmem:[%s19711_s19 + $0x1624] ss:$72 sps:$4 sm:$0xff]  }
 0x307   : > { %7315 = vmatpush1.bf16.msra.mxu1 %v17649_v63  ;;  %7275 = vmatprep.subr.bf16.mxu0 %v17654_v2  ;;  %v17711_v63 = vld [vmem:[%s19711_s19 + $0x42c] ss:$72 sps:$4 sm:$0xff]   ;;  %v17706_v2 = vld [vmem:[%s19711_s19 + $0x1620] ss:$72 sps:$4 sm:$0xff]  }
 0x308   : > { %7316 = vmatprep.subr.bf16.mxu1 %v17657_v3  ;;  %v17709_v3 = vld [vmem:[%s19711_s19 + $0x428] ss:$72 sps:$4 sm:$0xff]  }
 0x30a   : > { %7276 = vmatpush1.bf16.msra.mxu0 %v17652_v10  ;;  %v17714_v10 = vld [vmem:[%s19711_s19 + $0x16b4] ss:$72 sps:$4 sm:$0xff]  }
 0x30b   : > { %7317 = vmatpush1.bf16.msra.mxu1 %v17655_v4  ;;  %7277 = vmatprep.subr.bf16.mxu0 %v17660_v37  ;;  %v17717_v4 = vld [vmem:[%s19711_s19 + $0x4bc] ss:$72 sps:$4 sm:$0xff]   ;;  %v17712_v37 = vld [vmem:[%s19711_s19 + $0x16b0] ss:$72 sps:$4 sm:$0xff]  }
 0x30c   : > { %7318 = vmatprep.subr.bf16.mxu1 %v17663_v6  ;;  %v17715_v6 = vld [vmem:[%s19711_s19 + $0x4b8] ss:$72 sps:$4 sm:$0xff]  }
 0x30e   : > { %7278 = vmatpush1.bf16.msra.mxu0 %v17658_v7  ;;  %v17720_v7 = vld [vmem:[%s19711_s19 + $0x1744] ss:$72 sps:$4 sm:$0xff]  }
 0x30f   : > { %7319 = vmatpush1.bf16.msra.mxu1 %v17661_v8  ;;  %7329 = vmatprep.subr.bf16.mxu0 %v17666_v9  ;;  %v17723_v8 = vld [vmem:[%s19711_s19 + $0x54c] ss:$72 sps:$4 sm:$0xff]   ;;  %v17718_v9 = vld [vmem:[%s19711_s19 + $0x1740] ss:$72 sps:$4 sm:$0xff]  }
 0x310   : > { %7370 = vmatprep.subr.bf16.mxu1 %v17669_v11  ;;  %v17721_v11 = vld [vmem:[%s19711_s19 + $0x548] ss:$72 sps:$4 sm:$0xff]  }
 0x311   : > { %7280 = vmatmul.mubr.bf16.vlgmr.msra.gmra.mrb[36].mxu0 %v19808_v12 }
 0x312   : > { %7321 = vmatmul.mubr.bf16.vlgmr.msra.gmra.mrb[36].mxu1 %v19817_v17  ;;  %7330 = vmatpush1.bf16.msra.mxu0 %v17664_v14  ;;  %v17726_v14 = vld [vmem:[%s19711_s19 + $0x17d4] ss:$72 sps:$4 sm:$0xff]  }
 0x313   : > { %7371 = vmatpush1.bf16.msra.mxu1 %v17667_v15  ;;  %7331 = vmatprep.subr.bf16.mxu0 %v17672_v18  ;;  %v17729_v15 = vld [vmem:[%s19711_s19 + $0x5dc] ss:$72 sps:$4 sm:$0xff]   ;;  %v17724_v18 = vld [vmem:[%s19711_s19 + $0x17d0] ss:$72 sps:$4 sm:$0xff]  }
 0x314   : > { %7372 = vmatprep.subr.bf16.mxu1 %v17675_v19  ;;  %7361 = vmatprep.mubr.bf16.mxu0 %v19824_v22  ;;  %v17727_v19 = vld [vmem:[%s19711_s19 + $0x5d8] ss:$72 sps:$4 sm:$0xff]  }
 0x315   : > { %7402 = vmatprep.mubr.bf16.mxu1 %v19784_v60 }
 0x316   : > { %7332 = vmatpush1.bf16.msra.mxu0 %v17670_v20  ;;  %v17732_v20 = vld [vmem:[%s19711_s19 + $0x1864] ss:$72 sps:$4 sm:$0xff]  }
 0x317   : > { %7373 = vmatpush1.bf16.msra.mxu1 %v17673_v21  ;;  %7333 = vmatprep.subr.bf16.mxu0 %v17678_v24  ;;  %v17735_v21 = vld [vmem:[%s19711_s19 + $0x66c] ss:$72 sps:$4 sm:$0xff]   ;;  %v17730_v24 = vld [vmem:[%s19711_s19 + $0x1860] ss:$72 sps:$4 sm:$0xff]  }
 0x318   : > { %7374 = vmatprep.subr.bf16.mxu1 %v17681_v25  ;;  %v17733_v25 = vld [vmem:[%s19711_s19 + $0x668] ss:$72 sps:$4 sm:$0xff]  }
 0x31a   : > { %7334 = vmatpush1.bf16.msra.mxu0 %v17676_v29  ;;  %v17738_v29 = vld [vmem:[%s19711_s19 + $0x18f4] ss:$72 sps:$4 sm:$0xff]  }
 0x31b   : > { %7375 = vmatpush1.bf16.msra.mxu1 %v17679_v30  ;;  %7335 = vmatprep.subr.bf16.mxu0 %v17684_v47  ;;  %v17741_v30 = vld [vmem:[%s19711_s19 + $0x6fc] ss:$72 sps:$4 sm:$0xff]   ;;  %v17736_v47 = vld [vmem:[%s19711_s19 + $0x18f0] ss:$72 sps:$4 sm:$0xff]  }
 0x31c   : > { %7376 = vmatprep.subr.bf16.mxu1 %v17687_v31  ;;  %v17739_v31 = vld [vmem:[%s19711_s19 + $0x6f8] ss:$72 sps:$4 sm:$0xff]  }
 0x31e   : > { %7336 = vmatpush1.bf16.msra.mxu0 %v17682_v53  ;;  %v17744_v53 = vld [vmem:[%s19711_s19 + $0x1984] ss:$72 sps:$4 sm:$0xff]  }
 0x31f   : > { %7377 = vmatpush1.bf16.msra.mxu1 %v17685_v33  ;;  %7337 = vmatprep.subr.bf16.mxu0 %v17690_v34  ;;  %v17747_v33 = vld [vmem:[%s19711_s19 + $0x78c] ss:$72 sps:$4 sm:$0xff]   ;;  %v17742_v34 = vld [vmem:[%s19711_s19 + $0x1980] ss:$72 sps:$4 sm:$0xff]  }
 0x320   : > { %7378 = vmatprep.subr.bf16.mxu1 %v17693_v36  ;;  %v17745_v36 = vld [vmem:[%s19711_s19 + $0x788] ss:$72 sps:$4 sm:$0xff]  }
 0x322   : > { %7338 = vmatpush1.bf16.msra.mxu0 %v17688_v39  ;;  %v17750_v39 = vld [vmem:[%s19711_s19 + $0x1a14] ss:$72 sps:$4 sm:$0xff]  }
 0x323   : > { %7379 = vmatpush1.bf16.msra.mxu1 %v17691_v40  ;;  %7339 = vmatprep.subr.bf16.mxu0 %v17696_v41  ;;  %v17753_v40 = vld [vmem:[%s19711_s19 + $0x81c] ss:$72 sps:$4 sm:$0xff]   ;;  %v17748_v41 = vld [vmem:[%s19711_s19 + $0x1a10] ss:$72 sps:$4 sm:$0xff]  }
 0x324   : > { %7380 = vmatprep.subr.bf16.mxu1 %v17699_v42  ;;  %v7035_v46 = vpop.f32.mrb[24].mxu0  ;;  %v17751_v42 = vld [vmem:[%s19711_s19 + $0x818] ss:$72 sps:$4 sm:$0xff]  }
 0x325   : > { %v7076_v48 = vpop.f32.mrb[24].mxu1  ;;  %v7037_v56 = vpop.f32.mrb[25].mxu0 }
 0x326   : > { %v20508_v55 = vadd.f32 %v7076_v48, %v7035_v46  ;;  %v7078_v57 = vpop.f32.mrb[25].mxu1  ;;  %v7039_v23 = vpop.f32.mrb[26].mxu0  ;;  %7340 = vmatpush1.bf16.msra.mxu0 %v17694_v13  ;;  %v17756_v13 = vld [vmem:[%s19711_s19 + $0x1aa4] ss:$72 sps:$4 sm:$0xff]  }
 0x327   : > { %v20510_v58 = vadd.f32 %v7078_v57, %v7037_v56  ;;  %v7080_v59 = vpop.f32.mrb[26].mxu1  ;;  %7381 = vmatpush1.bf16.msra.mxu1 %v17697_v44  ;;  %v7040_v26 = vpop.f32.mrb[27].mxu0  ;;  %7341 = vmatprep.subr.bf16.mxu0 %v17702_v16  ;;  %v17759_v44 = vld [vmem:[%s19711_s19 + $0x8ac] ss:$72 sps:$4 sm:$0xff]   ;;  %v17754_v16 = vld [vmem:[%s19711_s19 + $0x1aa0] ss:$72 sps:$4 sm:$0xff]  }
 0x328   : > { %v7081_v61 = vpop.f32.mrb[27].mxu1  ;;  %7382 = vmatprep.subr.bf16.mxu1 %v17705_v45  ;;  %v17757_v45 = vld [vmem:[%s19711_s19 + $0x8a8] ss:$72 sps:$4 sm:$0xff]   ;;  %v17762_v46 = vld [vmem:[%s19711_s19 + $0x93c] ss:$72 sps:$4 sm:$0xff]  }
 0x329   : > { %v17765_v48 = vld [vmem:[%s19711_s19 + $0x123c] ss:$72 sps:$4 sm:$0xff]   ;;  %v17768_v56 = vld [vmem:[%s19711_s19 + $0x9cc] ss:$72 sps:$4 sm:$0xff]   ;;  %v17766_v23 = vld [vmem:[%s19711_s19 + $0x9c8] ss:$72 sps:$4 sm:$0xff]  }
 0x32a   : > { %7342 = vmatpush1.bf16.msra.mxu0 %v17700_v50  ;;  %v17760_v50 = vld [vmem:[%s19711_s19 + $0x938] ss:$72 sps:$4 sm:$0xff]   ;;  %v17771_v57 = vld [vmem:[%s19711_s19 + $0x12cc] ss:$72 sps:$4 sm:$0xff]   ;;  %v17769_v59 = vld [vmem:[%s19711_s19 + $0x12c8] ss:$72 sps:$4 sm:$0xff]  }
 0x32b   : > { %7383 = vmatpush1.bf16.msra.mxu1 %v17703_v52  ;;  %7343 = vmatprep.subr.bf16.mxu0 %v17708_v62  ;;  %v17763_v52 = vld [vmem:[%s19711_s19 + $0x1238] ss:$72 sps:$4 sm:$0xff]   ;;  %v17774_v26 = vld [vmem:[%s19711_s19 + $0xa5c] ss:$72 sps:$4 sm:$0xff]  }
 0x32c   : > { %7384 = vmatprep.subr.bf16.mxu1 %v17711_v63  ;;  %v17777_v61 = vld [vmem:[%s19711_s19 + $0x135c] ss:$72 sps:$4 sm:$0xff]   ;;  %v17772_v62 = vld [vmem:[%s19711_s19 + $0xa58] ss:$72 sps:$4 sm:$0xff]  }
 0x32d   : > { %v17775_v63 = vld [vmem:[%s19711_s19 + $0x1358] ss:$72 sps:$4 sm:$0xff]  }
 0x32e   : > { %7344 = vmatpush1.bf16.msra.mxu0 %v17706_v2  ;;  %v17780_v2 = vld [vmem:[%s19711_s19 + $0xaec] ss:$72 sps:$4 sm:$0xff]  }
 0x32f   : > { %7385 = vmatpush1.bf16.msra.mxu1 %v17709_v3  ;;  %7345 = vmatprep.subr.bf16.mxu0 %v17714_v10  ;;  %v17783_v3 = vld [vmem:[%s19711_s19 + $0x13ec] ss:$72 sps:$4 sm:$0xff]   ;;  %v17778_v10 = vld [vmem:[%s19711_s19 + $0xae8] ss:$72 sps:$4 sm:$0xff]  }
 0x330   : > { %7386 = vmatprep.subr.bf16.mxu1 %v17717_v4  ;;  %v17781_v4 = vld [vmem:[%s19711_s19 + $0x13e8] ss:$72 sps:$4 sm:$0xff]  }
 0x332   : > { %7346 = vmatpush1.bf16.msra.mxu0 %v17712_v37  ;;  %v17786_v37 = vld [vmem:[%s19711_s19 + $0xb7c] ss:$72 sps:$4 sm:$0xff]  }
 0x333   : > { %7387 = vmatpush1.bf16.msra.mxu1 %v17715_v6  ;;  %7347 = vmatprep.subr.bf16.mxu0 %v17720_v7  ;;  %v17789_v6 = vld [vmem:[%s19711_s19 + $0x147c] ss:$72 sps:$4 sm:$0xff]   ;;  %v17784_v7 = vld [vmem:[%s19711_s19 + $0xb78] ss:$72 sps:$4 sm:$0xff]  }
 0x334   : > { %7388 = vmatprep.subr.bf16.mxu1 %v17723_v8  ;;  %v17787_v8 = vld [vmem:[%s19711_s19 + $0x1478] ss:$72 sps:$4 sm:$0xff]  }
 0x336   : > { %7348 = vmatpush1.bf16.msra.mxu0 %v17718_v9  ;;  %v17792_v9 = vld [vmem:[%s19711_s19 + $0xc0c] ss:$72 sps:$4 sm:$0xff]  }
 0x337   : > { %7389 = vmatpush1.bf16.msra.mxu1 %v17721_v11  ;;  %7349 = vmatprep.subr.bf16.mxu0 %v17726_v14  ;;  %v17795_v11 = vld [vmem:[%s19711_s19 + $0x150c] ss:$72 sps:$4 sm:$0xff]   ;;  %v17790_v14 = vld [vmem:[%s19711_s19 + $0xc08] ss:$72 sps:$4 sm:$0xff]  }
 0x338   : > { %7390 = vmatprep.subr.bf16.mxu1 %v17729_v15  ;;  %v17793_v15 = vld [vmem:[%s19711_s19 + $0x1508] ss:$72 sps:$4 sm:$0xff]  }
 0x33a   : > { %7350 = vmatpush1.bf16.msra.mxu0 %v17724_v18  ;;  %v17798_v18 = vld [vmem:[%s19711_s19 + $0xc9c] ss:$72 sps:$4 sm:$0xff]  }
 0x33b   : > { %7391 = vmatpush1.bf16.msra.mxu1 %v17727_v19  ;;  %7351 = vmatprep.subr.bf16.mxu0 %v17732_v20  ;;  %v17801_v19 = vld [vmem:[%s19711_s19 + $0x159c] ss:$72 sps:$4 sm:$0xff]  }
 0x33c   : > { %7392 = vmatprep.subr.bf16.mxu1 %v17735_v21 }
 0x33e   : > { %7352 = vmatpush1.bf16.msra.mxu0 %v17730_v24  ;;  %v17796_v24 = vld [vmem:[%s19711_s19 + $0xc98] ss:$72 sps:$4 sm:$0xff]  }
 0x33f   : > { %7393 = vmatpush1.bf16.msra.mxu1 %v17733_v25  ;;  %7353 = vmatprep.subr.bf16.mxu0 %v17738_v29  ;;  %v17799_v25 = vld [vmem:[%s19711_s19 + $0x1598] ss:$72 sps:$4 sm:$0xff]  }
 0x340   : > { %7394 = vmatprep.subr.bf16.mxu1 %v17741_v30 }
 0x342   : > { %7354 = vmatpush1.bf16.msra.mxu0 %v17736_v47 }
 0x343   : > { %7395 = vmatpush1.bf16.msra.mxu1 %v17739_v31  ;;  %7355 = vmatprep.subr.bf16.mxu0 %v17744_v53 }
 0x344   : > { %7396 = vmatprep.subr.bf16.mxu1 %v17747_v33 }
 0x346   : > { %7356 = vmatpush1.bf16.msra.mxu0 %v17742_v34 }
 0x347   : > { %7397 = vmatpush1.bf16.msra.mxu1 %v17745_v36  ;;  %7357 = vmatprep.subr.bf16.mxu0 %v17750_v39  ;;  %v17807_v39 = vld [vmem:[%s19711_s19 + $0x162c] ss:$72 sps:$4 sm:$0xff]  }
 0x348   : > { %7398 = vmatprep.subr.bf16.mxu1 %v17753_v40  ;;  %v17805_v40 = vld [vmem:[%s19711_s19 + $0x1628] ss:$72 sps:$4 sm:$0xff]  }
 0x34a   : > { %7358 = vmatpush1.bf16.msra.mxu0 %v17748_v41  ;;  %v17810_v41 = vld [vmem:[%s19711_s19 + $0xdbc] ss:$72 sps:$4 sm:$0xff]  }
 0x34b   : > { %7399 = vmatpush1.bf16.msra.mxu1 %v17751_v42  ;;  %7359 = vmatprep.subr.bf16.mxu0 %v17756_v13  ;;  %v17813_v42 = vld [vmem:[%s19711_s19 + $0x16bc] ss:$72 sps:$4 sm:$0xff]   ;;  %v17808_v13 = vld [vmem:[%s19711_s19 + $0xdb8] ss:$72 sps:$4 sm:$0xff]  }
 0x34c   : > { %7400 = vmatprep.subr.bf16.mxu1 %v17759_v44  ;;  %v17811_v44 = vld [vmem:[%s19711_s19 + $0x16b8] ss:$72 sps:$4 sm:$0xff]  }
 0x34e   : > { %7360 = vmatpush1.bf16.msra.mxu0 %v17754_v16  ;;  %v17816_v16 = vld [vmem:[%s19711_s19 + $0xe4c] ss:$72 sps:$4 sm:$0xff]  }
 0x34f   : > { %7401 = vmatpush1.bf16.msra.mxu1 %v17757_v45  ;;  %7411 = vmatprep.subr.bf16.mxu0 %v17762_v46  ;;  %v17819_v45 = vld [vmem:[%s19711_s19 + $0x174c] ss:$72 sps:$4 sm:$0xff]   ;;  %v17814_v46 = vld [vmem:[%s19711_s19 + $0xe48] ss:$72 sps:$4 sm:$0xff]  }
 0x350   : > { %7452 = vmatprep.subr.bf16.mxu1 %v17765_v48  ;;  %v17817_v48 = vld [vmem:[%s19711_s19 + $0x1748] ss:$72 sps:$4 sm:$0xff]  }
 0x351   : > { %7362 = vmatmul.mubr.bf16.vlgmr.msra.gmra.mrb[40].mxu0 %v19892_v27 }
 0x352   : > { %7403 = vmatmul.mubr.bf16.vlgmr.msra.gmra.mrb[40].mxu1 %v19808_v12  ;;  %7412 = vmatpush1.bf16.msra.mxu0 %v17760_v50  ;;  %v17822_v50 = vld [vmem:[%s19711_s19 + $0xedc] ss:$72 sps:$4 sm:$0xff]  }
 0x353   : > { %7453 = vmatpush1.bf16.msra.mxu1 %v17763_v52  ;;  %7413 = vmatprep.subr.bf16.mxu0 %v17768_v56  ;;  %v17825_v52 = vld [vmem:[%s19711_s19 + $0x17dc] ss:$72 sps:$4 sm:$0xff]   ;;  %v17820_v56 = vld [vmem:[%s19711_s19 + $0xed8] ss:$72 sps:$4 sm:$0xff]  }
 0x354   : > { %7454 = vmatprep.subr.bf16.mxu1 %v17771_v57  ;;  %7443 = vmatprep.mubr.bf16.mxu0 %v19791_v0  ;;  %v17823_v57 = vld [vmem:[%s19711_s19 + $0x17d8] ss:$72 sps:$4 sm:$0xff]  }
 0x355   : > { %7484 = vmatprep.mubr.bf16.mxu1 %v19824_v22 }
 0x356   : > { %7414 = vmatpush1.bf16.msra.mxu0 %v17766_v23  ;;  %v17828_v23 = vld [vmem:[%s19711_s19 + $0xf6c] ss:$72 sps:$4 sm:$0xff]  }
 0x357   : > { %7455 = vmatpush1.bf16.msra.mxu1 %v17769_v59  ;;  %7415 = vmatprep.subr.bf16.mxu0 %v17774_v26  ;;  %v17831_v59 = vld [vmem:[%s19711_s19 + $0x186c] ss:$72 sps:$4 sm:$0xff]   ;;  %v17826_v26 = vld [vmem:[%s19711_s19 + $0xf68] ss:$72 sps:$4 sm:$0xff]  }
 0x358   : > { %7456 = vmatprep.subr.bf16.mxu1 %v17777_v61  ;;  %v17829_v61 = vld [vmem:[%s19711_s19 + $0x1868] ss:$72 sps:$4 sm:$0xff]  }
 0x35a   : > { %7416 = vmatpush1.bf16.msra.mxu0 %v17772_v62  ;;  %v17834_v62 = vld [vmem:[%s19711_s19 + $0xffc] ss:$72 sps:$4 sm:$0xff]  }
 0x35b   : > { %7457 = vmatpush1.bf16.msra.mxu1 %v17775_v63  ;;  %7417 = vmatprep.subr.bf16.mxu0 %v17780_v2  ;;  %v17837_v63 = vld [vmem:[%s19711_s19 + $0x18fc] ss:$72 sps:$4 sm:$0xff]   ;;  %v17832_v2 = vld [vmem:[%s19711_s19 + $0xff8] ss:$72 sps:$4 sm:$0xff]  }
 0x35c   : > { %7458 = vmatprep.subr.bf16.mxu1 %v17783_v3  ;;  %v17835_v3 = vld [vmem:[%s19711_s19 + $0x18f8] ss:$72 sps:$4 sm:$0xff]  }
 0x35e   : > { %7418 = vmatpush1.bf16.msra.mxu0 %v17778_v10  ;;  %v17840_v10 = vld [vmem:[%s19711_s19 + $0x108c] ss:$72 sps:$4 sm:$0xff]  }
 0x35f   : > { %7459 = vmatpush1.bf16.msra.mxu1 %v17781_v4  ;;  %7419 = vmatprep.subr.bf16.mxu0 %v17786_v37  ;;  %v17843_v4 = vld [vmem:[%s19711_s19 + $0x198c] ss:$72 sps:$4 sm:$0xff]   ;;  %v17838_v37 = vld [vmem:[%s19711_s19 + $0x1088] ss:$72 sps:$4 sm:$0xff]  }
 0x360   : > { %7460 = vmatprep.subr.bf16.mxu1 %v17789_v6  ;;  %v17841_v6 = vld [vmem:[%s19711_s19 + $0x1988] ss:$72 sps:$4 sm:$0xff]  }
 0x362   : > { %7420 = vmatpush1.bf16.msra.mxu0 %v17784_v7  ;;  %v17846_v7 = vld [vmem:[%s19711_s19 + $0x111c] ss:$72 sps:$4 sm:$0xff]  }
 0x363   : > { %7461 = vmatpush1.bf16.msra.mxu1 %v17787_v8  ;;  %7421 = vmatprep.subr.bf16.mxu0 %v17792_v9  ;;  %v17849_v8 = vld [vmem:[%s19711_s19 + $0x1a1c] ss:$72 sps:$4 sm:$0xff]   ;;  %v17844_v9 = vld [vmem:[%s19711_s19 + $0x1118] ss:$72 sps:$4 sm:$0xff]  }
 0x364   : > { %7462 = vmatprep.subr.bf16.mxu1 %v17795_v11  ;;  %v7117_v20 = vpop.f32.mrb[28].mxu0  ;;  %v17847_v11 = vld [vmem:[%s19711_s19 + $0x1a18] ss:$72 sps:$4 sm:$0xff]  }
 0x365   : > { %v20578_v21 = vpop.f32.mrb[28].mxu1  ;;  %v20583_v29 = vadd.f32 %v7117_v20, %v20508_v55  ;;  %v7119_v30 = vpop.f32.mrb[29].mxu0  ;;  %v17804_v55 = vld [vmem:[%s19711_s19 + $0xd2c] ss:$72 sps:$4 sm:$0xff]  }
 0x366   : > { %v20585_v47 = vpop.f32.mrb[29].mxu1  ;;  %v20588_v31 = vadd.f32 %v7119_v30, %v20510_v58  ;;  %v7121_v53 = vpop.f32.mrb[30].mxu0  ;;  %7422 = vmatpush1.bf16.msra.mxu0 %v17790_v14  ;;  %v17802_v58 = vld [vmem:[%s19711_s19 + $0xd28] ss:$72 sps:$4 sm:$0xff]   ;;  %v17852_v14 = vld [vmem:[%s19711_s19 + $0x11ac] ss:$72 sps:$4 sm:$0xff]  }
 0x367   : > { %v7162_v33 = vpop.f32.mrb[30].mxu1  ;;  %7463 = vmatpush1.bf16.msra.mxu1 %v17793_v15  ;;  %v7122_v34 = vpop.f32.mrb[31].mxu0  ;;  %7423 = vmatprep.subr.bf16.mxu0 %v17798_v18  ;;  %v17855_v15 = vld [vmem:[%s19711_s19 + $0x1aac] ss:$72 sps:$4 sm:$0xff]   ;;  %v17850_v18 = vld [vmem:[%s19711_s19 + $0x11a8] ss:$72 sps:$4 sm:$0xff]  }
 0x368   : > { %v7163_v36 = vpop.f32.mrb[31].mxu1  ;;  %7464 = vmatprep.subr.bf16.mxu1 %v17801_v19  ;;  %v17853_v19 = vld [vmem:[%s19711_s19 + $0x1aa8] ss:$72 sps:$4 sm:$0xff]   ;;  %v17858_v20 = vld [vmem:[%s19711_s19 + $0x44] ss:$72 sps:$4 sm:$0xff]  }
 0x369   : > { %v17859_v30 = vld [vmem:[%s19711_s19 + $0x940] ss:$72 sps:$4 sm:$0xff]   ;;  %v17864_v53 = vld [vmem:[%s19711_s19 + $0xd4] ss:$72 sps:$4 sm:$0xff]   ;;  %v17862_v34 = vld [vmem:[%s19711_s19 + $0xd0] ss:$72 sps:$4 sm:$0xff]  }
 0x36a   : > { %7424 = vmatpush1.bf16.msra.mxu0 %v17796_v24  ;;  %v17861_v24 = vld [vmem:[%s19711_s19 + $0x944] ss:$72 sps:$4 sm:$0xff]   ;;  %v17867_v33 = vld [vmem:[%s19711_s19 + $0x9d4] ss:$72 sps:$4 sm:$0xff]   ;;  %v17865_v36 = vld [vmem:[%s19711_s19 + $0x9d0] ss:$72 sps:$4 sm:$0xff]  }
 0x36b   : > { %7465 = vmatpush1.bf16.msra.mxu1 %v17799_v25  ;;  %7425 = vmatprep.subr.bf16.mxu0 %v17804_v55  ;;  %v17856_v25 = vld [vmem:[%s19711_s19 + $0x40] ss:$72 sps:$4 sm:$0xff]   ;;  %v17870_v55 = vld [vmem:[%s19711_s19 + $0x164] ss:$72 sps:$4 sm:$0xff]  }
 0x36c   : > { %7466 = vmatprep.subr.bf16.mxu1 %v17807_v39  ;;  %v17873_v39 = vld [vmem:[%s19711_s19 + $0xa64] ss:$72 sps:$4 sm:$0xff]  }
 0x36e   : > { %7426 = vmatpush1.bf16.msra.mxu0 %v17802_v58  ;;  %v17868_v58 = vld [vmem:[%s19711_s19 + $0x160] ss:$72 sps:$4 sm:$0xff]  }
 0x36f   : > { %7467 = vmatpush1.bf16.msra.mxu1 %v17805_v40  ;;  %7427 = vmatprep.subr.bf16.mxu0 %v17810_v41  ;;  %v17871_v40 = vld [vmem:[%s19711_s19 + $0xa60] ss:$72 sps:$4 sm:$0xff]   ;;  %v17876_v41 = vld [vmem:[%s19711_s19 + $0x1f4] ss:$72 sps:$4 sm:$0xff]  }
 0x370   : > { %7468 = vmatprep.subr.bf16.mxu1 %v17813_v42  ;;  %v17879_v42 = vld [vmem:[%s19711_s19 + $0xaf4] ss:$72 sps:$4 sm:$0xff]  }
 0x372   : > { %7428 = vmatpush1.bf16.msra.mxu0 %v17808_v13  ;;  %v17877_v13 = vld [vmem:[%s19711_s19 + $0xaf0] ss:$72 sps:$4 sm:$0xff]  }
 0x373   : > { %7469 = vmatpush1.bf16.msra.mxu1 %v17811_v44  ;;  %7429 = vmatprep.subr.bf16.mxu0 %v17816_v16  ;;  %v17885_v44 = vld [vmem:[%s19711_s19 + $0xb84] ss:$72 sps:$4 sm:$0xff]   ;;  %v17880_v16 = vld [vmem:[%s19711_s19 + $0x280] ss:$72 sps:$4 sm:$0xff]  }
 0x374   : > { %7470 = vmatprep.subr.bf16.mxu1 %v17819_v45  ;;  %v17883_v45 = vld [vmem:[%s19711_s19 + $0xb80] ss:$72 sps:$4 sm:$0xff]  }
 0x376   : > { %7430 = vmatpush1.bf16.msra.mxu0 %v17814_v46  ;;  %v17888_v46 = vld [vmem:[%s19711_s19 + $0x314] ss:$72 sps:$4 sm:$0xff]  }
 0x377   : > { %7471 = vmatpush1.bf16.msra.mxu1 %v17817_v48  ;;  %7431 = vmatprep.subr.bf16.mxu0 %v17822_v50  ;;  %v17891_v48 = vld [vmem:[%s19711_s19 + $0xc14] ss:$72 sps:$4 sm:$0xff]   ;;  %v17886_v50 = vld [vmem:[%s19711_s19 + $0x310] ss:$72 sps:$4 sm:$0xff]  }
 0x378   : > { %7472 = vmatprep.subr.bf16.mxu1 %v17825_v52  ;;  %v17889_v52 = vld [vmem:[%s19711_s19 + $0xc10] ss:$72 sps:$4 sm:$0xff]  }
 0x37a   : > { %7432 = vmatpush1.bf16.msra.mxu0 %v17820_v56  ;;  %v17894_v56 = vld [vmem:[%s19711_s19 + $0x3a4] ss:$72 sps:$4 sm:$0xff]  }
 0x37b   : > { %7473 = vmatpush1.bf16.msra.mxu1 %v17823_v57  ;;  %7433 = vmatprep.subr.bf16.mxu0 %v17828_v23  ;;  %v17897_v57 = vld [vmem:[%s19711_s19 + $0xca4] ss:$72 sps:$4 sm:$0xff]  }
 0x37c   : > { %7474 = vmatprep.subr.bf16.mxu1 %v17831_v59 }
 0x37e   : > { %7434 = vmatpush1.bf16.msra.mxu0 %v17826_v26  ;;  %v17892_v26 = vld [vmem:[%s19711_s19 + $0x3a0] ss:$72 sps:$4 sm:$0xff]  }
 0x37f   : > { %7475 = vmatpush1.bf16.msra.mxu1 %v17829_v61  ;;  %7435 = vmatprep.subr.bf16.mxu0 %v17834_v62  ;;  %v17895_v61 = vld [vmem:[%s19711_s19 + $0xca0] ss:$72 sps:$4 sm:$0xff]  }
 0x380   : > { %7476 = vmatprep.subr.bf16.mxu1 %v17837_v63 }
 0x382   : > { %7436 = vmatpush1.bf16.msra.mxu0 %v17832_v2 }
 0x383   : > { %7477 = vmatpush1.bf16.msra.mxu1 %v17835_v3  ;;  %7437 = vmatprep.subr.bf16.mxu0 %v17840_v10 }
 0x384   : > { %7478 = vmatprep.subr.bf16.mxu1 %v17843_v4 }
 0x386   : > { %7438 = vmatpush1.bf16.msra.mxu0 %v17838_v37 }
 0x387   : > { %7479 = vmatpush1.bf16.msra.mxu1 %v17841_v6  ;;  %7439 = vmatprep.subr.bf16.mxu0 %v17846_v7 }
 0x388   : > { %7480 = vmatprep.subr.bf16.mxu1 %v17849_v8  ;;  %v17903_v8 = vld [vmem:[%s19711_s19 + $0xd34] ss:$72 sps:$4 sm:$0xff]  }
 0x38a   : > { %7440 = vmatpush1.bf16.msra.mxu0 %v17844_v9 }
 0x38b   : > { %7481 = vmatpush1.bf16.msra.mxu1 %v17847_v11  ;;  %7441 = vmatprep.subr.bf16.mxu0 %v17852_v14  ;;  %v17901_v11 = vld [vmem:[%s19711_s19 + $0xd30] ss:$72 sps:$4 sm:$0xff]   ;;  %v17906_v14 = vld [vmem:[%s19711_s19 + $0x4c4] ss:$72 sps:$4 sm:$0xff]  }
 0x38c   : > { %7482 = vmatprep.subr.bf16.mxu1 %v17855_v15  ;;  %v17909_v15 = vld [vmem:[%s19711_s19 + $0xdc4] ss:$72 sps:$4 sm:$0xff]  }
 0x38e   : > { %7442 = vmatpush1.bf16.msra.mxu0 %v17850_v18  ;;  %v17904_v18 = vld [vmem:[%s19711_s19 + $0x4c0] ss:$72 sps:$4 sm:$0xff]  }
 0x38f   : > { %7483 = vmatpush1.bf16.msra.mxu1 %v17853_v19  ;;  %7493 = vmatprep.subr.bf16.mxu0 %v17858_v20  ;;  %v17907_v19 = vld [vmem:[%s19711_s19 + $0xdc0] ss:$72 sps:$4 sm:$0xff]   ;;  %v17912_v20 = vld [vmem:[%s19711_s19 + $0x554] ss:$72 sps:$4 sm:$0xff]  }
 0x390   : > { %7534 = vmatprep.subr.bf16.mxu1 %v17861_v24  ;;  %v17915_v24 = vld [vmem:[%s19711_s19 + $0xe54] ss:$72 sps:$4 sm:$0xff]  }
 0x391   : > { %7444 = vmatmul.mubr.bf16.vlgmr.msra.gmra.mrb[44].mxu0 %v19817_v17 }
 0x392   : > { %7485 = vmatmul.mubr.bf16.vlgmr.msra.gmra.mrb[44].mxu1 %v19892_v27  ;;  %7494 = vmatpush1.bf16.msra.mxu0 %v17856_v25  ;;  %v17910_v25 = vld [vmem:[%s19711_s19 + $0x550] ss:$72 sps:$4 sm:$0xff]  }
 0x393   : > { %7535 = vmatpush1.bf16.msra.mxu1 %v17859_v30  ;;  %7495 = vmatprep.subr.bf16.mxu0 %v17864_v53  ;;  %v17913_v30 = vld [vmem:[%s19711_s19 + $0xe50] ss:$72 sps:$4 sm:$0xff]   ;;  %v17918_v53 = vld [vmem:[%s19711_s19 + $0x5e4] ss:$72 sps:$4 sm:$0xff]  }
 0x394   : > { %7536 = vmatprep.subr.bf16.mxu1 %v17867_v33  ;;  %7525 = vmatprep.mubr.bf16.mxu0 %v19784_v60  ;;  %v17874_v60 = vld [vmem:[%s19711_s19 + $0x1f0] ss:$72 sps:$4 sm:$0xff]   ;;  %v17921_v33 = vld [vmem:[%s19711_s19 + $0xee4] ss:$72 sps:$4 sm:$0xff]  }
 0x395   : > { %7566 = vmatprep.mubr.bf16.mxu1 %v19791_v0  ;;  %v17882_v0 = vld [vmem:[%s19711_s19 + $0x284] ss:$72 sps:$4 sm:$0xff]  }
 0x396   : > { %7496 = vmatpush1.bf16.msra.mxu0 %v17862_v34  ;;  %v17916_v34 = vld [vmem:[%s19711_s19 + $0x5e0] ss:$72 sps:$4 sm:$0xff]  }
 0x397   : > { %7537 = vmatpush1.bf16.msra.mxu1 %v17865_v36  ;;  %7497 = vmatprep.subr.bf16.mxu0 %v17870_v55  ;;  %v17919_v36 = vld [vmem:[%s19711_s19 + $0xee0] ss:$72 sps:$4 sm:$0xff]   ;;  %v17924_v55 = vld [vmem:[%s19711_s19 + $0x674] ss:$72 sps:$4 sm:$0xff]  }
 0x398   : > { %7538 = vmatprep.subr.bf16.mxu1 %v17873_v39  ;;  %v17927_v39 = vld [vmem:[%s19711_s19 + $0xf74] ss:$72 sps:$4 sm:$0xff]  }
 0x39a   : > { %7498 = vmatpush1.bf16.msra.mxu0 %v17868_v58  ;;  %v17922_v58 = vld [vmem:[%s19711_s19 + $0x670] ss:$72 sps:$4 sm:$0xff]  }
 0x39b   : > { %7539 = vmatpush1.bf16.msra.mxu1 %v17871_v40  ;;  %7499 = vmatprep.subr.bf16.mxu0 %v17876_v41  ;;  %v17925_v40 = vld [vmem:[%s19711_s19 + $0xf70] ss:$72 sps:$4 sm:$0xff]   ;;  %v17930_v41 = vld [vmem:[%s19711_s19 + $0x704] ss:$72 sps:$4 sm:$0xff]  }
 0x39c   : > { %7540 = vmatprep.subr.bf16.mxu1 %v17879_v42  ;;  %v17933_v42 = vld [vmem:[%s19711_s19 + $0x1004] ss:$72 sps:$4 sm:$0xff]  }
 0x39e   : > { %7500 = vmatpush1.bf16.msra.mxu0 %v17874_v60  ;;  %v17928_v60 = vld [vmem:[%s19711_s19 + $0x700] ss:$72 sps:$4 sm:$0xff]  }
 0x39f   : > { %7541 = vmatpush1.bf16.msra.mxu1 %v17877_v13  ;;  %7501 = vmatprep.subr.bf16.mxu0 %v17882_v0  ;;  %v17931_v13 = vld [vmem:[%s19711_s19 + $0x1000] ss:$72 sps:$4 sm:$0xff]   ;;  %v17936_v0 = vld [vmem:[%s19711_s19 + $0x794] ss:$72 sps:$4 sm:$0xff]  }
 0x3a0   : > { %7542 = vmatprep.subr.bf16.mxu1 %v17885_v44  ;;  %v17939_v44 = vld [vmem:[%s19711_s19 + $0x1094] ss:$72 sps:$4 sm:$0xff]  }
 0x3a2   : > { %7502 = vmatpush1.bf16.msra.mxu0 %v17880_v16  ;;  %v17934_v16 = vld [vmem:[%s19711_s19 + $0x790] ss:$72 sps:$4 sm:$0xff]  }
 0x3a3   : > { %7543 = vmatpush1.bf16.msra.mxu1 %v17883_v45  ;;  %7503 = vmatprep.subr.bf16.mxu0 %v17888_v46  ;;  %v17937_v45 = vld [vmem:[%s19711_s19 + $0x1090] ss:$72 sps:$4 sm:$0xff]   ;;  %v17942_v46 = vld [vmem:[%s19711_s19 + $0x824] ss:$72 sps:$4 sm:$0xff]  }
 0x3a4   : > { %7544 = vmatprep.subr.bf16.mxu1 %v17891_v48  ;;  %v7199_v23 = vpop.f32.mrb[32].mxu0  ;;  %v17945_v48 = vld [vmem:[%s19711_s19 + $0x1124] ss:$72 sps:$4 sm:$0xff]  }
 0x3a5   : > { %v7240_v59 = vpop.f32.mrb[32].mxu1  ;;  %v7200_v62 = vadd.f32 %v7199_v23, %v20578_v21  ;;  %v7201_v63 = vpop.f32.mrb[33].mxu0  ;;  %v17900_v21 = vld [vmem:[%s19711_s19 + $0x434] ss:$72 sps:$4 sm:$0xff]  }
 0x3a6   : > { %v7242_v2 = vpop.f32.mrb[33].mxu1  ;;  %v7202_v3 = vadd.f32 %v7201_v63, %v20585_v47  ;;  %v7203_v10 = vpop.f32.mrb[34].mxu0  ;;  %7504 = vmatpush1.bf16.msra.mxu0 %v17886_v50  ;;  %v17898_v47 = vld [vmem:[%s19711_s19 + $0x430] ss:$72 sps:$4 sm:$0xff]   ;;  %v20697_v50 = vld [vmem:[%s22211_s0] sm:$0x3f] }
 0x3a7   : > { %v7244_v4 = vpop.f32.mrb[34].mxu1  ;;  %7545 = vmatpush1.bf16.msra.mxu1 %v17889_v52  ;;  %v20660_v37 = vadd.f32 %v7240_v59, %v7200_v62  ;;  %v7204_v6 = vpop.f32.mrb[35].mxu0  ;;  %7505 = vmatprep.subr.bf16.mxu0 %v17894_v56  ;;  %v17940_v52 = vld [vmem:[%s19711_s19 + $0x820] ss:$72 sps:$4 sm:$0xff]   ;;  %v17951_v23 = vld [vmem:[%s19711_s19 + $0x11b4] ss:$72 sps:$4 sm:$0xff]   ;;  %v20705_v59 = vrot.slane %v20697_v50, %v19770_v49 }
 0x3a8   : > { %v7245_v7 = vpop.f32.mrb[35].mxu1  ;;  %7546 = vmatprep.subr.bf16.mxu1 %v17897_v57  ;;  %v20664_v9 = vadd.f32 %v7242_v2, %v7202_v3  ;;  %v17943_v56 = vld [vmem:[%s19711_s19 + $0x1120] ss:$72 sps:$4 sm:$0xff]   ;;  %v17948_v57 = vld [vmem:[%s19711_s19 + $0x8b4] ss:$72 sps:$4 sm:$0xff]  }
 0x3a9   : > { %v17954_v62 = vld [vmem:[%s19711_s19 + $0x1244] ss:$72 sps:$4 sm:$0xff]   ;;  %v17952_v2 = vld [vmem:[%s19711_s19 + $0x1240] ss:$72 sps:$4 sm:$0xff]   ;;  %v7632_v10 = vcombine.high %v20705_v59, %v20705_v59  ;;  %v17960_v4 = vld [vmem:[%s19711_s19 + $0x12d4] ss:$72 sps:$4 sm:$0xff]  }
 0x3aa   : > { %7506 = vmatpush1.bf16.msra.mxu0 %v17892_v26  ;;  %v17946_v26 = vld [vmem:[%s19711_s19 + $0x8b0] ss:$72 sps:$4 sm:$0xff]   ;;  %v17957_v63 = vld [vmem:[%s19704_s15 + $0x4] ss:$72 sps:$4 sm:$0xff]   ;;  %v17955_v3 = vld [vmem:[%s19704_s15] ss:$72 sps:$4 sm:$0xff]  }
 0x3ab   : > { %7547 = vmatpush1.bf16.msra.mxu1 %v17895_v61  ;;  %7507 = vmatprep.subr.bf16.mxu0 %v17900_v21  ;;  %v17949_v61 = vld [vmem:[%s19711_s19 + $0x11b0] ss:$72 sps:$4 sm:$0xff]   ;;  %v17963_v6 = vld [vmem:[%s19704_s15 + $0x94] ss:$72 sps:$4 sm:$0xff]   ;;  %v20718_v7 = vrot.slane %v7632_v10, %v19770_v49 }
 0x3ac   : > { %7548 = vmatprep.subr.bf16.mxu1 %v17903_v8  ;;  %v17958_v21 = vld [vmem:[%s19711_s19 + $0x12d0] ss:$72 sps:$4 sm:$0xff]  }
 0x3ad   : > { %v17961_v8 = vld [vmem:[%s19704_s15 + $0x90] ss:$72 sps:$4 sm:$0xff]  }
 0x3ae   : > { %7508 = vmatpush1.bf16.msra.mxu0 %v17898_v47  ;;  %v17966_v47 = vld [vmem:[%s19711_s19 + $0x1364] ss:$72 sps:$4 sm:$0xff]   ;;  %v18009_v10 = vld [vmem:[%s19704_s15 + $0x510] ss:$72 sps:$4 sm:$0xff]  }
 0x3af   : > { %7549 = vmatpush1.bf16.msra.mxu1 %v17901_v11  ;;  %7509 = vmatprep.subr.bf16.mxu0 %v17906_v14  ;;  %v17969_v11 = vld [vmem:[%s19704_s15 + $0x124] ss:$72 sps:$4 sm:$0xff]   ;;  %v17972_v14 = vld [vmem:[%s19711_s19 + $0x13f4] ss:$72 sps:$4 sm:$0xff]  }
 0x3b0   : > { %7550 = vmatprep.subr.bf16.mxu1 %v17909_v15  ;;  %v17975_v15 = vld [vmem:[%s19704_s15 + $0x1b4] ss:$72 sps:$4 sm:$0xff]  }
 0x3b2   : > { %7510 = vmatpush1.bf16.msra.mxu0 %v17904_v18  ;;  %v17973_v18 = vld [vmem:[%s19704_s15 + $0x1b0] ss:$72 sps:$4 sm:$0xff]  }
 0x3b3   : > { %7551 = vmatpush1.bf16.msra.mxu1 %v17907_v19  ;;  %7511 = vmatprep.subr.bf16.mxu0 %v17912_v20  ;;  %v17978_v19 = vld [vmem:[%s19711_s19 + $0x1484] ss:$72 sps:$4 sm:$0xff]  }
 0x3b4   : > { %7552 = vmatprep.subr.bf16.mxu1 %v17915_v24  ;;  %v17981_v20 = vld [vmem:[%s19704_s15 + $0x244] ss:$72 sps:$4 sm:$0xff]   ;;  %v17976_v24 = vld [vmem:[%s19711_s19 + $0x1480] ss:$72 sps:$4 sm:$0xff]  }
 0x3b6   : > { %7512 = vmatpush1.bf16.msra.mxu0 %v17910_v25  ;;  %v17979_v25 = vld [vmem:[%s19704_s15 + $0x240] ss:$72 sps:$4 sm:$0xff]  }
 0x3b7   : > { %7553 = vmatpush1.bf16.msra.mxu1 %v17913_v30  ;;  %7513 = vmatprep.subr.bf16.mxu0 %v17918_v53  ;;  %v17984_v30 = vld [vmem:[%s19711_s19 + $0x1514] ss:$72 sps:$4 sm:$0xff]  }
 0x3b8   : > { %7554 = vmatprep.subr.bf16.mxu1 %v17921_v33  ;;  %v17987_v53 = vld [vmem:[%s19704_s15 + $0x2d4] ss:$72 sps:$4 sm:$0xff]   ;;  %v17982_v33 = vld [vmem:[%s19711_s19 + $0x1510] ss:$72 sps:$4 sm:$0xff]  }
 0x3ba   : > { %7514 = vmatpush1.bf16.msra.mxu0 %v17916_v34  ;;  %v17985_v34 = vld [vmem:[%s19704_s15 + $0x2d0] ss:$72 sps:$4 sm:$0xff]  }
 0x3bb   : > { %7555 = vmatpush1.bf16.msra.mxu1 %v17919_v36  ;;  %7515 = vmatprep.subr.bf16.mxu0 %v17924_v55  ;;  %v17990_v36 = vld [vmem:[%s19711_s19 + $0x15a4] ss:$72 sps:$4 sm:$0xff]  }
 0x3bc   : > { %7556 = vmatprep.subr.bf16.mxu1 %v17927_v39  ;;  %v17993_v55 = vld [vmem:[%s19704_s15 + $0x364] ss:$72 sps:$4 sm:$0xff]  }
 0x3be   : > { %7516 = vmatpush1.bf16.msra.mxu0 %v17922_v58 }
 0x3bf   : > { %7557 = vmatpush1.bf16.msra.mxu1 %v17925_v40  ;;  %7517 = vmatprep.subr.bf16.mxu0 %v17930_v41  ;;  %v17988_v40 = vld [vmem:[%s19711_s19 + $0x15a0] ss:$72 sps:$4 sm:$0xff]  }
 0x3c0   : > { %7558 = vmatprep.subr.bf16.mxu1 %v17933_v42  ;;  %v17991_v41 = vld [vmem:[%s19704_s15 + $0x360] ss:$72 sps:$4 sm:$0xff]  }
 0x3c2   : > { %7518 = vmatpush1.bf16.msra.mxu0 %v17928_v60 }
 0x3c3   : > { %7559 = vmatpush1.bf16.msra.mxu1 %v17931_v13  ;;  %7519 = vmatprep.subr.bf16.mxu0 %v17936_v0 }
 0x3c4   : > { %7560 = vmatprep.subr.bf16.mxu1 %v17939_v44 }
 0x3c6   : > { %7520 = vmatpush1.bf16.msra.mxu0 %v17934_v16 }
 0x3c7   : > { %7561 = vmatpush1.bf16.msra.mxu1 %v17937_v45  ;;  %7521 = vmatprep.subr.bf16.mxu0 %v17942_v46 }
 0x3c8   : > { %7562 = vmatprep.subr.bf16.mxu1 %v17945_v48  ;;  %v17996_v48 = vld [vmem:[%s19711_s19 + $0x1634] ss:$72 sps:$4 sm:$0xff]  }
 0x3ca   : > { %7522 = vmatpush1.bf16.msra.mxu0 %v17940_v52  ;;  %v17999_v52 = vld [vmem:[%s19704_s15 + $0x3f4] ss:$72 sps:$4 sm:$0xff]  }
 0x3cb   : > { %7563 = vmatpush1.bf16.msra.mxu1 %v17943_v56  ;;  %7523 = vmatprep.subr.bf16.mxu0 %v17948_v57  ;;  %v17994_v56 = vld [vmem:[%s19711_s19 + $0x1630] ss:$72 sps:$4 sm:$0xff]  }
 0x3cc   : > { %7564 = vmatprep.subr.bf16.mxu1 %v17951_v23  ;;  %v17997_v57 = vld [vmem:[%s19704_s15 + $0x3f0] ss:$72 sps:$4 sm:$0xff]   ;;  %v18002_v23 = vld [vmem:[%s19711_s19 + $0x16c4] ss:$72 sps:$4 sm:$0xff]  }
 0x3ce   : > { %7524 = vmatpush1.bf16.msra.mxu0 %v17946_v26  ;;  %v18005_v26 = vld [vmem:[%s19704_s15 + $0x484] ss:$72 sps:$4 sm:$0xff]  }
 0x3cf   : > { %7565 = vmatpush1.bf16.msra.mxu1 %v17949_v61  ;;  %7575 = vmatprep.subr.bf16.mxu0 %v17954_v62  ;;  %v18000_v61 = vld [vmem:[%s19711_s19 + $0x16c0] ss:$72 sps:$4 sm:$0xff]  }
 0x3d0   : > { %11990 = vmatprep.subr.bf16.mxu1 %v17957_v63  ;;  %v18003_v62 = vld [vmem:[%s19704_s15 + $0x480] ss:$72 sps:$4 sm:$0xff]   ;;  %v18008_v63 = vld [vmem:[%s19711_s19 + $0x1754] ss:$72 sps:$4 sm:$0xff]  }
 0x3d1   : > { %7526 = vmatmul.mubr.bf16.vlgmr.msra.gmra.mrb[48].mxu0 %v19808_v12  ;;  %v17964_v12 = vld [vmem:[%s19711_s19 + $0x1360] ss:$72 sps:$4 sm:$0xff]  }
 0x3d2   : > { %7567 = vmatmul.mubr.bf16.vlgmr.msra.gmra.mrb[48].mxu1 %v19817_v17  ;;  %7576 = vmatpush1.bf16.msra.mxu0 %v17952_v2  ;;  %v17967_v17 = vld [vmem:[%s19704_s15 + $0x120] ss:$72 sps:$4 sm:$0xff]   ;;  %v18011_v2 = vld [vmem:[%s19704_s15 + $0x514] ss:$72 sps:$4 sm:$0xff]  }
 0x3d3   : > { %11991 = vmatpush1.bf16.msra.mxu1 %v17955_v3  ;;  %7577 = vmatprep.subr.bf16.mxu0 %v17960_v4  ;;  %v18006_v3 = vld [vmem:[%s19711_s19 + $0x1750] ss:$72 sps:$4 sm:$0xff]   ;;  %v18014_v4 = vld [vmem:[%s19711_s19 + $0x17e4] ss:$72 sps:$4 sm:$0xff]  }
 0x3d4   : > { %11992 = vmatprep.subr.bf16.mxu1 %v17963_v6  ;;  %7607 = vmatprep.mubr.bf16.mxu0 %v19824_v22  ;;  %v17970_v22 = vld [vmem:[%s19711_s19 + $0x13f0] ss:$72 sps:$4 sm:$0xff]   ;;  %v18017_v6 = vld [vmem:[%s19704_s15 + $0x5a4] ss:$72 sps:$4 sm:$0xff]  }
 0x3d5   : > { %12022 = vmatprep.mubr.bf16.mxu1 %v20718_v7 }
 0x3d6   : > { %7578 = vmatpush1.bf16.msra.mxu0 %v17958_v21  ;;  %v18012_v21 = vld [vmem:[%s19711_s19 + $0x17e0] ss:$72 sps:$4 sm:$0xff]  }
 0x3d7   : > { %11993 = vmatpush1.bf16.msra.mxu1 %v17961_v8  ;;  %7579 = vmatprep.subr.bf16.mxu0 %v17966_v47  ;;  %v18015_v8 = vld [vmem:[%s19704_s15 + $0x5a0] ss:$72 sps:$4 sm:$0xff]   ;;  %v18020_v47 = vld [vmem:[%s19711_s19 + $0x1874] ss:$72 sps:$4 sm:$0xff]  }
 0x3d8   : > { %11994 = vmatprep.subr.bf16.mxu1 %v17969_v11  ;;  %v18023_v11 = vld [vmem:[%s19704_s15 + $0x634] ss:$72 sps:$4 sm:$0xff]  }
 0x3da   : > { %7580 = vmatpush1.bf16.msra.mxu0 %v17964_v12  ;;  %v18018_v12 = vld [vmem:[%s19711_s19 + $0x1870] ss:$72 sps:$4 sm:$0xff]  }
 0x3db   : > { %11995 = vmatpush1.bf16.msra.mxu1 %v17967_v17  ;;  %7581 = vmatprep.subr.bf16.mxu0 %v17972_v14  ;;  %v18021_v17 = vld [vmem:[%s19704_s15 + $0x630] ss:$72 sps:$4 sm:$0xff]   ;;  %v18026_v14 = vld [vmem:[%s19711_s19 + $0x1904] ss:$72 sps:$4 sm:$0xff]  }
 0x3dc   : > { %11996 = vmatprep.subr.bf16.mxu1 %v17975_v15  ;;  %v18029_v15 = vld [vmem:[%s19704_s15 + $0x6c4] ss:$72 sps:$4 sm:$0xff]  }
 0x3de   : > { %7582 = vmatpush1.bf16.msra.mxu0 %v17970_v22  ;;  %v18024_v22 = vld [vmem:[%s19711_s19 + $0x1900] ss:$72 sps:$4 sm:$0xff]  }
 0x3df   : > { %11997 = vmatpush1.bf16.msra.mxu1 %v17973_v18  ;;  %7583 = vmatprep.subr.bf16.mxu0 %v17978_v19  ;;  %v18027_v18 = vld [vmem:[%s19704_s15 + $0x6c0] ss:$72 sps:$4 sm:$0xff]   ;;  %v18032_v19 = vld [vmem:[%s19711_s19 + $0x1994] ss:$72 sps:$4 sm:$0xff]  }
 0x3e0   : > { %11998 = vmatprep.subr.bf16.mxu1 %v17981_v20  ;;  %v18035_v20 = vld [vmem:[%s19704_s15 + $0x754] ss:$72 sps:$4 sm:$0xff]  }
 0x3e2   : > { %7584 = vmatpush1.bf16.msra.mxu0 %v17976_v24  ;;  %v18030_v24 = vld [vmem:[%s19711_s19 + $0x1990] ss:$72 sps:$4 sm:$0xff]  }
 0x3e3   : > { %11999 = vmatpush1.bf16.msra.mxu1 %v17979_v25  ;;  %7585 = vmatprep.subr.bf16.mxu0 %v17984_v30  ;;  %v18033_v25 = vld [vmem:[%s19704_s15 + $0x750] ss:$72 sps:$4 sm:$0xff]   ;;  %v18038_v30 = vld [vmem:[%s19711_s19 + $0x1a24] ss:$72 sps:$4 sm:$0xff]  }
 0x3e4   : > { %12000 = vmatprep.subr.bf16.mxu1 %v17987_v53  ;;  %v7281_v39 = vpop.f32.mrb[36].mxu0  ;;  %v18041_v53 = vld [vmem:[%s19704_s15 + $0x7e4] ss:$72 sps:$4 sm:$0xff]  }
 0x3e5   : > { %v7322_v58 = vpop.f32.mrb[36].mxu1  ;;  %v7283_v60 = vpop.f32.mrb[37].mxu0 }
 0x3e6   : > { %v20746_v42 = vadd.f32 %v7322_v58, %v7281_v39  ;;  %v7324_v13 = vpop.f32.mrb[37].mxu1  ;;  %v7285_v44 = vpop.f32.mrb[38].mxu0  ;;  %7586 = vmatpush1.bf16.msra.mxu0 %v17982_v33  ;;  %v7617_v33 = vcombine.high %v20697_v50, %v20697_v50  ;;  %v18047_v39 = vld [vmem:[%s19704_s15 + $0x874] ss:$72 sps:$4 sm:$0xff]   ;;  %v18042_v50 = vld [vmem:[%s19711_s19 + $0x1ab0] ss:$72 sps:$4 sm:$0xff]  }
 0x3e7   : > { %v20748_v0 = vadd.f32 %v7324_v13, %v7283_v60  ;;  %v7326_v16 = vpop.f32.mrb[38].mxu1  ;;  %12001 = vmatpush1.bf16.msra.mxu1 %v17985_v34  ;;  %v7286_v45 = vpop.f32.mrb[39].mxu0  ;;  %7587 = vmatprep.subr.bf16.mxu0 %v17990_v36  ;;  %v18036_v34 = vld [vmem:[%s19711_s19 + $0x1a20] ss:$72 sps:$4 sm:$0xff]   ;;  %v18053_v60 = vld [vmem:[%s19704_s15 + $0x1204] ss:$72 sps:$4 sm:$0xff]  }
 0x3e8   : > { %v7327_v46 = vpop.f32.mrb[39].mxu1  ;;  %12002 = vmatprep.subr.bf16.mxu1 %v17993_v55  ;;  %v18039_v36 = vld [vmem:[%s19704_s15 + $0x7e0] ss:$72 sps:$4 sm:$0xff]   ;;  %v18044_v55 = vld [vmem:[%s19711_s19 + $0x1ab4] ss:$72 sps:$4 sm:$0xff]   ;;  %v20787_v58 = vrot.slane %v7617_v33, %v19770_v49  ;;  %v20799_v45 = vrot.slane %v20705_v59, %v19770_v49 }
 0x3e9   : > { %v18048_v13 = vld [vmem:[%s19704_s15 + $0x900] ss:$72 sps:$4 sm:$0xff]   ;;  %v18056_v46 = vld [vmem:[%s19704_s15 + $0x994] ss:$72 sps:$4 sm:$0xff]   ;;  %v18054_v59 = vld [vmem:[%s19704_s15 + $0x990] ss:$72 sps:$4 sm:$0xff]  }
 0x3ea   : > { %7588 = vmatpush1.bf16.msra.mxu0 %v17988_v40  ;;  %v18045_v40 = vld [vmem:[%s19704_s15 + $0x870] ss:$72 sps:$4 sm:$0xff]   ;;  %v18051_v44 = vld [vmem:[%s19704_s15 + $0x1200] ss:$72 sps:$4 sm:$0xff]   ;;  %v7633_v16 = vcombine.high %v20787_v58, %v20787_v58 }
 0x3eb   : > { %12003 = vmatpush1.bf16.msra.mxu1 %v17991_v41  ;;  %7589 = vmatprep.subr.bf16.mxu0 %v17996_v48  ;;  %v18050_v41 = vld [vmem:[%s19704_s15 + $0x904] ss:$72 sps:$4 sm:$0xff]   ;;  %v18059_v48 = vld [vmem:[%s19704_s15 + $0x1294] ss:$72 sps:$4 sm:$0xff]  }
 0x3ec   : > { %12004 = vmatprep.subr.bf16.mxu1 %v17999_v52  ;;  %v20805_v52 = vcombine.high %v20718_v7, %v20718_v7 }
 0x3ee   : > { %7590 = vmatpush1.bf16.msra.mxu0 %v17994_v56  ;;  %v20808_v56 = vrot.slane %v7633_v16, %v19770_v49  ;;  %v18102_v16 = vld [vmem:[%s19704_s15 + $0xe10] ss:$72 sps:$4 sm:$0xff]  }
 0x3ef   : > { %12005 = vmatpush1.bf16.msra.mxu1 %v17997_v57  ;;  %7591 = vmatprep.subr.bf16.mxu0 %v18002_v23  ;;  %v18057_v57 = vld [vmem:[%s19704_s15 + $0x1290] ss:$72 sps:$4 sm:$0xff]   ;;  %v18062_v23 = vld [vmem:[%s19704_s15 + $0xa24] ss:$72 sps:$4 sm:$0xff]  }
 0x3f0   : > { %12006 = vmatprep.subr.bf16.mxu1 %v18005_v26  ;;  %v18065_v26 = vld [vmem:[%s19704_s15 + $0x1324] ss:$72 sps:$4 sm:$0xff]  }
 0x3f2   : > { %7592 = vmatpush1.bf16.msra.mxu0 %v18000_v61  ;;  %v18063_v61 = vld [vmem:[%s19704_s15 + $0x1320] ss:$72 sps:$4 sm:$0xff]  }
 0x3f3   : > { %12007 = vmatpush1.bf16.msra.mxu1 %v18003_v62  ;;  %7593 = vmatprep.subr.bf16.mxu0 %v18008_v63  ;;  %v18068_v62 = vld [vmem:[%s19704_s15 + $0xab4] ss:$72 sps:$4 sm:$0xff]  }
 0x3f4   : > { %12008 = vmatprep.subr.bf16.mxu1 %v18011_v2  ;;  %v18071_v63 = vld [vmem:[%s19704_s15 + $0x13b4] ss:$72 sps:$4 sm:$0xff]   ;;  %v18066_v2 = vld [vmem:[%s19704_s15 + $0xab0] ss:$72 sps:$4 sm:$0xff]  }
 0x3f6   : > { %7594 = vmatpush1.bf16.msra.mxu0 %v18006_v3  ;;  %v18069_v3 = vld [vmem:[%s19704_s15 + $0x13b0] ss:$72 sps:$4 sm:$0xff]  }
 0x3f7   : > { %12009 = vmatpush1.bf16.msra.mxu1 %v18009_v10  ;;  %7595 = vmatprep.subr.bf16.mxu0 %v18014_v4  ;;  %v18074_v10 = vld [vmem:[%s19704_s15 + $0xb44] ss:$72 sps:$4 sm:$0xff]  }
 0x3f8   : > { %12010 = vmatprep.subr.bf16.mxu1 %v18017_v6  ;;  %v18077_v4 = vld [vmem:[%s19704_s15 + $0x1444] ss:$72 sps:$4 sm:$0xff]   ;;  %v18072_v6 = vld [vmem:[%s19704_s15 + $0xb40] ss:$72 sps:$4 sm:$0xff]  }
 0x3fa   : > { %7596 = vmatpush1.bf16.msra.mxu0 %v18012_v21  ;;  %v18075_v21 = vld [vmem:[%s19704_s15 + $0x1440] ss:$72 sps:$4 sm:$0xff]  }
 0x3fb   : > { %12011 = vmatpush1.bf16.msra.mxu1 %v18015_v8  ;;  %7597 = vmatprep.subr.bf16.mxu0 %v18020_v47  ;;  %v18080_v8 = vld [vmem:[%s19704_s15 + $0xbd4] ss:$72 sps:$4 sm:$0xff]  }
 0x3fc   : > { %12012 = vmatprep.subr.bf16.mxu1 %v18023_v11  ;;  %v18083_v47 = vld [vmem:[%s19704_s15 + $0x14d4] ss:$72 sps:$4 sm:$0xff]   ;;  %v18078_v11 = vld [vmem:[%s19704_s15 + $0xbd0] ss:$72 sps:$4 sm:$0xff]  }
 0x3fe   : > { %7598 = vmatpush1.bf16.msra.mxu0 %v18018_v12  ;;  %v18081_v12 = vld [vmem:[%s19704_s15 + $0x14d0] ss:$72 sps:$4 sm:$0xff]  }
 0x3ff   : > { %12013 = vmatpush1.bf16.msra.mxu1 %v18021_v17  ;;  %7599 = vmatprep.subr.bf16.mxu0 %v18026_v14  ;;  %v18086_v17 = vld [vmem:[%s19704_s15 + $0xc64] ss:$72 sps:$4 sm:$0xff]  }
 0x400   : > { %12014 = vmatprep.subr.bf16.mxu1 %v18029_v15  ;;  %v18089_v14 = vld [vmem:[%s19704_s15 + $0x1564] ss:$72 sps:$4 sm:$0xff]  }
 0x402   : > { %7600 = vmatpush1.bf16.msra.mxu0 %v18024_v22 }
 0x403   : > { %12015 = vmatpush1.bf16.msra.mxu1 %v18027_v18  ;;  %7601 = vmatprep.subr.bf16.mxu0 %v18032_v19  ;;  %v18084_v18 = vld [vmem:[%s19704_s15 + $0xc60] ss:$72 sps:$4 sm:$0xff]  }
 0x404   : > { %12016 = vmatprep.subr.bf16.mxu1 %v18035_v20  ;;  %v18087_v19 = vld [vmem:[%s19704_s15 + $0x1560] ss:$72 sps:$4 sm:$0xff]  }
 0x406   : > { %7602 = vmatpush1.bf16.msra.mxu0 %v18030_v24 }
 0x407   : > { %12017 = vmatpush1.bf16.msra.mxu1 %v18033_v25  ;;  %7603 = vmatprep.subr.bf16.mxu0 %v18038_v30 }
 0x408   : > { %12018 = vmatprep.subr.bf16.mxu1 %v18041_v53 }
 0x40a   : > { %7604 = vmatpush1.bf16.msra.mxu0 %v18036_v34 }
 0x40b   : > { %12019 = vmatpush1.bf16.msra.mxu1 %v18039_v36  ;;  %7605 = vmatprep.subr.bf16.mxu0 %v18044_v55  ;;  %v18095_v55 = vld [vmem:[%s19704_s15 + $0x15f4] ss:$72 sps:$4 sm:$0xff]  }
 0x40c   : > { %12020 = vmatprep.subr.bf16.mxu1 %v18047_v39  ;;  %v18093_v39 = vld [vmem:[%s19704_s15 + $0x15f0] ss:$72 sps:$4 sm:$0xff]  }
 0x40e   : > { %7606 = vmatpush1.bf16.msra.mxu0 %v18042_v50  ;;  %v18098_v50 = vld [vmem:[%s19704_s15 + $0xd84] ss:$72 sps:$4 sm:$0xff]  }
 0x40f   : > { %12021 = vmatpush1.bf16.msra.mxu1 %v18045_v40  ;;  %12031 = vmatprep.subr.bf16.mxu0 %v18050_v41  ;;  %v18101_v40 = vld [vmem:[%s19704_s15 + $0x1684] ss:$72 sps:$4 sm:$0xff]   ;;  %v18096_v41 = vld [vmem:[%s19704_s15 + $0xd80] ss:$72 sps:$4 sm:$0xff]  }
 0x410   : > { %12072 = vmatprep.subr.bf16.mxu1 %v18053_v60  ;;  %v18099_v60 = vld [vmem:[%s19704_s15 + $0x1680] ss:$72 sps:$4 sm:$0xff]  }
 0x411   : > { %7608 = vmatmul.mubr.bf16.vlgmr.msra.gmra.mrb[52].mxu0 %v19892_v27  ;;  %v18060_v27 = vld [vmem:[%s19704_s15 + $0xa20] ss:$72 sps:$4 sm:$0xff]  }
 0x412   : > { %12023 = vmatmul.mubr.bf16.vlgmr.msra.gmra.mrb[52].mxu1 %v20799_v45  ;;  %12032 = vmatpush1.bf16.msra.mxu0 %v18048_v13  ;;  %v18104_v13 = vld [vmem:[%s19704_s15 + $0xe14] ss:$72 sps:$4 sm:$0xff]  }
 0x413   : > { %12073 = vmatpush1.bf16.msra.mxu1 %v18051_v44  ;;  %12033 = vmatprep.subr.bf16.mxu0 %v18056_v46  ;;  %v18107_v44 = vld [vmem:[%s19704_s15 + $0x1714] ss:$72 sps:$4 sm:$0xff]   ;;  %v18105_v46 = vld [vmem:[%s19704_s15 + $0x1710] ss:$72 sps:$4 sm:$0xff]  }
 0x414   : > { %12074 = vmatprep.subr.bf16.mxu1 %v18059_v48  ;;  %12063 = vmatprep.mubr.bf16.mxu0 %v20805_v52  ;;  %v18110_v48 = vld [vmem:[%s19704_s15 + $0xea4] ss:$72 sps:$4 sm:$0xff]  }
 0x415   : > { %12104 = vmatprep.mubr.bf16.mxu1 %v20808_v56 }
 0x416   : > { %12034 = vmatpush1.bf16.msra.mxu0 %v18054_v59  ;;  %v18113_v59 = vld [vmem:[%s19704_s15 + $0x17a4] ss:$72 sps:$4 sm:$0xff]  }
 0x417   : > { %12075 = vmatpush1.bf16.msra.mxu1 %v18057_v57  ;;  %12035 = vmatprep.subr.bf16.mxu0 %v18062_v23  ;;  %v18108_v57 = vld [vmem:[%s19704_s15 + $0xea0] ss:$72 sps:$4 sm:$0xff]  }
 0x418   : > { %12076 = vmatprep.subr.bf16.mxu1 %v18065_v26  ;;  %v18111_v23 = vld [vmem:[%s19704_s15 + $0x17a0] ss:$72 sps:$4 sm:$0xff]   ;;  %v18116_v26 = vld [vmem:[%s19704_s15 + $0xf34] ss:$72 sps:$4 sm:$0xff]  }
 0x41a   : > { %12036 = vmatpush1.bf16.msra.mxu0 %v18060_v27  ;;  %v18119_v27 = vld [vmem:[%s19704_s15 + $0x1834] ss:$72 sps:$4 sm:$0xff]  }
 0x41b   : > { %12077 = vmatpush1.bf16.msra.mxu1 %v18063_v61  ;;  %12037 = vmatprep.subr.bf16.mxu0 %v18068_v62  ;;  %v18114_v61 = vld [vmem:[%s19704_s15 + $0xf30] ss:$72 sps:$4 sm:$0xff]  }
 0x41c   : > { %12078 = vmatprep.subr.bf16.mxu1 %v18071_v63  ;;  %v18117_v62 = vld [vmem:[%s19704_s15 + $0x1830] ss:$72 sps:$4 sm:$0xff]   ;;  %v18122_v63 = vld [vmem:[%s19704_s15 + $0xfc4] ss:$72 sps:$4 sm:$0xff]  }
 0x41e   : > { %12038 = vmatpush1.bf16.msra.mxu0 %v18066_v2  ;;  %v18125_v2 = vld [vmem:[%s19704_s15 + $0x18c4] ss:$72 sps:$4 sm:$0xff]  }
 0x41f   : > { %12079 = vmatpush1.bf16.msra.mxu1 %v18069_v3  ;;  %12039 = vmatprep.subr.bf16.mxu0 %v18074_v10  ;;  %v18120_v3 = vld [vmem:[%s19704_s15 + $0xfc0] ss:$72 sps:$4 sm:$0xff]  }
 0x420   : > { %12080 = vmatprep.subr.bf16.mxu1 %v18077_v4  ;;  %v18123_v10 = vld [vmem:[%s19704_s15 + $0x18c0] ss:$72 sps:$4 sm:$0xff]   ;;  %v18128_v4 = vld [vmem:[%s19704_s15 + $0x1054] ss:$72 sps:$4 sm:$0xff]  }
 0x422   : > { %12040 = vmatpush1.bf16.msra.mxu0 %v18072_v6  ;;  %v18131_v6 = vld [vmem:[%s19704_s15 + $0x1954] ss:$72 sps:$4 sm:$0xff]  }
 0x423   : > { %12081 = vmatpush1.bf16.msra.mxu1 %v18075_v21  ;;  %12041 = vmatprep.subr.bf16.mxu0 %v18080_v8  ;;  %v18126_v21 = vld [vmem:[%s19704_s15 + $0x1050] ss:$72 sps:$4 sm:$0xff]  }
 0x424   : > { %12082 = vmatprep.subr.bf16.mxu1 %v18083_v47  ;;  %v7363_v15 = vpop.f32.mrb[40].mxu0  ;;  %v18129_v8 = vld [vmem:[%s19704_s15 + $0x1950] ss:$72 sps:$4 sm:$0xff]   ;;  %v18134_v47 = vld [vmem:[%s19704_s15 + $0x10e4] ss:$72 sps:$4 sm:$0xff]  }
 0x425   : > { %v20834_v22 = vpop.f32.mrb[40].mxu1  ;;  %v20839_v20 = vadd.f32 %v7363_v15, %v20746_v42  ;;  %v7365_v24 = vpop.f32.mrb[41].mxu0  ;;  %v18092_v42 = vld [vmem:[%s19704_s15 + $0xcf4] ss:$72 sps:$4 sm:$0xff]  }
 0x426   : > { %v20841_v25 = vpop.f32.mrb[41].mxu1  ;;  %v20844_v30 = vadd.f32 %v7365_v24, %v20748_v0  ;;  %v7367_v53 = vpop.f32.mrb[42].mxu0  ;;  %12042 = vmatpush1.bf16.msra.mxu0 %v18078_v11  ;;  %v18090_v0 = vld [vmem:[%s19704_s15 + $0xcf0] ss:$72 sps:$4 sm:$0xff]   ;;  %v18137_v11 = vld [vmem:[%s19704_s15 + $0x19e4] ss:$72 sps:$4 sm:$0xff]  }
 0x427   : > { %v7408_v33 = vpop.f32.mrb[42].mxu1  ;;  %12083 = vmatpush1.bf16.msra.mxu1 %v18081_v12  ;;  %v7368_v34 = vpop.f32.mrb[43].mxu0  ;;  %12043 = vmatprep.subr.bf16.mxu0 %v18086_v17  ;;  %v18132_v12 = vld [vmem:[%s19704_s15 + $0x10e0] ss:$72 sps:$4 sm:$0xff]   ;;  %v18143_v15 = vld [vmem:[%s19704_s15 + $0x1a74] ss:$72 sps:$4 sm:$0xff]  }
 0x428   : > { %v7409_v36 = vpop.f32.mrb[43].mxu1  ;;  %12084 = vmatprep.subr.bf16.mxu1 %v18089_v14  ;;  %v18135_v17 = vld [vmem:[%s19704_s15 + $0x19e0] ss:$72 sps:$4 sm:$0xff]   ;;  %v18140_v14 = vld [vmem:[%s19704_s15 + $0x1174] ss:$72 sps:$4 sm:$0xff]   ;;  %v20886_v33 = vcombine.high %v20799_v45, %v20799_v45  ;;  %v20890_v34 = vrot.slane %v20787_v58, %v19770_v49 }
 0x429   : > { %v18147_v24 = vld [vmem:[%s19704_s15 + $0xc] ss:$72 sps:$4 sm:$0xff]   ;;  %v18145_v36 = vld [vmem:[%s19704_s15 + $0x8] ss:$72 sps:$4 sm:$0xff]   ;;  %v18151_v49 = vld [vmem:[%s19704_s15 + $0x98] ss:$72 sps:$4 sm:$0xff]  }
 0x42a   : > { %12044 = vmatpush1.bf16.msra.mxu0 %v18084_v18  ;;  %v18138_v18 = vld [vmem:[%s19704_s15 + $0x1170] ss:$72 sps:$4 sm:$0xff]   ;;  %v18150_v53 = vld [vmem:[%s19704_s15 + $0x90c] ss:$72 sps:$4 sm:$0xff]  }
 0x42b   : > { %12085 = vmatpush1.bf16.msra.mxu1 %v18087_v19  ;;  %12045 = vmatprep.subr.bf16.mxu0 %v18092_v42  ;;  %v18141_v19 = vld [vmem:[%s19704_s15 + $0x1a70] ss:$72 sps:$4 sm:$0xff]  }
 0x42c   : > { %12086 = vmatprep.subr.bf16.mxu1 %v18095_v55  ;;  %v18148_v42 = vld [vmem:[%s19704_s15 + $0x908] ss:$72 sps:$4 sm:$0xff]   ;;  %v18153_v55 = vld [vmem:[%s19704_s15 + $0x9c] ss:$72 sps:$4 sm:$0xff]   ;;  %v18154_v58 = vld [vmem:[%s19704_s15 + $0x998] ss:$72 sps:$4 sm:$0xff]  }
 0x42e   : > { %12046 = vmatpush1.bf16.msra.mxu0 %v18090_v0  ;;  %v18156_v0 = vld [vmem:[%s19704_s15 + $0x99c] ss:$72 sps:$4 sm:$0xff]  }
 0x42f   : > { %12087 = vmatpush1.bf16.msra.mxu1 %v18093_v39  ;;  %12047 = vmatprep.subr.bf16.mxu0 %v18098_v50  ;;  %v18159_v39 = vld [vmem:[%s19704_s15 + $0x12c] ss:$72 sps:$4 sm:$0xff]  }
 0x430   : > { %12088 = vmatprep.subr.bf16.mxu1 %v18101_v40  ;;  %v18162_v50 = vld [vmem:[%s19704_s15 + $0xa2c] ss:$72 sps:$4 sm:$0xff]   ;;  %v18157_v40 = vld [vmem:[%s19704_s15 + $0x128] ss:$72 sps:$4 sm:$0xff]  }
 0x432   : > { %12048 = vmatpush1.bf16.msra.mxu0 %v18096_v41  ;;  %v18160_v41 = vld [vmem:[%s19704_s15 + $0xa28] ss:$72 sps:$4 sm:$0xff]  }
 0x433   : > { %12089 = vmatpush1.bf16.msra.mxu1 %v18099_v60  ;;  %12049 = vmatprep.subr.bf16.mxu0 %v18104_v13  ;;  %v18165_v60 = vld [vmem:[%s19704_s15 + $0x1bc] ss:$72 sps:$4 sm:$0xff]  }
 0x434   : > { %12090 = vmatprep.subr.bf16.mxu1 %v18107_v44  ;;  %v18168_v13 = vld [vmem:[%s19704_s15 + $0xabc] ss:$72 sps:$4 sm:$0xff]   ;;  %v18163_v44 = vld [vmem:[%s19704_s15 + $0x1b8] ss:$72 sps:$4 sm:$0xff]  }
 0x436   : > { %12050 = vmatpush1.bf16.msra.mxu0 %v18102_v16  ;;  %v18166_v16 = vld [vmem:[%s19704_s15 + $0xab8] ss:$72 sps:$4 sm:$0xff]  }
 0x437   : > { %12091 = vmatpush1.bf16.msra.mxu1 %v18105_v46  ;;  %12051 = vmatprep.subr.bf16.mxu0 %v18110_v48  ;;  %v18171_v46 = vld [vmem:[%s19704_s15 + $0x24c] ss:$72 sps:$4 sm:$0xff]  }
 0x438   : > { %12092 = vmatprep.subr.bf16.mxu1 %v18113_v59  ;;  %v18174_v48 = vld [vmem:[%s19704_s15 + $0xb4c] ss:$72 sps:$4 sm:$0xff]   ;;  %v18169_v59 = vld [vmem:[%s19704_s15 + $0x248] ss:$72 sps:$4 sm:$0xff]  }
 0x43a   : > { %12052 = vmatpush1.bf16.msra.mxu0 %v18108_v57  ;;  %v18172_v57 = vld [vmem:[%s19704_s15 + $0xb48] ss:$72 sps:$4 sm:$0xff]  }
 0x43b   : > { %12093 = vmatpush1.bf16.msra.mxu1 %v18111_v23  ;;  %12053 = vmatprep.subr.bf16.mxu0 %v18116_v26  ;;  %v18177_v23 = vld [vmem:[%s19704_s15 + $0x2dc] ss:$72 sps:$4 sm:$0xff]  }
 0x43c   : > { %12094 = vmatprep.subr.bf16.mxu1 %v18119_v27  ;;  %v18180_v26 = vld [vmem:[%s19704_s15 + $0xbdc] ss:$72 sps:$4 sm:$0xff]   ;;  %v18175_v27 = vld [vmem:[%s19704_s15 + $0x2d8] ss:$72 sps:$4 sm:$0xff]  }
 0x43e   : > { %12054 = vmatpush1.bf16.msra.mxu0 %v18114_v61  ;;  %v18178_v61 = vld [vmem:[%s19704_s15 + $0xbd8] ss:$72 sps:$4 sm:$0xff]  }
 0x43f   : > { %12095 = vmatpush1.bf16.msra.mxu1 %v18117_v62  ;;  %12055 = vmatprep.subr.bf16.mxu0 %v18122_v63  ;;  %v18183_v62 = vld [vmem:[%s19704_s15 + $0x36c] ss:$72 sps:$4 sm:$0xff]  }
 0x440   : > { %12096 = vmatprep.subr.bf16.mxu1 %v18125_v2  ;;  %v18186_v63 = vld [vmem:[%s19704_s15 + $0xc6c] ss:$72 sps:$4 sm:$0xff]  }
 0x442   : > { %12056 = vmatpush1.bf16.msra.mxu0 %v18120_v3 }
 0x443   : > { %12097 = vmatpush1.bf16.msra.mxu1 %v18123_v10  ;;  %12057 = vmatprep.subr.bf16.mxu0 %v18128_v4 }
 0x444   : > { %12098 = vmatprep.subr.bf16.mxu1 %v18131_v6 }
 0x446   : > { %12058 = vmatpush1.bf16.msra.mxu0 %v18126_v21 }
 0x447   : > { %12099 = vmatpush1.bf16.msra.mxu1 %v18129_v8  ;;  %12059 = vmatprep.subr.bf16.mxu0 %v18134_v47 }
 0x448   : > { %12100 = vmatprep.subr.bf16.mxu1 %v18137_v11  ;;  %v18181_v11 = vld [vmem:[%s19704_s15 + $0x368] ss:$72 sps:$4 sm:$0xff]  }
 0x44a   : > { %12060 = vmatpush1.bf16.msra.mxu0 %v18132_v12  ;;  %v18184_v12 = vld [vmem:[%s19704_s15 + $0xc68] ss:$72 sps:$4 sm:$0xff]  }
 0x44b   : > { %12101 = vmatpush1.bf16.msra.mxu1 %v18135_v17  ;;  %12061 = vmatprep.subr.bf16.mxu0 %v18140_v14 }
 0x44c   : > { %12102 = vmatprep.subr.bf16.mxu1 %v18143_v15 }
 0x44e   : > { %12062 = vmatpush1.bf16.msra.mxu0 %v18138_v18 }
 0x44f   : > { %12103 = vmatpush1.bf16.msra.mxu1 %v18141_v19  ;;  %12113 = vmatprep.subr.bf16.mxu0 %v18147_v24  ;;  %v18187_v19 = vld [vmem:[%s19704_s15 + $0x3f8] ss:$72 sps:$4 sm:$0xff]  }
 0x450   : > { %12154 = vmatprep.subr.bf16.mxu1 %v18150_v53  ;;  %v18190_v24 = vld [vmem:[%s19704_s15 + $0xcf8] ss:$72 sps:$4 sm:$0xff]   ;;  %v18195_v53 = vld [vmem:[%s19704_s15 + $0x48c] ss:$72 sps:$4 sm:$0xff]  }
 0x451   : > { %12064 = vmatmul.mubr.bf16.vlgmr.msra.gmra.mrb[56].mxu0 %v20886_v33 }
 0x452   : > { %12105 = vmatmul.mubr.bf16.vlgmr.msra.gmra.mrb[56].mxu1 %v20890_v34  ;;  %12114 = vmatpush1.bf16.msra.mxu0 %v18145_v36  ;;  %v18198_v36 = vld [vmem:[%s19704_s15 + $0xd8c] ss:$72 sps:$4 sm:$0xff]  }
 0x453   : > { %12155 = vmatpush1.bf16.msra.mxu1 %v18148_v42  ;;  %12115 = vmatprep.subr.bf16.mxu0 %v18153_v55  ;;  %v18193_v42 = vld [vmem:[%s19704_s15 + $0x488] ss:$72 sps:$4 sm:$0xff]  }
 0x454   : > { %12156 = vmatprep.subr.bf16.mxu1 %v18156_v0  ;;  %12145 = vmatprep.mubr.bf16.mxu0 %v20718_v7  ;;  %v18196_v55 = vld [vmem:[%s19704_s15 + $0xd88] ss:$72 sps:$4 sm:$0xff]   ;;  %v18201_v0 = vld [vmem:[%s19704_s15 + $0x51c] ss:$72 sps:$4 sm:$0xff]  }
 0x455   : > { %12186 = vmatprep.mubr.bf16.mxu1 %v20805_v52 }
 0x456   : > { %12116 = vmatpush1.bf16.msra.mxu0 %v18151_v49  ;;  %v18204_v49 = vld [vmem:[%s19704_s15 + $0xe1c] ss:$72 sps:$4 sm:$0xff]  }
 0x457   : > { %12157 = vmatpush1.bf16.msra.mxu1 %v18154_v58  ;;  %12117 = vmatprep.subr.bf16.mxu0 %v18159_v39  ;;  %v18199_v58 = vld [vmem:[%s19704_s15 + $0x518] ss:$72 sps:$4 sm:$0xff]  }
 0x458   : > { %12158 = vmatprep.subr.bf16.mxu1 %v18162_v50  ;;  %v18202_v39 = vld [vmem:[%s19704_s15 + $0xe18] ss:$72 sps:$4 sm:$0xff]   ;;  %v18207_v50 = vld [vmem:[%s19704_s15 + $0x5ac] ss:$72 sps:$4 sm:$0xff]  }
 0x45a   : > { %12118 = vmatpush1.bf16.msra.mxu0 %v18157_v40  ;;  %v18210_v40 = vld [vmem:[%s19704_s15 + $0xeac] ss:$72 sps:$4 sm:$0xff]  }
 0x45b   : > { %12159 = vmatpush1.bf16.msra.mxu1 %v18160_v41  ;;  %12119 = vmatprep.subr.bf16.mxu0 %v18165_v60  ;;  %v18205_v41 = vld [vmem:[%s19704_s15 + $0x5a8] ss:$72 sps:$4 sm:$0xff]  }
 0x45c   : > { %12160 = vmatprep.subr.bf16.mxu1 %v18168_v13  ;;  %v18208_v60 = vld [vmem:[%s19704_s15 + $0xea8] ss:$72 sps:$4 sm:$0xff]   ;;  %v18213_v13 = vld [vmem:[%s19704_s15 + $0x63c] ss:$72 sps:$4 sm:$0xff]  }
 0x45e   : > { %12120 = vmatpush1.bf16.msra.mxu0 %v18163_v44  ;;  %v18216_v44 = vld [vmem:[%s19704_s15 + $0xf3c] ss:$72 sps:$4 sm:$0xff]  }
 0x45f   : > { %12161 = vmatpush1.bf16.msra.mxu1 %v18166_v16  ;;  %12121 = vmatprep.subr.bf16.mxu0 %v18171_v46  ;;  %v18211_v16 = vld [vmem:[%s19704_s15 + $0x638] ss:$72 sps:$4 sm:$0xff]  }
 0x460   : > { %12162 = vmatprep.subr.bf16.mxu1 %v18174_v48  ;;  %v18214_v46 = vld [vmem:[%s19704_s15 + $0xf38] ss:$72 sps:$4 sm:$0xff]   ;;  %v18219_v48 = vld [vmem:[%s19704_s15 + $0x6cc] ss:$72 sps:$4 sm:$0xff]  }
 0x462   : > { %12122 = vmatpush1.bf16.msra.mxu0 %v18169_v59  ;;  %v18222_v59 = vld [vmem:[%s19704_s15 + $0xfcc] ss:$72 sps:$4 sm:$0xff]  }
 0x463   : > { %12163 = vmatpush1.bf16.msra.mxu1 %v18172_v57  ;;  %12123 = vmatprep.subr.bf16.mxu0 %v18177_v23  ;;  %v18217_v57 = vld [vmem:[%s19704_s15 + $0x6c8] ss:$72 sps:$4 sm:$0xff]  }
 0x464   : > { %12164 = vmatprep.subr.bf16.mxu1 %v18180_v26  ;;  %v7445_v2 = vpop.f32.mrb[44].mxu0  ;;  %v18220_v23 = vld [vmem:[%s19704_s15 + $0xfc8] ss:$72 sps:$4 sm:$0xff]   ;;  %v18225_v26 = vld [vmem:[%s19704_s15 + $0x75c] ss:$72 sps:$4 sm:$0xff]  }
 0x465   : > { %v7486_v3 = vpop.f32.mrb[44].mxu1  ;;  %v7446_v10 = vadd.f32 %v7445_v2, %v20834_v22  ;;  %v7447_v4 = vpop.f32.mrb[45].mxu0  ;;  %v18189_v22 = vld [vmem:[%s19704_s15 + $0x3fc] ss:$72 sps:$4 sm:$0xff]   ;;  %v18234_v2 = vld [vmem:[%s19704_s15 + $0x10ec] ss:$72 sps:$4 sm:$0xff]  }
 0x466   : > { %v7488_v6 = vpop.f32.mrb[45].mxu1  ;;  %v7448_v21 = vadd.f32 %v7447_v4, %v20841_v25  ;;  %v7449_v8 = vpop.f32.mrb[46].mxu0  ;;  %12124 = vmatpush1.bf16.msra.mxu0 %v18175_v27  ;;  %v18192_v25 = vld [vmem:[%s19704_s15 + $0xcfc] ss:$72 sps:$4 sm:$0xff]  }
 0x467   : > { %v7490_v47 = vpop.f32.mrb[46].mxu1  ;;  %12165 = vmatpush1.bf16.msra.mxu1 %v18178_v61  ;;  %v20924_v17 = vadd.f32 %v7486_v3, %v7446_v10  ;;  %v7450_v14 = vpop.f32.mrb[47].mxu0  ;;  %12125 = vmatprep.subr.bf16.mxu0 %v18183_v62  ;;  %v18228_v27 = vld [vmem:[%s19704_s15 + $0x105c] ss:$72 sps:$4 sm:$0xff]   ;;  %v18223_v61 = vld [vmem:[%s19704_s15 + $0x758] ss:$72 sps:$4 sm:$0xff]  }
 0x468   : > { %v7491_v15 = vpop.f32.mrb[47].mxu1  ;;  %12166 = vmatprep.subr.bf16.mxu1 %v18186_v63  ;;  %v20928_v18 = vadd.f32 %v7488_v6, %v7448_v21  ;;  %v18226_v62 = vld [vmem:[%s19704_s15 + $0x1058] ss:$72 sps:$4 sm:$0xff]   ;;  %v18231_v63 = vld [vmem:[%s19704_s15 + $0x7ec] ss:$72 sps:$4 sm:$0xff]  }
 0x469   : > { %v18229_v3 = vld [vmem:[%s19704_s15 + $0x7e8] ss:$72 sps:$4 sm:$0xff]   ;;  %v18237_v4 = vld [vmem:[%s19704_s15 + $0x87c] ss:$72 sps:$4 sm:$0xff]   ;;  %v18235_v21 = vld [vmem:[%s19704_s15 + $0x878] ss:$72 sps:$4 sm:$0xff]  }
 0x46a   : > { %12126 = vmatpush1.bf16.msra.mxu0 %v18181_v11  ;;  %v18232_v10 = vld [vmem:[%s19704_s15 + $0x10e8] ss:$72 sps:$4 sm:$0xff]   ;;  %v18240_v6 = vld [vmem:[%s19704_s15 + $0x117c] ss:$72 sps:$4 sm:$0xff]   ;;  %v18238_v8 = vld [vmem:[%s19704_s15 + $0x1178] ss:$72 sps:$4 sm:$0xff]  }
 0x46b   : > { %12167 = vmatpush1.bf16.msra.mxu1 %v18184_v12  ;;  %12127 = vmatprep.subr.bf16.mxu0 %v18189_v22  ;;  %v18243_v47 = vld [vmem:[%s19704_s15 + $0x120c] ss:$72 sps:$4 sm:$0xff]   ;;  %v18241_v12 = vld [vmem:[%s19704_s15 + $0x1208] ss:$72 sps:$4 sm:$0xff]   ;;  %v18249_v15 = vld [vmem:[%s19704_s15 + $0x129c] ss:$72 sps:$4 sm:$0xff]  }
 0x46c   : > { %12168 = vmatprep.subr.bf16.mxu1 %v18192_v25  ;;  %v18246_v11 = vld [vmem:[%s19704_s15 + $0x14] ss:$72 sps:$4 sm:$0xff]   ;;  %v18244_v14 = vld [vmem:[%s19704_s15 + $0x10] ss:$72 sps:$4 sm:$0xff]   ;;  %v18252_v22 = vld [vmem:[%s19704_s15 + $0xa4] ss:$72 sps:$4 sm:$0xff]  }
 0x46d   : > { %v18247_v25 = vld [vmem:[%s19704_s15 + $0x1298] ss:$72 sps:$4 sm:$0xff]  }
 0x46e   : > { %12128 = vmatpush1.bf16.msra.mxu0 %v18187_v19  ;;  %v18250_v19 = vld [vmem:[%s19704_s15 + $0xa0] ss:$72 sps:$4 sm:$0xff]  }
 0x46f   : > { %12169 = vmatpush1.bf16.msra.mxu1 %v18190_v24  ;;  %12129 = vmatprep.subr.bf16.mxu0 %v18195_v53  ;;  %v18255_v24 = vld [vmem:[%s19704_s15 + $0x132c] ss:$72 sps:$4 sm:$0xff]  }
 0x470   : > { %12170 = vmatprep.subr.bf16.mxu1 %v18198_v36  ;;  %v18258_v53 = vld [vmem:[%s19704_s15 + $0x134] ss:$72 sps:$4 sm:$0xff]   ;;  %v18253_v36 = vld [vmem:[%s19704_s15 + $0x1328] ss:$72 sps:$4 sm:$0xff]  }
 0x472   : > { %12130 = vmatpush1.bf16.msra.mxu0 %v18193_v42  ;;  %v18256_v42 = vld [vmem:[%s19704_s15 + $0x130] ss:$72 sps:$4 sm:$0xff]  }
 0x473   : > { %12171 = vmatpush1.bf16.msra.mxu1 %v18196_v55  ;;  %12131 = vmatprep.subr.bf16.mxu0 %v18201_v0  ;;  %v18261_v55 = vld [vmem:[%s19704_s15 + $0x13bc] ss:$72 sps:$4 sm:$0xff]  }
 0x474   : > { %12172 = vmatprep.subr.bf16.mxu1 %v18204_v49  ;;  %v18264_v0 = vld [vmem:[%s19704_s15 + $0x1c4] ss:$72 sps:$4 sm:$0xff]   ;;  %v18259_v49 = vld [vmem:[%s19704_s15 + $0x13b8] ss:$72 sps:$4 sm:$0xff]  }
 0x476   : > { %12132 = vmatpush1.bf16.msra.mxu0 %v18199_v58  ;;  %v18262_v58 = vld [vmem:[%s19704_s15 + $0x1c0] ss:$72 sps:$4 sm:$0xff]  }
 0x477   : > { %12173 = vmatpush1.bf16.msra.mxu1 %v18202_v39  ;;  %12133 = vmatprep.subr.bf16.mxu0 %v18207_v50  ;;  %v18267_v39 = vld [vmem:[%s19704_s15 + $0x144c] ss:$72 sps:$4 sm:$0xff]  }
 0x478   : > { %12174 = vmatprep.subr.bf16.mxu1 %v18210_v40  ;;  %v18270_v50 = vld [vmem:[%s19704_s15 + $0x254] ss:$72 sps:$4 sm:$0xff]   ;;  %v18265_v40 = vld [vmem:[%s19704_s15 + $0x1448] ss:$72 sps:$4 sm:$0xff]  }
 0x47a   : > { %12134 = vmatpush1.bf16.msra.mxu0 %v18205_v41  ;;  %v18268_v41 = vld [vmem:[%s19704_s15 + $0x250] ss:$72 sps:$4 sm:$0xff]  }
 0x47b   : > { %12175 = vmatpush1.bf16.msra.mxu1 %v18208_v60  ;;  %12135 = vmatprep.subr.bf16.mxu0 %v18213_v13  ;;  %v18273_v60 = vld [vmem:[%s19704_s15 + $0x14dc] ss:$72 sps:$4 sm:$0xff]  }
 0x47c   : > { %12176 = vmatprep.subr.bf16.mxu1 %v18216_v44  ;;  %v18276_v13 = vld [vmem:[%s19704_s15 + $0x2e4] ss:$72 sps:$4 sm:$0xff]   ;;  %v18271_v44 = vld [vmem:[%s19704_s15 + $0x14d8] ss:$72 sps:$4 sm:$0xff]  }
 0x47e   : > { %12136 = vmatpush1.bf16.msra.mxu0 %v18211_v16  ;;  %v18274_v16 = vld [vmem:[%s19704_s15 + $0x2e0] ss:$72 sps:$4 sm:$0xff]  }
 0x47f   : > { %12177 = vmatpush1.bf16.msra.mxu1 %v18214_v46  ;;  %12137 = vmatprep.subr.bf16.mxu0 %v18219_v48  ;;  %v18279_v46 = vld [vmem:[%s19704_s15 + $0x156c] ss:$72 sps:$4 sm:$0xff]  }
 0x480   : > { %12178 = vmatprep.subr.bf16.mxu1 %v18222_v59  ;;  %v18282_v48 = vld [vmem:[%s19704_s15 + $0x374] ss:$72 sps:$4 sm:$0xff]  }
 0x482   : > { %12138 = vmatpush1.bf16.msra.mxu0 %v18217_v57 }
 0x483   : > { %12179 = vmatpush1.bf16.msra.mxu1 %v18220_v23  ;;  %12139 = vmatprep.subr.bf16.mxu0 %v18225_v26 }
 0x484   : > { %12180 = vmatprep.subr.bf16.mxu1 %v18228_v27 }
 0x486   : > { %12140 = vmatpush1.bf16.msra.mxu0 %v18223_v61 }
 0x487   : > { %12181 = vmatpush1.bf16.msra.mxu1 %v18226_v62  ;;  %12141 = vmatprep.subr.bf16.mxu0 %v18231_v63 }
 0x488   : > { %12182 = vmatprep.subr.bf16.mxu1 %v18234_v2  ;;  %v18277_v2 = vld [vmem:[%s19704_s15 + $0x1568] ss:$72 sps:$4 sm:$0xff]  }
 0x48a   : > { %12142 = vmatpush1.bf16.msra.mxu0 %v18229_v3  ;;  %v18280_v3 = vld [vmem:[%s19704_s15 + $0x370] ss:$72 sps:$4 sm:$0xff]  }
 0x48b   : > { %12183 = vmatpush1.bf16.msra.mxu1 %v18232_v10  ;;  %12143 = vmatprep.subr.bf16.mxu0 %v18237_v4 }
 0x48c   : > { %12184 = vmatprep.subr.bf16.mxu1 %v18240_v6  ;;  %v18285_v6 = vld [vmem:[%s19704_s15 + $0x15fc] ss:$72 sps:$4 sm:$0xff]  }
 0x48e   : > { %12144 = vmatpush1.bf16.msra.mxu0 %v18235_v21  ;;  %v18288_v21 = vld [vmem:[%s19704_s15 + $0x404] ss:$72 sps:$4 sm:$0xff]  }
 0x48f   : > { %12185 = vmatpush1.bf16.msra.mxu1 %v18238_v8  ;;  %12195 = vmatprep.subr.bf16.mxu0 %v18243_v47  ;;  %v18283_v8 = vld [vmem:[%s19704_s15 + $0x15f8] ss:$72 sps:$4 sm:$0xff]  }
 0x490   : > { %12236 = vmatprep.subr.bf16.mxu1 %v18246_v11  ;;  %v18286_v47 = vld [vmem:[%s19704_s15 + $0x400] ss:$72 sps:$4 sm:$0xff]   ;;  %v18291_v11 = vld [vmem:[%s19704_s15 + $0x168c] ss:$72 sps:$4 sm:$0xff]  }
 0x491   : > { %12146 = vmatmul.mubr.bf16.vlgmr.msra.gmra.mrb[60].mxu0 %v20799_v45 }
 0x492   : > { %12187 = vmatmul.mubr.bf16.vlgmr.msra.gmra.mrb[60].mxu1 %v20886_v33  ;;  %12196 = vmatpush1.bf16.msra.mxu0 %v18241_v12  ;;  %v18294_v12 = vld [vmem:[%s19704_s15 + $0x494] ss:$72 sps:$4 sm:$0xff]  }
 0x493   : > { %12237 = vmatpush1.bf16.msra.mxu1 %v18244_v14  ;;  %12197 = vmatprep.subr.bf16.mxu0 %v18249_v15  ;;  %v18289_v14 = vld [vmem:[%s19704_s15 + $0x1688] ss:$72 sps:$4 sm:$0xff]  }
 0x494   : > { %12238 = vmatprep.subr.bf16.mxu1 %v18252_v22  ;;  %12227 = vmatprep.mubr.bf16.mxu0 %v20808_v56  ;;  %v18292_v15 = vld [vmem:[%s19704_s15 + $0x490] ss:$72 sps:$4 sm:$0xff]   ;;  %v18297_v22 = vld [vmem:[%s19704_s15 + $0x171c] ss:$72 sps:$4 sm:$0xff]  }
 0x495   : > { %12268 = vmatprep.mubr.bf16.mxu1 %v20718_v7 }
 0x496   : > { %12198 = vmatpush1.bf16.msra.mxu0 %v18247_v25  ;;  %v18300_v25 = vld [vmem:[%s19704_s15 + $0x524] ss:$72 sps:$4 sm:$0xff]  }
 0x497   : > { %12239 = vmatpush1.bf16.msra.mxu1 %v18250_v19  ;;  %12199 = vmatprep.subr.bf16.mxu0 %v18255_v24  ;;  %v18295_v19 = vld [vmem:[%s19704_s15 + $0x1718] ss:$72 sps:$4 sm:$0xff]  }
 0x498   : > { %12240 = vmatprep.subr.bf16.mxu1 %v18258_v53  ;;  %v18298_v24 = vld [vmem:[%s19704_s15 + $0x520] ss:$72 sps:$4 sm:$0xff]   ;;  %v18303_v53 = vld [vmem:[%s19704_s15 + $0x17ac] ss:$72 sps:$4 sm:$0xff]  }
 0x49a   : > { %12200 = vmatpush1.bf16.msra.mxu0 %v18253_v36  ;;  %v18306_v36 = vld [vmem:[%s19704_s15 + $0x5b4] ss:$72 sps:$4 sm:$0xff]  }
 0x49b   : > { %12241 = vmatpush1.bf16.msra.mxu1 %v18256_v42  ;;  %12201 = vmatprep.subr.bf16.mxu0 %v18261_v55  ;;  %v18301_v42 = vld [vmem:[%s19704_s15 + $0x17a8] ss:$72 sps:$4 sm:$0xff]  }
 0x49c   : > { %12242 = vmatprep.subr.bf16.mxu1 %v18264_v0  ;;  %v18304_v55 = vld [vmem:[%s19704_s15 + $0x5b0] ss:$72 sps:$4 sm:$0xff]   ;;  %v18309_v0 = vld [vmem:[%s19704_s15 + $0x183c] ss:$72 sps:$4 sm:$0xff]  }
 0x49e   : > { %12202 = vmatpush1.bf16.msra.mxu0 %v18259_v49  ;;  %v18312_v49 = vld [vmem:[%s19704_s15 + $0x644] ss:$72 sps:$4 sm:$0xff]  }
 0x49f   : > { %12243 = vmatpush1.bf16.msra.mxu1 %v18262_v58  ;;  %12203 = vmatprep.subr.bf16.mxu0 %v18267_v39  ;;  %v18307_v58 = vld [vmem:[%s19704_s15 + $0x1838] ss:$72 sps:$4 sm:$0xff]  }
 0x4a0   : > { %12244 = vmatprep.subr.bf16.mxu1 %v18270_v50  ;;  %v18310_v39 = vld [vmem:[%s19704_s15 + $0x640] ss:$72 sps:$4 sm:$0xff]   ;;  %v18315_v50 = vld [vmem:[%s19704_s15 + $0x18cc] ss:$72 sps:$4 sm:$0xff]  }
 0x4a2   : > { %12204 = vmatpush1.bf16.msra.mxu0 %v18265_v40  ;;  %v18318_v40 = vld [vmem:[%s19704_s15 + $0x6d4] ss:$72 sps:$4 sm:$0xff]  }
 0x4a3   : > { %12245 = vmatpush1.bf16.msra.mxu1 %v18268_v41  ;;  %12205 = vmatprep.subr.bf16.mxu0 %v18273_v60  ;;  %v18313_v41 = vld [vmem:[%s19704_s15 + $0x18c8] ss:$72 sps:$4 sm:$0xff]  }
 0x4a4   : > { %12246 = vmatprep.subr.bf16.mxu1 %v18276_v13  ;;  %v7527_v59 = vpop.f32.mrb[48].mxu0  ;;  %v18316_v60 = vld [vmem:[%s19704_s15 + $0x6d0] ss:$72 sps:$4 sm:$0xff]   ;;  %v18321_v13 = vld [vmem:[%s19704_s15 + $0x195c] ss:$72 sps:$4 sm:$0xff]  }
 0x4a5   : > { %v7568_v57 = vpop.f32.mrb[48].mxu1  ;;  %v7529_v26 = vpop.f32.mrb[49].mxu0 }
 0x4a6   : > { %v20994_v23 = vadd.f32 %v7568_v57, %v7527_v59  ;;  %v7570_v27 = vpop.f32.mrb[49].mxu1  ;;  %v7531_v62 = vpop.f32.mrb[50].mxu0  ;;  %12206 = vmatpush1.bf16.msra.mxu0 %v18271_v44  ;;  %v18324_v44 = vld [vmem:[%s19704_s15 + $0x764] ss:$72 sps:$4 sm:$0xff]   ;;  %v18330_v59 = vld [vmem:[%s19704_s15 + $0x7f4] ss:$72 sps:$4 sm:$0xff]  }
 0x4a7   : > { %v20996_v61 = vadd.f32 %v7570_v27, %v7529_v26  ;;  %v7572_v63 = vpop.f32.mrb[50].mxu1  ;;  %12247 = vmatpush1.bf16.msra.mxu1 %v18274_v16  ;;  %v7532_v10 = vpop.f32.mrb[51].mxu0  ;;  %12207 = vmatprep.subr.bf16.mxu0 %v18279_v46  ;;  %v18319_v16 = vld [vmem:[%s19704_s15 + $0x1958] ss:$72 sps:$4 sm:$0xff]   ;;  %v18325_v57 = vld [vmem:[%s19704_s15 + $0x19e8] ss:$72 sps:$4 sm:$0xff]  }
 0x4a8   : > { %v7573_v4 = vpop.f32.mrb[51].mxu1  ;;  %12248 = vmatprep.subr.bf16.mxu1 %v18282_v48  ;;  %v18322_v46 = vld [vmem:[%s19704_s15 + $0x760] ss:$72 sps:$4 sm:$0xff]   ;;  %v18327_v48 = vld [vmem:[%s19704_s15 + $0x19ec] ss:$72 sps:$4 sm:$0xff]  }
 0x4a9   : > { %v18328_v26 = vld [vmem:[%s19704_s15 + $0x7f0] ss:$72 sps:$4 sm:$0xff]   ;;  %v18333_v27 = vld [vmem:[%s19704_s15 + $0x1a7c] ss:$72 sps:$4 sm:$0xff]  }
 0x4aa   : > { %12208 = vmatpush1.bf16.msra.mxu0 %v18277_v2  ;;  %v18336_v62 = vld [vmem:[%s19704_s15 + $0x884] ss:$72 sps:$4 sm:$0xff]   ;;  %v18331_v63 = vld [vmem:[%s19704_s15 + $0x1a78] ss:$72 sps:$4 sm:$0xff]   ;;  %v18342_v10 = vld [vmem:[%s19704_s15 + $0x1214] ss:$72 sps:$4 sm:$0xff]  }
 0x4ab   : > { %12249 = vmatpush1.bf16.msra.mxu1 %v18280_v3  ;;  %12209 = vmatprep.subr.bf16.mxu0 %v18285_v6  ;;  %v18334_v2 = vld [vmem:[%s19704_s15 + $0x880] ss:$72 sps:$4 sm:$0xff]   ;;  %v18339_v3 = vld [vmem:[%s19704_s15 + $0x914] ss:$72 sps:$4 sm:$0xff]   ;;  %v18337_v4 = vld [vmem:[%s19704_s15 + $0x910] ss:$72 sps:$4 sm:$0xff]  }
 0x4ac   : > { %12250 = vmatprep.subr.bf16.mxu1 %v18288_v21  ;;  %v18340_v6 = vld [vmem:[%s19704_s15 + $0x1210] ss:$72 sps:$4 sm:$0xff]   ;;  %v18345_v21 = vld [vmem:[%s19704_s15 + $0x9a4] ss:$72 sps:$4 sm:$0xff]  }
 0x4ae   : > { %12210 = vmatpush1.bf16.msra.mxu0 %v18283_v8  ;;  %v18348_v8 = vld [vmem:[%s19704_s15 + $0x12a4] ss:$72 sps:$4 sm:$0xff]  }
 0x4af   : > { %12251 = vmatpush1.bf16.msra.mxu1 %v18286_v47  ;;  %12211 = vmatprep.subr.bf16.mxu0 %v18291_v11  ;;  %v18343_v47 = vld [vmem:[%s19704_s15 + $0x9a0] ss:$72 sps:$4 sm:$0xff]  }
 0x4b0   : > { %12252 = vmatprep.subr.bf16.mxu1 %v18294_v12  ;;  %v18346_v11 = vld [vmem:[%s19704_s15 + $0x12a0] ss:$72 sps:$4 sm:$0xff]   ;;  %v18351_v12 = vld [vmem:[%s19704_s15 + $0xa34] ss:$72 sps:$4 sm:$0xff]  }
 0x4b2   : > { %12212 = vmatpush1.bf16.msra.mxu0 %v18289_v14  ;;  %v18354_v14 = vld [vmem:[%s19704_s15 + $0x1334] ss:$72 sps:$4 sm:$0xff]  }
 0x4b3   : > { %12253 = vmatpush1.bf16.msra.mxu1 %v18292_v15  ;;  %12213 = vmatprep.subr.bf16.mxu0 %v18297_v22  ;;  %v18349_v15 = vld [vmem:[%s19704_s15 + $0xa30] ss:$72 sps:$4 sm:$0xff]  }
 0x4b4   : > { %12254 = vmatprep.subr.bf16.mxu1 %v18300_v25  ;;  %v18352_v22 = vld [vmem:[%s19704_s15 + $0x1330] ss:$72 sps:$4 sm:$0xff]   ;;  %v18357_v25 = vld [vmem:[%s19704_s15 + $0xac4] ss:$72 sps:$4 sm:$0xff]  }
 0x4b6   : > { %12214 = vmatpush1.bf16.msra.mxu0 %v18295_v19  ;;  %v18360_v19 = vld [vmem:[%s19704_s15 + $0x13c4] ss:$72 sps:$4 sm:$0xff]  }
 0x4b7   : > { %12255 = vmatpush1.bf16.msra.mxu1 %v18298_v24  ;;  %12215 = vmatprep.subr.bf16.mxu0 %v18303_v53  ;;  %v18355_v24 = vld [vmem:[%s19704_s15 + $0xac0] ss:$72 sps:$4 sm:$0xff]  }
 0x4b8   : > { %12256 = vmatprep.subr.bf16.mxu1 %v18306_v36  ;;  %v18358_v53 = vld [vmem:[%s19704_s15 + $0x13c0] ss:$72 sps:$4 sm:$0xff]   ;;  %v18363_v36 = vld [vmem:[%s19704_s15 + $0xb54] ss:$72 sps:$4 sm:$0xff]  }
 0x4ba   : > { %12216 = vmatpush1.bf16.msra.mxu0 %v18301_v42  ;;  %v18366_v42 = vld [vmem:[%s19704_s15 + $0x1454] ss:$72 sps:$4 sm:$0xff]  }
 0x4bb   : > { %12257 = vmatpush1.bf16.msra.mxu1 %v18304_v55  ;;  %12217 = vmatprep.subr.bf16.mxu0 %v18309_v0  ;;  %v18361_v55 = vld [vmem:[%s19704_s15 + $0xb50] ss:$72 sps:$4 sm:$0xff]  }
 0x4bc   : > { %12258 = vmatprep.subr.bf16.mxu1 %v18312_v49  ;;  %v18364_v0 = vld [vmem:[%s19704_s15 + $0x1450] ss:$72 sps:$4 sm:$0xff]   ;;  %v18369_v49 = vld [vmem:[%s19704_s15 + $0xbe4] ss:$72 sps:$4 sm:$0xff]  }
 0x4be   : > { %12218 = vmatpush1.bf16.msra.mxu0 %v18307_v58  ;;  %v18372_v58 = vld [vmem:[%s19704_s15 + $0x14e4] ss:$72 sps:$4 sm:$0xff]  }
 0x4bf   : > { %12259 = vmatpush1.bf16.msra.mxu1 %v18310_v39  ;;  %12219 = vmatprep.subr.bf16.mxu0 %v18315_v50  ;;  %v18367_v39 = vld [vmem:[%s19704_s15 + $0xbe0] ss:$72 sps:$4 sm:$0xff]  }
 0x4c0   : > { %12260 = vmatprep.subr.bf16.mxu1 %v18318_v40  ;;  %v18370_v50 = vld [vmem:[%s19704_s15 + $0x14e0] ss:$72 sps:$4 sm:$0xff]   ;;  %v18375_v40 = vld [vmem:[%s19704_s15 + $0xc74] ss:$72 sps:$4 sm:$0xff]  }
 0x4c2   : > { %12220 = vmatpush1.bf16.msra.mxu0 %v18313_v41  ;;  %v18378_v41 = vld [vmem:[%s19704_s15 + $0x1574] ss:$72 sps:$4 sm:$0xff]  }
 0x4c3   : > { %12261 = vmatpush1.bf16.msra.mxu1 %v18316_v60  ;;  %12221 = vmatprep.subr.bf16.mxu0 %v18321_v13 }
 0x4c4   : > { %12262 = vmatprep.subr.bf16.mxu1 %v18324_v44 }
 0x4c6   : > { %12222 = vmatpush1.bf16.msra.mxu0 %v18319_v16 }
 0x4c7   : > { %12263 = vmatpush1.bf16.msra.mxu1 %v18322_v46  ;;  %12223 = vmatprep.subr.bf16.mxu0 %v18327_v48 }
 0x4c8   : > { %12264 = vmatprep.subr.bf16.mxu1 %v18330_v59 }
 0x4ca   : > { %12224 = vmatpush1.bf16.msra.mxu0 %v18325_v57 }
 0x4cb   : > { %12265 = vmatpush1.bf16.msra.mxu1 %v18328_v26  ;;  %12225 = vmatprep.subr.bf16.mxu0 %v18333_v27 }
 0x4cc   : > { %12266 = vmatprep.subr.bf16.mxu1 %v18336_v62 }
 0x4ce   : > { %12226 = vmatpush1.bf16.msra.mxu0 %v18331_v63 }
 0x4cf   : > { %12267 = vmatpush1.bf16.msra.mxu1 %v18334_v2  ;;  %12277 = vmatprep.subr.bf16.mxu0 %v18339_v3  ;;  %v18384_v2 = vld [vmem:[%s19704_s15 + $0x1604] ss:$72 sps:$4 sm:$0xff]   ;;  %v18382_v3 = vld [vmem:[%s19704_s15 + $0x1600] ss:$72 sps:$4 sm:$0xff]  }
 0x4d0   : > { %12318 = vmatprep.subr.bf16.mxu1 %v18342_v10  ;;  %v18387_v10 = vld [vmem:[%s19704_s15 + $0xd94] ss:$72 sps:$4 sm:$0xff]  }
 0x4d1   : > { %12228 = vmatmul.mubr.bf16.vlgmr.msra.gmra.mrb[64].mxu0 %v20890_v34 }
 0x4d2   : > { %12269 = vmatmul.mubr.bf16.vlgmr.msra.gmra.mrb[64].mxu1 %v20799_v45  ;;  %12278 = vmatpush1.bf16.msra.mxu0 %v18337_v4  ;;  %v18390_v4 = vld [vmem:[%s19704_s15 + $0x1694] ss:$72 sps:$4 sm:$0xff]  }
 0x4d3   : > { %12319 = vmatpush1.bf16.msra.mxu1 %v18340_v6  ;;  %12279 = vmatprep.subr.bf16.mxu0 %v18345_v21  ;;  %v18385_v6 = vld [vmem:[%s19704_s15 + $0xd90] ss:$72 sps:$4 sm:$0xff]  }
 0x4d4   : > { %12320 = vmatprep.subr.bf16.mxu1 %v18348_v8  ;;  %12309 = vmatprep.mubr.bf16.mxu0 %v20805_v52  ;;  %v18388_v21 = vld [vmem:[%s19704_s15 + $0x1690] ss:$72 sps:$4 sm:$0xff]   ;;  %v18393_v8 = vld [vmem:[%s19704_s15 + $0xe24] ss:$72 sps:$4 sm:$0xff]  }
 0x4d5   : > { %12350 = vmatprep.mubr.bf16.mxu1 %v20808_v56 }
 0x4d6   : > { %12280 = vmatpush1.bf16.msra.mxu0 %v18343_v47  ;;  %v18396_v47 = vld [vmem:[%s19704_s15 + $0x1724] ss:$72 sps:$4 sm:$0xff]  }
 0x4d7   : > { %12321 = vmatpush1.bf16.msra.mxu1 %v18346_v11  ;;  %12281 = vmatprep.subr.bf16.mxu0 %v18351_v12  ;;  %v18391_v11 = vld [vmem:[%s19704_s15 + $0xe20] ss:$72 sps:$4 sm:$0xff]  }
 0x4d8   : > { %12322 = vmatprep.subr.bf16.mxu1 %v18354_v14  ;;  %v18394_v12 = vld [vmem:[%s19704_s15 + $0x1720] ss:$72 sps:$4 sm:$0xff]   ;;  %v18399_v14 = vld [vmem:[%s19704_s15 + $0xeb4] ss:$72 sps:$4 sm:$0xff]  }
 0x4da   : > { %12282 = vmatpush1.bf16.msra.mxu0 %v18349_v15  ;;  %v18402_v15 = vld [vmem:[%s19704_s15 + $0x17b4] ss:$72 sps:$4 sm:$0xff]  }
 0x4db   : > { %12323 = vmatpush1.bf16.msra.mxu1 %v18352_v22  ;;  %12283 = vmatprep.subr.bf16.mxu0 %v18357_v25  ;;  %v18397_v22 = vld [vmem:[%s19704_s15 + $0xeb0] ss:$72 sps:$4 sm:$0xff]  }
 0x4dc   : > { %12324 = vmatprep.subr.bf16.mxu1 %v18360_v19  ;;  %v18400_v25 = vld [vmem:[%s19704_s15 + $0x17b0] ss:$72 sps:$4 sm:$0xff]   ;;  %v18405_v19 = vld [vmem:[%s19704_s15 + $0xf44] ss:$72 sps:$4 sm:$0xff]  }
 0x4de   : > { %12284 = vmatpush1.bf16.msra.mxu0 %v18355_v24  ;;  %v18408_v24 = vld [vmem:[%s19704_s15 + $0x1844] ss:$72 sps:$4 sm:$0xff]  }
 0x4df   : > { %12325 = vmatpush1.bf16.msra.mxu1 %v18358_v53  ;;  %12285 = vmatprep.subr.bf16.mxu0 %v18363_v36  ;;  %v18403_v53 = vld [vmem:[%s19704_s15 + $0xf40] ss:$72 sps:$4 sm:$0xff]  }
 0x4e0   : > { %12326 = vmatprep.subr.bf16.mxu1 %v18366_v42  ;;  %v18406_v36 = vld [vmem:[%s19704_s15 + $0x1840] ss:$72 sps:$4 sm:$0xff]   ;;  %v18411_v42 = vld [vmem:[%s19704_s15 + $0xfd4] ss:$72 sps:$4 sm:$0xff]  }
 0x4e2   : > { %12286 = vmatpush1.bf16.msra.mxu0 %v18361_v55  ;;  %v18414_v55 = vld [vmem:[%s19704_s15 + $0x18d4] ss:$72 sps:$4 sm:$0xff]  }
 0x4e3   : > { %12327 = vmatpush1.bf16.msra.mxu1 %v18364_v0  ;;  %12287 = vmatprep.subr.bf16.mxu0 %v18369_v49  ;;  %v18409_v0 = vld [vmem:[%s19704_s15 + $0xfd0] ss:$72 sps:$4 sm:$0xff]  }
 0x4e4   : > { %12328 = vmatprep.subr.bf16.mxu1 %v18372_v58  ;;  %v7609_v60 = vpop.f32.mrb[52].mxu0  ;;  %v18412_v49 = vld [vmem:[%s19704_s15 + $0x18d0] ss:$72 sps:$4 sm:$0xff]   ;;  %v18417_v58 = vld [vmem:[%s19704_s15 + $0x1064] ss:$72 sps:$4 sm:$0xff]  }
 0x4e5   : > { %v12024_v13 = vpop.f32.mrb[52].mxu1  ;;  %v21067_v44 = vadd.f32 %v7609_v60, %v20994_v23  ;;  %v7611_v46 = vpop.f32.mrb[53].mxu0  ;;  %v18373_v23 = vld [vmem:[%s19704_s15 + $0xc70] ss:$72 sps:$4 sm:$0xff]   ;;  %v18426_v60 = vld [vmem:[%s19704_s15 + $0x19f4] ss:$72 sps:$4 sm:$0xff]  }
 0x4e6   : > { %v21070_v16 = vadd.f32 %v12024_v13, %v20135_v35  ;;  %v12026_v48 = vpop.f32.mrb[53].mxu1  ;;  %v21073_v59 = vadd.f32 %v7611_v46, %v20996_v61  ;;  %v7613_v26 = vpop.f32.mrb[54].mxu0  ;;  %12288 = vmatpush1.bf16.msra.mxu0 %v18367_v39  ;;  %v18376_v35 = vld [vmem:[%s19704_s15 + $0x1570] ss:$72 sps:$4 sm:$0xff]   ;;  %v18381_v61 = vld [vmem:[%s19704_s15 + $0xd04] ss:$72 sps:$4 sm:$0xff]  }
 0x4e7   : > { %v21076_v57 = vadd.f32 %v12026_v48, %v20140_v38  ;;  %v12028_v27 = vpop.f32.mrb[54].mxu1  ;;  %12329 = vmatpush1.bf16.msra.mxu1 %v18370_v50  ;;  %v7614_v62 = vpop.f32.mrb[55].mxu0  ;;  %12289 = vmatprep.subr.bf16.mxu0 %v18375_v40  ;;  %v18379_v38 = vld [vmem:[%s19704_s15 + $0xd00] ss:$72 sps:$4 sm:$0xff]   ;;  %v18420_v39 = vld [vmem:[%s19704_s15 + $0x1964] ss:$72 sps:$4 sm:$0xff]  }
 0x4e8   : > { %v12029_v63 = vpop.f32.mrb[55].mxu1  ;;  %12330 = vmatprep.subr.bf16.mxu1 %v18378_v41  ;;  %v18415_v50 = vld [vmem:[%s19704_s15 + $0x1060] ss:$72 sps:$4 sm:$0xff]   ;;  %v18423_v41 = vld [vmem:[%s19704_s15 + $0x10f4] ss:$72 sps:$4 sm:$0xff]  }
 0x4e9   : > { %v18418_v40 = vld [vmem:[%s19704_s15 + $0x1960] ss:$72 sps:$4 sm:$0xff]   ;;  %v18421_v13 = vld [vmem:[%s19704_s15 + $0x10f0] ss:$72 sps:$4 sm:$0xff]   ;;  %v18429_v48 = vld [vmem:[%s19704_s15 + $0x1184] ss:$72 sps:$4 sm:$0xff]  }
 0x4ea   : > { %12290 = vmatpush1.bf16.msra.mxu0 %v18373_v23  ;;  %v18424_v46 = vld [vmem:[%s19704_s15 + $0x19f0] ss:$72 sps:$4 sm:$0xff]   ;;  %v18432_v26 = vld [vmem:[%s19704_s15 + $0x1a84] ss:$72 sps:$4 sm:$0xff]   ;;  %v18427_v27 = vld [vmem:[%s19704_s15 + $0x1180] ss:$72 sps:$4 sm:$0xff]  }
 0x4eb   : > { %12331 = vmatpush1.bf16.msra.mxu1 %v18376_v35  ;;  %12291 = vmatprep.subr.bf16.mxu0 %v18381_v61  ;;  %v18430_v23 = vld [vmem:[%s19704_s15 + $0x1a80] ss:$72 sps:$4 sm:$0xff]   ;;  %v18435_v35 = vld [vmem:[%s19704_s15 + $0x1c] ss:$72 sps:$4 sm:$0xff]  }
 0x4ec   : > { %12332 = vmatprep.subr.bf16.mxu1 %v18384_v2  ;;  %v18438_v62 = vld [vmem:[%s19704_s15 + $0x91c] ss:$72 sps:$4 sm:$0xff]   ;;  %v18433_v63 = vld [vmem:[%s19704_s15 + $0x18] ss:$72 sps:$4 sm:$0xff]   ;;  %v18441_v2 = vld [vmem:[%s19704_s15 + $0xac] ss:$72 sps:$4 sm:$0xff]  }
 0x4ed   : > { %v18436_v61 = vld [vmem:[%s19704_s15 + $0x918] ss:$72 sps:$4 sm:$0xff]  }
 0x4ee   : > { %12292 = vmatpush1.bf16.msra.mxu0 %v18379_v38  ;;  %v18444_v38 = vld [vmem:[%s19704_s15 + $0x9ac] ss:$72 sps:$4 sm:$0xff]  }
 0x4ef   : > { %12333 = vmatpush1.bf16.msra.mxu1 %v18382_v3  ;;  %12293 = vmatprep.subr.bf16.mxu0 %v18387_v10  ;;  %v18439_v3 = vld [vmem:[%s19704_s15 + $0xa8] ss:$72 sps:$4 sm:$0xff]  }
 0x4f0   : > { %12334 = vmatprep.subr.bf16.mxu1 %v18390_v4  ;;  %v18442_v10 = vld [vmem:[%s19704_s15 + $0x9a8] ss:$72 sps:$4 sm:$0xff]   ;;  %v18447_v4 = vld [vmem:[%s19704_s15 + $0x13c] ss:$72 sps:$4 sm:$0xff]  }
 0x4f2   : > { %12294 = vmatpush1.bf16.msra.mxu0 %v18385_v6  ;;  %v18450_v6 = vld [vmem:[%s19704_s15 + $0xa3c] ss:$72 sps:$4 sm:$0xff]  }
 0x4f3   : > { %12335 = vmatpush1.bf16.msra.mxu1 %v18388_v21  ;;  %12295 = vmatprep.subr.bf16.mxu0 %v18393_v8  ;;  %v18445_v21 = vld [vmem:[%s19704_s15 + $0x138] ss:$72 sps:$4 sm:$0xff]  }
 0x4f4   : > { %12336 = vmatprep.subr.bf16.mxu1 %v18396_v47  ;;  %v18448_v8 = vld [vmem:[%s19704_s15 + $0xa38] ss:$72 sps:$4 sm:$0xff]   ;;  %v18453_v47 = vld [vmem:[%s19704_s15 + $0x1cc] ss:$72 sps:$4 sm:$0xff]  }
 0x4f6   : > { %12296 = vmatpush1.bf16.msra.mxu0 %v18391_v11  ;;  %v18456_v11 = vld [vmem:[%s19704_s15 + $0xacc] ss:$72 sps:$4 sm:$0xff]  }
 0x4f7   : > { %12337 = vmatpush1.bf16.msra.mxu1 %v18394_v12  ;;  %12297 = vmatprep.subr.bf16.mxu0 %v18399_v14  ;;  %v18451_v12 = vld [vmem:[%s19704_s15 + $0x1c8] ss:$72 sps:$4 sm:$0xff]  }
 0x4f8   : > { %12338 = vmatprep.subr.bf16.mxu1 %v18402_v15  ;;  %v18454_v14 = vld [vmem:[%s19704_s15 + $0xac8] ss:$72 sps:$4 sm:$0xff]   ;;  %v18459_v15 = vld [vmem:[%s19704_s15 + $0x25c] ss:$72 sps:$4 sm:$0xff]  }
 0x4fa   : > { %12298 = vmatpush1.bf16.msra.mxu0 %v18397_v22  ;;  %v18462_v22 = vld [vmem:[%s19704_s15 + $0xb5c] ss:$72 sps:$4 sm:$0xff]  }
 0x4fb   : > { %12339 = vmatpush1.bf16.msra.mxu1 %v18400_v25  ;;  %12299 = vmatprep.subr.bf16.mxu0 %v18405_v19  ;;  %v18457_v25 = vld [vmem:[%s19704_s15 + $0x258] ss:$72 sps:$4 sm:$0xff]  }
 0x4fc   : > { %12340 = vmatprep.subr.bf16.mxu1 %v18408_v24  ;;  %v18460_v19 = vld [vmem:[%s19704_s15 + $0xb58] ss:$72 sps:$4 sm:$0xff]   ;;  %v18465_v24 = vld [vmem:[%s19704_s15 + $0x2ec] ss:$72 sps:$4 sm:$0xff]  }
 0x4fe   : > { %12300 = vmatpush1.bf16.msra.mxu0 %v18403_v53  ;;  %v18468_v53 = vld [vmem:[%s19704_s15 + $0xbec] ss:$72 sps:$4 sm:$0xff]  }
 0x4ff   : > { %12341 = vmatpush1.bf16.msra.mxu1 %v18406_v36  ;;  %12301 = vmatprep.subr.bf16.mxu0 %v18411_v42  ;;  %v18463_v36 = vld [vmem:[%s19704_s15 + $0x2e8] ss:$72 sps:$4 sm:$0xff]  }
 0x500   : > { %12342 = vmatprep.subr.bf16.mxu1 %v18414_v55  ;;  %v18466_v42 = vld [vmem:[%s19704_s15 + $0xbe8] ss:$72 sps:$4 sm:$0xff]   ;;  %v18471_v55 = vld [vmem:[%s19704_s15 + $0x37c] ss:$72 sps:$4 sm:$0xff]  }
 0x502   : > { %12302 = vmatpush1.bf16.msra.mxu0 %v18409_v0  ;;  %v18474_v0 = vld [vmem:[%s19704_s15 + $0xc7c] ss:$72 sps:$4 sm:$0xff]  }
 0x503   : > { %12343 = vmatpush1.bf16.msra.mxu1 %v18412_v49  ;;  %12303 = vmatprep.subr.bf16.mxu0 %v18417_v58 }
 0x504   : > { %12344 = vmatprep.subr.bf16.mxu1 %v18420_v39 }
 0x506   : > { %12304 = vmatpush1.bf16.msra.mxu0 %v18415_v50 }
 0x507   : > { %12345 = vmatpush1.bf16.msra.mxu1 %v18418_v40  ;;  %12305 = vmatprep.subr.bf16.mxu0 %v18423_v41 }
 0x508   : > { %12346 = vmatprep.subr.bf16.mxu1 %v18426_v60 }
 0x50a   : > { %12306 = vmatpush1.bf16.msra.mxu0 %v18421_v13 }
 0x50b   : > { %12347 = vmatpush1.bf16.msra.mxu1 %v18424_v46  ;;  %12307 = vmatprep.subr.bf16.mxu0 %v18429_v48  ;;  %v18469_v46 = vld [vmem:[%s19704_s15 + $0x378] ss:$72 sps:$4 sm:$0xff]  }
 0x50c   : > { %12348 = vmatprep.subr.bf16.mxu1 %v18432_v26  ;;  %v18472_v48 = vld [vmem:[%s19704_s15 + $0xc78] ss:$72 sps:$4 sm:$0xff]  }
 0x50e   : > { %12308 = vmatpush1.bf16.msra.mxu0 %v18427_v27 }
 0x50f   : > { %12349 = vmatpush1.bf16.msra.mxu1 %v18430_v23  ;;  %12359 = vmatprep.subr.bf16.mxu0 %v18435_v35 }
 0x510   : > { %12400 = vmatprep.subr.bf16.mxu1 %v18438_v62  ;;  %v18475_v62 = vld [vmem:[%s19704_s15 + $0x408] ss:$72 sps:$4 sm:$0xff]  }
 0x511   : > { %12310 = vmatmul.mubr.bf16.vlgmr.msra.gmra.mrb[68].mxu0 %v20886_v33 }
 0x512   : > { %12351 = vmatmul.mubr.bf16.vlgmr.msra.gmra.mrb[68].mxu1 %v20890_v34  ;;  %12360 = vmatpush1.bf16.msra.mxu0 %v18433_v63  ;;  %v18478_v63 = vld [vmem:[%s19704_s15 + $0xd08] ss:$72 sps:$4 sm:$0xff]  }
 0x513   : > { %12401 = vmatpush1.bf16.msra.mxu1 %v18436_v61  ;;  %12361 = vmatprep.subr.bf16.mxu0 %v18441_v2  ;;  %v18483_v61 = vld [vmem:[%s19704_s15 + $0x49c] ss:$72 sps:$4 sm:$0xff]  }
 0x514   : > { %12402 = vmatprep.subr.bf16.mxu1 %v18444_v38  ;;  %12391 = vmatprep.mubr.bf16.mxu0 %v20718_v7  ;;  %v18486_v2 = vld [vmem:[%s19704_s15 + $0xd9c] ss:$72 sps:$4 sm:$0xff]   ;;  %v18481_v38 = vld [vmem:[%s19704_s15 + $0x498] ss:$72 sps:$4 sm:$0xff]  }
 0x515   : > { %12432 = vmatprep.mubr.bf16.mxu1 %v20805_v52 }
 0x516   : > { %12362 = vmatpush1.bf16.msra.mxu0 %v18439_v3  ;;  %v18484_v3 = vld [vmem:[%s19704_s15 + $0xd98] ss:$72 sps:$4 sm:$0xff]  }
 0x517   : > { %12403 = vmatpush1.bf16.msra.mxu1 %v18442_v10  ;;  %12363 = vmatprep.subr.bf16.mxu0 %v18447_v4  ;;  %v18489_v10 = vld [vmem:[%s19704_s15 + $0x52c] ss:$72 sps:$4 sm:$0xff]  }
 0x518   : > { %12404 = vmatprep.subr.bf16.mxu1 %v18450_v6  ;;  %v18492_v4 = vld [vmem:[%s19704_s15 + $0xe2c] ss:$72 sps:$4 sm:$0xff]   ;;  %v18487_v6 = vld [vmem:[%s19704_s15 + $0x528] ss:$72 sps:$4 sm:$0xff]  }
 0x51a   : > { %12364 = vmatpush1.bf16.msra.mxu0 %v18445_v21  ;;  %v18490_v21 = vld [vmem:[%s19704_s15 + $0xe28] ss:$72 sps:$4 sm:$0xff]  }
 0x51b   : > { %12405 = vmatpush1.bf16.msra.mxu1 %v18448_v8  ;;  %12365 = vmatprep.subr.bf16.mxu0 %v18453_v47  ;;  %v18495_v8 = vld [vmem:[%s19704_s15 + $0x5bc] ss:$72 sps:$4 sm:$0xff]  }
 0x51c   : > { %12406 = vmatprep.subr.bf16.mxu1 %v18456_v11  ;;  %v18498_v47 = vld [vmem:[%s19704_s15 + $0xebc] ss:$72 sps:$4 sm:$0xff]   ;;  %v18493_v11 = vld [vmem:[%s19704_s15 + $0x5b8] ss:$72 sps:$4 sm:$0xff]  }
 0x51e   : > { %12366 = vmatpush1.bf16.msra.mxu0 %v18451_v12  ;;  %v18496_v12 = vld [vmem:[%s19704_s15 + $0xeb8] ss:$72 sps:$4 sm:$0xff]  }
 0x51f   : > { %12407 = vmatpush1.bf16.msra.mxu1 %v18454_v14  ;;  %12367 = vmatprep.subr.bf16.mxu0 %v18459_v15  ;;  %v18501_v14 = vld [vmem:[%s19704_s15 + $0x64c] ss:$72 sps:$4 sm:$0xff]  }
 0x520   : > { %12408 = vmatprep.subr.bf16.mxu1 %v18462_v22  ;;  %v18504_v15 = vld [vmem:[%s19704_s15 + $0xf4c] ss:$72 sps:$4 sm:$0xff]   ;;  %v18499_v22 = vld [vmem:[%s19704_s15 + $0x648] ss:$72 sps:$4 sm:$0xff]  }
 0x522   : > { %12368 = vmatpush1.bf16.msra.mxu0 %v18457_v25  ;;  %v18502_v25 = vld [vmem:[%s19704_s15 + $0xf48] ss:$72 sps:$4 sm:$0xff]  }
 0x523   : > { %12409 = vmatpush1.bf16.msra.mxu1 %v18460_v19  ;;  %12369 = vmatprep.subr.bf16.mxu0 %v18465_v24  ;;  %v18507_v19 = vld [vmem:[%s19704_s15 + $0x6dc] ss:$72 sps:$4 sm:$0xff]  }
 0x524   : > { %12410 = vmatprep.subr.bf16.mxu1 %v18468_v53  ;;  %v12065_v49 = vpop.f32.mrb[56].mxu0  ;;  %v18510_v24 = vld [vmem:[%s19704_s15 + $0xfdc] ss:$72 sps:$4 sm:$0xff]   ;;  %v18505_v53 = vld [vmem:[%s19704_s15 + $0x6d8] ss:$72 sps:$4 sm:$0xff]  }
 0x525   : > { %v12106_v58 = vpop.f32.mrb[56].mxu1  ;;  %v12066_v39 = vadd.f32 %v12065_v49, %v21070_v16  ;;  %v12067_v50 = vpop.f32.mrb[57].mxu0  ;;  %v18477_v16 = vld [vmem:[%s19704_s15 + $0x40c] ss:$72 sps:$4 sm:$0xff]   ;;  %v18514_v49 = vld [vmem:[%s19704_s15 + $0x1068] ss:$72 sps:$4 sm:$0xff]  }
 0x526   : > { %v12108_v40 = vpop.f32.mrb[57].mxu1  ;;  %v12068_v41 = vadd.f32 %v12067_v50, %v21076_v57  ;;  %v12069_v60 = vpop.f32.mrb[58].mxu0  ;;  %12370 = vmatpush1.bf16.msra.mxu0 %v18463_v36  ;;  %v18480_v57 = vld [vmem:[%s19704_s15 + $0xd0c] ss:$72 sps:$4 sm:$0xff]   ;;  %v18508_v36 = vld [vmem:[%s19704_s15 + $0xfd8] ss:$72 sps:$4 sm:$0xff]  }
 0x527   : > { %v12110_v13 = vpop.f32.mrb[58].mxu1  ;;  %12411 = vmatpush1.bf16.msra.mxu1 %v18466_v42  ;;  %v21150_v26 = vadd.f32 %v12106_v58, %v12066_v39  ;;  %v12070_v27 = vpop.f32.mrb[59].mxu0  ;;  %12371 = vmatprep.subr.bf16.mxu0 %v18471_v55  ;;  %v18513_v42 = vld [vmem:[%s19704_s15 + $0x76c] ss:$72 sps:$4 sm:$0xff]   ;;  %v18519_v58 = vld [vmem:[%s19704_s15 + $0x7fc] ss:$72 sps:$4 sm:$0xff]  }
 0x528   : > { %v12111_v23 = vpop.f32.mrb[59].mxu1  ;;  %12412 = vmatprep.subr.bf16.mxu1 %v18474_v0  ;;  %v21154_v35 = vadd.f32 %v12108_v40, %v12068_v41  ;;  %v18516_v55 = vld [vmem:[%s19704_s15 + $0x106c] ss:$72 sps:$4 sm:$0xff]   ;;  %v18511_v0 = vld [vmem:[%s19704_s15 + $0x768] ss:$72 sps:$4 sm:$0xff]  }
 0x529   : > { %v18522_v39 = vld [vmem:[%s19704_s15 + $0x10fc] ss:$72 sps:$4 sm:$0xff]   ;;  %v18517_v50 = vld [vmem:[%s19704_s15 + $0x7f8] ss:$72 sps:$4 sm:$0xff]   ;;  %v18525_v41 = vld [vmem:[%s19704_s15 + $0x88c] ss:$72 sps:$4 sm:$0xff]  }
 0x52a   : > { %12372 = vmatpush1.bf16.msra.mxu0 %v18469_v46  ;;  %v18520_v40 = vld [vmem:[%s19704_s15 + $0x10f8] ss:$72 sps:$4 sm:$0xff]   ;;  %v18528_v60 = vld [vmem:[%s19704_s15 + $0x118c] ss:$72 sps:$4 sm:$0xff]   ;;  %v18523_v13 = vld [vmem:[%s19704_s15 + $0x888] ss:$72 sps:$4 sm:$0xff]  }
 0x52b   : > { %12413 = vmatpush1.bf16.msra.mxu1 %v18472_v48  ;;  %12373 = vmatprep.subr.bf16.mxu0 %v18477_v16  ;;  %v18526_v46 = vld [vmem:[%s19704_s15 + $0x1188] ss:$72 sps:$4 sm:$0xff]   ;;  %v18531_v48 = vld [vmem:[%s19704_s15 + $0x121c] ss:$72 sps:$4 sm:$0xff]   ;;  %v18529_v23 = vld [vmem:[%s19704_s15 + $0x1218] ss:$72 sps:$4 sm:$0xff]  }
 0x52c   : > { %12414 = vmatprep.subr.bf16.mxu1 %v18480_v57  ;;  %v18534_v27 = vld [vmem:[%s19704_s15 + $0x24] ss:$72 sps:$4 sm:$0xff]   ;;  %v18532_v16 = vld [vmem:[%s19704_s15 + $0x20] ss:$72 sps:$4 sm:$0xff]  }
 0x52d   : > { %v18537_v57 = vld [vmem:[%s19704_s15 + $0x12ac] ss:$72 sps:$4 sm:$0xff]  }
 0x52e   : > { %12374 = vmatpush1.bf16.msra.mxu0 %v18475_v62  ;;  %v18540_v62 = vld [vmem:[%s19704_s15 + $0xb4] ss:$72 sps:$4 sm:$0xff]  }
 0x52f   : > { %12415 = vmatpush1.bf16.msra.mxu1 %v18478_v63  ;;  %12375 = vmatprep.subr.bf16.mxu0 %v18483_v61  ;;  %v18535_v63 = vld [vmem:[%s19704_s15 + $0x12a8] ss:$72 sps:$4 sm:$0xff]  }
 0x530   : > { %12416 = vmatprep.subr.bf16.mxu1 %v18486_v2  ;;  %v18538_v61 = vld [vmem:[%s19704_s15 + $0xb0] ss:$72 sps:$4 sm:$0xff]   ;;  %v18543_v2 = vld [vmem:[%s19704_s15 + $0x133c] ss:$72 sps:$4 sm:$0xff]  }
 0x532   : > { %12376 = vmatpush1.bf16.msra.mxu0 %v18481_v38  ;;  %v18546_v38 = vld [vmem:[%s19704_s15 + $0x144] ss:$72 sps:$4 sm:$0xff]  }
 0x533   : > { %12417 = vmatpush1.bf16.msra.mxu1 %v18484_v3  ;;  %12377 = vmatprep.subr.bf16.mxu0 %v18489_v10  ;;  %v18541_v3 = vld [vmem:[%s19704_s15 + $0x1338] ss:$72 sps:$4 sm:$0xff]  }
 0x534   : > { %12418 = vmatprep.subr.bf16.mxu1 %v18492_v4  ;;  %v18544_v10 = vld [vmem:[%s19704_s15 + $0x140] ss:$72 sps:$4 sm:$0xff]   ;;  %v18549_v4 = vld [vmem:[%s19704_s15 + $0x13cc] ss:$72 sps:$4 sm:$0xff]  }
 0x536   : > { %12378 = vmatpush1.bf16.msra.mxu0 %v18487_v6  ;;  %v18552_v6 = vld [vmem:[%s19704_s15 + $0x1d4] ss:$72 sps:$4 sm:$0xff]  }
 0x537   : > { %12419 = vmatpush1.bf16.msra.mxu1 %v18490_v21  ;;  %12379 = vmatprep.subr.bf16.mxu0 %v18495_v8  ;;  %v18547_v21 = vld [vmem:[%s19704_s15 + $0x13c8] ss:$72 sps:$4 sm:$0xff]  }
 0x538   : > { %12420 = vmatprep.subr.bf16.mxu1 %v18498_v47  ;;  %v18550_v8 = vld [vmem:[%s19704_s15 + $0x1d0] ss:$72 sps:$4 sm:$0xff]   ;;  %v18555_v47 = vld [vmem:[%s19704_s15 + $0x145c] ss:$72 sps:$4 sm:$0xff]  }
 0x53a   : > { %12380 = vmatpush1.bf16.msra.mxu0 %v18493_v11  ;;  %v18558_v11 = vld [vmem:[%s19704_s15 + $0x264] ss:$72 sps:$4 sm:$0xff]  }
 0x53b   : > { %12421 = vmatpush1.bf16.msra.mxu1 %v18496_v12  ;;  %12381 = vmatprep.subr.bf16.mxu0 %v18501_v14  ;;  %v18553_v12 = vld [vmem:[%s19704_s15 + $0x1458] ss:$72 sps:$4 sm:$0xff]  }
 0x53c   : > { %12422 = vmatprep.subr.bf16.mxu1 %v18504_v15  ;;  %v18556_v14 = vld [vmem:[%s19704_s15 + $0x260] ss:$72 sps:$4 sm:$0xff]   ;;  %v18561_v15 = vld [vmem:[%s19704_s15 + $0x14ec] ss:$72 sps:$4 sm:$0xff]  }
 0x53e   : > { %12382 = vmatpush1.bf16.msra.mxu0 %v18499_v22  ;;  %v18564_v22 = vld [vmem:[%s19704_s15 + $0x2f4] ss:$72 sps:$4 sm:$0xff]  }
 0x53f   : > { %12423 = vmatpush1.bf16.msra.mxu1 %v18502_v25  ;;  %12383 = vmatprep.subr.bf16.mxu0 %v18507_v19  ;;  %v18559_v25 = vld [vmem:[%s19704_s15 + $0x14e8] ss:$72 sps:$4 sm:$0xff]  }
 0x540   : > { %12424 = vmatprep.subr.bf16.mxu1 %v18510_v24  ;;  %v18562_v19 = vld [vmem:[%s19704_s15 + $0x2f0] ss:$72 sps:$4 sm:$0xff]   ;;  %v18567_v24 = vld [vmem:[%s19704_s15 + $0x157c] ss:$72 sps:$4 sm:$0xff]  }
 0x542   : > { %12384 = vmatpush1.bf16.msra.mxu0 %v18505_v53  ;;  %v18570_v53 = vld [vmem:[%s19704_s15 + $0x384] ss:$72 sps:$4 sm:$0xff]  }
 0x543   : > { %12425 = vmatpush1.bf16.msra.mxu1 %v18508_v36  ;;  %12385 = vmatprep.subr.bf16.mxu0 %v18513_v42 }
 0x544   : > { %12426 = vmatprep.subr.bf16.mxu1 %v18516_v55 }
 0x546   : > { %12386 = vmatpush1.bf16.msra.mxu0 %v18511_v0 }
 0x547   : > { %12427 = vmatpush1.bf16.msra.mxu1 %v18514_v49  ;;  %12387 = vmatprep.subr.bf16.mxu0 %v18519_v58 }
 0x548   : > { %12428 = vmatprep.subr.bf16.mxu1 %v18522_v39 }
 0x54a   : > { %12388 = vmatpush1.bf16.msra.mxu0 %v18517_v50 }
 0x54b   : > { %12429 = vmatpush1.bf16.msra.mxu1 %v18520_v40  ;;  %12389 = vmatprep.subr.bf16.mxu0 %v18525_v41  ;;  %v18565_v40 = vld [vmem:[%s19704_s15 + $0x1578] ss:$72 sps:$4 sm:$0xff]  }
 0x54c   : > { %12430 = vmatprep.subr.bf16.mxu1 %v18528_v60  ;;  %v18568_v41 = vld [vmem:[%s19704_s15 + $0x380] ss:$72 sps:$4 sm:$0xff]  }
 0x54e   : > { %12390 = vmatpush1.bf16.msra.mxu0 %v18523_v13 }
 0x54f   : > { %12431 = vmatpush1.bf16.msra.mxu1 %v18526_v46  ;;  %12441 = vmatprep.subr.bf16.mxu0 %v18531_v48 }
 0x550   : > { %12482 = vmatprep.subr.bf16.mxu1 %v18534_v27  ;;  %v18571_v27 = vld [vmem:[%s19704_s15 + $0x1608] ss:$72 sps:$4 sm:$0xff]  }
 0x551   : > { %12392 = vmatmul.mubr.bf16.vlgmr.msra.gmra.mrb[72].mxu0 %v20799_v45 }
 0x552   : > { %12433 = vmatmul.mubr.bf16.vlgmr.msra.gmra.mrb[72].mxu1 %v20886_v33  ;;  %12442 = vmatpush1.bf16.msra.mxu0 %v18529_v23  ;;  %v18574_v23 = vld [vmem:[%s19704_s15 + $0x410] ss:$72 sps:$4 sm:$0xff]  }
 0x553   : > { %12483 = vmatpush1.bf16.msra.mxu1 %v18532_v16  ;;  %12443 = vmatprep.subr.bf16.mxu0 %v18537_v57  ;;  %v18579_v16 = vld [vmem:[%s19704_s15 + $0x169c] ss:$72 sps:$4 sm:$0xff]  }
 0x554   : > { %12484 = vmatprep.subr.bf16.mxu1 %v18540_v62  ;;  %12473 = vmatprep.mubr.bf16.mxu0 %v20808_v56  ;;  %v18582_v57 = vld [vmem:[%s19704_s15 + $0x4a4] ss:$72 sps:$4 sm:$0xff]   ;;  %v18577_v62 = vld [vmem:[%s19704_s15 + $0x1698] ss:$72 sps:$4 sm:$0xff]  }
 0x555   : > { %12514 = vmatprep.mubr.bf16.mxu1 %v20718_v7 }
 0x556   : > { %12444 = vmatpush1.bf16.msra.mxu0 %v18535_v63  ;;  %v18580_v63 = vld [vmem:[%s19704_s15 + $0x4a0] ss:$72 sps:$4 sm:$0xff]  }
 0x557   : > { %12485 = vmatpush1.bf16.msra.mxu1 %v18538_v61  ;;  %12445 = vmatprep.subr.bf16.mxu0 %v18543_v2  ;;  %v18585_v61 = vld [vmem:[%s19704_s15 + $0x172c] ss:$72 sps:$4 sm:$0xff]  }
 0x558   : > { %12486 = vmatprep.subr.bf16.mxu1 %v18546_v38  ;;  %v18588_v2 = vld [vmem:[%s19704_s15 + $0x534] ss:$72 sps:$4 sm:$0xff]   ;;  %v18583_v38 = vld [vmem:[%s19704_s15 + $0x1728] ss:$72 sps:$4 sm:$0xff]  }
 0x55a   : > { %12446 = vmatpush1.bf16.msra.mxu0 %v18541_v3  ;;  %v18586_v3 = vld [vmem:[%s19704_s15 + $0x530] ss:$72 sps:$4 sm:$0xff]  }
 0x55b   : > { %12487 = vmatpush1.bf16.msra.mxu1 %v18544_v10  ;;  %12447 = vmatprep.subr.bf16.mxu0 %v18549_v4  ;;  %v18591_v10 = vld [vmem:[%s19704_s15 + $0x17bc] ss:$72 sps:$4 sm:$0xff]  }
 0x55c   : > { %12488 = vmatprep.subr.bf16.mxu1 %v18552_v6  ;;  %v18594_v4 = vld [vmem:[%s19704_s15 + $0x5c4] ss:$72 sps:$4 sm:$0xff]   ;;  %v18589_v6 = vld [vmem:[%s19704_s15 + $0x17b8] ss:$72 sps:$4 sm:$0xff]  }
 0x55e   : > { %12448 = vmatpush1.bf16.msra.mxu0 %v18547_v21  ;;  %v18592_v21 = vld [vmem:[%s19704_s15 + $0x5c0] ss:$72 sps:$4 sm:$0xff]  }
 0x55f   : > { %12489 = vmatpush1.bf16.msra.mxu1 %v18550_v8  ;;  %12449 = vmatprep.subr.bf16.mxu0 %v18555_v47  ;;  %v18597_v8 = vld [vmem:[%s19704_s15 + $0x184c] ss:$72 sps:$4 sm:$0xff]  }
 0x560   : > { %12490 = vmatprep.subr.bf16.mxu1 %v18558_v11  ;;  %v18600_v47 = vld [vmem:[%s19704_s15 + $0x654] ss:$72 sps:$4 sm:$0xff]   ;;  %v18595_v11 = vld [vmem:[%s19704_s15 + $0x1848] ss:$72 sps:$4 sm:$0xff]  }
 0x562   : > { %12450 = vmatpush1.bf16.msra.mxu0 %v18553_v12  ;;  %v18598_v12 = vld [vmem:[%s19704_s15 + $0x650] ss:$72 sps:$4 sm:$0xff]  }
 0x563   : > { %12491 = vmatpush1.bf16.msra.mxu1 %v18556_v14  ;;  %12451 = vmatprep.subr.bf16.mxu0 %v18561_v15  ;;  %v18603_v14 = vld [vmem:[%s19704_s15 + $0x18dc] ss:$72 sps:$4 sm:$0xff]  }
 0x564   : > { %12492 = vmatprep.subr.bf16.mxu1 %v18564_v22  ;;  %v12147_v36 = vpop.f32.mrb[60].mxu0  ;;  %v18606_v15 = vld [vmem:[%s19704_s15 + $0x6e4] ss:$72 sps:$4 sm:$0xff]   ;;  %v18601_v22 = vld [vmem:[%s19704_s15 + $0x18d8] ss:$72 sps:$4 sm:$0xff]  }
 0x565   : > { %v12188_v42 = vpop.f32.mrb[60].mxu1  ;;  %v12148_v55 = vadd.f32 %v12147_v36, %v20212_v1  ;;  %v12149_v0 = vpop.f32.mrb[61].mxu0  ;;  %v18573_v1 = vld [vmem:[%s19704_s15 + $0x160c] ss:$72 sps:$4 sm:$0xff]   ;;  %v18610_v36 = vld [vmem:[%s19704_s15 + $0x770] ss:$72 sps:$4 sm:$0xff]  }
 0x566   : > { %v12190_v49 = vpop.f32.mrb[61].mxu1  ;;  %v12150_v58 = vadd.f32 %v12149_v0, %v20216_v5  ;;  %v12151_v39 = vpop.f32.mrb[62].mxu0  ;;  %12452 = vmatpush1.bf16.msra.mxu0 %v18559_v25  ;;  %v18576_v5 = vld [vmem:[%s19704_s15 + $0x414] ss:$72 sps:$4 sm:$0xff]   ;;  %v18604_v25 = vld [vmem:[%s19704_s15 + $0x6e0] ss:$72 sps:$4 sm:$0xff]  }
 0x567   : > { %v12192_v50 = vpop.f32.mrb[62].mxu1  ;;  %12493 = vmatpush1.bf16.msra.mxu1 %v18562_v19  ;;  %v21224_v60 = vadd.f32 %v12188_v42, %v12148_v55  ;;  %v12152_v13 = vpop.f32.mrb[63].mxu0  ;;  %12453 = vmatprep.subr.bf16.mxu0 %v18567_v24  ;;  %v18609_v19 = vld [vmem:[%s19704_s15 + $0x196c] ss:$72 sps:$4 sm:$0xff]   ;;  %v18615_v42 = vld [vmem:[%s19704_s15 + $0x19fc] ss:$72 sps:$4 sm:$0xff]  }
 0x568   : > { %v12193_v46 = vpop.f32.mrb[63].mxu1  ;;  %12494 = vmatprep.subr.bf16.mxu1 %v18570_v53  ;;  %v21228_v48 = vadd.f32 %v12190_v49, %v12150_v58  ;;  %v18612_v24 = vld [vmem:[%s19704_s15 + $0x774] ss:$72 sps:$4 sm:$0xff]   ;;  %v18607_v53 = vld [vmem:[%s19704_s15 + $0x1968] ss:$72 sps:$4 sm:$0xff]  }
 0x569   : > { %v18618_v55 = vld [vmem:[%s19704_s15 + $0x804] ss:$72 sps:$4 sm:$0xff]   ;;  %v18613_v0 = vld [vmem:[%s19704_s15 + $0x19f8] ss:$72 sps:$4 sm:$0xff]   ;;  %v18624_v39 = vld [vmem:[%s19704_s15 + $0x894] ss:$72 sps:$4 sm:$0xff]  }
 0x56a   : > { %12454 = vmatpush1.bf16.msra.mxu0 %v18565_v40  ;;  %v18616_v49 = vld [vmem:[%s19704_s15 + $0x800] ss:$72 sps:$4 sm:$0xff]   ;;  %v18621_v58 = vld [vmem:[%s19704_s15 + $0x1a8c] ss:$72 sps:$4 sm:$0xff]   ;;  %v18622_v40 = vld [vmem:[%s19704_s15 + $0x890] ss:$72 sps:$4 sm:$0xff]  }
 0x56b   : > { %12495 = vmatpush1.bf16.msra.mxu1 %v18568_v41  ;;  %12455 = vmatprep.subr.bf16.mxu0 %v18573_v1  ;;  %v18619_v50 = vld [vmem:[%s19704_s15 + $0x1a88] ss:$72 sps:$4 sm:$0xff]   ;;  %v18627_v41 = vld [vmem:[%s19704_s15 + $0x924] ss:$72 sps:$4 sm:$0xff]  }
 0x56c   : > { %12496 = vmatprep.subr.bf16.mxu1 %v18576_v5  ;;  %v18630_v13 = vld [vmem:[%s19704_s15 + $0x1224] ss:$72 sps:$4 sm:$0xff]   ;;  %v18625_v46 = vld [vmem:[%s19704_s15 + $0x920] ss:$72 sps:$4 sm:$0xff]   ;;  %v18633_v5 = vld [vmem:[%s19704_s15 + $0x9b4] ss:$72 sps:$4 sm:$0xff]  }
 0x56d   : > { %v18628_v1 = vld [vmem:[%s19704_s15 + $0x1220] ss:$72 sps:$4 sm:$0xff]  }
 0x56e   : > { %12456 = vmatpush1.bf16.msra.mxu0 %v18571_v27  ;;  %v18636_v27 = vld [vmem:[%s19704_s15 + $0x12b4] ss:$72 sps:$4 sm:$0xff]  }
 0x56f   : > { %12497 = vmatpush1.bf16.msra.mxu1 %v18574_v23  ;;  %12457 = vmatprep.subr.bf16.mxu0 %v18579_v16  ;;  %v18631_v23 = vld [vmem:[%s19704_s15 + $0x9b0] ss:$72 sps:$4 sm:$0xff]  }
 0x570   : > { %12498 = vmatprep.subr.bf16.mxu1 %v18582_v57  ;;  %v18634_v16 = vld [vmem:[%s19704_s15 + $0x12b0] ss:$72 sps:$4 sm:$0xff]   ;;  %v18639_v57 = vld [vmem:[%s19704_s15 + $0xa44] ss:$72 sps:$4 sm:$0xff]  }
 0x572   : > { %12458 = vmatpush1.bf16.msra.mxu0 %v18577_v62  ;;  %v18642_v62 = vld [vmem:[%s19704_s15 + $0x1344] ss:$72 sps:$4 sm:$0xff]  }
 0x573   : > { %12499 = vmatpush1.bf16.msra.mxu1 %v18580_v63  ;;  %12459 = vmatprep.subr.bf16.mxu0 %v18585_v61  ;;  %v18637_v63 = vld [vmem:[%s19704_s15 + $0xa40] ss:$72 sps:$4 sm:$0xff]  }
 0x574   : > { %12500 = vmatprep.subr.bf16.mxu1 %v18588_v2  ;;  %v18640_v61 = vld [vmem:[%s19704_s15 + $0x1340] ss:$72 sps:$4 sm:$0xff]   ;;  %v18645_v2 = vld [vmem:[%s19704_s15 + $0xad4] ss:$72 sps:$4 sm:$0xff]  }
 0x576   : > { %12460 = vmatpush1.bf16.msra.mxu0 %v18583_v38  ;;  %v18648_v38 = vld [vmem:[%s19704_s15 + $0x13d4] ss:$72 sps:$4 sm:$0xff]  }
 0x577   : > { %12501 = vmatpush1.bf16.msra.mxu1 %v18586_v3  ;;  %12461 = vmatprep.subr.bf16.mxu0 %v18591_v10  ;;  %v18643_v3 = vld [vmem:[%s19704_s15 + $0xad0] ss:$72 sps:$4 sm:$0xff]  }
 0x578   : > { %12502 = vmatprep.subr.bf16.mxu1 %v18594_v4  ;;  %v18646_v10 = vld [vmem:[%s19704_s15 + $0x13d0] ss:$72 sps:$4 sm:$0xff]   ;;  %v18651_v4 = vld [vmem:[%s19704_s15 + $0xb64] ss:$72 sps:$4 sm:$0xff]  }
 0x57a   : > { %12462 = vmatpush1.bf16.msra.mxu0 %v18589_v6  ;;  %v18654_v6 = vld [vmem:[%s19704_s15 + $0x1464] ss:$72 sps:$4 sm:$0xff]  }
 0x57b   : > { %12503 = vmatpush1.bf16.msra.mxu1 %v18592_v21  ;;  %12463 = vmatprep.subr.bf16.mxu0 %v18597_v8  ;;  %v18649_v21 = vld [vmem:[%s19704_s15 + $0xb60] ss:$72 sps:$4 sm:$0xff]  }
 0x57c   : > { %12504 = vmatprep.subr.bf16.mxu1 %v18600_v47  ;;  %v18652_v8 = vld [vmem:[%s19704_s15 + $0x1460] ss:$72 sps:$4 sm:$0xff]   ;;  %v18657_v47 = vld [vmem:[%s19704_s15 + $0xbf4] ss:$72 sps:$4 sm:$0xff]  }
 0x57e   : > { %12464 = vmatpush1.bf16.msra.mxu0 %v18595_v11  ;;  %v18660_v11 = vld [vmem:[%s19704_s15 + $0x14f4] ss:$72 sps:$4 sm:$0xff]  }
 0x57f   : > { %12505 = vmatpush1.bf16.msra.mxu1 %v18598_v12  ;;  %12465 = vmatprep.subr.bf16.mxu0 %v18603_v14  ;;  %v18655_v12 = vld [vmem:[%s19704_s15 + $0xbf0] ss:$72 sps:$4 sm:$0xff]  }
 0x580   : > { %12506 = vmatprep.subr.bf16.mxu1 %v18606_v15  ;;  %v18658_v14 = vld [vmem:[%s19704_s15 + $0x14f0] ss:$72 sps:$4 sm:$0xff]   ;;  %v18663_v15 = vld [vmem:[%s19704_s15 + $0xc84] ss:$72 sps:$4 sm:$0xff]  }
 0x582   : > { %12466 = vmatpush1.bf16.msra.mxu0 %v18601_v22  ;;  %v18666_v22 = vld [vmem:[%s19704_s15 + $0x1584] ss:$72 sps:$4 sm:$0xff]  }
 0x583   : > { %12507 = vmatpush1.bf16.msra.mxu1 %v18604_v25  ;;  %12467 = vmatprep.subr.bf16.mxu0 %v18609_v19 }
 0x584   : > { %12508 = vmatprep.subr.bf16.mxu1 %v18612_v24 }
 0x586   : > { %12468 = vmatpush1.bf16.msra.mxu0 %v18607_v53 }
 0x587   : > { %12509 = vmatpush1.bf16.msra.mxu1 %v18610_v36  ;;  %12469 = vmatprep.subr.bf16.mxu0 %v18615_v42 }
 0x588   : > { %12510 = vmatprep.subr.bf16.mxu1 %v18618_v55 }
 0x58a   : > { %12470 = vmatpush1.bf16.msra.mxu0 %v18613_v0 }
 0x58b   : > { %12511 = vmatpush1.bf16.msra.mxu1 %v18616_v49  ;;  %12471 = vmatprep.subr.bf16.mxu0 %v18621_v58 }
 0x58c   : > { %12512 = vmatprep.subr.bf16.mxu1 %v18624_v39 }
 0x58e   : > { %12472 = vmatpush1.bf16.msra.mxu0 %v18619_v50 }
 0x58f   : > { %12513 = vmatpush1.bf16.msra.mxu1 %v18622_v40  ;;  %12523 = vmatprep.subr.bf16.mxu0 %v18627_v41  ;;  %v18672_v40 = vld [vmem:[%s19704_s15 + $0x1614] ss:$72 sps:$4 sm:$0xff]   ;;  %v18670_v41 = vld [vmem:[%s19704_s15 + $0x1610] ss:$72 sps:$4 sm:$0xff]  }
 0x590   : > { %12564 = vmatprep.subr.bf16.mxu1 %v18630_v13  ;;  %v18675_v13 = vld [vmem:[%s19704_s15 + $0xda4] ss:$72 sps:$4 sm:$0xff]  }
 0x591   : > { %12474 = vmatmul.mubr.bf16.vlgmr.msra.gmra.mrb[76].mxu0 %v20890_v34 }
 0x592   : > { %12515 = vmatmul.mubr.bf16.vlgmr.msra.gmra.mrb[76].mxu1 %v20799_v45  ;;  %12524 = vmatpush1.bf16.msra.mxu0 %v18625_v46  ;;  %v18678_v46 = vld [vmem:[%s19704_s15 + $0x16a4] ss:$72 sps:$4 sm:$0xff]  }
 0x593   : > { %12565 = vmatpush1.bf16.msra.mxu1 %v18628_v1  ;;  %12525 = vmatprep.subr.bf16.mxu0 %v18633_v5  ;;  %v18673_v1 = vld [vmem:[%s19704_s15 + $0xda0] ss:$72 sps:$4 sm:$0xff]  }
 0x594   : > { %12566 = vmatprep.subr.bf16.mxu1 %v18636_v27  ;;  %12555 = vmatprep.mubr.bf16.mxu0 %v20805_v52  ;;  %v18676_v5 = vld [vmem:[%s19704_s15 + $0x16a0] ss:$72 sps:$4 sm:$0xff]   ;;  %v18681_v27 = vld [vmem:[%s19704_s15 + $0xe34] ss:$72 sps:$4 sm:$0xff]  }
 0x595   : > { %12596 = vmatprep.mubr.bf16.mxu1 %v20808_v56 }
 0x596   : > { %12526 = vmatpush1.bf16.msra.mxu0 %v18631_v23  ;;  %v18684_v23 = vld [vmem:[%s19704_s15 + $0x1734] ss:$72 sps:$4 sm:$0xff]  }
 0x597   : > { %12567 = vmatpush1.bf16.msra.mxu1 %v18634_v16  ;;  %12527 = vmatprep.subr.bf16.mxu0 %v18639_v57  ;;  %v18679_v16 = vld [vmem:[%s19704_s15 + $0xe30] ss:$72 sps:$4 sm:$0xff]  }
 0x598   : > { %12568 = vmatprep.subr.bf16.mxu1 %v18642_v62  ;;  %v18682_v57 = vld [vmem:[%s19704_s15 + $0x1730] ss:$72 sps:$4 sm:$0xff]   ;;  %v18687_v62 = vld [vmem:[%s19704_s15 + $0xec4] ss:$72 sps:$4 sm:$0xff]  }
 0x59a   : > { %12528 = vmatpush1.bf16.msra.mxu0 %v18637_v63  ;;  %v18690_v63 = vld [vmem:[%s19704_s15 + $0x17c4] ss:$72 sps:$4 sm:$0xff]  }
 0x59b   : > { %12569 = vmatpush1.bf16.msra.mxu1 %v18640_v61  ;;  %12529 = vmatprep.subr.bf16.mxu0 %v18645_v2  ;;  %v18685_v61 = vld [vmem:[%s19704_s15 + $0xec0] ss:$72 sps:$4 sm:$0xff]  }
 0x59c   : > { %12570 = vmatprep.subr.bf16.mxu1 %v18648_v38  ;;  %v18688_v2 = vld [vmem:[%s19704_s15 + $0x17c0] ss:$72 sps:$4 sm:$0xff]   ;;  %v18693_v38 = vld [vmem:[%s19704_s15 + $0xf54] ss:$72 sps:$4 sm:$0xff]  }
 0x59e   : > { %12530 = vmatpush1.bf16.msra.mxu0 %v18643_v3  ;;  %v18696_v3 = vld [vmem:[%s19704_s15 + $0x1854] ss:$72 sps:$4 sm:$0xff]  }
 0x59f   : > { %12571 = vmatpush1.bf16.msra.mxu1 %v18646_v10  ;;  %12531 = vmatprep.subr.bf16.mxu0 %v18651_v4  ;;  %v18691_v10 = vld [vmem:[%s19704_s15 + $0xf50] ss:$72 sps:$4 sm:$0xff]  }
 0x5a0   : > { %12572 = vmatprep.subr.bf16.mxu1 %v18654_v6  ;;  %v18694_v4 = vld [vmem:[%s19704_s15 + $0x1850] ss:$72 sps:$4 sm:$0xff]   ;;  %v18699_v6 = vld [vmem:[%s19704_s15 + $0xfe4] ss:$72 sps:$4 sm:$0xff]  }
 0x5a2   : > { %12532 = vmatpush1.bf16.msra.mxu0 %v18649_v21  ;;  %v18702_v21 = vld [vmem:[%s19704_s15 + $0x18e4] ss:$72 sps:$4 sm:$0xff]  }
 0x5a3   : > { %12573 = vmatpush1.bf16.msra.mxu1 %v18652_v8  ;;  %12533 = vmatprep.subr.bf16.mxu0 %v18657_v47  ;;  %v18697_v8 = vld [vmem:[%s19704_s15 + $0xfe0] ss:$72 sps:$4 sm:$0xff]  }
 0x5a4   : > { %12574 = vmatprep.subr.bf16.mxu1 %v18660_v11  ;;  %v12229_v25 = vpop.f32.mrb[64].mxu0  ;;  %v18700_v47 = vld [vmem:[%s19704_s15 + $0x18e0] ss:$72 sps:$4 sm:$0xff]   ;;  %v18705_v11 = vld [vmem:[%s19704_s15 + $0x1074] ss:$72 sps:$4 sm:$0xff]  }
 0x5a5   : > { %v12270_v19 = vpop.f32.mrb[64].mxu1  ;;  %v21295_v24 = vadd.f32 %v12229_v25, %v21224_v60  ;;  %v12231_v36 = vpop.f32.mrb[65].mxu0  ;;  %v18661_v60 = vld [vmem:[%s19704_s15 + $0xc80] ss:$72 sps:$4 sm:$0xff]   ;;  %v18714_v25 = vld [vmem:[%s19704_s15 + $0x1a04] ss:$72 sps:$4 sm:$0xff]  }
 0x5a6   : > { %v21298_v53 = vadd.f32 %v12270_v19, %v20359_v51  ;;  %v12272_v42 = vpop.f32.mrb[65].mxu1  ;;  %v21301_v55 = vadd.f32 %v12231_v36, %v21228_v48  ;;  %v12233_v49 = vpop.f32.mrb[66].mxu0  ;;  %12534 = vmatpush1.bf16.msra.mxu0 %v18655_v12  ;;  %v18664_v51 = vld [vmem:[%s19704_s15 + $0x1580] ss:$72 sps:$4 sm:$0xff]   ;;  %v18669_v48 = vld [vmem:[%s19704_s15 + $0xd14] ss:$72 sps:$4 sm:$0xff]  }
 0x5a7   : > { %v21304_v0 = vadd.f32 %v12272_v42, %v20364_v54  ;;  %v12274_v58 = vpop.f32.mrb[66].mxu1  ;;  %12575 = vmatpush1.bf16.msra.mxu1 %v18658_v14  ;;  %v12234_v39 = vpop.f32.mrb[67].mxu0  ;;  %12535 = vmatprep.subr.bf16.mxu0 %v18663_v15  ;;  %v18667_v54 = vld [vmem:[%s19704_s15 + $0xd10] ss:$72 sps:$4 sm:$0xff]   ;;  %v18708_v12 = vld [vmem:[%s19704_s15 + $0x1974] ss:$72 sps:$4 sm:$0xff]  }
 0x5a8   : > { %v12275_v50 = vpop.f32.mrb[67].mxu1  ;;  %12576 = vmatprep.subr.bf16.mxu1 %v18666_v22  ;;  %v18703_v14 = vld [vmem:[%s19704_s15 + $0x1070] ss:$72 sps:$4 sm:$0xff]   ;;  %v18711_v22 = vld [vmem:[%s19704_s15 + $0x1104] ss:$72 sps:$4 sm:$0xff]  }
 0x5a9   : > { %v18706_v15 = vld [vmem:[%s19704_s15 + $0x1970] ss:$72 sps:$4 sm:$0xff]   ;;  %v18709_v19 = vld [vmem:[%s19704_s15 + $0x1100] ss:$72 sps:$4 sm:$0xff]   ;;  %v18717_v42 = vld [vmem:[%s19704_s15 + $0x1194] ss:$72 sps:$4 sm:$0xff]  }
 0x5aa   : > { %12536 = vmatpush1.bf16.msra.mxu0 %v18661_v60  ;;  %v18712_v36 = vld [vmem:[%s19704_s15 + $0x1a00] ss:$72 sps:$4 sm:$0xff]   ;;  %v18720_v49 = vld [vmem:[%s19704_s15 + $0x1a94] ss:$72 sps:$4 sm:$0xff]   ;;  %v18715_v58 = vld [vmem:[%s19704_s15 + $0x1190] ss:$72 sps:$4 sm:$0xff]  }
 0x5ab   : > { %12577 = vmatpush1.bf16.msra.mxu1 %v18664_v51  ;;  %12537 = vmatprep.subr.bf16.mxu0 %v18669_v48  ;;  %v18718_v60 = vld [vmem:[%s19704_s15 + $0x1a90] ss:$72 sps:$4 sm:$0xff]   ;;  %v18723_v51 = vld [vmem:[%s19704_s15 + $0x2c] ss:$72 sps:$4 sm:$0xff]  }
 0x5ac   : > { %12578 = vmatprep.subr.bf16.mxu1 %v18672_v40  ;;  %v18726_v39 = vld [vmem:[%s19704_s15 + $0x92c] ss:$72 sps:$4 sm:$0xff]   ;;  %v18721_v50 = vld [vmem:[%s19704_s15 + $0x28] ss:$72 sps:$4 sm:$0xff]   ;;  %v18729_v40 = vld [vmem:[%s19704_s15 + $0xbc] ss:$72 sps:$4 sm:$0xff]  }
 0x5ad   : > { %v18724_v48 = vld [vmem:[%s19704_s15 + $0x928] ss:$72 sps:$4 sm:$0xff]  }
 0x5ae   : > { %12538 = vmatpush1.bf16.msra.mxu0 %v18667_v54  ;;  %v18732_v54 = vld [vmem:[%s19704_s15 + $0x9bc] ss:$72 sps:$4 sm:$0xff]  }
 0x5af   : > { %12579 = vmatpush1.bf16.msra.mxu1 %v18670_v41  ;;  %12539 = vmatprep.subr.bf16.mxu0 %v18675_v13  ;;  %v18727_v41 = vld [vmem:[%s19704_s15 + $0xb8] ss:$72 sps:$4 sm:$0xff]  }
 0x5b0   : > { %12580 = vmatprep.subr.bf16.mxu1 %v18678_v46  ;;  %v18730_v13 = vld [vmem:[%s19704_s15 + $0x9b8] ss:$72 sps:$4 sm:$0xff]   ;;  %v18735_v46 = vld [vmem:[%s19704_s15 + $0x14c] ss:$72 sps:$4 sm:$0xff]  }
 0x5b2   : > { %12540 = vmatpush1.bf16.msra.mxu0 %v18673_v1  ;;  %v18738_v1 = vld [vmem:[%s19704_s15 + $0xa4c] ss:$72 sps:$4 sm:$0xff]  }
 0x5b3   : > { %12581 = vmatpush1.bf16.msra.mxu1 %v18676_v5  ;;  %12541 = vmatprep.subr.bf16.mxu0 %v18681_v27  ;;  %v18733_v5 = vld [vmem:[%s19704_s15 + $0x148] ss:$72 sps:$4 sm:$0xff]  }
 0x5b4   : > { %12582 = vmatprep.subr.bf16.mxu1 %v18684_v23  ;;  %v18736_v27 = vld [vmem:[%s19704_s15 + $0xa48] ss:$72 sps:$4 sm:$0xff]   ;;  %v18741_v23 = vld [vmem:[%s19704_s15 + $0x1dc] ss:$72 sps:$4 sm:$0xff]  }
 0x5b6   : > { %12542 = vmatpush1.bf16.msra.mxu0 %v18679_v16  ;;  %v18744_v16 = vld [vmem:[%s19704_s15 + $0xadc] ss:$72 sps:$4 sm:$0xff]  }
 0x5b7   : > { %12583 = vmatpush1.bf16.msra.mxu1 %v18682_v57  ;;  %12543 = vmatprep.subr.bf16.mxu0 %v18687_v62  ;;  %v18739_v57 = vld [vmem:[%s19704_s15 + $0x1d8] ss:$72 sps:$4 sm:$0xff]  }
 0x5b8   : > { %12584 = vmatprep.subr.bf16.mxu1 %v18690_v63  ;;  %v18742_v62 = vld [vmem:[%s19704_s15 + $0xad8] ss:$72 sps:$4 sm:$0xff]   ;;  %v18747_v63 = vld [vmem:[%s19704_s15 + $0x26c] ss:$72 sps:$4 sm:$0xff]  }
 0x5ba   : > { %12544 = vmatpush1.bf16.msra.mxu0 %v18685_v61  ;;  %v18750_v61 = vld [vmem:[%s19704_s15 + $0xb6c] ss:$72 sps:$4 sm:$0xff]  }
 0x5bb   : > { %12585 = vmatpush1.bf16.msra.mxu1 %v18688_v2  ;;  %12545 = vmatprep.subr.bf16.mxu0 %v18693_v38  ;;  %v18745_v2 = vld [vmem:[%s19704_s15 + $0x268] ss:$72 sps:$4 sm:$0xff]  }
 0x5bc   : > { %12586 = vmatprep.subr.bf16.mxu1 %v18696_v3  ;;  %v18748_v38 = vld [vmem:[%s19704_s15 + $0xb68] ss:$72 sps:$4 sm:$0xff]   ;;  %v18753_v3 = vld [vmem:[%s19704_s15 + $0x2fc] ss:$72 sps:$4 sm:$0xff]  }
 0x5be   : > { %12546 = vmatpush1.bf16.msra.mxu0 %v18691_v10  ;;  %v18756_v10 = vld [vmem:[%s19704_s15 + $0xbfc] ss:$72 sps:$4 sm:$0xff]  }
 0x5bf   : > { %12587 = vmatpush1.bf16.msra.mxu1 %v18694_v4  ;;  %12547 = vmatprep.subr.bf16.mxu0 %v18699_v6  ;;  %v18751_v4 = vld [vmem:[%s19704_s15 + $0x2f8] ss:$72 sps:$4 sm:$0xff]  }
 0x5c0   : > { %12588 = vmatprep.subr.bf16.mxu1 %v18702_v21  ;;  %v18754_v6 = vld [vmem:[%s19704_s15 + $0xbf8] ss:$72 sps:$4 sm:$0xff]   ;;  %v18759_v21 = vld [vmem:[%s19704_s15 + $0x38c] ss:$72 sps:$4 sm:$0xff]  }
 0x5c2   : > { %12548 = vmatpush1.bf16.msra.mxu0 %v18697_v8  ;;  %v18762_v8 = vld [vmem:[%s19704_s15 + $0xc8c] ss:$72 sps:$4 sm:$0xff]  }
 0x5c3   : > { %12589 = vmatpush1.bf16.msra.mxu1 %v18700_v47  ;;  %12549 = vmatprep.subr.bf16.mxu0 %v18705_v11 }
 0x5c4   : > { %12590 = vmatprep.subr.bf16.mxu1 %v18708_v12 }
 0x5c6   : > { %12550 = vmatpush1.bf16.msra.mxu0 %v18703_v14 }
 0x5c7   : > { %12591 = vmatpush1.bf16.msra.mxu1 %v18706_v15  ;;  %12551 = vmatprep.subr.bf16.mxu0 %v18711_v22 }
 0x5c8   : > { %12592 = vmatprep.subr.bf16.mxu1 %v18714_v25 }
 0x5ca   : > { %12552 = vmatpush1.bf16.msra.mxu0 %v18709_v19 }
 0x5cb   : > { %12593 = vmatpush1.bf16.msra.mxu1 %v18712_v36  ;;  %12553 = vmatprep.subr.bf16.mxu0 %v18717_v42  ;;  %v18757_v36 = vld [vmem:[%s19704_s15 + $0x388] ss:$72 sps:$4 sm:$0xff]  }
 0x5cc   : > { %12594 = vmatprep.subr.bf16.mxu1 %v18720_v49  ;;  %v18760_v42 = vld [vmem:[%s19704_s15 + $0xc88] ss:$72 sps:$4 sm:$0xff]  }
 0x5ce   : > { %12554 = vmatpush1.bf16.msra.mxu0 %v18715_v58 }
 0x5cf   : > { %12595 = vmatpush1.bf16.msra.mxu1 %v18718_v60  ;;  %12605 = vmatprep.subr.bf16.mxu0 %v18723_v51 }
 0x5d0   : > { %12646 = vmatprep.subr.bf16.mxu1 %v18726_v39  ;;  %v18763_v39 = vld [vmem:[%s19704_s15 + $0x418] ss:$72 sps:$4 sm:$0xff]  }
 0x5d1   : > { %12556 = vmatmul.mubr.bf16.vlgmr.msra.gmra.mrb[80].mxu0 %v20886_v33 }
 0x5d2   : > { %12597 = vmatmul.mubr.bf16.vlgmr.msra.gmra.mrb[80].mxu1 %v20890_v34  ;;  %12606 = vmatpush1.bf16.msra.mxu0 %v18721_v50  ;;  %v18766_v50 = vld [vmem:[%s19704_s15 + $0xd18] ss:$72 sps:$4 sm:$0xff]  }
 0x5d3   : > { %12647 = vmatpush1.bf16.msra.mxu1 %v18724_v48  ;;  %12607 = vmatprep.subr.bf16.mxu0 %v18729_v40  ;;  %v18771_v48 = vld [vmem:[%s19704_s15 + $0x4ac] ss:$72 sps:$4 sm:$0xff]  }
 0x5d4   : > { %12648 = vmatprep.subr.bf16.mxu1 %v18732_v54  ;;  %12637 = vmatprep.mubr.bf16.mxu0 %v20718_v7  ;;  %v18774_v40 = vld [vmem:[%s19704_s15 + $0xdac] ss:$72 sps:$4 sm:$0xff]   ;;  %v18769_v54 = vld [vmem:[%s19704_s15 + $0x4a8] ss:$72 sps:$4 sm:$0xff]  }
 0x5d5   : > { %12678 = vmatprep.mubr.bf16.mxu1 %v20805_v52 }
 0x5d6   : > { %12608 = vmatpush1.bf16.msra.mxu0 %v18727_v41  ;;  %v18772_v41 = vld [vmem:[%s19704_s15 + $0xda8] ss:$72 sps:$4 sm:$0xff]  }
 0x5d7   : > { %12649 = vmatpush1.bf16.msra.mxu1 %v18730_v13  ;;  %12609 = vmatprep.subr.bf16.mxu0 %v18735_v46  ;;  %v18777_v13 = vld [vmem:[%s19704_s15 + $0x53c] ss:$72 sps:$4 sm:$0xff]  }
 0x5d8   : > { %12650 = vmatprep.subr.bf16.mxu1 %v18738_v1  ;;  %v18780_v46 = vld [vmem:[%s19704_s15 + $0xe3c] ss:$72 sps:$4 sm:$0xff]   ;;  %v18775_v1 = vld [vmem:[%s19704_s15 + $0x538] ss:$72 sps:$4 sm:$0xff]  }
 0x5da   : > { %12610 = vmatpush1.bf16.msra.mxu0 %v18733_v5  ;;  %v18778_v5 = vld [vmem:[%s19704_s15 + $0xe38] ss:$72 sps:$4 sm:$0xff]  }
 0x5db   : > { %12651 = vmatpush1.bf16.msra.mxu1 %v18736_v27  ;;  %12611 = vmatprep.subr.bf16.mxu0 %v18741_v23  ;;  %v18783_v27 = vld [vmem:[%s19704_s15 + $0x5cc] ss:$72 sps:$4 sm:$0xff]  }
 0x5dc   : > { %12652 = vmatprep.subr.bf16.mxu1 %v18744_v16  ;;  %v18786_v23 = vld [vmem:[%s19704_s15 + $0xecc] ss:$72 sps:$4 sm:$0xff]   ;;  %v18781_v16 = vld [vmem:[%s19704_s15 + $0x5c8] ss:$72 sps:$4 sm:$0xff]  }
 0x5de   : > { %12612 = vmatpush1.bf16.msra.mxu0 %v18739_v57  ;;  %v18784_v57 = vld [vmem:[%s19704_s15 + $0xec8] ss:$72 sps:$4 sm:$0xff]  }
 0x5df   : > { %12653 = vmatpush1.bf16.msra.mxu1 %v18742_v62  ;;  %12613 = vmatprep.subr.bf16.mxu0 %v18747_v63  ;;  %v18789_v62 = vld [vmem:[%s19704_s15 + $0x65c] ss:$72 sps:$4 sm:$0xff]  }
 0x5e0   : > { %12654 = vmatprep.subr.bf16.mxu1 %v18750_v61  ;;  %v18792_v63 = vld [vmem:[%s19704_s15 + $0xf5c] ss:$72 sps:$4 sm:$0xff]   ;;  %v18787_v61 = vld [vmem:[%s19704_s15 + $0x658] ss:$72 sps:$4 sm:$0xff]  }
 0x5e2   : > { %12614 = vmatpush1.bf16.msra.mxu0 %v18745_v2  ;;  %v18790_v2 = vld [vmem:[%s19704_s15 + $0xf58] ss:$72 sps:$4 sm:$0xff]  }
 0x5e3   : > { %12655 = vmatpush1.bf16.msra.mxu1 %v18748_v38  ;;  %12615 = vmatprep.subr.bf16.mxu0 %v18753_v3  ;;  %v18795_v38 = vld [vmem:[%s19704_s15 + $0x6ec] ss:$72 sps:$4 sm:$0xff]  }
 0x5e4   : > { %12656 = vmatprep.subr.bf16.mxu1 %v18756_v10  ;;  %v12311_v47 = vpop.f32.mrb[68].mxu0  ;;  %v18798_v3 = vld [vmem:[%s19704_s15 + $0xfec] ss:$72 sps:$4 sm:$0xff]   ;;  %v18793_v10 = vld [vmem:[%s19704_s15 + $0x6e8] ss:$72 sps:$4 sm:$0xff]  }
 0x5e5   : > { %v12352_v11 = vpop.f32.mrb[68].mxu1  ;;  %v12312_v12 = vadd.f32 %v12311_v47, %v21298_v53  ;;  %v12313_v14 = vpop.f32.mrb[69].mxu0  ;;  %v18765_v53 = vld [vmem:[%s19704_s15 + $0x41c] ss:$72 sps:$4 sm:$0xff]   ;;  %v18802_v47 = vld [vmem:[%s19704_s15 + $0x1078] ss:$72 sps:$4 sm:$0xff]  }
 0x5e6   : > { %v12354_v15 = vpop.f32.mrb[69].mxu1  ;;  %v12314_v22 = vadd.f32 %v12313_v14, %v21304_v0  ;;  %v12315_v25 = vpop.f32.mrb[70].mxu0  ;;  %12616 = vmatpush1.bf16.msra.mxu0 %v18751_v4  ;;  %v18768_v0 = vld [vmem:[%s19704_s15 + $0xd1c] ss:$72 sps:$4 sm:$0xff]   ;;  %v18796_v4 = vld [vmem:[%s19704_s15 + $0xfe8] ss:$72 sps:$4 sm:$0xff]  }
 0x5e7   : > { %v12356_v19 = vpop.f32.mrb[70].mxu1  ;;  %12657 = vmatpush1.bf16.msra.mxu1 %v18754_v6  ;;  %v21378_v49 = vadd.f32 %v12352_v11, %v12312_v12  ;;  %v12316_v58 = vpop.f32.mrb[71].mxu0  ;;  %12617 = vmatprep.subr.bf16.mxu0 %v18759_v21  ;;  %v18801_v6 = vld [vmem:[%s19704_s15 + $0x77c] ss:$72 sps:$4 sm:$0xff]   ;;  %v18807_v11 = vld [vmem:[%s19704_s15 + $0x80c] ss:$72 sps:$4 sm:$0xff]  }
 0x5e8   : > { %v12357_v60 = vpop.f32.mrb[71].mxu1  ;;  %12658 = vmatprep.subr.bf16.mxu1 %v18762_v8  ;;  %v21382_v51 = vadd.f32 %v12354_v15, %v12314_v22  ;;  %v18804_v21 = vld [vmem:[%s19704_s15 + $0x107c] ss:$72 sps:$4 sm:$0xff]   ;;  %v18799_v8 = vld [vmem:[%s19704_s15 + $0x778] ss:$72 sps:$4 sm:$0xff]  }
 0x5e9   : > { %v18810_v12 = vld [vmem:[%s19704_s15 + $0x110c] ss:$72 sps:$4 sm:$0xff]   ;;  %v18805_v14 = vld [vmem:[%s19704_s15 + $0x808] ss:$72 sps:$4 sm:$0xff]   ;;  %v18813_v22 = vld [vmem:[%s19704_s15 + $0x89c] ss:$72 sps:$4 sm:$0xff]  }
 0x5ea   : > { %12618 = vmatpush1.bf16.msra.mxu0 %v18757_v36  ;;  %v18808_v15 = vld [vmem:[%s19704_s15 + $0x1108] ss:$72 sps:$4 sm:$0xff]   ;;  %v18816_v25 = vld [vmem:[%s19704_s15 + $0x119c] ss:$72 sps:$4 sm:$0xff]   ;;  %v18811_v19 = vld [vmem:[%s19704_s15 + $0x898] ss:$72 sps:$4 sm:$0xff]  }
 0x5eb   : > { %12659 = vmatpush1.bf16.msra.mxu1 %v18760_v42  ;;  %12619 = vmatprep.subr.bf16.mxu0 %v18765_v53  ;;  %v18814_v36 = vld [vmem:[%s19704_s15 + $0x1198] ss:$72 sps:$4 sm:$0xff]   ;;  %v18819_v42 = vld [vmem:[%s19704_s15 + $0x122c] ss:$72 sps:$4 sm:$0xff]   ;;  %v18817_v60 = vld [vmem:[%s19704_s15 + $0x1228] ss:$72 sps:$4 sm:$0xff]  }
 0x5ec   : > { %12660 = vmatprep.subr.bf16.mxu1 %v18768_v0  ;;  %v18822_v58 = vld [vmem:[%s19704_s15 + $0x34] ss:$72 sps:$4 sm:$0xff]   ;;  %v18820_v53 = vld [vmem:[%s19704_s15 + $0x30] ss:$72 sps:$4 sm:$0xff]  }
 0x5ed   : > { %v18825_v0 = vld [vmem:[%s19704_s15 + $0x12bc] ss:$72 sps:$4 sm:$0xff]  }
 0x5ee   : > { %12620 = vmatpush1.bf16.msra.mxu0 %v18763_v39  ;;  %v18828_v39 = vld [vmem:[%s19704_s15 + $0xc4] ss:$72 sps:$4 sm:$0xff]  }
 0x5ef   : > { %12661 = vmatpush1.bf16.msra.mxu1 %v18766_v50  ;;  %12621 = vmatprep.subr.bf16.mxu0 %v18771_v48  ;;  %v18823_v50 = vld [vmem:[%s19704_s15 + $0x12b8] ss:$72 sps:$4 sm:$0xff]  }
 0x5f0   : > { %12662 = vmatprep.subr.bf16.mxu1 %v18774_v40  ;;  %v18826_v48 = vld [vmem:[%s19704_s15 + $0xc0] ss:$72 sps:$4 sm:$0xff]   ;;  %v18831_v40 = vld [vmem:[%s19704_s15 + $0x134c] ss:$72 sps:$4 sm:$0xff]  }
 0x5f2   : > { %12622 = vmatpush1.bf16.msra.mxu0 %v18769_v54  ;;  %v18834_v54 = vld [vmem:[%s19704_s15 + $0x154] ss:$72 sps:$4 sm:$0xff]  }
 0x5f3   : > { %12663 = vmatpush1.bf16.msra.mxu1 %v18772_v41  ;;  %12623 = vmatprep.subr.bf16.mxu0 %v18777_v13  ;;  %v18829_v41 = vld [vmem:[%s19704_s15 + $0x1348] ss:$72 sps:$4 sm:$0xff]  }
 0x5f4   : > { %12664 = vmatprep.subr.bf16.mxu1 %v18780_v46  ;;  %v18832_v13 = vld [vmem:[%s19704_s15 + $0x150] ss:$72 sps:$4 sm:$0xff]   ;;  %v18837_v46 = vld [vmem:[%s19704_s15 + $0x13dc] ss:$72 sps:$4 sm:$0xff]  }
 0x5f6   : > { %12624 = vmatpush1.bf16.msra.mxu0 %v18775_v1  ;;  %v18840_v1 = vld [vmem:[%s19704_s15 + $0x1e4] ss:$72 sps:$4 sm:$0xff]  }
 0x5f7   : > { %12665 = vmatpush1.bf16.msra.mxu1 %v18778_v5  ;;  %12625 = vmatprep.subr.bf16.mxu0 %v18783_v27  ;;  %v18835_v5 = vld [vmem:[%s19704_s15 + $0x13d8] ss:$72 sps:$4 sm:$0xff]  }
 0x5f8   : > { %12666 = vmatprep.subr.bf16.mxu1 %v18786_v23  ;;  %v18838_v27 = vld [vmem:[%s19704_s15 + $0x1e0] ss:$72 sps:$4 sm:$0xff]   ;;  %v18843_v23 = vld [vmem:[%s19704_s15 + $0x146c] ss:$72 sps:$4 sm:$0xff]  }
 0x5fa   : > { %12626 = vmatpush1.bf16.msra.mxu0 %v18781_v16  ;;  %v18846_v16 = vld [vmem:[%s19704_s15 + $0x274] ss:$72 sps:$4 sm:$0xff]  }
 0x5fb   : > { %12667 = vmatpush1.bf16.msra.mxu1 %v18784_v57  ;;  %12627 = vmatprep.subr.bf16.mxu0 %v18789_v62  ;;  %v18841_v57 = vld [vmem:[%s19704_s15 + $0x1468] ss:$72 sps:$4 sm:$0xff]  }
 0x5fc   : > { %12668 = vmatprep.subr.bf16.mxu1 %v18792_v63  ;;  %v18844_v62 = vld [vmem:[%s19704_s15 + $0x270] ss:$72 sps:$4 sm:$0xff]   ;;  %v18849_v63 = vld [vmem:[%s19704_s15 + $0x14fc] ss:$72 sps:$4 sm:$0xff]  }
 0x5fe   : > { %12628 = vmatpush1.bf16.msra.mxu0 %v18787_v61  ;;  %v18852_v61 = vld [vmem:[%s19704_s15 + $0x304] ss:$72 sps:$4 sm:$0xff]  }
 0x5ff   : > { %12669 = vmatpush1.bf16.msra.mxu1 %v18790_v2  ;;  %12629 = vmatprep.subr.bf16.mxu0 %v18795_v38  ;;  %v18847_v2 = vld [vmem:[%s19704_s15 + $0x14f8] ss:$72 sps:$4 sm:$0xff]  }
 0x600   : > { %12670 = vmatprep.subr.bf16.mxu1 %v18798_v3  ;;  %v18850_v38 = vld [vmem:[%s19704_s15 + $0x300] ss:$72 sps:$4 sm:$0xff]   ;;  %v18855_v3 = vld [vmem:[%s19704_s15 + $0x158c] ss:$72 sps:$4 sm:$0xff]  }
 0x602   : > { %12630 = vmatpush1.bf16.msra.mxu0 %v18793_v10  ;;  %v18858_v10 = vld [vmem:[%s19704_s15 + $0x394] ss:$72 sps:$4 sm:$0xff]  }
 0x603   : > { %12671 = vmatpush1.bf16.msra.mxu1 %v18796_v4  ;;  %12631 = vmatprep.subr.bf16.mxu0 %v18801_v6 }
 0x604   : > { %12672 = vmatprep.subr.bf16.mxu1 %v18804_v21 }
 0x606   : > { %12632 = vmatpush1.bf16.msra.mxu0 %v18799_v8 }
 0x607   : > { %12673 = vmatpush1.bf16.msra.mxu1 %v18802_v47  ;;  %12633 = vmatprep.subr.bf16.mxu0 %v18807_v11 }
 0x608   : > { %12674 = vmatprep.subr.bf16.mxu1 %v18810_v12 }
 0x60a   : > { %12634 = vmatpush1.bf16.msra.mxu0 %v18805_v14 }
 0x60b   : > { %12675 = vmatpush1.bf16.msra.mxu1 %v18808_v15  ;;  %12635 = vmatprep.subr.bf16.mxu0 %v18813_v22  ;;  %v18853_v15 = vld [vmem:[%s19704_s15 + $0x1588] ss:$72 sps:$4 sm:$0xff]  }
 0x60c   : > { %12676 = vmatprep.subr.bf16.mxu1 %v18816_v25  ;;  %v18856_v22 = vld [vmem:[%s19704_s15 + $0x390] ss:$72 sps:$4 sm:$0xff]  }
 0x60e   : > { %12636 = vmatpush1.bf16.msra.mxu0 %v18811_v19 }
 0x60f   : > { %12677 = vmatpush1.bf16.msra.mxu1 %v18814_v36  ;;  %12687 = vmatprep.subr.bf16.mxu0 %v18819_v42 }
 0x610   : > { %12728 = vmatprep.subr.bf16.mxu1 %v18822_v58  ;;  %v18859_v58 = vld [vmem:[%s19704_s15 + $0x1618] ss:$72 sps:$4 sm:$0xff]  }
 0x611   : > { %12638 = vmatmul.mubr.bf16.vlgmr.msra.gmra.mrb[84].mxu0 %v20799_v45 }
 0x612   : > { %12679 = vmatmul.mubr.bf16.vlgmr.msra.gmra.mrb[84].mxu1 %v20886_v33  ;;  %12688 = vmatpush1.bf16.msra.mxu0 %v18817_v60  ;;  %v18862_v60 = vld [vmem:[%s19704_s15 + $0x420] ss:$72 sps:$4 sm:$0xff]  }
 0x613   : > { %12729 = vmatpush1.bf16.msra.mxu1 %v18820_v53  ;;  %12689 = vmatprep.subr.bf16.mxu0 %v18825_v0  ;;  %v18867_v53 = vld [vmem:[%s19704_s15 + $0x16ac] ss:$72 sps:$4 sm:$0xff]  }
 0x614   : > { %12730 = vmatprep.subr.bf16.mxu1 %v18828_v39  ;;  %12719 = vmatprep.mubr.bf16.mxu0 %v20808_v56  ;;  %v18870_v0 = vld [vmem:[%s19704_s15 + $0x4b4] ss:$72 sps:$4 sm:$0xff]   ;;  %v18865_v39 = vld [vmem:[%s19704_s15 + $0x16a8] ss:$72 sps:$4 sm:$0xff]  }
 0x615   : > { %12760 = vmatprep.mubr.bf16.mxu1 %v20718_v7 }
 0x616   : > { %12690 = vmatpush1.bf16.msra.mxu0 %v18823_v50  ;;  %v18868_v50 = vld [vmem:[%s19704_s15 + $0x4b0] ss:$72 sps:$4 sm:$0xff]  }
 0x617   : > { %12731 = vmatpush1.bf16.msra.mxu1 %v18826_v48  ;;  %12691 = vmatprep.subr.bf16.mxu0 %v18831_v40  ;;  %v18873_v48 = vld [vmem:[%s19704_s15 + $0x173c] ss:$72 sps:$4 sm:$0xff]  }
 0x618   : > { %12732 = vmatprep.subr.bf16.mxu1 %v18834_v54  ;;  %v18876_v40 = vld [vmem:[%s19704_s15 + $0x544] ss:$72 sps:$4 sm:$0xff]   ;;  %v18871_v54 = vld [vmem:[%s19704_s15 + $0x1738] ss:$72 sps:$4 sm:$0xff]  }
 0x61a   : > { %12692 = vmatpush1.bf16.msra.mxu0 %v18829_v41  ;;  %v18874_v41 = vld [vmem:[%s19704_s15 + $0x540] ss:$72 sps:$4 sm:$0xff]  }
 0x61b   : > { %12733 = vmatpush1.bf16.msra.mxu1 %v18832_v13  ;;  %12693 = vmatprep.subr.bf16.mxu0 %v18837_v46  ;;  %v18879_v13 = vld [vmem:[%s19704_s15 + $0x17cc] ss:$72 sps:$4 sm:$0xff]  }
 0x61c   : > { %12734 = vmatprep.subr.bf16.mxu1 %v18840_v1  ;;  %v18882_v46 = vld [vmem:[%s19704_s15 + $0x5d4] ss:$72 sps:$4 sm:$0xff]   ;;  %v18877_v1 = vld [vmem:[%s19704_s15 + $0x17c8] ss:$72 sps:$4 sm:$0xff]  }
 0x61e   : > { %12694 = vmatpush1.bf16.msra.mxu0 %v18835_v5  ;;  %v18880_v5 = vld [vmem:[%s19704_s15 + $0x5d0] ss:$72 sps:$4 sm:$0xff]  }
 0x61f   : > { %12735 = vmatpush1.bf16.msra.mxu1 %v18838_v27  ;;  %12695 = vmatprep.subr.bf16.mxu0 %v18843_v23  ;;  %v18885_v27 = vld [vmem:[%s19704_s15 + $0x185c] ss:$72 sps:$4 sm:$0xff]  }
 0x620   : > { %12736 = vmatprep.subr.bf16.mxu1 %v18846_v16  ;;  %v18888_v23 = vld [vmem:[%s19704_s15 + $0x664] ss:$72 sps:$4 sm:$0xff]   ;;  %v18883_v16 = vld [vmem:[%s19704_s15 + $0x1858] ss:$72 sps:$4 sm:$0xff]  }
 0x622   : > { %12696 = vmatpush1.bf16.msra.mxu0 %v18841_v57  ;;  %v18886_v57 = vld [vmem:[%s19704_s15 + $0x660] ss:$72 sps:$4 sm:$0xff]  }
 0x623   : > { %12737 = vmatpush1.bf16.msra.mxu1 %v18844_v62  ;;  %12697 = vmatprep.subr.bf16.mxu0 %v18849_v63  ;;  %v18891_v62 = vld [vmem:[%s19704_s15 + $0x18ec] ss:$72 sps:$4 sm:$0xff]  }
 0x624   : > { %12738 = vmatprep.subr.bf16.mxu1 %v18852_v61  ;;  %v12393_v4 = vpop.f32.mrb[72].mxu0  ;;  %v18894_v63 = vld [vmem:[%s19704_s15 + $0x6f4] ss:$72 sps:$4 sm:$0xff]   ;;  %v18889_v61 = vld [vmem:[%s19704_s15 + $0x18e8] ss:$72 sps:$4 sm:$0xff]  }
 0x625   : > { %v12434_v6 = vpop.f32.mrb[72].mxu1  ;;  %v12394_v21 = vadd.f32 %v12393_v4, %v20436_v28  ;;  %v12395_v8 = vpop.f32.mrb[73].mxu0  ;;  %v18861_v28 = vld [vmem:[%s19704_s15 + $0x161c] ss:$72 sps:$4 sm:$0xff]   ;;  %v18898_v4 = vld [vmem:[%s19704_s15 + $0x780] ss:$72 sps:$4 sm:$0xff]  }
 0x626   : > { %v12436_v47 = vpop.f32.mrb[73].mxu1  ;;  %v12396_v11 = vadd.f32 %v12395_v8, %v20440_v32  ;;  %v12397_v12 = vpop.f32.mrb[74].mxu0  ;;  %12698 = vmatpush1.bf16.msra.mxu0 %v18847_v2  ;;  %v18864_v32 = vld [vmem:[%s19704_s15 + $0x424] ss:$72 sps:$4 sm:$0xff]   ;;  %v18892_v2 = vld [vmem:[%s19704_s15 + $0x6f0] ss:$72 sps:$4 sm:$0xff]  }
 0x627   : > { %v12438_v14 = vpop.f32.mrb[74].mxu1  ;;  %12739 = vmatpush1.bf16.msra.mxu1 %v18850_v38  ;;  %v21452_v25 = vadd.f32 %v12434_v6, %v12394_v21  ;;  %v12398_v19 = vpop.f32.mrb[75].mxu0  ;;  %12699 = vmatprep.subr.bf16.mxu0 %v18855_v3  ;;  %v18897_v38 = vld [vmem:[%s19704_s15 + $0x197c] ss:$72 sps:$4 sm:$0xff]   ;;  %v18903_v6 = vld [vmem:[%s19704_s15 + $0x1a0c] ss:$72 sps:$4 sm:$0xff]  }
 0x628   : > { %v12439_v36 = vpop.f32.mrb[75].mxu1  ;;  %12740 = vmatprep.subr.bf16.mxu1 %v18858_v10  ;;  %v21456_v42 = vadd.f32 %v12436_v47, %v12396_v11  ;;  %v18900_v3 = vld [vmem:[%s19704_s15 + $0x784] ss:$72 sps:$4 sm:$0xff]   ;;  %v18895_v10 = vld [vmem:[%s19704_s15 + $0x1978] ss:$72 sps:$4 sm:$0xff]  }
 0x629   : > { %v18906_v21 = vld [vmem:[%s19704_s15 + $0x814] ss:$72 sps:$4 sm:$0xff]   ;;  %v18901_v8 = vld [vmem:[%s19704_s15 + $0x1a08] ss:$72 sps:$4 sm:$0xff]   ;;  %v18912_v12 = vld [vmem:[%s19704_s15 + $0x8a4] ss:$72 sps:$4 sm:$0xff]  }
 0x62a   : > { %12700 = vmatpush1.bf16.msra.mxu0 %v18853_v15  ;;  %v18904_v47 = vld [vmem:[%s19704_s15 + $0x810] ss:$72 sps:$4 sm:$0xff]   ;;  %v18909_v11 = vld [vmem:[%s19704_s15 + $0x1a9c] ss:$72 sps:$4 sm:$0xff]   ;;  %v18910_v15 = vld [vmem:[%s19704_s15 + $0x8a0] ss:$72 sps:$4 sm:$0xff]  }
 0x62b   : > { %12741 = vmatpush1.bf16.msra.mxu1 %v18856_v22  ;;  %12701 = vmatprep.subr.bf16.mxu0 %v18861_v28  ;;  %v18907_v14 = vld [vmem:[%s19704_s15 + $0x1a98] ss:$72 sps:$4 sm:$0xff]   ;;  %v18915_v22 = vld [vmem:[%s19704_s15 + $0x934] ss:$72 sps:$4 sm:$0xff]  }
 0x62c   : > { %12742 = vmatprep.subr.bf16.mxu1 %v18864_v32  ;;  %v18918_v19 = vld [vmem:[%s19704_s15 + $0x1234] ss:$72 sps:$4 sm:$0xff]   ;;  %v18913_v36 = vld [vmem:[%s19704_s15 + $0x930] ss:$72 sps:$4 sm:$0xff]   ;;  %v18921_v32 = vld [vmem:[%s19704_s15 + $0x9c4] ss:$72 sps:$4 sm:$0xff]  }
 0x62d   : > { %v18916_v28 = vld [vmem:[%s19704_s15 + $0x1230] ss:$72 sps:$4 sm:$0xff]  }
 0x62e   : > { %12702 = vmatpush1.bf16.msra.mxu0 %v18859_v58  ;;  %v18924_v58 = vld [vmem:[%s19704_s15 + $0x12c4] ss:$72 sps:$4 sm:$0xff]  }
 0x62f   : > { %12743 = vmatpush1.bf16.msra.mxu1 %v18862_v60  ;;  %12703 = vmatprep.subr.bf16.mxu0 %v18867_v53  ;;  %v18919_v60 = vld [vmem:[%s19704_s15 + $0x9c0] ss:$72 sps:$4 sm:$0xff]  }
 0x630   : > { %12744 = vmatprep.subr.bf16.mxu1 %v18870_v0  ;;  %v18922_v53 = vld [vmem:[%s19704_s15 + $0x12c0] ss:$72 sps:$4 sm:$0xff]   ;;  %v18927_v0 = vld [vmem:[%s19704_s15 + $0xa54] ss:$72 sps:$4 sm:$0xff]  }
 0x632   : > { %12704 = vmatpush1.bf16.msra.mxu0 %v18865_v39  ;;  %v18930_v39 = vld [vmem:[%s19704_s15 + $0x1354] ss:$72 sps:$4 sm:$0xff]  }
 0x633   : > { %12745 = vmatpush1.bf16.msra.mxu1 %v18868_v50  ;;  %12705 = vmatprep.subr.bf16.mxu0 %v18873_v48  ;;  %v18925_v50 = vld [vmem:[%s19704_s15 + $0xa50] ss:$72 sps:$4 sm:$0xff]  }
 0x634   : > { %12746 = vmatprep.subr.bf16.mxu1 %v18876_v40  ;;  %v18928_v48 = vld [vmem:[%s19704_s15 + $0x1350] ss:$72 sps:$4 sm:$0xff]   ;;  %v18933_v40 = vld [vmem:[%s19704_s15 + $0xae4] ss:$72 sps:$4 sm:$0xff]  }
 0x636   : > { %12706 = vmatpush1.bf16.msra.mxu0 %v18871_v54  ;;  %v18936_v54 = vld [vmem:[%s19704_s15 + $0x13e4] ss:$72 sps:$4 sm:$0xff]  }
 0x637   : > { %12747 = vmatpush1.bf16.msra.mxu1 %v18874_v41  ;;  %12707 = vmatprep.subr.bf16.mxu0 %v18879_v13  ;;  %v18931_v41 = vld [vmem:[%s19704_s15 + $0xae0] ss:$72 sps:$4 sm:$0xff]  }
 0x638   : > { %12748 = vmatprep.subr.bf16.mxu1 %v18882_v46  ;;  %v18934_v13 = vld [vmem:[%s19704_s15 + $0x13e0] ss:$72 sps:$4 sm:$0xff]   ;;  %v18939_v46 = vld [vmem:[%s19704_s15 + $0xb74] ss:$72 sps:$4 sm:$0xff]  }
 0x63a   : > { %12708 = vmatpush1.bf16.msra.mxu0 %v18877_v1  ;;  %v18942_v1 = vld [vmem:[%s19704_s15 + $0x1474] ss:$72 sps:$4 sm:$0xff]  }
 0x63b   : > { %12749 = vmatpush1.bf16.msra.mxu1 %v18880_v5  ;;  %12709 = vmatprep.subr.bf16.mxu0 %v18885_v27  ;;  %v18937_v5 = vld [vmem:[%s19704_s15 + $0xb70] ss:$72 sps:$4 sm:$0xff]  }
 0x63c   : > { %12750 = vmatprep.subr.bf16.mxu1 %v18888_v23  ;;  %v18940_v27 = vld [vmem:[%s19704_s15 + $0x1470] ss:$72 sps:$4 sm:$0xff]   ;;  %v13129_v23 = vsub.s32 6, %v19762_v43 }
 0x63e   : > { %12710 = vmatpush1.bf16.msra.mxu0 %v18883_v16  ;;  %v18945_v16 = vld [vmem:[%s19704_s15 + $0xc04] ss:$72 sps:$4 sm:$0xff]  }
 0x63f   : > { %12751 = vmatpush1.bf16.msra.mxu1 %v18886_v57  ;;  %12711 = vmatprep.subr.bf16.mxu0 %v18891_v62  ;;  %v18948_v57 = vld [vmem:[%s19704_s15 + $0x1504] ss:$72 sps:$4 sm:$0xff]  }
 0x640   : > { %12752 = vmatprep.subr.bf16.mxu1 %v18894_v63  ;;  %v13097_v62 = vld [vmem:[%s19717_s22] sm:$0xff] }
 0x641   : > { %v18943_v63 = vld [vmem:[%s19704_s15 + $0xc00] ss:$72 sps:$4 sm:$0xff]  }
 0x642   : > { %12712 = vmatpush1.bf16.msra.mxu0 %v18889_v61  ;;  %v18946_v61 = vld [vmem:[%s19704_s15 + $0x1500] ss:$72 sps:$4 sm:$0xff]  }
 0x643   : > { %12753 = vmatpush1.bf16.msra.mxu1 %v18892_v2  ;;  %12713 = vmatprep.subr.bf16.mxu0 %v18897_v38  ;;  %v13130_v2 = vrot.slane %v13097_v62, %v13129_v23  ;;  %v18951_v38 = vld [vmem:[%s19704_s15 + $0xc94] ss:$72 sps:$4 sm:$0xff]  }
 0x644   : > { %12754 = vmatprep.subr.bf16.mxu1 %v18900_v3  ;;  %v18954_v3 = vld [vmem:[%s19704_s15 + $0x1594] ss:$72 sps:$4 sm:$0xff]  }
 0x645   : > { %v18990_v62 = vld [vmem:[%s19704_s15 + $0x18f4] ss:$72 sps:$4 sm:$0xff]  }
 0x646   : > { %12714 = vmatpush1.bf16.msra.mxu0 %v18895_v10 }
 0x647   : > { %12755 = vmatpush1.bf16.msra.mxu1 %v18898_v4  ;;  %12715 = vmatprep.subr.bf16.mxu0 %v18903_v6 }
 0x648   : > { %12756 = vmatprep.subr.bf16.mxu1 %v18906_v21 }
 0x64a   : > { %12716 = vmatpush1.bf16.msra.mxu0 %v18901_v8 }
 0x64b   : > { %12757 = vmatpush1.bf16.msra.mxu1 %v18904_v47  ;;  %12717 = vmatprep.subr.bf16.mxu0 %v18909_v11 }
 0x64c   : > { %12758 = vmatprep.subr.bf16.mxu1 %v18912_v12 }
 0x64e   : > { %12718 = vmatpush1.bf16.msra.mxu0 %v18907_v14 }
 0x64f   : > { %12759 = vmatpush1.bf16.msra.mxu1 %v18910_v15  ;;  %12769 = vmatprep.subr.bf16.mxu0 %v18915_v22 }
 0x650   : > { %12810 = vmatprep.subr.bf16.mxu1 %v18918_v19 }
 0x651   : > { %12720 = vmatmul.mubr.bf16.vlgmr.msra.gmra.mrb[88].mxu0 %v20890_v34 }
 0x652   : > { %12761 = vmatmul.mubr.bf16.vlgmr.msra.gmra.mrb[88].mxu1 %v20799_v45  ;;  %12770 = vmatpush1.bf16.msra.mxu0 %v18913_v36 }
 0x653   : > { %12811 = vmatpush1.bf16.msra.mxu1 %v18916_v28  ;;  %12771 = vmatprep.subr.bf16.mxu0 %v18921_v32  ;;  %v18955_v28 = vld [vmem:[%s19704_s15 + $0xd20] ss:$72 sps:$4 sm:$0xff]  }
 0x654   : > { %12812 = vmatprep.subr.bf16.mxu1 %v18924_v58  ;;  %12801 = vmatprep.mubr.bf16.mxu0 %v20805_v52  ;;  %v18958_v32 = vld [vmem:[%s19704_s15 + $0x1620] ss:$72 sps:$4 sm:$0xff]   ;;  %v18963_v58 = vld [vmem:[%s19704_s15 + $0xdb4] ss:$72 sps:$4 sm:$0xff]  }
 0x655   : > { %12842 = vmatprep.mubr.bf16.mxu1 %v20808_v56 }
 0x656   : > { %12772 = vmatpush1.bf16.msra.mxu0 %v18919_v60  ;;  %v18966_v60 = vld [vmem:[%s19704_s15 + $0x16b4] ss:$72 sps:$4 sm:$0xff]  }
 0x657   : > { %12813 = vmatpush1.bf16.msra.mxu1 %v18922_v53  ;;  %12773 = vmatprep.subr.bf16.mxu0 %v18927_v0  ;;  %v18961_v53 = vld [vmem:[%s19704_s15 + $0xdb0] ss:$72 sps:$4 sm:$0xff]  }
 0x658   : > { %12814 = vmatprep.subr.bf16.mxu1 %v18930_v39  ;;  %v18964_v0 = vld [vmem:[%s19704_s15 + $0x16b0] ss:$72 sps:$4 sm:$0xff]   ;;  %v18969_v39 = vld [vmem:[%s19704_s15 + $0xe44] ss:$72 sps:$4 sm:$0xff]  }
 0x65a   : > { %12774 = vmatpush1.bf16.msra.mxu0 %v18925_v50  ;;  %v18972_v50 = vld [vmem:[%s19704_s15 + $0x1744] ss:$72 sps:$4 sm:$0xff]  }
 0x65b   : > { %12815 = vmatpush1.bf16.msra.mxu1 %v18928_v48  ;;  %12775 = vmatprep.subr.bf16.mxu0 %v18933_v40  ;;  %v18967_v48 = vld [vmem:[%s19704_s15 + $0xe40] ss:$72 sps:$4 sm:$0xff]  }
 0x65c   : > { %12816 = vmatprep.subr.bf16.mxu1 %v18936_v54  ;;  %v18970_v40 = vld [vmem:[%s19704_s15 + $0x1740] ss:$72 sps:$4 sm:$0xff]   ;;  %v18975_v54 = vld [vmem:[%s19704_s15 + $0xed4] ss:$72 sps:$4 sm:$0xff]  }
 0x65e   : > { %12776 = vmatpush1.bf16.msra.mxu0 %v18931_v41  ;;  %v18978_v41 = vld [vmem:[%s19704_s15 + $0x17d4] ss:$72 sps:$4 sm:$0xff]  }
 0x65f   : > { %12817 = vmatpush1.bf16.msra.mxu1 %v18934_v13  ;;  %12777 = vmatprep.subr.bf16.mxu0 %v18939_v46  ;;  %v18973_v13 = vld [vmem:[%s19704_s15 + $0xed0] ss:$72 sps:$4 sm:$0xff]  }
 0x660   : > { %12818 = vmatprep.subr.bf16.mxu1 %v18942_v1  ;;  %v18976_v46 = vld [vmem:[%s19704_s15 + $0x17d0] ss:$72 sps:$4 sm:$0xff]   ;;  %v18981_v1 = vld [vmem:[%s19704_s15 + $0xf64] ss:$72 sps:$4 sm:$0xff]  }
 0x662   : > { %12778 = vmatpush1.bf16.msra.mxu0 %v18937_v5  ;;  %v18984_v5 = vld [vmem:[%s19704_s15 + $0x1864] ss:$72 sps:$4 sm:$0xff]  }
 0x663   : > { %12819 = vmatpush1.bf16.msra.mxu1 %v18940_v27  ;;  %12779 = vmatprep.subr.bf16.mxu0 %v18945_v16  ;;  %v18979_v27 = vld [vmem:[%s19704_s15 + $0xf60] ss:$72 sps:$4 sm:$0xff]  }
 0x664   : > { %12820 = vmatprep.subr.bf16.mxu1 %v18948_v57  ;;  %v12475_v10 = vpop.f32.mrb[76].mxu0  ;;  %v18982_v16 = vld [vmem:[%s19704_s15 + $0x1860] ss:$72 sps:$4 sm:$0xff]   ;;  %v18987_v57 = vld [vmem:[%s19704_s15 + $0xff4] ss:$72 sps:$4 sm:$0xff]  }
 0x665   : > { %v12516_v4 = vpop.f32.mrb[76].mxu1  ;;  %v12476_v6 = vadd.f32 %v12475_v10, %v21452_v25  ;;  %v12477_v8 = vpop.f32.mrb[77].mxu0  ;;  %v18949_v25 = vld [vmem:[%s19704_s15 + $0xc90] ss:$72 sps:$4 sm:$0xff]   ;;  %v18994_v10 = vld [vmem:[%s19704_s15 + $0x1980] ss:$72 sps:$4 sm:$0xff]  }
 0x666   : > { %v21528_v21 = vadd.f32 %v12516_v4, %v20583_v29  ;;  %v12518_v47 = vpop.f32.mrb[77].mxu1  ;;  %v21531_v11 = vadd.f32 %v12477_v8, %v21456_v42  ;;  %v12479_v14 = vpop.f32.mrb[78].mxu0  ;;  %12780 = vmatpush1.bf16.msra.mxu0 %v18943_v63  ;;  %v18952_v29 = vld [vmem:[%s19704_s15 + $0x1590] ss:$72 sps:$4 sm:$0xff]   ;;  %v18960_v42 = vld [vmem:[%s19704_s15 + $0x1624] ss:$72 sps:$4 sm:$0xff]  }
 0x667   : > { %v21534_v12 = vadd.f32 %v12518_v47, %v20588_v31  ;;  %v12520_v15 = vpop.f32.mrb[78].mxu1  ;;  %12821 = vmatpush1.bf16.msra.mxu1 %v18946_v61  ;;  %v21538_v22 = vadd.f32 %v13130_v2, %v12476_v6  ;;  %v12480_v19 = vpop.f32.mrb[79].mxu0  ;;  %12781 = vmatprep.subr.bf16.mxu0 %v18951_v38  ;;  %v18957_v31 = vld [vmem:[%s19704_s15 + $0xd24] ss:$72 sps:$4 sm:$0xff]   ;;  %v18985_v63 = vld [vmem:[%s19704_s15 + $0xff0] ss:$72 sps:$4 sm:$0xff]  }
 0x668   : > { %v12521_v36 = vpop.f32.mrb[79].mxu1  ;;  %12822 = vmatprep.subr.bf16.mxu1 %v18954_v3  ;;  %v18988_v61 = vld [vmem:[%s19704_s15 + $0x18f0] ss:$72 sps:$4 sm:$0xff]   ;;  %v18993_v2 = vld [vmem:[%s19704_s15 + $0x1084] ss:$72 sps:$4 sm:$0xff]  }
 0x669   : > { %v18996_v38 = vld [vmem:[%s19704_s15 + $0x1984] ss:$72 sps:$4 sm:$0xff]   ;;  %v18991_v3 = vld [vmem:[%s19704_s15 + $0x1080] ss:$72 sps:$4 sm:$0xff]   ;;  %v18999_v4 = vld [vmem:[%s19704_s15 + $0x1114] ss:$72 sps:$4 sm:$0xff]  }
 0x66a   : > { %12782 = vmatpush1.bf16.msra.mxu0 %v18949_v25  ;;  %v19002_v6 = vld [vmem:[%s19704_s15 + $0x1a14] ss:$72 sps:$4 sm:$0xff]   ;;  %v18997_v8 = vld [vmem:[%s19704_s15 + $0x1110] ss:$72 sps:$4 sm:$0xff]   ;;  %v19005_v14 = vld [vmem:[%s19704_s15 + $0x11a4] ss:$72 sps:$4 sm:$0xff]  }
 0x66b   : > { %12823 = vmatpush1.bf16.msra.mxu1 %v18952_v29  ;;  %12783 = vmatprep.subr.bf16.mxu0 %v18957_v31  ;;  %v19000_v47 = vld [vmem:[%s19704_s15 + $0x1a10] ss:$72 sps:$4 sm:$0xff]   ;;  %v19008_v15 = vld [vmem:[%s19704_s15 + $0x1aa4] ss:$72 sps:$4 sm:$0xff]   ;;  %v19003_v25 = vld [vmem:[%s19704_s15 + $0x11a0] ss:$72 sps:$4 sm:$0xff]  }
 0x66c   : > { %12824 = vmatprep.subr.bf16.mxu1 %v18960_v42  ;;  %v19006_v29 = vld [vmem:[%s19704_s15 + $0x1aa0] ss:$72 sps:$4 sm:$0xff]   ;;  %v19011_v19 = vld [vmem:[%s19704_s15 + $0x3c] ss:$72 sps:$4 sm:$0xff]  }
 0x66d   : > { %v19014_v36 = vld [vmem:[%s19704_s15 + $0x93c] ss:$72 sps:$4 sm:$0xff]   ;;  %v19009_v31 = vld [vmem:[%s19704_s15 + $0x38] ss:$72 sps:$4 sm:$0xff]  }
 0x66e   : > { %12784 = vmatpush1.bf16.msra.mxu0 %v18955_v28  ;;  %v19012_v42 = vld [vmem:[%s19704_s15 + $0x938] ss:$72 sps:$4 sm:$0xff]   ;;  %v19017_v28 = vld [vmem:[%s19704_s15 + $0xcc] ss:$72 sps:$4 sm:$0xff]  }
 0x66f   : > { %12825 = vmatpush1.bf16.msra.mxu1 %v18958_v32  ;;  %12785 = vmatprep.subr.bf16.mxu0 %v18963_v58  ;;  %v19020_v32 = vld [vmem:[%s19704_s15 + $0x9cc] ss:$72 sps:$4 sm:$0xff]   ;;  %v19015_v58 = vld [vmem:[%s19704_s15 + $0xc8] ss:$72 sps:$4 sm:$0xff]  }
 0x670   : > { %12826 = vmatprep.subr.bf16.mxu1 %v18966_v60  ;;  %v19018_v60 = vld [vmem:[%s19704_s15 + $0x9c8] ss:$72 sps:$4 sm:$0xff]  }
 0x672   : > { %12786 = vmatpush1.bf16.msra.mxu0 %v18961_v53  ;;  %v19023_v53 = vld [vmem:[%s19704_s15 + $0x15c] ss:$72 sps:$4 sm:$0xff]  }
 0x673   : > { %12827 = vmatpush1.bf16.msra.mxu1 %v18964_v0  ;;  %12787 = vmatprep.subr.bf16.mxu0 %v18969_v39  ;;  %v19026_v0 = vld [vmem:[%s19704_s15 + $0xa5c] ss:$72 sps:$4 sm:$0xff]   ;;  %v19021_v39 = vld [vmem:[%s19704_s15 + $0x158] ss:$72 sps:$4 sm:$0xff]  }
 0x674   : > { %12828 = vmatprep.subr.bf16.mxu1 %v18972_v50  ;;  %v19024_v50 = vld [vmem:[%s19704_s15 + $0xa58] ss:$72 sps:$4 sm:$0xff]  }
 0x676   : > { %12788 = vmatpush1.bf16.msra.mxu0 %v18967_v48  ;;  %v19029_v48 = vld [vmem:[%s19704_s15 + $0x1ec] ss:$72 sps:$4 sm:$0xff]  }
 0x677   : > { %12829 = vmatpush1.bf16.msra.mxu1 %v18970_v40  ;;  %12789 = vmatprep.subr.bf16.mxu0 %v18975_v54  ;;  %v19032_v40 = vld [vmem:[%s19704_s15 + $0xaec] ss:$72 sps:$4 sm:$0xff]   ;;  %v19027_v54 = vld [vmem:[%s19704_s15 + $0x1e8] ss:$72 sps:$4 sm:$0xff]  }
 0x678   : > { %12830 = vmatprep.subr.bf16.mxu1 %v18978_v41  ;;  %v19030_v41 = vld [vmem:[%s19704_s15 + $0xae8] ss:$72 sps:$4 sm:$0xff]  }
 0x67a   : > { %12790 = vmatpush1.bf16.msra.mxu0 %v18973_v13  ;;  %v19035_v13 = vld [vmem:[%s19704_s15 + $0x27c] ss:$72 sps:$4 sm:$0xff]  }
 0x67b   : > { %12831 = vmatpush1.bf16.msra.mxu1 %v18976_v46  ;;  %12791 = vmatprep.subr.bf16.mxu0 %v18981_v1  ;;  %v19038_v46 = vld [vmem:[%s19704_s15 + $0xb7c] ss:$72 sps:$4 sm:$0xff]   ;;  %v19033_v1 = vld [vmem:[%s19704_s15 + $0x278] ss:$72 sps:$4 sm:$0xff]  }
 0x67c   : > { %12832 = vmatprep.subr.bf16.mxu1 %v18984_v5  ;;  %v19036_v5 = vld [vmem:[%s19704_s15 + $0xb78] ss:$72 sps:$4 sm:$0xff]  }
 0x67e   : > { %12792 = vmatpush1.bf16.msra.mxu0 %v18979_v27  ;;  %v19041_v27 = vld [vmem:[%s19704_s15 + $0x30c] ss:$72 sps:$4 sm:$0xff]  }
 0x67f   : > { %12833 = vmatpush1.bf16.msra.mxu1 %v18982_v16  ;;  %12793 = vmatprep.subr.bf16.mxu0 %v18987_v57  ;;  %v19044_v16 = vld [vmem:[%s19704_s15 + $0xc0c] ss:$72 sps:$4 sm:$0xff]   ;;  %v19039_v57 = vld [vmem:[%s19704_s15 + $0x308] ss:$72 sps:$4 sm:$0xff]  }
 0x680   : > { %12834 = vmatprep.subr.bf16.mxu1 %v18990_v62  ;;  %v19042_v62 = vld [vmem:[%s19704_s15 + $0xc08] ss:$72 sps:$4 sm:$0xff]  }
 0x682   : > { %12794 = vmatpush1.bf16.msra.mxu0 %v18985_v63  ;;  %v19047_v63 = vld [vmem:[%s19704_s15 + $0x39c] ss:$72 sps:$4 sm:$0xff]  }
 0x683   : > { %12835 = vmatpush1.bf16.msra.mxu1 %v18988_v61  ;;  %12795 = vmatprep.subr.bf16.mxu0 %v18993_v2  ;;  %v19050_v61 = vld [vmem:[%s19704_s15 + $0xc9c] ss:$72 sps:$4 sm:$0xff]  }
 0x684   : > { %12836 = vmatprep.subr.bf16.mxu1 %v18996_v38 }
 0x686   : > { %12796 = vmatpush1.bf16.msra.mxu0 %v18991_v3 }
 0x687   : > { %12837 = vmatpush1.bf16.msra.mxu1 %v18994_v10  ;;  %12797 = vmatprep.subr.bf16.mxu0 %v18999_v4 }
 0x688   : > { %12838 = vmatprep.subr.bf16.mxu1 %v19002_v6 }
 0x68a   : > { %12798 = vmatpush1.bf16.msra.mxu0 %v18997_v8 }
 0x68b   : > { %12839 = vmatpush1.bf16.msra.mxu1 %v19000_v47  ;;  %12799 = vmatprep.subr.bf16.mxu0 %v19005_v14  ;;  %v19045_v14 = vld [vmem:[%s19704_s15 + $0x398] ss:$72 sps:$4 sm:$0xff]  }
 0x68c   : > { %12840 = vmatprep.subr.bf16.mxu1 %v19008_v15  ;;  %v19048_v15 = vld [vmem:[%s19704_s15 + $0xc98] ss:$72 sps:$4 sm:$0xff]  }
 0x68e   : > { %12800 = vmatpush1.bf16.msra.mxu0 %v19003_v25 }
 0x68f   : > { %12841 = vmatpush1.bf16.msra.mxu1 %v19006_v29  ;;  %12851 = vmatprep.subr.bf16.mxu0 %v19011_v19 }
 0x690   : > { %12892 = vmatprep.subr.bf16.mxu1 %v19014_v36 }
 0x691   : > { %12802 = vmatmul.mubr.bf16.vlgmr.msra.gmra.mrb[92].mxu0 %v20886_v33 }
 0x692   : > { %12843 = vmatmul.mubr.bf16.vlgmr.msra.gmra.mrb[92].mxu1 %v20890_v34  ;;  %12852 = vmatpush1.bf16.msra.mxu0 %v19009_v31  ;;  %v19051_v31 = vld [vmem:[%s19704_s15 + $0x428] ss:$72 sps:$4 sm:$0xff]  }
 0x693   : > { %12893 = vmatpush1.bf16.msra.mxu1 %v19012_v42  ;;  %12853 = vmatprep.subr.bf16.mxu0 %v19017_v28  ;;  %v19054_v42 = vld [vmem:[%s19704_s15 + $0xd28] ss:$72 sps:$4 sm:$0xff]   ;;  %v19059_v28 = vld [vmem:[%s19704_s15 + $0x4bc] ss:$72 sps:$4 sm:$0xff]  }
 0x694   : > { %12894 = vmatprep.subr.bf16.mxu1 %v19020_v32  ;;  %12883 = vmatprep.mubr.bf16.mxu0 %v20718_v7  ;;  %v19062_v32 = vld [vmem:[%s19704_s15 + $0xdbc] ss:$72 sps:$4 sm:$0xff]  }
 0x695   : > { %12924 = vmatprep.mubr.bf16.mxu1 %v20805_v52 }
 0x696   : > { %12854 = vmatpush1.bf16.msra.mxu0 %v19015_v58  ;;  %v19057_v58 = vld [vmem:[%s19704_s15 + $0x4b8] ss:$72 sps:$4 sm:$0xff]  }
 0x697   : > { %12895 = vmatpush1.bf16.msra.mxu1 %v19018_v60  ;;  %12855 = vmatprep.subr.bf16.mxu0 %v19023_v53  ;;  %v19060_v60 = vld [vmem:[%s19704_s15 + $0xdb8] ss:$72 sps:$4 sm:$0xff]   ;;  %v19065_v53 = vld [vmem:[%s19704_s15 + $0x54c] ss:$72 sps:$4 sm:$0xff]  }
 0x698   : > { %12896 = vmatprep.subr.bf16.mxu1 %v19026_v0  ;;  %v19068_v0 = vld [vmem:[%s19704_s15 + $0xe4c] ss:$72 sps:$4 sm:$0xff]  }
 0x69a   : > { %12856 = vmatpush1.bf16.msra.mxu0 %v19021_v39  ;;  %v19063_v39 = vld [vmem:[%s19704_s15 + $0x548] ss:$72 sps:$4 sm:$0xff]  }
 0x69b   : > { %12897 = vmatpush1.bf16.msra.mxu1 %v19024_v50  ;;  %12857 = vmatprep.subr.bf16.mxu0 %v19029_v48  ;;  %v19066_v50 = vld [vmem:[%s19704_s15 + $0xe48] ss:$72 sps:$4 sm:$0xff]   ;;  %v19071_v48 = vld [vmem:[%s19704_s15 + $0x5dc] ss:$72 sps:$4 sm:$0xff]  }
 0x69c   : > { %12898 = vmatprep.subr.bf16.mxu1 %v19032_v40  ;;  %v19074_v40 = vld [vmem:[%s19704_s15 + $0xedc] ss:$72 sps:$4 sm:$0xff]  }
 0x69e   : > { %12858 = vmatpush1.bf16.msra.mxu0 %v19027_v54  ;;  %v19069_v54 = vld [vmem:[%s19704_s15 + $0x5d8] ss:$72 sps:$4 sm:$0xff]  }
 0x69f   : > { %12899 = vmatpush1.bf16.msra.mxu1 %v19030_v41  ;;  %12859 = vmatprep.subr.bf16.mxu0 %v19035_v13  ;;  %v19072_v41 = vld [vmem:[%s19704_s15 + $0xed8] ss:$72 sps:$4 sm:$0xff]   ;;  %v19077_v13 = vld [vmem:[%s19704_s15 + $0x66c] ss:$72 sps:$4 sm:$0xff]  }
 0x6a0   : > { %12900 = vmatprep.subr.bf16.mxu1 %v19038_v46  ;;  %v19080_v46 = vld [vmem:[%s19704_s15 + $0xf6c] ss:$72 sps:$4 sm:$0xff]  }
 0x6a2   : > { %12860 = vmatpush1.bf16.msra.mxu0 %v19033_v1  ;;  %v19075_v1 = vld [vmem:[%s19704_s15 + $0x668] ss:$72 sps:$4 sm:$0xff]  }
 0x6a3   : > { %12901 = vmatpush1.bf16.msra.mxu1 %v19036_v5  ;;  %12861 = vmatprep.subr.bf16.mxu0 %v19041_v27  ;;  %v19078_v5 = vld [vmem:[%s19704_s15 + $0xf68] ss:$72 sps:$4 sm:$0xff]   ;;  %v19083_v27 = vld [vmem:[%s19704_s15 + $0x6fc] ss:$72 sps:$4 sm:$0xff]  }
 0x6a4   : > { %12902 = vmatprep.subr.bf16.mxu1 %v19044_v16  ;;  %v12557_v2 = vpop.f32.mrb[80].mxu0  ;;  %v19086_v16 = vld [vmem:[%s19704_s15 + $0xffc] ss:$72 sps:$4 sm:$0xff]  }
 0x6a5   : > { %v12598_v38 = vpop.f32.mrb[80].mxu1  ;;  %v12558_v3 = vadd.f32 %v12557_v2, %v21528_v21  ;;  %v12559_v10 = vpop.f32.mrb[81].mxu0  ;;  %v19053_v21 = vld [vmem:[%s19704_s15 + $0x42c] ss:$72 sps:$4 sm:$0xff]   ;;  %v19087_v2 = vld [vmem:[%s19704_s15 + $0x788] ss:$72 sps:$4 sm:$0xff]  }
 0x6a6   : > { %v12600_v4 = vpop.f32.mrb[81].mxu1  ;;  %v12560_v6 = vadd.f32 %v12559_v10, %v21534_v12  ;;  %v12561_v8 = vpop.f32.mrb[82].mxu0  ;;  %12862 = vmatpush1.bf16.msra.mxu0 %v19039_v57  ;;  %v19056_v12 = vld [vmem:[%s19704_s15 + $0xd2c] ss:$72 sps:$4 sm:$0xff]   ;;  %v19081_v57 = vld [vmem:[%s19704_s15 + $0x6f8] ss:$72 sps:$4 sm:$0xff]  }
 0x6a7   : > { %v12602_v47 = vpop.f32.mrb[82].mxu1  ;;  %12903 = vmatpush1.bf16.msra.mxu1 %v19042_v62  ;;  %v21610_v25 = vadd.f32 %v12598_v38, %v12558_v3  ;;  %v12562_v29 = vpop.f32.mrb[83].mxu0  ;;  %12863 = vmatprep.subr.bf16.mxu0 %v19047_v63  ;;  %v19084_v62 = vld [vmem:[%s19704_s15 + $0xff8] ss:$72 sps:$4 sm:$0xff]   ;;  %v19089_v63 = vld [vmem:[%s19704_s15 + $0x78c] ss:$72 sps:$4 sm:$0xff]  }
 0x6a8   : > { %v12603_v19 = vpop.f32.mrb[83].mxu1  ;;  %12904 = vmatprep.subr.bf16.mxu1 %v19050_v61  ;;  %v21614_v36 = vadd.f32 %v12600_v4, %v12560_v6  ;;  %v19092_v61 = vld [vmem:[%s19704_s15 + $0x108c] ss:$72 sps:$4 sm:$0xff]   ;;  %v19090_v38 = vld [vmem:[%s19704_s15 + $0x1088] ss:$72 sps:$4 sm:$0xff]  }
 0x6a9   : > { %v19095_v3 = vld [vmem:[%s19704_s15 + $0x81c] ss:$72 sps:$4 sm:$0xff]   ;;  %v19093_v4 = vld [vmem:[%s19704_s15 + $0x818] ss:$72 sps:$4 sm:$0xff]   ;;  %v19101_v8 = vld [vmem:[%s19704_s15 + $0x8ac] ss:$72 sps:$4 sm:$0xff]  }
 0x6aa   : > { %12864 = vmatpush1.bf16.msra.mxu0 %v19045_v14  ;;  %v19098_v10 = vld [vmem:[%s19704_s15 + $0x111c] ss:$72 sps:$4 sm:$0xff]   ;;  %v19096_v6 = vld [vmem:[%s19704_s15 + $0x1118] ss:$72 sps:$4 sm:$0xff]   ;;  %v19104_v47 = vld [vmem:[%s19704_s15 + $0x11ac] ss:$72 sps:$4 sm:$0xff]  }
 0x6ab   : > { %12905 = vmatpush1.bf16.msra.mxu1 %v19048_v15  ;;  %12865 = vmatprep.subr.bf16.mxu0 %v19053_v21  ;;  %v19099_v14 = vld [vmem:[%s19704_s15 + $0x8a8] ss:$72 sps:$4 sm:$0xff]   ;;  %v19107_v29 = vld [vmem:[%s19704_s15 + $0x123c] ss:$72 sps:$4 sm:$0xff]   ;;  %v19105_v21 = vld [vmem:[%s19704_s15 + $0x1238] ss:$72 sps:$4 sm:$0xff]  }
 0x6ac   : > { %12906 = vmatprep.subr.bf16.mxu1 %v19056_v12  ;;  %v19102_v15 = vld [vmem:[%s19704_s15 + $0x11a8] ss:$72 sps:$4 sm:$0xff]   ;;  %v19110_v19 = vld [vmem:[%s19704_s15 + $0x44] ss:$72 sps:$4 sm:$0xff]  }
 0x6ad   : > { %v19108_v12 = vld [vmem:[%s19704_s15 + $0x40] ss:$72 sps:$4 sm:$0xff]  }
 0x6ae   : > { %12866 = vmatpush1.bf16.msra.mxu0 %v19051_v31  ;;  %v19113_v31 = vld [vmem:[%s19704_s15 + $0x12cc] ss:$72 sps:$4 sm:$0xff]  }
 0x6af   : > { %12907 = vmatpush1.bf16.msra.mxu1 %v19054_v42  ;;  %12867 = vmatprep.subr.bf16.mxu0 %v19059_v28  ;;  %v19116_v42 = vld [vmem:[%s19704_s15 + $0xd4] ss:$72 sps:$4 sm:$0xff]   ;;  %v19111_v28 = vld [vmem:[%s19704_s15 + $0x12c8] ss:$72 sps:$4 sm:$0xff]  }
 0x6b0   : > { %12908 = vmatprep.subr.bf16.mxu1 %v19062_v32  ;;  %v19114_v32 = vld [vmem:[%s19704_s15 + $0xd0] ss:$72 sps:$4 sm:$0xff]  }
 0x6b2   : > { %12868 = vmatpush1.bf16.msra.mxu0 %v19057_v58  ;;  %v19119_v58 = vld [vmem:[%s19704_s15 + $0x135c] ss:$72 sps:$4 sm:$0xff]  }
 0x6b3   : > { %12909 = vmatpush1.bf16.msra.mxu1 %v19060_v60  ;;  %12869 = vmatprep.subr.bf16.mxu0 %v19065_v53  ;;  %v19122_v60 = vld [vmem:[%s19704_s15 + $0x164] ss:$72 sps:$4 sm:$0xff]   ;;  %v19117_v53 = vld [vmem:[%s19704_s15 + $0x1358] ss:$72 sps:$4 sm:$0xff]  }
 0x6b4   : > { %12910 = vmatprep.subr.bf16.mxu1 %v19068_v0  ;;  %v19120_v0 = vld [vmem:[%s19704_s15 + $0x160] ss:$72 sps:$4 sm:$0xff]  }
 0x6b6   : > { %12870 = vmatpush1.bf16.msra.mxu0 %v19063_v39  ;;  %v19125_v39 = vld [vmem:[%s19704_s15 + $0x13ec] ss:$72 sps:$4 sm:$0xff]  }
 0x6b7   : > { %12911 = vmatpush1.bf16.msra.mxu1 %v19066_v50  ;;  %12871 = vmatprep.subr.bf16.mxu0 %v19071_v48  ;;  %v19128_v50 = vld [vmem:[%s19704_s15 + $0x1f4] ss:$72 sps:$4 sm:$0xff]   ;;  %v19123_v48 = vld [vmem:[%s19704_s15 + $0x13e8] ss:$72 sps:$4 sm:$0xff]  }
 0x6b8   : > { %12912 = vmatprep.subr.bf16.mxu1 %v19074_v40  ;;  %v19126_v40 = vld [vmem:[%s19704_s15 + $0x1f0] ss:$72 sps:$4 sm:$0xff]  }
 0x6ba   : > { %12872 = vmatpush1.bf16.msra.mxu0 %v19069_v54  ;;  %v19134_v54 = vld [vmem:[%s19704_s15 + $0x284] ss:$72 sps:$4 sm:$0xff]  }
 0x6bb   : > { %12913 = vmatpush1.bf16.msra.mxu1 %v19072_v41  ;;  %12873 = vmatprep.subr.bf16.mxu0 %v19077_v13  ;;  %v19129_v41 = vld [vmem:[%s19704_s15 + $0x1478] ss:$72 sps:$4 sm:$0xff]  }
 0x6bc   : > { %12914 = vmatprep.subr.bf16.mxu1 %v19080_v46  ;;  %v19132_v13 = vld [vmem:[%s19704_s15 + $0x280] ss:$72 sps:$4 sm:$0xff]   ;;  %v19137_v46 = vld [vmem:[%s19704_s15 + $0x150c] ss:$72 sps:$4 sm:$0xff]  }
 0x6be   : > { %12874 = vmatpush1.bf16.msra.mxu0 %v19075_v1  ;;  %v19140_v1 = vld [vmem:[%s19704_s15 + $0x314] ss:$72 sps:$4 sm:$0xff]  }
 0x6bf   : > { %12915 = vmatpush1.bf16.msra.mxu1 %v19078_v5  ;;  %12875 = vmatprep.subr.bf16.mxu0 %v19083_v27  ;;  %v19135_v5 = vld [vmem:[%s19704_s15 + $0x1508] ss:$72 sps:$4 sm:$0xff]  }
 0x6c0   : > { %12916 = vmatprep.subr.bf16.mxu1 %v19086_v16  ;;  %v19138_v27 = vld [vmem:[%s19704_s15 + $0x310] ss:$72 sps:$4 sm:$0xff]   ;;  %v19143_v16 = vld [vmem:[%s19704_s15 + $0x159c] ss:$72 sps:$4 sm:$0xff]  }
 0x6c2   : > { %12876 = vmatpush1.bf16.msra.mxu0 %v19081_v57  ;;  %v19146_v57 = vld [vmem:[%s19704_s15 + $0x3a4] ss:$72 sps:$4 sm:$0xff]  }
 0x6c3   : > { %12917 = vmatpush1.bf16.msra.mxu1 %v19084_v62  ;;  %12877 = vmatprep.subr.bf16.mxu0 %v19089_v63 }
 0x6c4   : > { %12918 = vmatprep.subr.bf16.mxu1 %v19092_v61 }
 0x6c6   : > { %12878 = vmatpush1.bf16.msra.mxu0 %v19087_v2 }
 0x6c7   : > { %12919 = vmatpush1.bf16.msra.mxu1 %v19090_v38  ;;  %12879 = vmatprep.subr.bf16.mxu0 %v19095_v3 }
 0x6c8   : > { %12920 = vmatprep.subr.bf16.mxu1 %v19098_v10 }
 0x6ca   : > { %12880 = vmatpush1.bf16.msra.mxu0 %v19093_v4 }
 0x6cb   : > { %12921 = vmatpush1.bf16.msra.mxu1 %v19096_v6  ;;  %12881 = vmatprep.subr.bf16.mxu0 %v19101_v8  ;;  %v19141_v6 = vld [vmem:[%s19704_s15 + $0x1598] ss:$72 sps:$4 sm:$0xff]  }
 0x6cc   : > { %12922 = vmatprep.subr.bf16.mxu1 %v19104_v47  ;;  %v19144_v8 = vld [vmem:[%s19704_s15 + $0x3a0] ss:$72 sps:$4 sm:$0xff]  }
 0x6ce   : > { %12882 = vmatpush1.bf16.msra.mxu0 %v19099_v14 }
 0x6cf   : > { %12923 = vmatpush1.bf16.msra.mxu1 %v19102_v15  ;;  %12933 = vmatprep.subr.bf16.mxu0 %v19107_v29 }
 0x6d0   : > { %12974 = vmatprep.subr.bf16.mxu1 %v19110_v19  ;;  %v19147_v19 = vld [vmem:[%s19704_s15 + $0x1628] ss:$72 sps:$4 sm:$0xff]  }
 0x6d1   : > { %12884 = vmatmul.mubr.bf16.vlgmr.msra.gmra.mrb[96].mxu0 %v20799_v45 }
 0x6d2   : > { %12925 = vmatmul.mubr.bf16.vlgmr.msra.gmra.mrb[96].mxu1 %v20886_v33  ;;  %12934 = vmatpush1.bf16.msra.mxu0 %v19105_v21  ;;  %v19150_v21 = vld [vmem:[%s19704_s15 + $0x430] ss:$72 sps:$4 sm:$0xff]  }
 0x6d3   : > { %12975 = vmatpush1.bf16.msra.mxu1 %v19108_v12  ;;  %12935 = vmatprep.subr.bf16.mxu0 %v19113_v31  ;;  %v19155_v12 = vld [vmem:[%s19704_s15 + $0x16bc] ss:$72 sps:$4 sm:$0xff]  }
 0x6d4   : > { %12976 = vmatprep.subr.bf16.mxu1 %v19116_v42  ;;  %12965 = vmatprep.mubr.bf16.mxu0 %v20808_v56  ;;  %v19158_v31 = vld [vmem:[%s19704_s15 + $0x4c4] ss:$72 sps:$4 sm:$0xff]   ;;  %v19153_v42 = vld [vmem:[%s19704_s15 + $0x16b8] ss:$72 sps:$4 sm:$0xff]  }
 0x6d5   : > { %13006 = vmatprep.mubr.bf16.mxu1 %v20718_v7  ;;  %v19131_v7 = vld [vmem:[%s19704_s15 + $0x147c] ss:$72 sps:$4 sm:$0xff]  }
 0x6d6   : > { %12936 = vmatpush1.bf16.msra.mxu0 %v19111_v28  ;;  %v19156_v28 = vld [vmem:[%s19704_s15 + $0x4c0] ss:$72 sps:$4 sm:$0xff]  }
 0x6d7   : > { %12977 = vmatpush1.bf16.msra.mxu1 %v19114_v32  ;;  %12937 = vmatprep.subr.bf16.mxu0 %v19119_v58  ;;  %v19161_v32 = vld [vmem:[%s19704_s15 + $0x174c] ss:$72 sps:$4 sm:$0xff]  }
 0x6d8   : > { %12978 = vmatprep.subr.bf16.mxu1 %v19122_v60  ;;  %v19164_v58 = vld [vmem:[%s19704_s15 + $0x554] ss:$72 sps:$4 sm:$0xff]   ;;  %v19159_v60 = vld [vmem:[%s19704_s15 + $0x1748] ss:$72 sps:$4 sm:$0xff]  }
 0x6da   : > { %12938 = vmatpush1.bf16.msra.mxu0 %v19117_v53  ;;  %v19162_v53 = vld [vmem:[%s19704_s15 + $0x550] ss:$72 sps:$4 sm:$0xff]  }
 0x6db   : > { %12979 = vmatpush1.bf16.msra.mxu1 %v19120_v0  ;;  %12939 = vmatprep.subr.bf16.mxu0 %v19125_v39  ;;  %v19167_v0 = vld [vmem:[%s19704_s15 + $0x17dc] ss:$72 sps:$4 sm:$0xff]  }
 0x6dc   : > { %12980 = vmatprep.subr.bf16.mxu1 %v19128_v50  ;;  %v19170_v39 = vld [vmem:[%s19704_s15 + $0x5e4] ss:$72 sps:$4 sm:$0xff]   ;;  %v19165_v50 = vld [vmem:[%s19704_s15 + $0x17d8] ss:$72 sps:$4 sm:$0xff]  }
 0x6de   : > { %12940 = vmatpush1.bf16.msra.mxu0 %v19123_v48  ;;  %v19168_v48 = vld [vmem:[%s19704_s15 + $0x5e0] ss:$72 sps:$4 sm:$0xff]  }
 0x6df   : > { %12981 = vmatpush1.bf16.msra.mxu1 %v19126_v40  ;;  %12941 = vmatprep.subr.bf16.mxu0 %v19131_v7  ;;  %v19173_v40 = vld [vmem:[%s19704_s15 + $0x186c] ss:$72 sps:$4 sm:$0xff]  }
 0x6e0   : > { %12982 = vmatprep.subr.bf16.mxu1 %v19134_v54  ;;  %v19176_v7 = vld [vmem:[%s19704_s15 + $0x674] ss:$72 sps:$4 sm:$0xff]   ;;  %v19171_v54 = vld [vmem:[%s19704_s15 + $0x1868] ss:$72 sps:$4 sm:$0xff]  }
 0x6e2   : > { %12942 = vmatpush1.bf16.msra.mxu0 %v19129_v41  ;;  %v19174_v41 = vld [vmem:[%s19704_s15 + $0x670] ss:$72 sps:$4 sm:$0xff]  }
 0x6e3   : > { %12983 = vmatpush1.bf16.msra.mxu1 %v19132_v13  ;;  %12943 = vmatprep.subr.bf16.mxu0 %v19137_v46  ;;  %v19179_v13 = vld [vmem:[%s19704_s15 + $0x18fc] ss:$72 sps:$4 sm:$0xff]  }
 0x6e4   : > { %12984 = vmatprep.subr.bf16.mxu1 %v19140_v1  ;;  %v12639_v62 = vpop.f32.mrb[84].mxu0  ;;  %v19182_v46 = vld [vmem:[%s19704_s15 + $0x704] ss:$72 sps:$4 sm:$0xff]   ;;  %v19177_v1 = vld [vmem:[%s19704_s15 + $0x18f8] ss:$72 sps:$4 sm:$0xff]  }
 0x6e5   : > { %v12680_v63 = vpop.f32.mrb[84].mxu1  ;;  %v12640_v61 = vadd.f32 %v12639_v62, %v20660_v37  ;;  %v12641_v2 = vpop.f32.mrb[85].mxu0  ;;  %v19149_v37 = vld [vmem:[%s19704_s15 + $0x162c] ss:$72 sps:$4 sm:$0xff]   ;;  %v19186_v62 = vld [vmem:[%s19704_s15 + $0x790] ss:$72 sps:$4 sm:$0xff]  }
 0x6e6   : > { %v12682_v38 = vpop.f32.mrb[85].mxu1  ;;  %v12642_v3 = vadd.f32 %v12641_v2, %v20664_v9  ;;  %v12643_v10 = vpop.f32.mrb[86].mxu0  ;;  %12944 = vmatpush1.bf16.msra.mxu0 %v19135_v5  ;;  %v19152_v9 = vld [vmem:[%s19704_s15 + $0x434] ss:$72 sps:$4 sm:$0xff]   ;;  %v19180_v5 = vld [vmem:[%s19704_s15 + $0x700] ss:$72 sps:$4 sm:$0xff]  }
 0x6e7   : > { %v12684_v4 = vpop.f32.mrb[86].mxu1  ;;  %12985 = vmatpush1.bf16.msra.mxu1 %v19138_v27  ;;  %v21684_v47 = vadd.f32 %v12680_v63, %v12640_v61  ;;  %v12644_v14 = vpop.f32.mrb[87].mxu0  ;;  %12945 = vmatprep.subr.bf16.mxu0 %v19143_v16  ;;  %v19185_v27 = vld [vmem:[%s19704_s15 + $0x198c] ss:$72 sps:$4 sm:$0xff]   ;;  %v19191_v63 = vld [vmem:[%s19704_s15 + $0x1a1c] ss:$72 sps:$4 sm:$0xff]  }
 0x6e8   : > { %v12685_v15 = vpop.f32.mrb[87].mxu1  ;;  %12986 = vmatprep.subr.bf16.mxu1 %v19146_v57  ;;  %v21688_v29 = vadd.f32 %v12682_v38, %v12642_v3  ;;  %v19188_v16 = vld [vmem:[%s19704_s15 + $0x794] ss:$72 sps:$4 sm:$0xff]   ;;  %v19183_v57 = vld [vmem:[%s19704_s15 + $0x1988] ss:$72 sps:$4 sm:$0xff]  }
 0x6e9   : > { %v19194_v61 = vld [vmem:[%s19704_s15 + $0x824] ss:$72 sps:$4 sm:$0xff]   ;;  %v19189_v2 = vld [vmem:[%s19704_s15 + $0x1a18] ss:$72 sps:$4 sm:$0xff]   ;;  %v19200_v10 = vld [vmem:[%s19704_s15 + $0x8b4] ss:$72 sps:$4 sm:$0xff]  }
 0x6ea   : > { %12946 = vmatpush1.bf16.msra.mxu0 %v19141_v6  ;;  %v19192_v38 = vld [vmem:[%s19704_s15 + $0x820] ss:$72 sps:$4 sm:$0xff]   ;;  %v19197_v3 = vld [vmem:[%s19704_s15 + $0x1aac] ss:$72 sps:$4 sm:$0xff]   ;;  %v19198_v6 = vld [vmem:[%s19704_s15 + $0x8b0] ss:$72 sps:$4 sm:$0xff]  }
 0x6eb   : > { %12987 = vmatpush1.bf16.msra.mxu1 %v19144_v8  ;;  %12947 = vmatprep.subr.bf16.mxu0 %v19149_v37  ;;  %v19195_v4 = vld [vmem:[%s19704_s15 + $0x1aa8] ss:$72 sps:$4 sm:$0xff]   ;;  %v19203_v8 = vld [vmem:[%s19704_s15 + $0x944] ss:$72 sps:$4 sm:$0xff]  }
 0x6ec   : > { %12988 = vmatprep.subr.bf16.mxu1 %v19152_v9  ;;  %v19206_v14 = vld [vmem:[%s19704_s15 + $0x1244] ss:$72 sps:$4 sm:$0xff]   ;;  %v19201_v15 = vld [vmem:[%s19704_s15 + $0x940] ss:$72 sps:$4 sm:$0xff]   ;;  %v19209_v9 = vld [vmem:[%s19704_s15 + $0x9d4] ss:$72 sps:$4 sm:$0xff]  }
 0x6ed   : > { %v19204_v37 = vld [vmem:[%s19704_s15 + $0x1240] ss:$72 sps:$4 sm:$0xff]  }
 0x6ee   : > { %12948 = vmatpush1.bf16.msra.mxu0 %v19147_v19  ;;  %v19212_v19 = vld [vmem:[%s19704_s15 + $0x12d4] ss:$72 sps:$4 sm:$0xff]  }
 0x6ef   : > { %12989 = vmatpush1.bf16.msra.mxu1 %v19150_v21  ;;  %12949 = vmatprep.subr.bf16.mxu0 %v19155_v12  ;;  %v19207_v21 = vld [vmem:[%s19704_s15 + $0x9d0] ss:$72 sps:$4 sm:$0xff]  }
 0x6f0   : > { %12990 = vmatprep.subr.bf16.mxu1 %v19158_v31  ;;  %v19210_v12 = vld [vmem:[%s19704_s15 + $0x12d0] ss:$72 sps:$4 sm:$0xff]   ;;  %v19215_v31 = vld [vmem:[%s19704_s15 + $0xa64] ss:$72 sps:$4 sm:$0xff]  }
 0x6f2   : > { %12950 = vmatpush1.bf16.msra.mxu0 %v19153_v42  ;;  %v19218_v42 = vld [vmem:[%s19704_s15 + $0x1364] ss:$72 sps:$4 sm:$0xff]  }
 0x6f3   : > { %12991 = vmatpush1.bf16.msra.mxu1 %v19156_v28  ;;  %12951 = vmatprep.subr.bf16.mxu0 %v19161_v32  ;;  %v19216_v28 = vld [vmem:[%s19704_s15 + $0x1360] ss:$72 sps:$4 sm:$0xff]   ;;  %v19221_v32 = vld [vmem:[%s19704_s15 + $0xaf4] ss:$72 sps:$4 sm:$0xff]  }
 0x6f4   : > { %12992 = vmatprep.subr.bf16.mxu1 %v19164_v58  ;;  %v19224_v58 = vld [vmem:[%s19704_s15 + $0x13f4] ss:$72 sps:$4 sm:$0xff]  }
 0x6f6   : > { %12952 = vmatpush1.bf16.msra.mxu0 %v19159_v60  ;;  %v19222_v60 = vld [vmem:[%s19704_s15 + $0x13f0] ss:$72 sps:$4 sm:$0xff]  }
 0x6f7   : > { %12993 = vmatpush1.bf16.msra.mxu1 %v19162_v53  ;;  %12953 = vmatprep.subr.bf16.mxu0 %v19167_v0  ;;  %v19230_v53 = vld [vmem:[%s19704_s15 + $0x1484] ss:$72 sps:$4 sm:$0xff]   ;;  %v19225_v0 = vld [vmem:[%s19704_s15 + $0xb80] ss:$72 sps:$4 sm:$0xff]  }
 0x6f8   : > { %12994 = vmatprep.subr.bf16.mxu1 %v19170_v39  ;;  %v19228_v39 = vld [vmem:[%s19704_s15 + $0x1480] ss:$72 sps:$4 sm:$0xff]  }
 0x6fa   : > { %12954 = vmatpush1.bf16.msra.mxu0 %v19165_v50  ;;  %v19233_v50 = vld [vmem:[%s19704_s15 + $0xc14] ss:$72 sps:$4 sm:$0xff]  }
 0x6fb   : > { %12995 = vmatpush1.bf16.msra.mxu1 %v19168_v48  ;;  %12955 = vmatprep.subr.bf16.mxu0 %v19173_v40  ;;  %v19236_v48 = vld [vmem:[%s19704_s15 + $0x1514] ss:$72 sps:$4 sm:$0xff]   ;;  %v13113_v40 = vsub.s32 2, %v19762_v43 }
 0x6fc   : > { %12996 = vmatprep.subr.bf16.mxu1 %v19176_v7  ;;  %v21752_v7 = vld [vmem:[%s19717_s22 + $0x8] sm:$0xff] }
 0x6fe   : > { %12956 = vmatpush1.bf16.msra.mxu0 %v19171_v54  ;;  %v19231_v54 = vld [vmem:[%s19704_s15 + $0xc10] ss:$72 sps:$4 sm:$0xff]  }
 0x6ff   : > { %12997 = vmatpush1.bf16.msra.mxu1 %v19174_v41  ;;  %12957 = vmatprep.subr.bf16.mxu0 %v19179_v13  ;;  %v19234_v41 = vld [vmem:[%s19704_s15 + $0x1510] ss:$72 sps:$4 sm:$0xff]   ;;  %v13146_v13 = vrot.slane %v21752_v7, %v13113_v40 }
 0x700   : > { %12998 = vmatprep.subr.bf16.mxu1 %v19182_v46  ;;  %v19239_v46 = vld [vmem:[%s19704_s15 + $0xca4] ss:$72 sps:$4 sm:$0xff]  }
 0x702   : > { %12958 = vmatpush1.bf16.msra.mxu0 %v19177_v1  ;;  %v19242_v1 = vld [vmem:[%s19704_s15 + $0x15a4] ss:$72 sps:$4 sm:$0xff]  }
 0x703   : > { %12999 = vmatpush1.bf16.msra.mxu1 %v19180_v5  ;;  %12959 = vmatprep.subr.bf16.mxu0 %v19185_v27 }
 0x704   : > { %13000 = vmatprep.subr.bf16.mxu1 %v19188_v16 }
 0x706   : > { %12960 = vmatpush1.bf16.msra.mxu0 %v19183_v57 }
 0x707   : > { %13001 = vmatpush1.bf16.msra.mxu1 %v19186_v62  ;;  %12961 = vmatprep.subr.bf16.mxu0 %v19191_v63 }
 0x708   : > { %13002 = vmatprep.subr.bf16.mxu1 %v19194_v61 }
 0x70a   : > { %12962 = vmatpush1.bf16.msra.mxu0 %v19189_v2 }
 0x70b   : > { %13003 = vmatpush1.bf16.msra.mxu1 %v19192_v38  ;;  %12963 = vmatprep.subr.bf16.mxu0 %v19197_v3 }
 0x70c   : > { %13004 = vmatprep.subr.bf16.mxu1 %v19200_v10 }
 0x70e   : > { %12964 = vmatpush1.bf16.msra.mxu0 %v19195_v4 }
 0x70f   : > { %13005 = vmatpush1.bf16.msra.mxu1 %v19198_v6  ;;  %13015 = vmatprep.subr.bf16.mxu0 %v19203_v8  ;;  %v19243_v8 = vld [vmem:[%s19704_s15 + $0xd30] ss:$72 sps:$4 sm:$0xff]  }
 0x710   : > { %13056 = vmatprep.subr.bf16.mxu1 %v19206_v14  ;;  %v19246_v14 = vld [vmem:[%s19704_s15 + $0x1630] ss:$72 sps:$4 sm:$0xff]  }
 0x711   : > { %12966 = vmatmul.mubr.bf16.vlgmr.msra.gmra.mrb[100].mxu0 %v20890_v34 }
 0x712   : > { %13007 = vmatmul.mubr.bf16.vlgmr.msra.gmra.mrb[100].mxu1 %v20799_v45  ;;  %13016 = vmatpush1.bf16.msra.mxu0 %v19201_v15  ;;  %v19213_v45 = vld [vmem:[%s19704_s15 + $0xa60] ss:$72 sps:$4 sm:$0xff]   ;;  %v19251_v15 = vld [vmem:[%s19704_s15 + $0xdc4] ss:$72 sps:$4 sm:$0xff]  }
 0x713   : > { %13057 = vmatpush1.bf16.msra.mxu1 %v19204_v37  ;;  %13017 = vmatprep.subr.bf16.mxu0 %v19209_v9  ;;  %v19254_v37 = vld [vmem:[%s19704_s15 + $0x16c4] ss:$72 sps:$4 sm:$0xff]   ;;  %v19249_v9 = vld [vmem:[%s19704_s15 + $0xdc0] ss:$72 sps:$4 sm:$0xff]  }
 0x714   : > { %13058 = vmatprep.subr.bf16.mxu1 %v19212_v19  ;;  %13047 = vmatprep.mubr.bf16.mxu0 %v20805_v52  ;;  %v19219_v52 = vld [vmem:[%s19704_s15 + $0xaf0] ss:$72 sps:$4 sm:$0xff]   ;;  %v19252_v19 = vld [vmem:[%s19704_s15 + $0x16c0] ss:$72 sps:$4 sm:$0xff]  }
 0x715   : > { %13088 = vmatprep.mubr.bf16.mxu1 %v20808_v56  ;;  %v19227_v56 = vld [vmem:[%s19704_s15 + $0xb84] ss:$72 sps:$4 sm:$0xff]  }
 0x716   : > { %13018 = vmatpush1.bf16.msra.mxu0 %v19207_v21  ;;  %v19257_v21 = vld [vmem:[%s19704_s15 + $0xe54] ss:$72 sps:$4 sm:$0xff]  }
 0x717   : > { %13059 = vmatpush1.bf16.msra.mxu1 %v19210_v12  ;;  %13019 = vmatprep.subr.bf16.mxu0 %v19215_v31  ;;  %v19260_v12 = vld [vmem:[%s19704_s15 + $0x1754] ss:$72 sps:$4 sm:$0xff]   ;;  %v19255_v31 = vld [vmem:[%s19704_s15 + $0xe50] ss:$72 sps:$4 sm:$0xff]  }
 0x718   : > { %13060 = vmatprep.subr.bf16.mxu1 %v19218_v42  ;;  %v19258_v42 = vld [vmem:[%s19704_s15 + $0x1750] ss:$72 sps:$4 sm:$0xff]  }
 0x71a   : > { %13020 = vmatpush1.bf16.msra.mxu0 %v19213_v45  ;;  %v19263_v45 = vld [vmem:[%s19704_s15 + $0xee4] ss:$72 sps:$4 sm:$0xff]  }
 0x71b   : > { %13061 = vmatpush1.bf16.msra.mxu1 %v19216_v28  ;;  %13021 = vmatprep.subr.bf16.mxu0 %v19221_v32  ;;  %v19266_v28 = vld [vmem:[%s19704_s15 + $0x17e4] ss:$72 sps:$4 sm:$0xff]   ;;  %v19261_v32 = vld [vmem:[%s19704_s15 + $0xee0] ss:$72 sps:$4 sm:$0xff]  }
 0x71c   : > { %13062 = vmatprep.subr.bf16.mxu1 %v19224_v58  ;;  %v19264_v58 = vld [vmem:[%s19704_s15 + $0x17e0] ss:$72 sps:$4 sm:$0xff]  }
 0x71e   : > { %13022 = vmatpush1.bf16.msra.mxu0 %v19219_v52  ;;  %v19269_v52 = vld [vmem:[%s19704_s15 + $0xf74] ss:$72 sps:$4 sm:$0xff]  }
 0x71f   : > { %13063 = vmatpush1.bf16.msra.mxu1 %v19222_v60  ;;  %13023 = vmatprep.subr.bf16.mxu0 %v19227_v56  ;;  %v19272_v60 = vld [vmem:[%s19704_s15 + $0x1874] ss:$72 sps:$4 sm:$0xff]   ;;  %v19267_v56 = vld [vmem:[%s19704_s15 + $0xf70] ss:$72 sps:$4 sm:$0xff]  }
 0x720   : > { %13064 = vmatprep.subr.bf16.mxu1 %v19230_v53  ;;  %v19270_v53 = vld [vmem:[%s19704_s15 + $0x1870] ss:$72 sps:$4 sm:$0xff]  }
 0x722   : > { %13024 = vmatpush1.bf16.msra.mxu0 %v19225_v0  ;;  %v19275_v0 = vld [vmem:[%s19704_s15 + $0x1004] ss:$72 sps:$4 sm:$0xff]  }
 0x723   : > { %13065 = vmatpush1.bf16.msra.mxu1 %v19228_v39  ;;  %13025 = vmatprep.subr.bf16.mxu0 %v19233_v50  ;;  %v19278_v39 = vld [vmem:[%s19704_s15 + $0x1904] ss:$72 sps:$4 sm:$0xff]   ;;  %v19273_v50 = vld [vmem:[%s19704_s15 + $0x1000] ss:$72 sps:$4 sm:$0xff]  }
 0x724   : > { %13066 = vmatprep.subr.bf16.mxu1 %v19236_v48  ;;  %v12721_v5 = vpop.f32.mrb[88].mxu0  ;;  %v19276_v48 = vld [vmem:[%s19704_s15 + $0x1900] ss:$72 sps:$4 sm:$0xff]  }
 0x725   : > { %v12762_v27 = vpop.f32.mrb[88].mxu1  ;;  %v12722_v16 = vadd.f32 %v12721_v5, %v21684_v47  ;;  %v12723_v62 = vpop.f32.mrb[89].mxu0  ;;  %v19237_v47 = vld [vmem:[%s19704_s15 + $0xca0] ss:$72 sps:$4 sm:$0xff]   ;;  %v19290_v5 = vld [vmem:[%s19704_s15 + $0x1a24] ss:$72 sps:$4 sm:$0xff]  }
 0x726   : > { %v21763_v57 = vadd.f32 %v12762_v27, %v20839_v20  ;;  %v12764_v63 = vpop.f32.mrb[89].mxu1  ;;  %v21766_v61 = vadd.f32 %v12723_v62, %v21688_v29  ;;  %v12725_v38 = vpop.f32.mrb[90].mxu0  ;;  %13026 = vmatpush1.bf16.msra.mxu0 %v19231_v54  ;;  %v19240_v20 = vld [vmem:[%s19704_s15 + $0x15a0] ss:$72 sps:$4 sm:$0xff]   ;;  %v19248_v29 = vld [vmem:[%s19704_s15 + $0x1634] ss:$72 sps:$4 sm:$0xff]  }
 0x727   : > { %v21769_v2 = vadd.f32 %v12764_v63, %v20844_v30  ;;  %v12766_v3 = vpop.f32.mrb[90].mxu1  ;;  %13067 = vmatpush1.bf16.msra.mxu1 %v19234_v41  ;;  %v21773_v10 = vadd.f32 %v13146_v13, %v12722_v16  ;;  %v12726_v4 = vpop.f32.mrb[91].mxu0  ;;  %13027 = vmatprep.subr.bf16.mxu0 %v19239_v46  ;;  %v19245_v30 = vld [vmem:[%s19704_s15 + $0xd34] ss:$72 sps:$4 sm:$0xff]   ;;  %v19279_v13 = vld [vmem:[%s19704_s15 + $0x1090] ss:$72 sps:$4 sm:$0xff]  }
 0x728   : > { %v12767_v6 = vpop.f32.mrb[91].mxu1  ;;  %13068 = vmatprep.subr.bf16.mxu1 %v19242_v1  ;;  %v19281_v54 = vld [vmem:[%s19704_s15 + $0x1094] ss:$72 sps:$4 sm:$0xff]   ;;  %v19282_v46 = vld [vmem:[%s19704_s15 + $0x1990] ss:$72 sps:$4 sm:$0xff]   ;;  %v21811_v27 = vsub.s32 1, %v19762_v43 }
 0x729   : > { %v19284_v41 = vld [vmem:[%s19704_s15 + $0x1994] ss:$72 sps:$4 sm:$0xff]   ;;  %v19287_v1 = vld [vmem:[%s19704_s15 + $0x1124] ss:$72 sps:$4 sm:$0xff]   ;;  %v13117_v16 = vsub.s32 3, %v19762_v43 }
 0x72a   : > { %13028 = vmatpush1.bf16.msra.mxu0 %v19237_v47  ;;  %v19285_v62 = vld [vmem:[%s19704_s15 + $0x1120] ss:$72 sps:$4 sm:$0xff]   ;;  %v19293_v38 = vld [vmem:[%s19704_s15 + $0x11b4] ss:$72 sps:$4 sm:$0xff]  }
 0x72b   : > { %13069 = vmatpush1.bf16.msra.mxu1 %v19240_v20  ;;  %13029 = vmatprep.subr.bf16.mxu0 %v19245_v30  ;;  %v19288_v63 = vld [vmem:[%s19704_s15 + $0x1a20] ss:$72 sps:$4 sm:$0xff]   ;;  %v19296_v3 = vld [vmem:[%s19704_s15 + $0x1ab4] ss:$72 sps:$4 sm:$0xff]  }
 0x72c   : > { %13070 = vmatprep.subr.bf16.mxu1 %v19248_v29  ;;  %v13245_v47 = vld [vmem:[%s21816_s2 + $0x80] sm:$0xff]  ;;  %v13246_v6 = vld [vmem:[%s21816_s2 + $0x88] sm:$0xff] }
 0x72d   : > { %v21825_v20 = vld [vmem:[%s19717_s22] sm:$0xff]  ;;  %v13278_v29 = vld [vmem:[%s21816_s2 + $0x188] sm:$0xff] }
 0x72e   : > { %13030 = vmatpush1.bf16.msra.mxu0 %v19243_v8  ;;  %v13110_v4 = vrot.slane %v21825_v20, %v21811_v27  ;;  %v13277_v30 = vld [vmem:[%s21816_s2 + $0x180] sm:$0xff]  ;;  %v13118_v8 = vrot.slane %v21825_v20, %v13117_v16 }
 0x72f   : > { %13071 = vmatpush1.bf16.msra.mxu1 %v19246_v14  ;;  %13031 = vmatprep.subr.bf16.mxu0 %v19251_v15  ;;  %v19291_v14 = vld [vmem:[%s19704_s15 + $0x11b0] ss:$72 sps:$4 sm:$0xff]  }
 0x730   : > { %13072 = vmatprep.subr.bf16.mxu1 %v19254_v37  ;;  %v19294_v15 = vld [vmem:[%s19704_s15 + $0x1ab0] ss:$72 sps:$4 sm:$0xff]   ;;  %v16343_v37 = vpack.c.bf16 %v13246_v6, %v13245_v47  ;;  %v13266_v47 = vld [vmem:[%s21816_s2 + $0x128] sm:$0xff] }
 0x731   : > { %v13252_v6 = vld [vmem:[%s21816_s2 + $0xb8] sm:$0xff] }
 0x732   : > { %13032 = vmatpush1.bf16.msra.mxu0 %v19249_v9  ;;  %v16375_v9 = vpack.c.bf16 %v13278_v29, %v13277_v30  ;;  %v13283_v30 = vld [vmem:[%s21816_s2 + $0x1b0] sm:$0xff]  ;;  %v13284_v29 = vld [vmem:[%s21816_s2 + $0x1b8] sm:$0xff] }
 0x733   : > { %13073 = vmatpush1.bf16.msra.mxu1 %v19252_v19  ;;  %13033 = vmatprep.subr.bf16.mxu0 %v19257_v21  ;;  %v13229_v19 = vld [vmem:[%s21816_s2] sm:$0xff]  ;;  %v13230_v21 = vld [vmem:[%s21816_s2 + $0x8] sm:$0xff] }
 0x734   : > { %13074 = vmatprep.subr.bf16.mxu1 %v19260_v12  ;;  %v13194_v12 = vadd.f32 %v13110_v4, %v21154_v35  ;;  %v13251_v4 = vld [vmem:[%s21816_s2 + $0xb0] sm:$0xff] }
 0x736   : > { %13034 = vmatpush1.bf16.msra.mxu0 %v19255_v31  ;;  %v13261_v31 = vld [vmem:[%s21816_s2 + $0x100] sm:$0xff] }
 0x737   : > { %13075 = vmatpush1.bf16.msra.mxu1 %v19258_v42  ;;  %13035 = vmatprep.subr.bf16.mxu0 %v19263_v45  ;;  %v13262_v42 = vld [vmem:[%s21816_s2 + $0x108] sm:$0xff]  ;;  %v13247_v45 = vld [vmem:[%s21816_s2 + $0x90] sm:$0xff] }
 0x738   : > { %13076 = vmatprep.subr.bf16.mxu1 %v19266_v28  ;;  %v13196_v28 = vadd.f32 %v13118_v8, %v21301_v55  ;;  %v16377_v35 = vpack.c.bf16 %v13262_v42, %v13261_v31  ;;  %v13253_v31 = vld [vmem:[%s21816_s2 + $0xc0] sm:$0xff]  ;;  %v13254_v42 = vld [vmem:[%s21816_s2 + $0xc8] sm:$0xff] }
 0x73a   : > { %13036 = vmatpush1.bf16.msra.mxu0 %v19261_v32  ;;  %v13248_v32 = vld [vmem:[%s21816_s2 + $0x98] sm:$0xff] }
 0x73b   : > { %13077 = vmatpush1.bf16.msra.mxu1 %v19264_v58  ;;  %13037 = vmatprep.subr.bf16.mxu0 %v19269_v52  ;;  %v13279_v58 = vld [vmem:[%s21816_s2 + $0x190] sm:$0xff]  ;;  %v13280_v52 = vld [vmem:[%s21816_s2 + $0x198] sm:$0xff] }
 0x73c   : > { %13078 = vmatprep.subr.bf16.mxu1 %v19272_v60  ;;  %v16345_v60 = vpack.c.bf16 %v13230_v21, %v13229_v19  ;;  %v16379_v55 = vpack.c.bf16 %v13280_v52, %v13279_v58  ;;  %v13267_v19 = vld [vmem:[%s21816_s2 + $0x130] sm:$0xff]  ;;  %v16387_v21 = vpack.c.bf16 %v13284_v29, %v13283_v30  ;;  %v16359_v52 = vpack.c.bf16 %v13254_v42, %v13253_v31  ;;  %v13260_v42 = vld [vmem:[%s21816_s2 + $0xf8] sm:$0xff] }
 0x73d   : > { %v13259_v31 = vld [vmem:[%s21816_s2 + $0xf0] sm:$0xff] }
 0x73e   : > { %13038 = vmatpush1.bf16.msra.mxu0 %v19267_v56  ;;  %v13231_v56 = vld [vmem:[%s21816_s2 + $0x10] sm:$0xff] }
 0x73f   : > { %13079 = vmatpush1.bf16.msra.mxu1 %v19270_v53  ;;  %13039 = vmatprep.subr.bf16.mxu0 %v19275_v0  ;;  %v13232_v53 = vld [vmem:[%s21816_s2 + $0x18] sm:$0xff]  ;;  %v13263_v0 = vld [vmem:[%s21816_s2 + $0x110] sm:$0xff] }
 0x740   : > { %13080 = vmatprep.subr.bf16.mxu1 %v19278_v39  ;;  %v13212_v39 = vmax.f32 %v13194_v12, 0.0  ;;  %v13268_v12 = vld [vmem:[%s21816_s2 + $0x138] sm:$0xff] }
 0x741   : > { %v16389_v58 = vpack.c.bf16 %v13268_v12, %v13267_v19  ;;  %v13274_v12 = vld [vmem:[%s21816_s2 + $0x168] sm:$0xff] }
 0x742   : > { %13040 = vmatpush1.bf16.msra.mxu0 %v19273_v50  ;;  %v16347_v50 = vpack.c.bf16 %v13248_v32, %v13247_v45  ;;  %v13285_v45 = vld [vmem:[%s21816_s2 + $0x1c0] sm:$0xff] }
 0x743   : > { %13081 = vmatpush1.bf16.msra.mxu1 %v19276_v48  ;;  %13041 = vmatprep.subr.bf16.mxu0 %v19281_v54  ;;  %v13264_v48 = vld [vmem:[%s21816_s2 + $0x118] sm:$0xff]  ;;  %v13249_v54 = vld [vmem:[%s21816_s2 + $0xa0] sm:$0xff] }
 0x744   : > { %13082 = vmatprep.subr.bf16.mxu1 %v19284_v41  ;;  %v13250_v41 = vld [vmem:[%s21816_s2 + $0xa8] sm:$0xff] }
 0x746   : > { %13042 = vmatpush1.bf16.msra.mxu0 %v19279_v13  ;;  %v13214_v13 = vmax.f32 %v13196_v28, 0.0  ;;  %v13286_v28 = vld [vmem:[%s21816_s2 + $0x1c8] sm:$0xff] }
 0x747   : > { %13083 = vmatpush1.bf16.msra.mxu1 %v19282_v46  ;;  %13043 = vmatprep.subr.bf16.mxu0 %v19287_v1  ;;  %v13281_v46 = vld [vmem:[%s21816_s2 + $0x1a0] sm:$0xff]  ;;  %v13282_v1 = vld [vmem:[%s21816_s2 + $0x1a8] sm:$0xff] }
 0x748   : > { %13084 = vmatprep.subr.bf16.mxu1 %v19290_v5  ;;  %v16349_v5 = vpack.c.bf16 %v13232_v53, %v13231_v56  ;;  %v13269_v56 = vld [vmem:[%s21816_s2 + $0x140] sm:$0xff]  ;;  %v16391_v53 = vpack.c.bf16 %v13286_v28, %v13285_v45 }
 0x74a   : > { %13044 = vmatpush1.bf16.msra.mxu0 %v19285_v62  ;;  %v16381_v62 = vpack.c.bf16 %v13264_v48, %v13263_v0  ;;  %v13270_v0 = vld [vmem:[%s21816_s2 + $0x148] sm:$0xff]  ;;  %v13288_v48 = vld [vmem:[%s21816_s2 + $0x1d8] sm:$0xff] }
 0x74b   : > { %13085 = vmatpush1.bf16.msra.mxu1 %v19288_v63  ;;  %13045 = vmatprep.subr.bf16.mxu0 %v19293_v38  ;;  %v16351_v63 = vpack.c.bf16 %v13250_v41, %v13249_v54  ;;  %v13233_v38 = vld [vmem:[%s21816_s2 + $0x20] sm:$0xff]  ;;  %v16393_v41 = vpack.c.bf16 %v13270_v0, %v13269_v56  ;;  %v13133_v56 = vsub.s32 7, %v19762_v43 }
 0x74c   : > { %13086 = vmatprep.subr.bf16.mxu1 %v19296_v3  ;;  %v13234_v3 = vld [vmem:[%s21816_s2 + $0x28] sm:$0xff] }
 0x74d   : > { %v16353_v8 = vpack.c.bf16 %v13234_v3, %v13233_v38  ;;  %v13257_v38 = vld [vmem:[%s21816_s2 + $0xe0] sm:$0xff]  ;;  %v13258_v3 = vld [vmem:[%s21816_s2 + $0xe8] sm:$0xff] }
 0x74e   : > { %13046 = vmatpush1.bf16.msra.mxu0 %v19291_v14  ;;  %v16367_v29 = vpack.c.bf16 %v13258_v3, %v13257_v38  ;;  %v13276_v38 = vld [vmem:[%s21816_s2 + $0x178] sm:$0xff]  ;;  %v13309_v3 = vld [vmem:[%s21816_s2 + $0x280] sm:$0xff] }
 0x74f   : > { %13087 = vmatpush1.bf16.msra.mxu1 %v19294_v15  ;;  %16344 = vmatprep.subr.bf16.mxu0 %v16343_v37  ;;  %v16355_v15 = vpack.c.bf16 %v13252_v6, %v13251_v4  ;;  %v13235_v37 = vld [vmem:[%s21816_s2 + $0x30] sm:$0xff]  ;;  %v13121_v6 = vsub.s32 4, %v19762_v43 }
 0x750   : > { %16376 = vmatprep.subr.bf16.mxu1 %v16375_v9  ;;  %v13236_v9 = vld [vmem:[%s21816_s2 + $0x38] sm:$0xff] }
 0x751   : > { %13048 = vmatmul.mubr.bf16.vlgmr.msra.gmra.mrb[104].mxu0 %v20886_v33  ;;  %v13265_v33 = vld [vmem:[%s21816_s2 + $0x120] sm:$0xff]  ;;  %v16357_v32 = vpack.c.bf16 %v13236_v9, %v13235_v37  ;;  %v13125_v37 = vsub.s32 5, %v19762_v43 }
 0x752   : > { %13089 = vmatmul.mubr.bf16.vlgmr.msra.gmra.mrb[104].mxu1 %v20890_v34  ;;  %16346 = vmatpush3.bf16.msra.mxu0 %v16345_v60  ;;  %v16383_v34 = vpack.c.bf16 %v13282_v1, %v13281_v46  ;;  %v16385_v14 = vpack.c.bf16 %v13266_v47, %v13265_v33  ;;  %v13237_v60 = vld [vmem:[%s21816_s2 + $0x40] sm:$0xff]  ;;  %v13239_v46 = vld [vmem:[%s21816_s2 + $0x50] sm:$0xff]  ;;  %v13240_v1 = vld [vmem:[%s21816_s2 + $0x58] sm:$0xff]  ;;  %v21888_v33 = vsub.s32 0, %v19762_v43 }
 0x753   : > { %13588 = vmatprep.mubr.f32.mxu0 %v13212_v39  ;;  %16378 = vmatpush3.bf16.msra.mxu1 %v16377_v35  ;;  %v13238_v35 = vld [vmem:[%s21816_s2 + $0x48] sm:$0xff]  ;;  %v13255_v39 = vld [vmem:[%s21816_s2 + $0xd0] sm:$0xff]  ;;  %v16365_v4 = vpack.c.bf16 %v13240_v1, %v13239_v46  ;;  %v13158_v0 = vrot.slane %v21752_v7, %v13125_v37 }
 0x754   : > { %13658 = vmatprep.mubr.f32.mxu1 %v13214_v13  ;;  %16348 = vmatprep.subr.bf16.mxu0 %v16347_v50  ;;  %v13256_v50 = vld [vmem:[%s21816_s2 + $0xd8] sm:$0xff]  ;;  %v16361_v54 = vpack.c.bf16 %v13238_v35, %v13237_v60  ;;  %v13290_v47 = vld [vmem:[%s21816_s2 + $0x1e8] sm:$0xff]  ;;  %v13106_v45 = vrot.slane %v21825_v20, %v21888_v33  ;;  %v13291_v60 = vld [vmem:[%s21816_s2 + $0x1f0] sm:$0xff] }
 0x755   : > { %16380 = vmatprep.subr.bf16.mxu1 %v16379_v55  ;;  %v13287_v55 = vld [vmem:[%s21816_s2 + $0x1d0] sm:$0xff]  ;;  %v16363_v13 = vpack.c.bf16 %v13256_v50, %v13255_v39  ;;  %v13292_v35 = vld [vmem:[%s21816_s2 + $0x1f8] sm:$0xff] }
 0x756   : > { %16350 = vmatpush3.bf16.msra.mxu0 %v16349_v5  ;;  %v13271_v5 = vld [vmem:[%s21816_s2 + $0x150] sm:$0xff] }
 0x757   : > { %16382 = vmatpush3.bf16.msra.mxu1 %v16381_v62  ;;  %16352 = vmatprep.subr.bf16.mxu0 %v16351_v63  ;;  %v16395_v62 = vpack.c.bf16 %v13288_v48, %v13287_v55  ;;  %v13272_v63 = vld [vmem:[%s21816_s2 + $0x158] sm:$0xff]  ;;  %v13243_v46 = vld [vmem:[%s21816_s2 + $0x70] sm:$0xff] }
 0x758   : > { %16384 = vmatprep.subr.bf16.mxu1 %v16383_v34  ;;  %v13289_v34 = vld [vmem:[%s21816_s2 + $0x1e0] sm:$0xff]  ;;  %v16397_v30 = vpack.c.bf16 %v13272_v63, %v13271_v5  ;;  %v13275_v1 = vld [vmem:[%s21816_s2 + $0x170] sm:$0xff]  ;;  %v13114_v5 = vrot.slane %v21825_v20, %v13113_v40  ;;  %v16403_v63 = vpack.c.bf16 %v13292_v35, %v13291_v60  ;;  %v13134_v40 = vrot.slane %v21825_v20, %v13133_v56 }
 0x759   : > { %v13343_v60 = vld [vmem:[%s21816_s2 + $0x390] sm:$0xff] }
 0x75a   : > { %16354 = vmatpush3.bf16.msra.mxu0 %v16353_v8  ;;  %v13241_v8 = vld [vmem:[%s21816_s2 + $0x60] sm:$0xff] }
 0x75b   : > { %16386 = vmatpush3.bf16.msra.mxu1 %v16385_v14  ;;  %16356 = vmatprep.subr.bf16.mxu0 %v16355_v15  ;;  %v13242_v14 = vld [vmem:[%s21816_s2 + $0x68] sm:$0xff]  ;;  %v13273_v15 = vld [vmem:[%s21816_s2 + $0x160] sm:$0xff] }
 0x75c   : > { %16388 = vmatprep.subr.bf16.mxu1 %v16387_v21  ;;  %v16399_v21 = vpack.c.bf16 %v13290_v47, %v13289_v34  ;;  %v13310_v34 = vld [vmem:[%s21816_s2 + $0x288] sm:$0xff]  ;;  %v13126_v47 = vrot.slane %v21825_v20, %v13125_v37  ;;  %v16405_v37 = vpack.c.bf16 %v13276_v38, %v13275_v1 }
 0x75d   : > { %v13298_v38 = vld [vmem:[%s21816_s2 + $0x228] sm:$0xff] }
 0x75e   : > { %16358 = vmatpush3.bf16.msra.mxu0 %v16357_v32  ;;  %v13154_v32 = vrot.slane %v21752_v7, %v13121_v6 }
 0x75f   : > { %16390 = vmatpush3.bf16.msra.mxu1 %v16389_v58  ;;  %16360 = vmatprep.subr.bf16.mxu0 %v16359_v52 }
 0x760   : > { %16392 = vmatprep.subr.bf16.mxu1 %v16391_v53 }
 0x762   : > { %16362 = vmatpush3.bf16.msra.mxu0 %v16361_v54 }
 0x763   : > { %16394 = vmatpush3.bf16.msra.mxu1 %v16393_v41  ;;  %16364 = vmatprep.subr.bf16.mxu0 %v16363_v13  ;;  %v16401_v41 = vpack.c.bf16 %v13274_v12, %v13273_v15  ;;  %v16371_v13 = vpack.c.bf16 %v13260_v42, %v13259_v31  ;;  %v13193_v15 = vadd.f32 %v13106_v45, %v21150_v26  ;;  %v13325_v42 = vld [vmem:[%s21816_s2 + $0x300] sm:$0xff]  ;;  %v13311_v26 = vld [vmem:[%s21816_s2 + $0x290] sm:$0xff]  ;;  %v13312_v45 = vld [vmem:[%s21816_s2 + $0x298] sm:$0xff] }
 0x764   : > { %v12803_v9 = vpop.f32.mrb[92].mxu0  ;;  %16396 = vmatprep.subr.bf16.mxu1 %v16395_v62  ;;  %v13195_v12 = vadd.f32 %v13114_v5, %v21295_v24  ;;  %v13344_v24 = vld [vmem:[%s21816_s2 + $0x398] sm:$0xff] }
 0x765   : > { %v12844_v19 = vpop.f32.mrb[92].mxu1  ;;  %v12804_v28 = vadd.f32 %v12803_v9, %v21763_v57  ;;  %v12805_v58 = vpop.f32.mrb[93].mxu0  ;;  %v16369_v57 = vpack.c.bf16 %v13242_v14, %v13241_v8  ;;  %v16407_v9 = vpack.c.bf16 %v13310_v34, %v13309_v3  ;;  %v13211_v35 = vmax.f32 %v13193_v15, 0.0  ;;  %v13329_v3 = vld [vmem:[%s21816_s2 + $0x320] sm:$0xff] }
 0x766   : > { %v12846_v52 = vpop.f32.mrb[93].mxu1  ;;  %v12806_v53 = vadd.f32 %v12805_v58, %v21769_v2  ;;  %v12807_v39 = vpop.f32.mrb[94].mxu0  ;;  %16366 = vmatpush3.bf16.msra.mxu0 %v16365_v4  ;;  %v13244_v2 = vld [vmem:[%s21816_s2 + $0x78] sm:$0xff]  ;;  %v13200_v58 = vadd.f32 %v13134_v40, %v21531_v11  ;;  %v13313_v11 = vld [vmem:[%s21816_s2 + $0x2a0] sm:$0xff]  ;;  %v13347_v40 = vld [vmem:[%s21816_s2 + $0x3b0] sm:$0xff] }
 0x767   : > { %v12848_v50 = vpop.f32.mrb[94].mxu1  ;;  %v12845_v55 = vadd.f32 %v12844_v19, %v12804_v28  ;;  %16398 = vmatpush3.bf16.msra.mxu1 %v16397_v30  ;;  %v12808_v48 = vpop.f32.mrb[95].mxu0  ;;  %16368 = vmatprep.subr.bf16.mxu0 %v16367_v29  ;;  %v13341_v30 = vld [vmem:[%s21816_s2 + $0x380] sm:$0xff]  ;;  %v13342_v29 = vld [vmem:[%s21816_s2 + $0x388] sm:$0xff]  ;;  %v16373_v14 = vpack.c.bf16 %v13244_v2, %v13243_v46  ;;  %v13296_v39 = vld [vmem:[%s21816_s2 + $0x218] sm:$0xff] }
 0x768   : > { %v12849_v54 = vpop.f32.mrb[95].mxu1  ;;  %v12847_v62 = vadd.f32 %v12846_v52, %v12806_v53  ;;  %16400 = vmatprep.subr.bf16.mxu1 %v16399_v21  ;;  %v13293_v19 = vld [vmem:[%s21816_s2 + $0x200] sm:$0xff]  ;;  %v13294_v21 = vld [vmem:[%s21816_s2 + $0x208] sm:$0xff]  ;;  %v16439_v31 = vpack.c.bf16 %v13342_v29, %v13341_v30  ;;  %v13213_v50 = vmax.f32 %v13195_v12, 0.0  ;;  %v13218_v2 = vmax.f32 %v13200_v58, 0.0  ;;  %v13315_v30 = vld [vmem:[%s21816_s2 + $0x2b0] sm:$0xff] }
 0x769   : > { %v21921_v4 = vadd.f32 %v13154_v32, %v12845_v55  ;;  %v13326_v28 = vld [vmem:[%s21816_s2 + $0x308] sm:$0xff]  ;;  %v13198_v32 = vadd.f32 %v13126_v47, %v21382_v51  ;;  %v16409_v52 = vpack.c.bf16 %v13294_v21, %v13293_v19  ;;  %v13327_v51 = vld [vmem:[%s21816_s2 + $0x310] sm:$0xff]  ;;  %v13328_v55 = vld [vmem:[%s21816_s2 + $0x318] sm:$0xff] }
 0x76a   : > { %v21928_v8 = vadd.f32 %v13158_v0, %v12847_v62  ;;  %16370 = vmatpush3.bf16.msra.mxu0 %v16369_v57  ;;  %v16441_v53 = vpack.c.bf16 %v13326_v28, %v13325_v42  ;;  %v13295_v0 = vld [vmem:[%s21816_s2 + $0x210] sm:$0xff]  ;;  %v16411_v57 = vpack.c.bf16 %v13312_v45, %v13311_v26  ;;  %v13314_v48 = vld [vmem:[%s21816_s2 + $0x2a8] sm:$0xff]  ;;  %v16445_v5 = vpack.c.bf16 %v13328_v55, %v13327_v51  ;;  %v13316_v29 = vld [vmem:[%s21816_s2 + $0x2b8] sm:$0xff] }
 0x76b   : > { %16402 = vmatpush3.bf16.msra.mxu1 %v16401_v41  ;;  %16372 = vmatprep.subr.bf16.mxu0 %v16371_v13  ;;  %v13216_v54 = vmax.f32 %v13198_v32, 0.0  ;;  %v16443_v41 = vpack.c.bf16 %v13344_v24, %v13343_v60  ;;  %v13345_v13 = vld [vmem:[%s21816_s2 + $0x3a0] sm:$0xff]  ;;  %v13346_v46 = vld [vmem:[%s21816_s2 + $0x3a8] sm:$0xff]  ;;  %v16413_v1 = vpack.c.bf16 %v13296_v39, %v13295_v0  ;;  %v16415_v62 = vpack.c.bf16 %v13314_v48, %v13313_v11  ;;  %v13299_v19 = vld [vmem:[%s21816_s2 + $0x230] sm:$0xff] }
 0x76c   : > { %16404 = vmatprep.subr.bf16.mxu1 %v16403_v63  ;;  %v13297_v63 = vld [vmem:[%s21816_s2 + $0x220] sm:$0xff]  ;;  %v16447_v34 = vpack.c.bf16 %v13346_v46, %v13345_v13  ;;  %v13330_v47 = vld [vmem:[%s21816_s2 + $0x328] sm:$0xff]  ;;  %v13300_v21 = vld [vmem:[%s21816_s2 + $0x238] sm:$0xff] }
 0x76d   : > { %v16417_v15 = vpack.c.bf16 %v13298_v38, %v13297_v63  ;;  %v13331_v12 = vld [vmem:[%s21816_s2 + $0x330] sm:$0xff]  ;;  %v13332_v42 = vld [vmem:[%s21816_s2 + $0x338] sm:$0xff]  ;;  %v13317_v28 = vld [vmem:[%s21816_s2 + $0x2c0] sm:$0xff]  ;;  %v16421_v58 = vpack.c.bf16 %v13300_v21, %v13299_v19 }
 0x76e   : > { %16374 = vmatpush3.bf16.msra.mxu0 %v16373_v14  ;;  %v13348_v14 = vld [vmem:[%s21816_s2 + $0x3b8] sm:$0xff]  ;;  %v13318_v32 = vld [vmem:[%s21816_s2 + $0x2c8] sm:$0xff]  ;;  %v13349_v26 = vld [vmem:[%s21816_s2 + $0x3c0] sm:$0xff] }
 0x76f   : > { %16406 = vmatpush3.bf16.msra.mxu1 %v16405_v37  ;;  %16408 = vmatprep.subr.bf16.mxu0 %v16407_v9  ;;  %v16449_v37 = vpack.c.bf16 %v13330_v47, %v13329_v3  ;;  %v16419_v9 = vpack.c.bf16 %v13316_v29, %v13315_v30  ;;  %v13350_v45 = vld [vmem:[%s21816_s2 + $0x3c8] sm:$0xff]  ;;  %v16423_v60 = vpack.c.bf16 %v13318_v32, %v13317_v28  ;;  %v13301_v24 = vld [vmem:[%s21816_s2 + $0x240] sm:$0xff]  ;;  %v13319_v51 = vld [vmem:[%s21816_s2 + $0x2d0] sm:$0xff] }
 0x770   : > { %16440 = vmatprep.subr.bf16.mxu1 %v16439_v31  ;;  %v16451_v31 = vpack.c.bf16 %v13348_v14, %v13347_v40  ;;  %v16455_v0 = vpack.c.bf16 %v13350_v45, %v13349_v26  ;;  %v13334_v39 = vld [vmem:[%s21816_s2 + $0x348] sm:$0xff]  ;;  %v13352_v55 = vld [vmem:[%s21816_s2 + $0x3d8] sm:$0xff]  ;;  %v13335_v46 = vld [vmem:[%s21816_s2 + $0x350] sm:$0xff] }
 0x771   : > { %13589 = vmatmul.mubr.f32.vlgmr.msra.gmra.mrb[108].mxu0 %v13211_v35  ;;  %v13302_v35 = vld [vmem:[%s21816_s2 + $0x248] sm:$0xff]  ;;  %v13304_v13 = vld [vmem:[%s21816_s2 + $0x258] sm:$0xff]  ;;  %v13353_v63 = vld [vmem:[%s21816_s2 + $0x3e0] sm:$0xff] }
 0x772   : > { %13659 = vmatmul.mubr.f32.vlgmr.msra.gmra.mrb[108].mxu1 %v13213_v50  ;;  %16410 = vmatpush3.bf16.msra.mxu0 %v16409_v52  ;;  %v16453_v52 = vpack.c.bf16 %v13332_v42, %v13331_v12  ;;  %v13320_v50 = vld [vmem:[%s21816_s2 + $0x2d8] sm:$0xff]  ;;  %v16425_v11 = vpack.c.bf16 %v13302_v35, %v13301_v24  ;;  %v13354_v38 = vld [vmem:[%s21816_s2 + $0x3e8] sm:$0xff]  ;;  %v13305_v30 = vld [vmem:[%s21816_s2 + $0x260] sm:$0xff]  ;;  %v13142_v35 = vrot.slane %v21752_v7, %v21811_v27 }
 0x773   : > { %13728 = vmatprep.mubr.f32.mxu0 %v13216_v54  ;;  %16442 = vmatpush3.bf16.msra.mxu1 %v16441_v53  ;;  %v13333_v53 = vld [vmem:[%s21816_s2 + $0x340] sm:$0xff]  ;;  %v16427_v54 = vpack.c.bf16 %v13320_v50, %v13319_v51  ;;  %v13306_v29 = vld [vmem:[%s21816_s2 + $0x268] sm:$0xff]  ;;  %v16463_v14 = vpack.c.bf16 %v13354_v38, %v13353_v63  ;;  %v13355_v19 = vld [vmem:[%s21816_s2 + $0x3f0] sm:$0xff]  ;;  %v13217_v38 = vmax.f32 %v21538_v22, 0.0 }
 0x774   : > { %13798 = vmatprep.mubr.f32.mxu1 %v13218_v2  ;;  %16412 = vmatprep.subr.bf16.mxu0 %v16411_v57  ;;  %v13351_v57 = vld [vmem:[%s21816_s2 + $0x3d0] sm:$0xff]  ;;  %v16457_v48 = vpack.c.bf16 %v13334_v39, %v13333_v53  ;;  %v13337_v40 = vld [vmem:[%s21816_s2 + $0x360] sm:$0xff]  ;;  %v13356_v21 = vld [vmem:[%s21816_s2 + $0x3f8] sm:$0xff]  ;;  %v16433_v12 = vpack.c.bf16 %v13306_v29, %v13305_v30  ;;  %v13150_v53 = vrot.slane %v21752_v7, %v13117_v16 }
 0x775   : > { %16444 = vmatprep.subr.bf16.mxu1 %v16443_v41  ;;  %v13303_v41 = vld [vmem:[%s21816_s2 + $0x250] sm:$0xff]  ;;  %v16459_v2 = vpack.c.bf16 %v13352_v55, %v13351_v57  ;;  %v13308_v26 = vld [vmem:[%s21816_s2 + $0x278] sm:$0xff]  ;;  %v13374_v24 = vld [vmem:[%s21816_s2 + $0x488] sm:$0xff]  ;;  %v13202_v16 = vadd.f32 %v13142_v35, %v21614_v36 }
 0x776   : > { %16414 = vmatpush3.bf16.msra.mxu0 %v16413_v1  ;;  %v13336_v1 = vld [vmem:[%s21816_s2 + $0x358] sm:$0xff]  ;;  %v16429_v3 = vpack.c.bf16 %v13304_v13, %v13303_v41  ;;  %v13307_v32 = vld [vmem:[%s21816_s2 + $0x270] sm:$0xff]  ;;  %v13357_v57 = vld [vmem:[%s21816_s2 + $0x400] sm:$0xff] }
 0x777   : > { %16446 = vmatpush3.bf16.msra.mxu1 %v16445_v5  ;;  %16416 = vmatprep.subr.bf16.mxu0 %v16415_v62  ;;  %v13321_v5 = vld [vmem:[%s21816_s2 + $0x2e0] sm:$0xff]  ;;  %v13322_v62 = vld [vmem:[%s21816_s2 + $0x2e8] sm:$0xff]  ;;  %v13339_v45 = vld [vmem:[%s21816_s2 + $0x370] sm:$0xff]  ;;  %v13220_v30 = vmax.f32 %v13202_v16, 0.0 }
 0x778   : > { %16448 = vmatprep.subr.bf16.mxu1 %v16447_v34  ;;  %v16461_v34 = vpack.c.bf16 %v13336_v1, %v13335_v46  ;;  %v16431_v47 = vpack.c.bf16 %v13322_v62, %v13321_v5  ;;  %v13358_v55 = vld [vmem:[%s21816_s2 + $0x408] sm:$0xff]  ;;  %v13376_v41 = vld [vmem:[%s21816_s2 + $0x498] sm:$0xff]  ;;  %v13407_v46 = vld [vmem:[%s21816_s2 + $0x590] sm:$0xff] }
 0x779   : > { %v13390_v7 = vld [vmem:[%s21816_s2 + $0x508] sm:$0xff]  ;;  %v16473_v13 = vpack.c.bf16 %v13358_v55, %v13357_v57  ;;  %v13359_v62 = vld [vmem:[%s21816_s2 + $0x410] sm:$0xff]  ;;  %v13360_v63 = vld [vmem:[%s21816_s2 + $0x418] sm:$0xff] }
 0x77a   : > { %16418 = vmatpush3.bf16.msra.mxu0 %v16417_v15  ;;  %v13338_v15 = vld [vmem:[%s21816_s2 + $0x368] sm:$0xff]  ;;  %v13391_v36 = vld [vmem:[%s21816_s2 + $0x510] sm:$0xff]  ;;  %v16477_v22 = vpack.c.bf16 %v13360_v63, %v13359_v62  ;;  %v13364_v35 = vld [vmem:[%s21816_s2 + $0x438] sm:$0xff] }
 0x77b   : > { %16450 = vmatpush3.bf16.msra.mxu1 %v16449_v37  ;;  %16420 = vmatprep.subr.bf16.mxu0 %v16419_v9  ;;  %v13323_v37 = vld [vmem:[%s21816_s2 + $0x2f0] sm:$0xff]  ;;  %v13324_v9 = vld [vmem:[%s21816_s2 + $0x2f8] sm:$0xff]  ;;  %v16465_v42 = vpack.c.bf16 %v13338_v15, %v13337_v40  ;;  %v13409_v40 = vld [vmem:[%s21816_s2 + $0x5a0] sm:$0xff] }
 0x77c   : > { %16452 = vmatprep.subr.bf16.mxu1 %v16451_v31  ;;  %v13122_v31 = vrot.slane %v21825_v20, %v13121_v6  ;;  %v16435_v28 = vpack.c.bf16 %v13324_v9, %v13323_v37  ;;  %v13405_v20 = vld [vmem:[%s21816_s2 + $0x580] sm:$0xff]  ;;  %v13406_v6 = vld [vmem:[%s21816_s2 + $0x588] sm:$0xff]  ;;  %v13367_v63 = vld [vmem:[%s21816_s2 + $0x450] sm:$0xff] }
 0x77d   : > { %v13397_v16 = vld [vmem:[%s21816_s2 + $0x540] sm:$0xff] }
 0x77e   : > { %16422 = vmatpush3.bf16.msra.mxu0 %v16421_v58  ;;  %v16467_v58 = vpack.c.bf16 %v13356_v21, %v13355_v19  ;;  %v13197_v39 = vadd.f32 %v13122_v31, %v21378_v49  ;;  %v13204_v49 = vadd.f32 %v13150_v53, %v21766_v61  ;;  %v13392_v61 = vld [vmem:[%s21816_s2 + $0x518] sm:$0xff]  ;;  %v13361_v19 = vld [vmem:[%s21816_s2 + $0x420] sm:$0xff]  ;;  %v13362_v21 = vld [vmem:[%s21816_s2 + $0x428] sm:$0xff] }
 0x77f   : > { %16454 = vmatpush3.bf16.msra.mxu1 %v16453_v52  ;;  %16424 = vmatprep.subr.bf16.mxu0 %v16423_v60  ;;  %v13340_v52 = vld [vmem:[%s21816_s2 + $0x378] sm:$0xff]  ;;  %v13373_v60 = vld [vmem:[%s21816_s2 + $0x480] sm:$0xff]  ;;  %v16509_v37 = vpack.c.bf16 %v13392_v61, %v13391_v36 }
 0x780   : > { %16456 = vmatprep.subr.bf16.mxu1 %v16455_v0  ;;  %v16437_v0 = vpack.c.bf16 %v13308_v26, %v13307_v32  ;;  %v16469_v51 = vpack.c.bf16 %v13340_v52, %v13339_v45  ;;  %v16471_v50 = vpack.c.bf16 %v13374_v24, %v13373_v60  ;;  %v13215_v1 = vmax.f32 %v13197_v39, 0.0  ;;  %v13380_v32 = vld [vmem:[%s21816_s2 + $0x4b8] sm:$0xff]  ;;  %v13411_v26 = vld [vmem:[%s21816_s2 + $0x5b0] sm:$0xff]  ;;  %v13382_v39 = vld [vmem:[%s21816_s2 + $0x4c8] sm:$0xff] }
 0x781   : > { %v13222_v15 = vmax.f32 %v13204_v49, 0.0  ;;  %v13412_v45 = vld [vmem:[%s21816_s2 + $0x5b8] sm:$0xff]  ;;  %v13363_v24 = vld [vmem:[%s21816_s2 + $0x430] sm:$0xff] }
 0x782   : > { %16426 = vmatpush3.bf16.msra.mxu0 %v16425_v11  ;;  %v16503_v11 = vpack.c.bf16 %v13406_v6, %v13405_v20  ;;  %v13395_v20 = vld [vmem:[%s21816_s2 + $0x530] sm:$0xff]  ;;  %v16515_v6 = vpack.c.bf16 %v13412_v45, %v13411_v26  ;;  %v13396_v53 = vld [vmem:[%s21816_s2 + $0x538] sm:$0xff]  ;;  %v16485_v57 = vpack.c.bf16 %v13364_v35, %v13363_v24 }
 0x783   : > { %16458 = vmatpush3.bf16.msra.mxu1 %v16457_v48  ;;  %16428 = vmatprep.subr.bf16.mxu0 %v16427_v54  ;;  %v13389_v48 = vld [vmem:[%s21816_s2 + $0x500] sm:$0xff]  ;;  %v13375_v54 = vld [vmem:[%s21816_s2 + $0x490] sm:$0xff]  ;;  %v16517_v55 = vpack.c.bf16 %v13396_v53, %v13395_v20  ;;  %v13368_v36 = vld [vmem:[%s21816_s2 + $0x458] sm:$0xff] }
 0x784   : > { %16460 = vmatprep.subr.bf16.mxu1 %v16459_v2  ;;  %v13408_v2 = vld [vmem:[%s21816_s2 + $0x598] sm:$0xff]  ;;  %v16505_v5 = vpack.c.bf16 %v13390_v7, %v13389_v48  ;;  %v13365_v48 = vld [vmem:[%s21816_s2 + $0x440] sm:$0xff]  ;;  %v13366_v7 = vld [vmem:[%s21816_s2 + $0x448] sm:$0xff] }
 0x785   : > { %v16507_v29 = vpack.c.bf16 %v13408_v2, %v13407_v46  ;;  %v13383_v49 = vld [vmem:[%s21816_s2 + $0x4d0] sm:$0xff]  ;;  %v13416_v2 = vld [vmem:[%s21816_s2 + $0x5d8] sm:$0xff] }
 0x786   : > { %16430 = vmatpush3.bf16.msra.mxu0 %v16429_v3  ;;  %v16475_v3 = vpack.c.bf16 %v13376_v41, %v13375_v54  ;;  %v13398_v41 = vld [vmem:[%s21816_s2 + $0x548] sm:$0xff]  ;;  %v13415_v46 = vld [vmem:[%s21816_s2 + $0x5d0] sm:$0xff]  ;;  %v13400_v61 = vld [vmem:[%s21816_s2 + $0x558] sm:$0xff] }
 0x787   : > { %16462 = vmatpush3.bf16.msra.mxu1 %v16461_v34  ;;  %16432 = vmatprep.subr.bf16.mxu0 %v16431_v47  ;;  %v13377_v34 = vld [vmem:[%s21816_s2 + $0x4a0] sm:$0xff]  ;;  %v13378_v47 = vld [vmem:[%s21816_s2 + $0x4a8] sm:$0xff] }
 0x788   : > { %16464 = vmatprep.subr.bf16.mxu1 %v16463_v14  ;;  %v13410_v14 = vld [vmem:[%s21816_s2 + $0x5a8] sm:$0xff]  ;;  %v16479_v9 = vpack.c.bf16 %v13378_v47, %v13377_v34  ;;  %v13385_v34 = vld [vmem:[%s21816_s2 + $0x4e0] sm:$0xff] }
 0x789   : > { %v16511_v31 = vpack.c.bf16 %v13410_v14, %v13409_v40  ;;  %v13386_v47 = vld [vmem:[%s21816_s2 + $0x4e8] sm:$0xff]  ;;  %v16493_v40 = vpack.c.bf16 %v13368_v36, %v13367_v63  ;;  %v13439_v63 = vld [vmem:[%s21816_s2 + $0x690] sm:$0xff]  ;;  %v13440_v36 = vld [vmem:[%s21816_s2 + $0x698] sm:$0xff] }
 0x78a   : > { %16434 = vmatpush3.bf16.msra.mxu0 %v16433_v12  ;;  %v13393_v12 = vld [vmem:[%s21816_s2 + $0x520] sm:$0xff] }
 0x78b   : > { %16466 = vmatpush3.bf16.msra.mxu1 %v16465_v42  ;;  %16436 = vmatprep.subr.bf16.mxu0 %v16435_v28  ;;  %v13394_v42 = vld [vmem:[%s21816_s2 + $0x528] sm:$0xff]  ;;  %v13379_v28 = vld [vmem:[%s21816_s2 + $0x4b0] sm:$0xff] }
 0x78c   : > { %16468 = vmatprep.subr.bf16.mxu1 %v16467_v58  ;;  %v16481_v58 = vpack.c.bf16 %v13362_v21, %v13361_v19  ;;  %v16513_v52 = vpack.c.bf16 %v13394_v42, %v13393_v12  ;;  %v16483_v60 = vpack.c.bf16 %v13380_v32, %v13379_v28  ;;  %v13387_v42 = vld [vmem:[%s21816_s2 + $0x4f0] sm:$0xff]  ;;  %v13388_v28 = vld [vmem:[%s21816_s2 + $0x4f8] sm:$0xff] }
 0x78e   : > { %16438 = vmatpush3.bf16.msra.mxu0 %v16437_v0  ;;  %v13381_v0 = vld [vmem:[%s21816_s2 + $0x4c0] sm:$0xff] }
 0x78f   : > { %16470 = vmatpush3.bf16.msra.mxu1 %v16469_v51  ;;  %16472 = vmatprep.subr.bf16.mxu0 %v16471_v50  ;;  %v13413_v51 = vld [vmem:[%s21816_s2 + $0x5c0] sm:$0xff]  ;;  %v13414_v50 = vld [vmem:[%s21816_s2 + $0x5c8] sm:$0xff] }
 0x790   : > { %16504 = vmatprep.subr.bf16.mxu1 %v16503_v11  ;;  %v16487_v11 = vpack.c.bf16 %v13382_v39, %v13381_v0  ;;  %v16519_v54 = vpack.c.bf16 %v13414_v50, %v13413_v51  ;;  %v16499_v50 = vpack.c.bf16 %v13388_v28, %v13387_v42  ;;  %v13474_v28 = vld [vmem:[%s21816_s2 + $0x7a8] sm:$0xff] }
 0x791   : > { %13729 = vmatmul.mubr.f32.vlgmr.msra.gmra.mrb[110].mxu0 %v13215_v1  ;;  %v16489_v1 = vpack.c.bf16 %v13366_v7, %v13365_v48  ;;  %v13404_v7 = vld [vmem:[%s21816_s2 + $0x578] sm:$0xff] }
 0x792   : > { %13799 = vmatmul.mubr.f32.vlgmr.msra.gmra.mrb[110].mxu1 %v13217_v38  ;;  %16474 = vmatpush3.bf16.msra.mxu0 %v16473_v13  ;;  %v13384_v13 = vld [vmem:[%s21816_s2 + $0x4d8] sm:$0xff]  ;;  %v13399_v38 = vld [vmem:[%s21816_s2 + $0x550] sm:$0xff] }
 0x793   : > { %13868 = vmatprep.mubr.f32.mxu0 %v13220_v30  ;;  %16506 = vmatpush3.bf16.msra.mxu1 %v16505_v5  ;;  %v16521_v5 = vpack.c.bf16 %v13398_v41, %v13397_v16  ;;  %v16491_v62 = vpack.c.bf16 %v13384_v13, %v13383_v49  ;;  %v13417_v30 = vld [vmem:[%s21816_s2 + $0x5e0] sm:$0xff]  ;;  %v16525_v14 = vpack.c.bf16 %v13400_v61, %v13399_v38  ;;  %v13470_v49 = vld [vmem:[%s21816_s2 + $0x788] sm:$0xff] }
 0x794   : > { %13938 = vmatprep.mubr.f32.mxu1 %v13222_v15  ;;  %16476 = vmatprep.subr.bf16.mxu0 %v16475_v3  ;;  %v16523_v3 = vpack.c.bf16 %v13416_v2, %v13415_v46  ;;  %v16495_v15 = vpack.c.bf16 %v13386_v47, %v13385_v34  ;;  %v13437_v16 = vld [vmem:[%s21816_s2 + $0x680] sm:$0xff]  ;;  %v13454_v61 = vld [vmem:[%s21816_s2 + $0x708] sm:$0xff]  ;;  %v13472_v47 = vld [vmem:[%s21816_s2 + $0x798] sm:$0xff] }
 0x795   : > { %16508 = vmatprep.subr.bf16.mxu1 %v16507_v29  ;;  %v13418_v29 = vld [vmem:[%s21816_s2 + $0x5e8] sm:$0xff]  ;;  %v13469_v41 = vld [vmem:[%s21816_s2 + $0x780] sm:$0xff] }
 0x796   : > { %16478 = vmatpush3.bf16.msra.mxu0 %v16477_v22  ;;  %v13369_v22 = vld [vmem:[%s21816_s2 + $0x460] sm:$0xff]  ;;  %v16527_v12 = vpack.c.bf16 %v13418_v29, %v13417_v30  ;;  %v16567_v38 = vpack.c.bf16 %v13470_v49, %v13469_v41  ;;  %v16539_v29 = vpack.c.bf16 %v13440_v36, %v13439_v63  ;;  %v13478_v49 = vld [vmem:[%s21816_s2 + $0x7c8] sm:$0xff] }
 0x797   : > { %16510 = vmatpush3.bf16.msra.mxu1 %v16509_v37  ;;  %16480 = vmatprep.subr.bf16.mxu0 %v16479_v9  ;;  %v13370_v37 = vld [vmem:[%s21816_s2 + $0x468] sm:$0xff]  ;;  %v13401_v9 = vld [vmem:[%s21816_s2 + $0x560] sm:$0xff] }
 0x798   : > { %16512 = vmatprep.subr.bf16.mxu1 %v16511_v31  ;;  %v13402_v31 = vld [vmem:[%s21816_s2 + $0x568] sm:$0xff]  ;;  %v13477_v41 = vld [vmem:[%s21816_s2 + $0x7c0] sm:$0xff] }
 0x799   : > { %v16529_v51 = vpack.c.bf16 %v13402_v31, %v13401_v9  ;;  %v13456_v31 = vld [vmem:[%s21816_s2 + $0x718] sm:$0xff]  ;;  %v16583_v63 = vpack.c.bf16 %v13478_v49, %v13477_v41  ;;  %v13461_v36 = vld [vmem:[%s21816_s2 + $0x740] sm:$0xff] }
 0x79a   : > { %16482 = vmatpush3.bf16.msra.mxu0 %v16481_v58  ;;  %v13419_v58 = vld [vmem:[%s21816_s2 + $0x5f0] sm:$0xff]  ;;  %v13504_v41 = vld [vmem:[%s21816_s2 + $0x898] sm:$0xff] }
 0x79b   : > { %16514 = vmatpush3.bf16.msra.mxu1 %v16513_v52  ;;  %16484 = vmatprep.subr.bf16.mxu0 %v16483_v60  ;;  %v13420_v52 = vld [vmem:[%s21816_s2 + $0x5f8] sm:$0xff] }
 0x79c   : > { %16516 = vmatprep.subr.bf16.mxu1 %v16515_v6  ;;  %v22068_v60 = vld [vmem:[%s19717_s22 + $0x8] sm:$0xff]  ;;  %v16531_v48 = vpack.c.bf16 %v13420_v52, %v13419_v58 }
 0x79d   : > { %v13138_v24 = vrot.slane %v22068_v60, %v21888_v33  ;;  %v13444_v58 = vld [vmem:[%s21816_s2 + $0x6b8] sm:$0xff] }
 0x79e   : > { %16486 = vmatpush3.bf16.msra.mxu0 %v16485_v57  ;;  %v13371_v57 = vld [vmem:[%s21816_s2 + $0x470] sm:$0xff] }
 0x79f   : > { %16518 = vmatpush3.bf16.msra.mxu1 %v16517_v55  ;;  %16488 = vmatprep.subr.bf16.mxu0 %v16487_v11  ;;  %v13372_v55 = vld [vmem:[%s21816_s2 + $0x478] sm:$0xff]  ;;  %v13201_v46 = vadd.f32 %v13138_v24, %v21610_v25  ;;  %v13471_v25 = vld [vmem:[%s21816_s2 + $0x790] sm:$0xff] }
 0x7a0   : > { %16520 = vmatprep.subr.bf16.mxu1 %v16519_v54  ;;  %v13438_v54 = vld [vmem:[%s21816_s2 + $0x688] sm:$0xff]  ;;  %v16501_v13 = vpack.c.bf16 %v13372_v55, %v13371_v57  ;;  %v13445_v57 = vld [vmem:[%s21816_s2 + $0x6c0] sm:$0xff] }
 0x7a1   : > { %v13219_v30 = vmax.f32 %v13201_v46, 0.0  ;;  %v13446_v55 = vld [vmem:[%s21816_s2 + $0x6c8] sm:$0xff]  ;;  %v13429_v46 = vld [vmem:[%s21816_s2 + $0x640] sm:$0xff] }
 0x7a2   : > { %16490 = vmatpush3.bf16.msra.mxu0 %v16489_v1  ;;  %v16535_v1 = vpack.c.bf16 %v13438_v54, %v13437_v16  ;;  %v13460_v16 = vld [vmem:[%s21816_s2 + $0x738] sm:$0xff] }
 0x7a3   : > { %16522 = vmatpush3.bf16.msra.mxu1 %v16521_v5  ;;  %16492 = vmatprep.subr.bf16.mxu0 %v16491_v62  ;;  %v13421_v5 = vld [vmem:[%s21816_s2 + $0x600] sm:$0xff]  ;;  %v13422_v62 = vld [vmem:[%s21816_s2 + $0x608] sm:$0xff] }
 0x7a4   : > { %v12885_v19 = vpop.f32.mrb[96].mxu0  ;;  %16524 = vmatprep.subr.bf16.mxu1 %v16523_v3  ;;  %v13453_v3 = vld [vmem:[%s21816_s2 + $0x700] sm:$0xff]  ;;  %v16537_v34 = vpack.c.bf16 %v13422_v62, %v13421_v5  ;;  %v13448_v5 = vld [vmem:[%s21816_s2 + $0x6d8] sm:$0xff] }
 0x7a5   : > { %v12926_v21 = vpop.f32.mrb[96].mxu1  ;;  %v12886_v32 = vadd.f32 %v12885_v19, %v20924_v17  ;;  %v12887_v26 = vpop.f32.mrb[97].mxu0  ;;  %v16497_v17 = vpack.c.bf16 %v13370_v37, %v13369_v22  ;;  %v13441_v22 = vld [vmem:[%s21816_s2 + $0x6a0] sm:$0xff]  ;;  %v13442_v37 = vld [vmem:[%s21816_s2 + $0x6a8] sm:$0xff]  ;;  %v16569_v9 = vpack.c.bf16 %v13454_v61, %v13453_v3  ;;  %v13224_v19 = vmax.f32 %v21928_v8, 0.0  ;;  %v13479_v61 = vld [vmem:[%s21816_s2 + $0x7d0] sm:$0xff] }
 0x7a6   : > { %v12928_v45 = vpop.f32.mrb[97].mxu1  ;;  %v12888_v35 = vadd.f32 %v12887_v26, %v20928_v18  ;;  %v12889_v20 = vpop.f32.mrb[98].mxu0  ;;  %16494 = vmatpush3.bf16.msra.mxu0 %v16493_v40  ;;  %v13403_v18 = vld [vmem:[%s21816_s2 + $0x570] sm:$0xff]  ;;  %v13425_v26 = vld [vmem:[%s21816_s2 + $0x620] sm:$0xff]  ;;  %v13426_v8 = vld [vmem:[%s21816_s2 + $0x628] sm:$0xff] }
 0x7a7   : > { %v12930_v6 = vpop.f32.mrb[98].mxu1  ;;  %v22073_v53 = vadd.f32 %v12926_v21, %v12886_v32  ;;  %16526 = vmatpush3.bf16.msra.mxu1 %v16525_v14  ;;  %v12890_v0 = vpop.f32.mrb[99].mxu0  ;;  %16496 = vmatprep.subr.bf16.mxu0 %v16495_v15  ;;  %v16533_v2 = vpack.c.bf16 %v13404_v7, %v13403_v18  ;;  %v13423_v40 = vld [vmem:[%s21816_s2 + $0x610] sm:$0xff]  ;;  %v13424_v14 = vld [vmem:[%s21816_s2 + $0x618] sm:$0xff]  ;;  %v13221_v15 = vmax.f32 %v21773_v10, 0.0  ;;  %v16571_v21 = vpack.c.bf16 %v13472_v47, %v13471_v25  ;;  %v13473_v10 = vld [vmem:[%s21816_s2 + $0x7a0] sm:$0xff] }
 0x7a8   : > { %v12931_v39 = vpop.f32.mrb[99].mxu1  ;;  %v22078_v11 = vadd.f32 %v12928_v45, %v12888_v35  ;;  %16528 = vmatprep.subr.bf16.mxu1 %v16527_v12  ;;  %v13455_v12 = vld [vmem:[%s21816_s2 + $0x710] sm:$0xff]  ;;  %v16541_v42 = vpack.c.bf16 %v13424_v14, %v13423_v40  ;;  %v16543_v32 = vpack.c.bf16 %v13442_v37, %v13441_v22  ;;  %v16575_v24 = vpack.c.bf16 %v13474_v28, %v13473_v10  ;;  %v13457_v35 = vld [vmem:[%s21816_s2 + $0x720] sm:$0xff]  ;;  %v13458_v20 = vld [vmem:[%s21816_s2 + $0x728] sm:$0xff] }
 0x7a9   : > { %v13443_v45 = vld [vmem:[%s21816_s2 + $0x6b0] sm:$0xff]  ;;  %v16573_v52 = vpack.c.bf16 %v13456_v31, %v13455_v12  ;;  %v16545_v6 = vpack.c.bf16 %v13426_v8, %v13425_v26  ;;  %v13476_v0 = vld [vmem:[%s21816_s2 + $0x7b8] sm:$0xff]  ;;  %v16577_v18 = vpack.c.bf16 %v13458_v20, %v13457_v35  ;;  %v13450_v40 = vld [vmem:[%s21816_s2 + $0x6e8] sm:$0xff] }
 0x7aa   : > { %16498 = vmatpush3.bf16.msra.mxu0 %v16497_v17  ;;  %v13475_v17 = vld [vmem:[%s21816_s2 + $0x7b0] sm:$0xff]  ;;  %v16547_v39 = vpack.c.bf16 %v13444_v58, %v13443_v45  ;;  %v13464_v37 = vld [vmem:[%s21816_s2 + $0x758] sm:$0xff]  ;;  %v13433_v31 = vld [vmem:[%s21816_s2 + $0x660] sm:$0xff] }
 0x7ab   : > { %16530 = vmatpush3.bf16.msra.mxu1 %v16529_v51  ;;  %16500 = vmatprep.subr.bf16.mxu0 %v16499_v50  ;;  %v13427_v51 = vld [vmem:[%s21816_s2 + $0x630] sm:$0xff]  ;;  %v13428_v50 = vld [vmem:[%s21816_s2 + $0x638] sm:$0xff]  ;;  %v13465_v8 = vld [vmem:[%s21816_s2 + $0x760] sm:$0xff] }
 0x7ac   : > { %16532 = vmatprep.subr.bf16.mxu1 %v16531_v48  ;;  %v16579_v48 = vpack.c.bf16 %v13476_v0, %v13475_v17  ;;  %v13459_v7 = vld [vmem:[%s21816_s2 + $0x730] sm:$0xff]  ;;  %v16549_v54 = vpack.c.bf16 %v13428_v50, %v13427_v51  ;;  %v13452_v28 = vld [vmem:[%s21816_s2 + $0x6f8] sm:$0xff]  ;;  %v13466_v45 = vld [vmem:[%s21816_s2 + $0x768] sm:$0xff] }
 0x7ad   : > { %v16581_v62 = vpack.c.bf16 %v13460_v16, %v13459_v7  ;;  %v13431_v47 = vld [vmem:[%s21816_s2 + $0x650] sm:$0xff]  ;;  %v16593_v17 = vpack.c.bf16 %v13466_v45, %v13465_v8  ;;  %v13501_v0 = vld [vmem:[%s21816_s2 + $0x880] sm:$0xff]  ;;  %v13486_v7 = vld [vmem:[%s21816_s2 + $0x808] sm:$0xff] }
 0x7ae   : > { %16502 = vmatpush3.bf16.msra.mxu0 %v16501_v13  ;;  %v16551_v13 = vpack.c.bf16 %v13446_v55, %v13445_v57  ;;  %v13463_v22 = vld [vmem:[%s21816_s2 + $0x750] sm:$0xff]  ;;  %v13468_v57 = vld [vmem:[%s21816_s2 + $0x778] sm:$0xff]  ;;  %v13497_v45 = vld [vmem:[%s21816_s2 + $0x860] sm:$0xff] }
 0x7af   : > { %16534 = vmatpush3.bf16.msra.mxu1 %v16533_v2  ;;  %16536 = vmatprep.subr.bf16.mxu0 %v16535_v1  ;;  %v13430_v2 = vld [vmem:[%s21816_s2 + $0x648] sm:$0xff]  ;;  %v13447_v1 = vld [vmem:[%s21816_s2 + $0x6d0] sm:$0xff] }
 0x7b0   : > { %16568 = vmatprep.subr.bf16.mxu1 %v16567_v38  ;;  %v13462_v38 = vld [vmem:[%s21816_s2 + $0x748] sm:$0xff]  ;;  %v16553_v3 = vpack.c.bf16 %v13430_v2, %v13429_v46  ;;  %v16555_v25 = vpack.c.bf16 %v13448_v5, %v13447_v1  ;;  %v13451_v10 = vld [vmem:[%s21816_s2 + $0x6f0] sm:$0xff]  ;;  %v13488_v1 = vld [vmem:[%s21816_s2 + $0x818] sm:$0xff] }
 0x7b1   : > { %13869 = vmatmul.mubr.f32.vlgmr.msra.gmra.mrb[112].mxu0 %v13219_v30  ;;  %v13432_v30 = vld [vmem:[%s21816_s2 + $0x658] sm:$0xff]  ;;  %v16585_v14 = vpack.c.bf16 %v13462_v38, %v13461_v36  ;;  %v16563_v35 = vpack.c.bf16 %v13452_v28, %v13451_v10  ;;  %v13435_v20 = vld [vmem:[%s21816_s2 + $0x670] sm:$0xff]  ;;  %v13505_v5 = vld [vmem:[%s21816_s2 + $0x8a0] sm:$0xff] }
 0x7b2   : > { %13939 = vmatmul.mubr.f32.vlgmr.msra.gmra.mrb[112].mxu1 %v13221_v15  ;;  %16538 = vmatpush3.bf16.msra.mxu0 %v16537_v34  ;;  %v13480_v34 = vld [vmem:[%s21816_s2 + $0x7d8] sm:$0xff]  ;;  %v13467_v50 = vld [vmem:[%s21816_s2 + $0x770] sm:$0xff]  ;;  %v13489_v38 = vld [vmem:[%s21816_s2 + $0x820] sm:$0xff] }
 0x7b3   : > { %14008 = vmatprep.mubr.f32.mxu0 %v13224_v19  ;;  %16540 = vmatprep.subr.bf16.mxu0 %v16539_v29  ;;  %v13449_v29 = vld [vmem:[%s21816_s2 + $0x6e0] sm:$0xff]  ;;  %v16587_v15 = vpack.c.bf16 %v13480_v34, %v13479_v61  ;;  %v16597_v16 = vpack.c.bf16 %v13468_v57, %v13467_v50  ;;  %v13487_v2 = vld [vmem:[%s21816_s2 + $0x810] sm:$0xff]  ;;  %v13508_v61 = vld [vmem:[%s21816_s2 + $0x8b8] sm:$0xff] }
 0x7b4   : > { %16570 = vmatpush3.bf16.msra.mxu1 %v16569_v9  ;;  %v16557_v9 = vpack.c.bf16 %v13432_v30, %v13431_v47  ;;  %v13481_v19 = vld [vmem:[%s21816_s2 + $0x7e0] sm:$0xff]  ;;  %v16559_v12 = vpack.c.bf16 %v13450_v40, %v13449_v29  ;;  %v13491_v47 = vld [vmem:[%s21816_s2 + $0x830] sm:$0xff]  ;;  %v13492_v30 = vld [vmem:[%s21816_s2 + $0x838] sm:$0xff] }
 0x7b5   : > { %16572 = vmatprep.subr.bf16.mxu1 %v16571_v21  ;;  %v13482_v21 = vld [vmem:[%s21816_s2 + $0x7e8] sm:$0xff]  ;;  %v13509_v29 = vld [vmem:[%s21816_s2 + $0x8c0] sm:$0xff] }
 0x7b6   : > { %16542 = vmatpush3.bf16.msra.mxu0 %v16541_v42  ;;  %v13434_v42 = vld [vmem:[%s21816_s2 + $0x668] sm:$0xff]  ;;  %v16591_v26 = vpack.c.bf16 %v13482_v21, %v13481_v19  ;;  %v13512_v19 = vld [vmem:[%s21816_s2 + $0x8d8] sm:$0xff]  ;;  %v13513_v10 = vld [vmem:[%s21816_s2 + $0x8e0] sm:$0xff] }
 0x7b7   : > { %16544 = vmatprep.subr.bf16.mxu0 %v16543_v32  ;;  %v16589_v32 = vpack.c.bf16 %v13464_v37, %v13463_v22  ;;  %v16561_v58 = vpack.c.bf16 %v13434_v42, %v13433_v31  ;;  %v13510_v40 = vld [vmem:[%s21816_s2 + $0x8c8] sm:$0xff]  ;;  %v13493_v22 = vld [vmem:[%s21816_s2 + $0x840] sm:$0xff]  ;;  %v13495_v31 = vld [vmem:[%s21816_s2 + $0x850] sm:$0xff] }
 0x7b8   : > { %16574 = vmatpush3.bf16.msra.mxu1 %v16573_v52  ;;  %v13483_v52 = vld [vmem:[%s21816_s2 + $0x7f0] sm:$0xff]  ;;  %v13494_v37 = vld [vmem:[%s21816_s2 + $0x848] sm:$0xff]  ;;  %v13496_v42 = vld [vmem:[%s21816_s2 + $0x858] sm:$0xff] }
 0x7b9   : > { %16576 = vmatprep.subr.bf16.mxu1 %v16575_v24  ;;  %v13484_v24 = vld [vmem:[%s21816_s2 + $0x7f8] sm:$0xff]  ;;  %v16617_v21 = vpack.c.bf16 %v13494_v37, %v13493_v22  ;;  %v13514_v28 = vld [vmem:[%s21816_s2 + $0x8e8] sm:$0xff] }
 0x7ba   : > { %16546 = vmatpush3.bf16.msra.mxu0 %v16545_v6  ;;  %v13436_v6 = vld [vmem:[%s21816_s2 + $0x678] sm:$0xff]  ;;  %v16595_v51 = vpack.c.bf16 %v13484_v24, %v13483_v52  ;;  %v16623_v8 = vpack.c.bf16 %v13514_v28, %v13513_v10 }
 0x7bb   : > { %16548 = vmatprep.subr.bf16.mxu0 %v16547_v39  ;;  %v13502_v39 = vld [vmem:[%s21816_s2 + $0x888] sm:$0xff]  ;;  %v16565_v55 = vpack.c.bf16 %v13436_v6, %v13435_v20  ;;  %v13515_v20 = vld [vmem:[%s21816_s2 + $0x8f0] sm:$0xff]  ;;  %v13516_v6 = vld [vmem:[%s21816_s2 + $0x8f8] sm:$0xff] }
 0x7bc   : > { %16578 = vmatpush3.bf16.msra.mxu1 %v16577_v18  ;;  %v16599_v18 = vpack.c.bf16 %v13502_v39, %v13501_v0 }
 0x7bd   : > { %16580 = vmatprep.subr.bf16.mxu1 %v16579_v48  ;;  %v13485_v48 = vld [vmem:[%s21816_s2 + $0x800] sm:$0xff] }
 0x7be   : > { %16550 = vmatpush3.bf16.msra.mxu0 %v16549_v54  ;;  %v13503_v54 = vld [vmem:[%s21816_s2 + $0x890] sm:$0xff]  ;;  %v16601_v49 = vpack.c.bf16 %v13486_v7, %v13485_v48  ;;  %v16627_v48 = vpack.c.bf16 %v13516_v6, %v13515_v20  ;;  %v13500_v7 = vld [vmem:[%s21816_s2 + $0x878] sm:$0xff] }
 0x7bf   : > { %16552 = vmatprep.subr.bf16.mxu0 %v16551_v13  ;;  %v13223_v13 = vmax.f32 %v21921_v4, 0.0  ;;  %v16603_v46 = vpack.c.bf16 %v13504_v41, %v13503_v54  ;;  %v13490_v4 = vld [vmem:[%s21816_s2 + $0x828] sm:$0xff] }
 0x7c0   : > { %16582 = vmatpush3.bf16.msra.mxu1 %v16581_v62  ;;  %v13506_v62 = vld [vmem:[%s21816_s2 + $0x8a8] sm:$0xff]  ;;  %v16609_v34 = vpack.c.bf16 %v13490_v4, %v13489_v38 }
 0x7c1   : > { %16584 = vmatprep.subr.bf16.mxu1 %v16583_v63  ;;  %v16605_v63 = vpack.c.bf16 %v13488_v1, %v13487_v2  ;;  %v16607_v36 = vpack.c.bf16 %v13506_v62, %v13505_v5 }
 0x7c2   : > { %16554 = vmatpush3.bf16.msra.mxu0 %v16553_v3  ;;  %v13507_v3 = vld [vmem:[%s21816_s2 + $0x8b0] sm:$0xff] }
 0x7c3   : > { %16556 = vmatprep.subr.bf16.mxu0 %v16555_v25  ;;  %v16611_v25 = vpack.c.bf16 %v13508_v61, %v13507_v3 }
 0x7c4   : > { %16586 = vmatpush3.bf16.msra.mxu1 %v16585_v14  ;;  %v16613_v14 = vpack.c.bf16 %v13492_v30, %v13491_v47 }
 0x7c5   : > { %16588 = vmatprep.subr.bf16.mxu1 %v16587_v15  ;;  %v16615_v15 = vpack.c.bf16 %v13510_v40, %v13509_v29 }
 0x7c6   : > { %16558 = vmatpush3.bf16.msra.mxu0 %v16557_v9  ;;  %v13511_v9 = vld [vmem:[%s21816_s2 + $0x8d0] sm:$0xff] }
 0x7c7   : > { %16560 = vmatprep.subr.bf16.mxu0 %v16559_v12  ;;  %v16619_v12 = vpack.c.bf16 %v13512_v19, %v13511_v9 }
 0x7c8   : > { %16590 = vmatpush3.bf16.msra.mxu1 %v16589_v32  ;;  %v16621_v32 = vpack.c.bf16 %v13496_v42, %v13495_v31 }
 0x7c9   : > { %16592 = vmatprep.subr.bf16.mxu1 %v16591_v26  ;;  %v13162_v26 = vrot.slane %v22068_v60, %v13129_v23 }
 0x7ca   : > { %16562 = vmatpush3.bf16.msra.mxu0 %v16561_v58  ;;  %v13498_v58 = vld [vmem:[%s21816_s2 + $0x868] sm:$0xff] }
 0x7cb   : > { %16564 = vmatprep.subr.bf16.mxu0 %v16563_v35  ;;  %v13166_v35 = vrot.slane %v22068_v60, %v13133_v56  ;;  %v16625_v43 = vpack.c.bf16 %v13498_v58, %v13497_v45 }
 0x7cc   : > { %16594 = vmatpush3.bf16.msra.mxu1 %v16593_v17 }
 0x7cd   : > { %16596 = vmatprep.subr.bf16.mxu1 %v16595_v51 }
 0x7ce   : > { %16566 = vmatpush3.bf16.msra.mxu0 %v16565_v55 }
 0x7cf   : > { %16600 = vmatprep.subr.bf16.mxu0 %v16599_v18 }
 0x7d0   : > { %16598 = vmatpush3.bf16.msra.mxu1 %v16597_v16 }
 0x7d1   : > { %14009 = vmatmul.mubr.f32.vlgmr.msra.gmra.mrb[114].mxu0 %v13223_v13 }
 0x7d2   : > { %16602 = vmatpush3.bf16.msra.mxu0 %v16601_v49 }
 0x7d3   : > { %16604 = vmatprep.subr.bf16.mxu0 %v16603_v46 }
 0x7d6   : > { %16606 = vmatpush3.bf16.msra.mxu0 %v16605_v63 }
 0x7d7   : > { %16608 = vmatprep.subr.bf16.mxu0 %v16607_v36 }
 0x7da   : > { %16610 = vmatpush3.bf16.msra.mxu0 %v16609_v34 }
 0x7db   : > { %16612 = vmatprep.subr.bf16.mxu0 %v16611_v25 }
 0x7de   : > { %16614 = vmatpush3.bf16.msra.mxu0 %v16613_v14 }
 0x7df   : > { %16616 = vmatprep.subr.bf16.mxu0 %v16615_v15 }
 0x7e2   : > { %16618 = vmatpush3.bf16.msra.mxu0 %v16617_v21 }
 0x7e3   : > { %16620 = vmatprep.subr.bf16.mxu0 %v16619_v12 }
 0x7e4   : > { %v12967_v52 = vpop.f32.mrb[100].mxu0 }
 0x7e5   : > { %v13008_v24 = vpop.f32.mrb[100].mxu1  ;;  %v12968_v17 = vadd.f32 %v12967_v52, %v22073_v53  ;;  %v12969_v39 = vpop.f32.mrb[101].mxu0  ;;  %v13499_v53 = vld [vmem:[%s21816_s2 + $0x870] sm:$0xff] }
 0x7e6   : > { %v13009_v0 = vadd.f32 %v13008_v24, %v21067_v44  ;;  %v13010_v23 = vpop.f32.mrb[101].mxu1  ;;  %v12970_v51 = vadd.f32 %v12969_v39, %v22078_v11  ;;  %v12971_v57 = vpop.f32.mrb[102].mxu0  ;;  %16622 = vmatpush3.bf16.msra.mxu0 %v16621_v32  ;;  %v16629_v54 = vpack.c.bf16 %v13500_v7, %v13499_v53 }
 0x7e7   : > { %v13011_v50 = vadd.f32 %v13010_v23, %v21073_v59  ;;  %v13012_v55 = vpop.f32.mrb[102].mxu1  ;;  %v13207_v18 = vadd.f32 %v13162_v26, %v12968_v17  ;;  %v12972_v56 = vpop.f32.mrb[103].mxu0  ;;  %16624 = vmatprep.subr.bf16.mxu0 %v16623_v8  ;;  %v13099_v59 = vld [vmem:[%s19717_s22 + $0x10] sm:$0x3] }
 0x7e8   : > { %v13013_v60 = vpop.f32.mrb[103].mxu1  ;;  %v13208_v16 = vadd.f32 %v13166_v35, %v12970_v51  ;;  %v13170_v46 = vrot.slane %v13099_v59, %v21888_v33  ;;  %v13174_v62 = vrot.slane %v13099_v59, %v21811_v27  ;;  %v16025_v33 = vld [vmem:[#allocation7] ss:$0 sm:$0xff] }
 0x7e9   : > { %v13225_v41 = vmax.f32 %v13207_v18, 0.0 }
 0x7ea   : > { %v13226_v44 = vmax.f32 %v13208_v16, 0.0  ;;  %16626 = vmatpush3.bf16.msra.mxu0 %v16625_v43 }
 0x7eb   : > { %16628 = vmatprep.subr.bf16.mxu0 %v16627_v48 }
 0x7ec   : > { %14078 = vmatprep.mubr.f32.mxu1 %v13226_v44 }
 0x7ed   : > { %14079 = vmatmul.mubr.f32.vlgmr.msra.gmra.mrb[114].mxu1 %v13225_v41 }
 0x7ee   : > { %16630 = vmatpush3.bf16.msra.mxu0 %v16629_v54 }
 0x824   : > { %v13049_v11 = vpop.f32.mrb[104].mxu0 }
 0x825   : > { %v13090_v49 = vpop.f32.mrb[104].mxu1  ;;  %v13050_v13 = vadd.f32 %v13049_v11, %v13009_v0  ;;  %v13051_v2 = vpop.f32.mrb[105].mxu0 }
 0x826   : > { %v13092_v1 = vpop.f32.mrb[105].mxu1  ;;  %v13052_v5 = vadd.f32 %v13051_v2, %v13011_v50  ;;  %v13053_v63 = vpop.f32.mrb[106].mxu0 }
 0x827   : > { %v13094_v36 = vpop.f32.mrb[106].mxu1  ;;  %v13091_v38 = vadd.f32 %v13090_v49, %v13050_v13  ;;  %v13054_v4 = vpop.f32.mrb[107].mxu0 }
 0x828   : > { %v13095_v3 = vpop.f32.mrb[107].mxu1  ;;  %v13093_v61 = vadd.f32 %v13092_v1, %v13052_v5 }
 0x829   : > { %v13209_v34 = vadd.f32 %v13170_v46, %v13091_v38 }
 0x82a   : > { %v13210_v25 = vadd.f32 %v13174_v62, %v13093_v61 }
 0x82b   : > { %v13227_v30 = vmax.f32 %v13209_v34, 0.0 }
 0x82c   : > { %v13228_v47 = vmax.f32 %v13210_v25, 0.0 }
 0x82e   : > { %14148 = vmatprep.mubr.f32.mxu0 %v13228_v47 }
 0x82f   : > { %14149 = vmatmul.mubr.f32.vlgmr.msra.gmra.mrb[116].mxu0 %v13227_v30 }
 0x844   : > { %v16060_v29 = vpop.f32.mrb[108].mxu0 }
 0x845   : > { %v16095_v40 = vpop.f32.mrb[108].mxu1  ;;  %v16061_v14 = vpop.f32.mrb[109].mxu0 }
 0x846   : > { %v16062_v15 = vadd.f32 %v16061_v14, %v16060_v29  ;;  %v16096_v22 = vpop.f32.mrb[109].mxu1 }
 0x847   : > { %v16097_v37 = vadd.f32 %v16096_v22, %v16095_v40 }
 0x848   : > { %v13591_v27 = vadd.f32 %v16062_v15, %v16025_v33 }
 0x84a   : > { %v13661_v9 = vadd.f32 %v16097_v37, %v13591_v27 }
 0x864   : > { %v16130_v19 = vpop.f32.mrb[110].mxu0 }
 0x865   : > { %v16165_v21 = vpop.f32.mrb[110].mxu1  ;;  %v16131_v12 = vpop.f32.mrb[111].mxu0 }
 0x866   : > { %v16132_v31 = vadd.f32 %v16131_v12, %v16130_v19  ;;  %v16166_v42 = vpop.f32.mrb[111].mxu1 }
 0x867   : > { %v16167_v10 = vadd.f32 %v16166_v42, %v16165_v21 }
 0x868   : > { %v13731_v28 = vadd.f32 %v16132_v31, %v13661_v9 }
 0x86a   : > { %v13801_v32 = vadd.f32 %v16167_v10, %v13731_v28 }
 0x884   : > { %v16200_v26 = vpop.f32.mrb[112].mxu0 }
 0x885   : > { %v16235_v8 = vpop.f32.mrb[112].mxu1  ;;  %v16201_v45 = vpop.f32.mrb[113].mxu0 }
 0x886   : > { %v16202_v58 = vadd.f32 %v16201_v45, %v16200_v26  ;;  %v16236_v52 = vpop.f32.mrb[113].mxu1 }
 0x887   : > { %v16237_v24 = vadd.f32 %v16236_v52, %v16235_v8 }
 0x888   : > { %v13871_v35 = vadd.f32 %v16202_v58, %v13801_v32 }
 0x88a   : > { %v13941_v20 = vadd.f32 %v16237_v24, %v13871_v35 }
 0x8a4   : > { %v16270_v6 = vpop.f32.mrb[114].mxu0 }
 0x8a5   : > { %v16271_v17 = vpop.f32.mrb[115].mxu0 }
 0x8a6   : > { %v16272_v0 = vadd.f32 %v16271_v17, %v16270_v6 }
 0x8a8   : > { %v14011_v39 = vadd.f32 %v16272_v0, %v13941_v20 }
 0x8c0   : > { %v16305_v23 = vpop.f32.mrb[114].mxu1 }
 0x8c1   : > { %v16306_v51 = vpop.f32.mrb[115].mxu1 }
 0x8c2   : > { %v16307_v50 = vadd.f32 %v16306_v51, %v16305_v23 }
 0x8c4   : > { %v14081_v57 = vadd.f32 %v16307_v50, %v14011_v39 }
 0x902   : > { %v16340_v55 = vpop.f32.mrb[116].mxu0 }
 0x903   : > { %v16341_v43 = vpop.f32.mrb[117].mxu0 }
 0x904   : > { %v16342_v18 = vadd.f32 %v16341_v43, %v16340_v55 }
 0x906   : > { %v14151_v56 = vadd.f32 %v16342_v18, %v14081_v57 }
 0x908   : > { %14155 = vst.msk [vmem:[%s404_s10] sm:$0x3] %vm14154_vm0, %v14151_v56 }
 0x909 PF: > { %s22246_s26 = sld [smem:[#allocation12_spill]]  ;;  %s22247_s21 = sld [smem:[#allocation13_spill]] }
 0x90a   : > { %p21_p8 = scmp.ge.s32.totalorder %s19529_s28, 4   ;;  %s22248_s24 = smov %s19451_s25 }
 0x90b   : > { %s22251_s27 = smov %s19529_s28 }
 0x90c   :  { %23 = sbr.rel (!%p21_p8) target bundleno = 9 (0x9), region = 119 }
 0x90f   : > { %s22249_s25 = smov %s22246_s26  ;;  %s22250_s26 = smov %s22247_s21 }
 0x913   :  { %14175 = vsyncpa [#allocation3], 1 }
 0x914   :  { %14177 = vsyncpa [#allocation3 + $0x1], 1 }
 0x915   :  { %14178 = vsyncpa [#allocation5], 1 }
 0x916   :  { %14180 = vsyncpa [#allocation5 + $0x1], 1 }
 0x917   :  { %14181 = vsyncpa [#allocation8], 1 }

</bundles_post_ra>
